<compile_context>
chip_gen: v7x
topology: tpu7x:2x2x1
jax: 0.10.0
libtpu: 0.0.40
codegen_flags: <defaults>
</compile_context>

<pallas_src>
import jax
import jax.numpy as jnp
import numpy as np
from jax.experimental import pallas as pl
from jax.experimental.pallas import tpu as pltpu

NEG_SLOPE = 0.01   # nn.LeakyReLU default
BN_EPS = 1e-5      # nn.BatchNorm2d default

_KSIZES = ((3, 2), (2, 2), (2, 1))     # conv1/2/3 kernel sizes
_CHANS = (16, 32, 64)                  # conv1/2/3 output channels
_VMEM = pl.BlockSpec(memory_space=pltpu.MemorySpace.VMEM)


# ----------------------------------------------------------------------------
# In-kernel building blocks (values stay in VMEM/vregs; no HBM round-trips)
# ----------------------------------------------------------------------------
def _conv1(x_ref, w):
    """First conv (Cin=1): 6 VPU broadcast-MACs on tap windows sliced from the ref."""
    N, H, W, _ = x_ref.shape
    KH, KW = _KSIZES[0]
    Cout = w.shape[-1]
    Ho, Wo = H - KH + 1, W - KW + 1
    acc = jnp.zeros((N, Ho, Wo, Cout), jnp.float32)
    t = 0
    for ki in range(KH):
        for kj in range(KW):
            xt = x_ref[:, ki:ki + Ho, kj:kj + Wo, :]      # (N, Ho, Wo, 1), transient
            acc = acc + xt * w[t:t + 1, :]                # lane-broadcast MAC
            t += 1
    return acc                                            # (N, Ho, Wo, Cout)


def _convK(y, w, KH, KW):
    """Conv as one tap-stacked 2-D MXU matmul per (n, h_out) row group.

    y: (N, H, W, Cin) value;  w: (KH*KW*Cin, Cout), rows ordered (ki, kj, cin).
    Returns (N, Ho, Wo, Cout) float32.
    """
    N, H, W, Cin = y.shape
    Cout = w.shape[-1]
    Ho, Wo = H - KH + 1, W - KW + 1
    rows = []
    for n in range(N):
        for ho in range(Ho):
            # im2col columns for this output row: lane-concat of the tap windows.
            col = jnp.concatenate(
                [y[n, ho + ki, kj:kj + Wo, :] for ki in range(KH) for kj in range(KW)],
                axis=-1)                                   # (Wo, KH*KW*Cin)
            rows.append(jnp.dot(col, w, preferred_element_type=jnp.float32)[None])
    z = jnp.concatenate(rows, axis=0)                      # (N*Ho, Wo, Cout)
    return z.reshape(N, Ho, Wo, Cout)                      # leading-dim split only


def _lrelu_bn_pool(z, b):
    """Bias + LeakyReLU + BatchNorm2d (training-mode batch stats) + MaxPool2d((2,1)).

    z: (N, Ho, Wo, C) conv output (pre-bias);  b: (1, C).
    """
    N, Ho, Wo, C = z.shape
    z = z + b
    z = jnp.maximum(z, NEG_SLOPE * z)                      # LeakyReLU: one VPU max

    # One-pass batch stats; reduce leading dims (VPU) first, sublane dim (XLU) last.
    cnt = float(N * Ho * Wo)
    s1 = jnp.sum(jnp.sum(jnp.sum(z, axis=0, keepdims=True),
                         axis=1, keepdims=True), axis=2, keepdims=True)
    s2 = jnp.sum(jnp.sum(jnp.sum(z * z, axis=0, keepdims=True),
                         axis=1, keepdims=True), axis=2, keepdims=True)
    mean = s1 / cnt
    var = s2 / cnt - mean * mean
    z = (z - mean) * jax.lax.rsqrt(var + BN_EPS)

    # MaxPool2d((2,1)): leading-dim-only reshape + a single vectorized max.
    Hp = Ho // 2
    z = z[:, :2 * Hp].reshape(N, Hp, 2, Wo, C)
    return jnp.maximum(z[:, :, 0], z[:, :, 1])             # (N, Hp, Wo, C)


def _cnn3_kernel(x_ref, w1_ref, b1_ref, w2_ref, b2_ref, w3_ref, b3_ref,
                 wh_ref, bh_ref, o_ref):
    y = _lrelu_bn_pool(_conv1(x_ref, w1_ref[...]), b1_ref[...])
    y = _lrelu_bn_pool(_convK(y, w2_ref[...], *_KSIZES[1]), b2_ref[...])
    y = _lrelu_bn_pool(_convK(y, w3_ref[...], *_KSIZES[2]), b3_ref[...])

    # Head: Linear(D->1) + sigmoid as a VPU multiply + reductions (wh pre-permuted to
    # the kernel's (h, w, c) order). Reduce leading/sublane axes before the lane axis.
    z = y * wh_ref[...]                                    # (N, Hf, Wf, C)
    s = jnp.sum(z, axis=1, keepdims=True)
    s = jnp.sum(s, axis=2, keepdims=True)
    s = jnp.sum(s, axis=3, keepdims=True)                  # (N, 1, 1, 1)
    logit = s + bh_ref[...]
    o_ref[...] = 1.0 / (1.0 + jnp.exp(-logit))


# ----------------------------------------------------------------------------
# Wrapper: one-time param packing + a single pallas_call per forward
# ----------------------------------------------------------------------------
def _out_hw(height_pixels, n_periods):
    h, w = height_pixels, n_periods * 3
    for kh, kw in _KSIZES:
        h, w = (h - kh + 1) // 2, w - kw + 1
    return h, w


def pack_params(params, height_pixels, n_periods):
    """Hoisted out of the forward: pack PyTorch-layout params into kernel layouts."""
    hf, wf = _out_hw(height_pixels, n_periods)
    cf = _CHANS[-1]
    f32 = jnp.float32
    return {
        "w1": params["w1"].reshape(-1, _CHANS[0]).astype(f32),   # (KH*KW, 16)
        "b1": params["b1"].reshape(1, _CHANS[0]).astype(f32),
        "w2": params["w2"].reshape(-1, _CHANS[1]).astype(f32),   # (64, 32)
        "b2": params["b2"].reshape(1, _CHANS[1]).astype(f32),
        "w3": params["w3"].reshape(-1, _CHANS[2]).astype(f32),   # (64, 64)
        "b3": params["b3"].reshape(1, _CHANS[2]).astype(f32),
        # nn.Flatten on NCHW flattens (c, h, w); permute the head weight to (h, w, c).
        "wh": params["wh"].reshape(cf, hf, wf).transpose(1, 2, 0)[None].astype(f32),
        "bh": params["bh"].reshape(1, 1, 1, 1).astype(f32),
    }


def cnn3_forward(x_nchw, packed):
    x = jnp.transpose(x_nchw, (0, 2, 3, 1)).astype(jnp.float32)   # NCHW -> NHWC
    N = x.shape[0]
    out = pl.pallas_call(
        _cnn3_kernel,
        out_shape=jax.ShapeDtypeStruct((N, 1, 1, 1), jnp.float32),
        in_specs=[_VMEM] * 9,
        out_specs=_VMEM,
    )(x, packed["w1"], packed["b1"], packed["w2"], packed["b2"],
      packed["w3"], packed["b3"], packed["wh"], packed["bh"])
    return jnp.squeeze(out)                                   # matches torch .squeeze()


# ----------------------------------------------------------------------------
# Pure-JAX reference (for correctness check)
# ----------------------------------------------------------------------------
def _ref_block(x, w4, b):
    y = jax.lax.conv_general_dilated(
        x, w4, (1, 1), "VALID", dimension_numbers=("NHWC", "HWIO", "NHWC")) + b
    y = jnp.where(y > 0, y, NEG_SLOPE * y)
    mean = y.mean(axis=(0, 1, 2), keepdims=True)
    var = ((y - mean) ** 2).mean(axis=(0, 1, 2), keepdims=True)
    y = (y - mean) * jax.lax.rsqrt(var + BN_EPS)
    N, Ho, Wo, C = y.shape
    Hp = Ho // 2
    return y[:, :2 * Hp].reshape(N, Hp, 2, Wo, C).max(axis=2)


def cnn3_reference(x_nchw, params):
    x = jnp.transpose(x_nchw, (0, 2, 3, 1))
    y = _ref_block(x, params["w1"], params["b1"])
    y = _ref_block(y, params["w2"], params["b2"])
    y = _ref_block(y, params["w3"], params["b3"])
    N = y.shape[0]
    t = jnp.transpose(y, (0, 3, 1, 2)).reshape(N, -1)
    return jnp.squeeze(jax.nn.sigmoid(t @ params["wh"] + params["bh"]))


# ----------------------------------------------------------------------------
# Deterministic parameter init + driver
# ----------------------------------------------------------------------------
def _head_dim(height_pixels, n_periods):
    h, w = _out_hw(height_pixels, n_periods)
    return _CHANS[-1] * h * w


def make_params(key, height_pixels, n_periods):
    ks = jax.random.split(key, 8)
    d = _head_dim(height_pixels, n_periods)
    return {
        "w1": 0.1 * jax.random.normal(ks[0], (3, 2, 1, 16), jnp.float32),
        "b1": 0.1 * jax.random.normal(ks[1], (16,), jnp.float32),
        "w2": 0.1 * jax.random.normal(ks[2], (2, 2, 16, 32), jnp.float32),
        "b2": 0.1 * jax.random.normal(ks[3], (32,), jnp.float32),
        "w3": 0.1 * jax.random.normal(ks[4], (2, 1, 32, 64), jnp.float32),
        "b3": 0.1 * jax.random.normal(ks[5], (64,), jnp.float32),
        "wh": 0.1 * jax.random.normal(ks[6], (d, 1), jnp.float32),
        "bh": 0.1 * jax.random.normal(ks[7], (1,), jnp.float32),
    }


if __name__ == "__main__":
    n_periods = 4
    height_pixels = 16
    batch = 2

    key = jax.random.PRNGKey(0)
    k_params, k_x = jax.random.split(key)
    params = make_params(k_params, height_pixels, n_periods)
    packed = pack_params(params, height_pixels, n_periods)       # one-time packing
    x = jax.random.normal(k_x, (batch, 1, height_pixels, n_periods * 3), jnp.float32)

    fwd = jax.jit(cnn3_forward)
    out = jax.block_until_ready(fwd(x, packed))

    ref = jax.block_until_ready(cnn3_reference(x, params))
    np.testing.assert_allclose(np.asarray(out), np.asarray(ref), rtol=1e-3, atol=1e-3)
    assert out.shape == (batch,)

    print("KERNEL_OK")
</pallas_src>

<mosaic_0001>
module attributes {stable_mosaic.version = 11 : i64} {
  func.func @_cnn3_kernel(%arg0: memref<2x16x12x1xf32, #tpu.memory_space<vmem>>, %arg1: memref<6x16xf32, #tpu.memory_space<vmem>>, %arg2: memref<1x16xf32, #tpu.memory_space<vmem>>, %arg3: memref<64x32xf32, #tpu.memory_space<vmem>>, %arg4: memref<1x32xf32, #tpu.memory_space<vmem>>, %arg5: memref<64x64xf32, #tpu.memory_space<vmem>>, %arg6: memref<1x64xf32, #tpu.memory_space<vmem>>, %arg7: memref<1x1x10x64xf32, #tpu.memory_space<vmem>>, %arg8: memref<1x1x1x1xf32, #tpu.memory_space<vmem>>, %arg9: memref<2x1x1x1xf32, #tpu.memory_space<vmem>>) attributes {dimension_semantics = [], scalar_prefetch = 0 : i64, scratch_operands = 0 : i64, tpu.core_type = #tpu.core_type<tc>} {
    %c0 = arith.constant 0 : index
    %c0_0 = arith.constant 0 : index
    %0 = vector.load %arg1[%c0, %c0_0] : memref<6x16xf32, #tpu.memory_space<vmem>>, vector<6x16xf32>
    %cst = arith.constant 0.000000e+00 : f32
    %1 = vector.broadcast %cst : f32 to vector<2x14x11x16xf32>
    %c0_1 = arith.constant 0 : index
    %c0_2 = arith.constant 0 : index
    %c0_3 = arith.constant 0 : index
    %c0_4 = arith.constant 0 : index
    %2 = vector.load %arg0[%c0_1, %c0_2, %c0_3, %c0_4] : memref<2x16x12x1xf32, #tpu.memory_space<vmem>>, vector<2x14x11x1xf32>
    %3 = vector.extract_strided_slice %0 {offsets = [0, 0], sizes = [1, 16], strides = [1, 1]} : vector<6x16xf32> to vector<1x16xf32>
    %4 = vector.shape_cast %3 : vector<1x16xf32> to vector<1x1x1x16xf32>
    %5 = vector.broadcast %2 : vector<2x14x11x1xf32> to vector<2x14x11x16xf32>
    %6 = vector.broadcast %4 : vector<1x1x1x16xf32> to vector<2x14x11x16xf32>
    %7 = arith.mulf %5, %6 : vector<2x14x11x16xf32>
    %8 = arith.addf %1, %7 : vector<2x14x11x16xf32>
    %c0_5 = arith.constant 0 : index
    %c0_6 = arith.constant 0 : index
    %c1 = arith.constant 1 : index
    %c0_7 = arith.constant 0 : index
    %9 = vector.load %arg0[%c0_5, %c0_6, %c1, %c0_7] : memref<2x16x12x1xf32, #tpu.memory_space<vmem>>, vector<2x14x11x1xf32>
    %10 = vector.extract_strided_slice %0 {offsets = [1, 0], sizes = [1, 16], strides = [1, 1]} : vector<6x16xf32> to vector<1x16xf32>
    %11 = vector.shape_cast %10 : vector<1x16xf32> to vector<1x1x1x16xf32>
    %12 = vector.broadcast %9 : vector<2x14x11x1xf32> to vector<2x14x11x16xf32>
    %13 = vector.broadcast %11 : vector<1x1x1x16xf32> to vector<2x14x11x16xf32>
    %14 = arith.mulf %12, %13 : vector<2x14x11x16xf32>
    %15 = arith.addf %8, %14 : vector<2x14x11x16xf32>
    %c0_8 = arith.constant 0 : index
    %c1_9 = arith.constant 1 : index
    %c0_10 = arith.constant 0 : index
    %c0_11 = arith.constant 0 : index
    %16 = vector.load %arg0[%c0_8, %c1_9, %c0_10, %c0_11] : memref<2x16x12x1xf32, #tpu.memory_space<vmem>>, vector<2x14x11x1xf32>
    %17 = vector.extract_strided_slice %0 {offsets = [2, 0], sizes = [1, 16], strides = [1, 1]} : vector<6x16xf32> to vector<1x16xf32>
    %18 = vector.shape_cast %17 : vector<1x16xf32> to vector<1x1x1x16xf32>
    %19 = vector.broadcast %16 : vector<2x14x11x1xf32> to vector<2x14x11x16xf32>
    %20 = vector.broadcast %18 : vector<1x1x1x16xf32> to vector<2x14x11x16xf32>
    %21 = arith.mulf %19, %20 : vector<2x14x11x16xf32>
    %22 = arith.addf %15, %21 : vector<2x14x11x16xf32>
    %c0_12 = arith.constant 0 : index
    %c1_13 = arith.constant 1 : index
    %c1_14 = arith.constant 1 : index
    %c0_15 = arith.constant 0 : index
    %23 = vector.load %arg0[%c0_12, %c1_13, %c1_14, %c0_15] : memref<2x16x12x1xf32, #tpu.memory_space<vmem>>, vector<2x14x11x1xf32>
    %24 = vector.extract_strided_slice %0 {offsets = [3, 0], sizes = [1, 16], strides = [1, 1]} : vector<6x16xf32> to vector<1x16xf32>
    %25 = vector.shape_cast %24 : vector<1x16xf32> to vector<1x1x1x16xf32>
    %26 = vector.broadcast %23 : vector<2x14x11x1xf32> to vector<2x14x11x16xf32>
    %27 = vector.broadcast %25 : vector<1x1x1x16xf32> to vector<2x14x11x16xf32>
    %28 = arith.mulf %26, %27 : vector<2x14x11x16xf32>
    %29 = arith.addf %22, %28 : vector<2x14x11x16xf32>
    %c0_16 = arith.constant 0 : index
    %c2 = arith.constant 2 : index
    %c0_17 = arith.constant 0 : index
    %c0_18 = arith.constant 0 : index
    %30 = vector.load %arg0[%c0_16, %c2, %c0_17, %c0_18] : memref<2x16x12x1xf32, #tpu.memory_space<vmem>>, vector<2x14x11x1xf32>
    %31 = vector.extract_strided_slice %0 {offsets = [4, 0], sizes = [1, 16], strides = [1, 1]} : vector<6x16xf32> to vector<1x16xf32>
    %32 = vector.shape_cast %31 : vector<1x16xf32> to vector<1x1x1x16xf32>
    %33 = vector.broadcast %30 : vector<2x14x11x1xf32> to vector<2x14x11x16xf32>
    %34 = vector.broadcast %32 : vector<1x1x1x16xf32> to vector<2x14x11x16xf32>
    %35 = arith.mulf %33, %34 : vector<2x14x11x16xf32>
    %36 = arith.addf %29, %35 : vector<2x14x11x16xf32>
    %c0_19 = arith.constant 0 : index
    %c2_20 = arith.constant 2 : index
    %c1_21 = arith.constant 1 : index
    %c0_22 = arith.constant 0 : index
    %37 = vector.load %arg0[%c0_19, %c2_20, %c1_21, %c0_22] : memref<2x16x12x1xf32, #tpu.memory_space<vmem>>, vector<2x14x11x1xf32>
    %38 = vector.extract_strided_slice %0 {offsets = [5, 0], sizes = [1, 16], strides = [1, 1]} : vector<6x16xf32> to vector<1x16xf32>
    %39 = vector.shape_cast %38 : vector<1x16xf32> to vector<1x1x1x16xf32>
    %40 = vector.broadcast %37 : vector<2x14x11x1xf32> to vector<2x14x11x16xf32>
    %41 = vector.broadcast %39 : vector<1x1x1x16xf32> to vector<2x14x11x16xf32>
    %42 = arith.mulf %40, %41 : vector<2x14x11x16xf32>
    %43 = arith.addf %36, %42 : vector<2x14x11x16xf32>
    %c0_23 = arith.constant 0 : index
    %c0_24 = arith.constant 0 : index
    %44 = vector.load %arg2[%c0_23, %c0_24] : memref<1x16xf32, #tpu.memory_space<vmem>>, vector<1x16xf32>
    %45 = vector.shape_cast %44 : vector<1x16xf32> to vector<1x1x1x16xf32>
    %46 = vector.broadcast %45 : vector<1x1x1x16xf32> to vector<2x14x11x16xf32>
    %47 = arith.addf %43, %46 : vector<2x14x11x16xf32>
    %cst_25 = arith.constant 0.00999999977 : f32
    %48 = vector.broadcast %cst_25 : f32 to vector<2x14x11x16xf32>
    %49 = arith.mulf %48, %47 : vector<2x14x11x16xf32>
    %50 = arith.maximumf %47, %49 : vector<2x14x11x16xf32>
    %cst_26 = arith.constant dense<0.000000e+00> : vector<14x11x16xf32>
    %51 = vector.multi_reduction <add>, %50, %cst_26 [0] : vector<2x14x11x16xf32> to vector<14x11x16xf32>
    %52 = vector.shape_cast %51 : vector<14x11x16xf32> to vector<1x14x11x16xf32>
    %cst_27 = arith.constant dense<0.000000e+00> : vector<1x11x16xf32>
    %53 = vector.multi_reduction <add>, %52, %cst_27 [1] : vector<1x14x11x16xf32> to vector<1x11x16xf32>
    %54 = vector.shape_cast %53 : vector<1x11x16xf32> to vector<1x1x11x16xf32>
    %cst_28 = arith.constant dense<0.000000e+00> : vector<1x1x16xf32>
    %55 = vector.multi_reduction <add>, %54, %cst_28 [2] : vector<1x1x11x16xf32> to vector<1x1x16xf32>
    %56 = vector.shape_cast %55 : vector<1x1x16xf32> to vector<1x1x1x16xf32>
    %57 = arith.mulf %50, %50 : vector<2x14x11x16xf32>
    %cst_29 = arith.constant dense<0.000000e+00> : vector<14x11x16xf32>
    %58 = vector.multi_reduction <add>, %57, %cst_29 [0] : vector<2x14x11x16xf32> to vector<14x11x16xf32>
    %59 = vector.shape_cast %58 : vector<14x11x16xf32> to vector<1x14x11x16xf32>
    %cst_30 = arith.constant dense<0.000000e+00> : vector<1x11x16xf32>
    %60 = vector.multi_reduction <add>, %59, %cst_30 [1] : vector<1x14x11x16xf32> to vector<1x11x16xf32>
    %61 = vector.shape_cast %60 : vector<1x11x16xf32> to vector<1x1x11x16xf32>
    %cst_31 = arith.constant dense<0.000000e+00> : vector<1x1x16xf32>
    %62 = vector.multi_reduction <add>, %61, %cst_31 [2] : vector<1x1x11x16xf32> to vector<1x1x16xf32>
    %63 = vector.shape_cast %62 : vector<1x1x16xf32> to vector<1x1x1x16xf32>
    %cst_32 = arith.constant 3.080000e+02 : f32
    %64 = vector.broadcast %cst_32 : f32 to vector<1x1x1x16xf32>
    %65 = arith.divf %56, %64 : vector<1x1x1x16xf32>
    %cst_33 = arith.constant 3.080000e+02 : f32
    %66 = vector.broadcast %cst_33 : f32 to vector<1x1x1x16xf32>
    %67 = arith.divf %63, %66 : vector<1x1x1x16xf32>
    %68 = arith.mulf %65, %65 : vector<1x1x1x16xf32>
    %69 = arith.subf %67, %68 : vector<1x1x1x16xf32>
    %70 = vector.broadcast %65 : vector<1x1x1x16xf32> to vector<2x14x11x16xf32>
    %71 = arith.subf %50, %70 : vector<2x14x11x16xf32>
    %cst_34 = arith.constant 9.99999974E-6 : f32
    %72 = vector.broadcast %cst_34 : f32 to vector<1x1x1x16xf32>
    %73 = arith.addf %69, %72 : vector<1x1x1x16xf32>
    %74 = math.rsqrt %73 : vector<1x1x1x16xf32>
    %75 = vector.broadcast %74 : vector<1x1x1x16xf32> to vector<2x14x11x16xf32>
    %76 = arith.mulf %71, %75 : vector<2x14x11x16xf32>
    %77 = vector.shape_cast %76 : vector<2x14x11x16xf32> to vector<2x7x2x11x16xf32>
    %78 = vector.extract_strided_slice %77 {offsets = [0, 0, 0, 0, 0], sizes = [2, 7, 1, 11, 16], strides = [1, 1, 1, 1, 1]} : vector<2x7x2x11x16xf32> to vector<2x7x1x11x16xf32>
    %79 = vector.shape_cast %78 : vector<2x7x1x11x16xf32> to vector<2x7x11x16xf32>
    %80 = vector.extract_strided_slice %77 {offsets = [0, 0, 1, 0, 0], sizes = [2, 7, 1, 11, 16], strides = [1, 1, 1, 1, 1]} : vector<2x7x2x11x16xf32> to vector<2x7x1x11x16xf32>
    %81 = vector.shape_cast %80 : vector<2x7x1x11x16xf32> to vector<2x7x11x16xf32>
    %82 = arith.maximumf %79, %81 : vector<2x7x11x16xf32>
    %c0_35 = arith.constant 0 : index
    %c0_36 = arith.constant 0 : index
    %83 = vector.load %arg3[%c0_35, %c0_36] : memref<64x32xf32, #tpu.memory_space<vmem>>, vector<64x32xf32>
    %84 = vector.extract_strided_slice %82 {offsets = [0, 0, 0, 0], sizes = [1, 1, 10, 16], strides = [1, 1, 1, 1]} : vector<2x7x11x16xf32> to vector<1x1x10x16xf32>
    %85 = vector.shape_cast %84 : vector<1x1x10x16xf32> to vector<10x16xf32>
    %86 = vector.extract_strided_slice %82 {offsets = [0, 0, 1, 0], sizes = [1, 1, 10, 16], strides = [1, 1, 1, 1]} : vector<2x7x11x16xf32> to vector<1x1x10x16xf32>
    %87 = vector.shape_cast %86 : vector<1x1x10x16xf32> to vector<10x16xf32>
    %88 = vector.extract_strided_slice %82 {offsets = [0, 1, 0, 0], sizes = [1, 1, 10, 16], strides = [1, 1, 1, 1]} : vector<2x7x11x16xf32> to vector<1x1x10x16xf32>
    %89 = vector.shape_cast %88 : vector<1x1x10x16xf32> to vector<10x16xf32>
    %90 = vector.extract_strided_slice %82 {offsets = [0, 1, 1, 0], sizes = [1, 1, 10, 16], strides = [1, 1, 1, 1]} : vector<2x7x11x16xf32> to vector<1x1x10x16xf32>
    %91 = vector.shape_cast %90 : vector<1x1x10x16xf32> to vector<10x16xf32>
    %92 = tpu.concatenate %85, %87, %89, %91 in 1 : vector<10x16xf32>, vector<10x16xf32>, vector<10x16xf32>, vector<10x16xf32> -> vector<10x64xf32>
    %cst_37 = arith.constant dense<0.000000e+00> : vector<10x32xf32>
    %93 = tpu.matmul %92, %83, %cst_37 {dimension_numbers = #tpu.dot_dimension_numbers<[1], [0], [0], [1], [0, 0, 1, 1], [], []>} : vector<10x64xf32>, vector<64x32xf32>, vector<10x32xf32> -> vector<10x32xf32>
    %94 = vector.shape_cast %93 : vector<10x32xf32> to vector<1x10x32xf32>
    %95 = vector.extract_strided_slice %82 {offsets = [0, 1, 0, 0], sizes = [1, 1, 10, 16], strides = [1, 1, 1, 1]} : vector<2x7x11x16xf32> to vector<1x1x10x16xf32>
    %96 = vector.shape_cast %95 : vector<1x1x10x16xf32> to vector<10x16xf32>
    %97 = vector.extract_strided_slice %82 {offsets = [0, 1, 1, 0], sizes = [1, 1, 10, 16], strides = [1, 1, 1, 1]} : vector<2x7x11x16xf32> to vector<1x1x10x16xf32>
    %98 = vector.shape_cast %97 : vector<1x1x10x16xf32> to vector<10x16xf32>
    %99 = vector.extract_strided_slice %82 {offsets = [0, 2, 0, 0], sizes = [1, 1, 10, 16], strides = [1, 1, 1, 1]} : vector<2x7x11x16xf32> to vector<1x1x10x16xf32>
    %100 = vector.shape_cast %99 : vector<1x1x10x16xf32> to vector<10x16xf32>
    %101 = vector.extract_strided_slice %82 {offsets = [0, 2, 1, 0], sizes = [1, 1, 10, 16], strides = [1, 1, 1, 1]} : vector<2x7x11x16xf32> to vector<1x1x10x16xf32>
    %102 = vector.shape_cast %101 : vector<1x1x10x16xf32> to vector<10x16xf32>
    %103 = tpu.concatenate %96, %98, %100, %102 in 1 : vector<10x16xf32>, vector<10x16xf32>, vector<10x16xf32>, vector<10x16xf32> -> vector<10x64xf32>
    %cst_38 = arith.constant dense<0.000000e+00> : vector<10x32xf32>
    %104 = tpu.matmul %103, %83, %cst_38 {dimension_numbers = #tpu.dot_dimension_numbers<[1], [0], [0], [1], [0, 0, 1, 1], [], []>} : vector<10x64xf32>, vector<64x32xf32>, vector<10x32xf32> -> vector<10x32xf32>
    %105 = vector.shape_cast %104 : vector<10x32xf32> to vector<1x10x32xf32>
    %106 = vector.extract_strided_slice %82 {offsets = [0, 2, 0, 0], sizes = [1, 1, 10, 16], strides = [1, 1, 1, 1]} : vector<2x7x11x16xf32> to vector<1x1x10x16xf32>
    %107 = vector.shape_cast %106 : vector<1x1x10x16xf32> to vector<10x16xf32>
    %108 = vector.extract_strided_slice %82 {offsets = [0, 2, 1, 0], sizes = [1, 1, 10, 16], strides = [1, 1, 1, 1]} : vector<2x7x11x16xf32> to vector<1x1x10x16xf32>
    %109 = vector.shape_cast %108 : vector<1x1x10x16xf32> to vector<10x16xf32>
    %110 = vector.extract_strided_slice %82 {offsets = [0, 3, 0, 0], sizes = [1, 1, 10, 16], strides = [1, 1, 1, 1]} : vector<2x7x11x16xf32> to vector<1x1x10x16xf32>
    %111 = vector.shape_cast %110 : vector<1x1x10x16xf32> to vector<10x16xf32>
    %112 = vector.extract_strided_slice %82 {offsets = [0, 3, 1, 0], sizes = [1, 1, 10, 16], strides = [1, 1, 1, 1]} : vector<2x7x11x16xf32> to vector<1x1x10x16xf32>
    %113 = vector.shape_cast %112 : vector<1x1x10x16xf32> to vector<10x16xf32>
    %114 = tpu.concatenate %107, %109, %111, %113 in 1 : vector<10x16xf32>, vector<10x16xf32>, vector<10x16xf32>, vector<10x16xf32> -> vector<10x64xf32>
    %cst_39 = arith.constant dense<0.000000e+00> : vector<10x32xf32>
    %115 = tpu.matmul %114, %83, %cst_39 {dimension_numbers = #tpu.dot_dimension_numbers<[1], [0], [0], [1], [0, 0, 1, 1], [], []>} : vector<10x64xf32>, vector<64x32xf32>, vector<10x32xf32> -> vector<10x32xf32>
    %116 = vector.shape_cast %115 : vector<10x32xf32> to vector<1x10x32xf32>
    %117 = vector.extract_strided_slice %82 {offsets = [0, 3, 0, 0], sizes = [1, 1, 10, 16], strides = [1, 1, 1, 1]} : vector<2x7x11x16xf32> to vector<1x1x10x16xf32>
    %118 = vector.shape_cast %117 : vector<1x1x10x16xf32> to vector<10x16xf32>
    %119 = vector.extract_strided_slice %82 {offsets = [0, 3, 1, 0], sizes = [1, 1, 10, 16], strides = [1, 1, 1, 1]} : vector<2x7x11x16xf32> to vector<1x1x10x16xf32>
    %120 = vector.shape_cast %119 : vector<1x1x10x16xf32> to vector<10x16xf32>
    %121 = vector.extract_strided_slice %82 {offsets = [0, 4, 0, 0], sizes = [1, 1, 10, 16], strides = [1, 1, 1, 1]} : vector<2x7x11x16xf32> to vector<1x1x10x16xf32>
    %122 = vector.shape_cast %121 : vector<1x1x10x16xf32> to vector<10x16xf32>
    %123 = vector.extract_strided_slice %82 {offsets = [0, 4, 1, 0], sizes = [1, 1, 10, 16], strides = [1, 1, 1, 1]} : vector<2x7x11x16xf32> to vector<1x1x10x16xf32>
    %124 = vector.shape_cast %123 : vector<1x1x10x16xf32> to vector<10x16xf32>
    %125 = tpu.concatenate %118, %120, %122, %124 in 1 : vector<10x16xf32>, vector<10x16xf32>, vector<10x16xf32>, vector<10x16xf32> -> vector<10x64xf32>
    %cst_40 = arith.constant dense<0.000000e+00> : vector<10x32xf32>
    %126 = tpu.matmul %125, %83, %cst_40 {dimension_numbers = #tpu.dot_dimension_numbers<[1], [0], [0], [1], [0, 0, 1, 1], [], []>} : vector<10x64xf32>, vector<64x32xf32>, vector<10x32xf32> -> vector<10x32xf32>
    %127 = vector.shape_cast %126 : vector<10x32xf32> to vector<1x10x32xf32>
    %128 = vector.extract_strided_slice %82 {offsets = [0, 4, 0, 0], sizes = [1, 1, 10, 16], strides = [1, 1, 1, 1]} : vector<2x7x11x16xf32> to vector<1x1x10x16xf32>
    %129 = vector.shape_cast %128 : vector<1x1x10x16xf32> to vector<10x16xf32>
    %130 = vector.extract_strided_slice %82 {offsets = [0, 4, 1, 0], sizes = [1, 1, 10, 16], strides = [1, 1, 1, 1]} : vector<2x7x11x16xf32> to vector<1x1x10x16xf32>
    %131 = vector.shape_cast %130 : vector<1x1x10x16xf32> to vector<10x16xf32>
    %132 = vector.extract_strided_slice %82 {offsets = [0, 5, 0, 0], sizes = [1, 1, 10, 16], strides = [1, 1, 1, 1]} : vector<2x7x11x16xf32> to vector<1x1x10x16xf32>
    %133 = vector.shape_cast %132 : vector<1x1x10x16xf32> to vector<10x16xf32>
    %134 = vector.extract_strided_slice %82 {offsets = [0, 5, 1, 0], sizes = [1, 1, 10, 16], strides = [1, 1, 1, 1]} : vector<2x7x11x16xf32> to vector<1x1x10x16xf32>
    %135 = vector.shape_cast %134 : vector<1x1x10x16xf32> to vector<10x16xf32>
    %136 = tpu.concatenate %129, %131, %133, %135 in 1 : vector<10x16xf32>, vector<10x16xf32>, vector<10x16xf32>, vector<10x16xf32> -> vector<10x64xf32>
    %cst_41 = arith.constant dense<0.000000e+00> : vector<10x32xf32>
    %137 = tpu.matmul %136, %83, %cst_41 {dimension_numbers = #tpu.dot_dimension_numbers<[1], [0], [0], [1], [0, 0, 1, 1], [], []>} : vector<10x64xf32>, vector<64x32xf32>, vector<10x32xf32> -> vector<10x32xf32>
    %138 = vector.shape_cast %137 : vector<10x32xf32> to vector<1x10x32xf32>
    %139 = vector.extract_strided_slice %82 {offsets = [0, 5, 0, 0], sizes = [1, 1, 10, 16], strides = [1, 1, 1, 1]} : vector<2x7x11x16xf32> to vector<1x1x10x16xf32>
    %140 = vector.shape_cast %139 : vector<1x1x10x16xf32> to vector<10x16xf32>
    %141 = vector.extract_strided_slice %82 {offsets = [0, 5, 1, 0], sizes = [1, 1, 10, 16], strides = [1, 1, 1, 1]} : vector<2x7x11x16xf32> to vector<1x1x10x16xf32>
    %142 = vector.shape_cast %141 : vector<1x1x10x16xf32> to vector<10x16xf32>
    %143 = vector.extract_strided_slice %82 {offsets = [0, 6, 0, 0], sizes = [1, 1, 10, 16], strides = [1, 1, 1, 1]} : vector<2x7x11x16xf32> to vector<1x1x10x16xf32>
    %144 = vector.shape_cast %143 : vector<1x1x10x16xf32> to vector<10x16xf32>
    %145 = vector.extract_strided_slice %82 {offsets = [0, 6, 1, 0], sizes = [1, 1, 10, 16], strides = [1, 1, 1, 1]} : vector<2x7x11x16xf32> to vector<1x1x10x16xf32>
    %146 = vector.shape_cast %145 : vector<1x1x10x16xf32> to vector<10x16xf32>
    %147 = tpu.concatenate %140, %142, %144, %146 in 1 : vector<10x16xf32>, vector<10x16xf32>, vector<10x16xf32>, vector<10x16xf32> -> vector<10x64xf32>
    %cst_42 = arith.constant dense<0.000000e+00> : vector<10x32xf32>
    %148 = tpu.matmul %147, %83, %cst_42 {dimension_numbers = #tpu.dot_dimension_numbers<[1], [0], [0], [1], [0, 0, 1, 1], [], []>} : vector<10x64xf32>, vector<64x32xf32>, vector<10x32xf32> -> vector<10x32xf32>
    %149 = vector.shape_cast %148 : vector<10x32xf32> to vector<1x10x32xf32>
    %150 = vector.extract_strided_slice %82 {offsets = [1, 0, 0, 0], sizes = [1, 1, 10, 16], strides = [1, 1, 1, 1]} : vector<2x7x11x16xf32> to vector<1x1x10x16xf32>
    %151 = vector.shape_cast %150 : vector<1x1x10x16xf32> to vector<10x16xf32>
    %152 = vector.extract_strided_slice %82 {offsets = [1, 0, 1, 0], sizes = [1, 1, 10, 16], strides = [1, 1, 1, 1]} : vector<2x7x11x16xf32> to vector<1x1x10x16xf32>
    %153 = vector.shape_cast %152 : vector<1x1x10x16xf32> to vector<10x16xf32>
    %154 = vector.extract_strided_slice %82 {offsets = [1, 1, 0, 0], sizes = [1, 1, 10, 16], strides = [1, 1, 1, 1]} : vector<2x7x11x16xf32> to vector<1x1x10x16xf32>
    %155 = vector.shape_cast %154 : vector<1x1x10x16xf32> to vector<10x16xf32>
    %156 = vector.extract_strided_slice %82 {offsets = [1, 1, 1, 0], sizes = [1, 1, 10, 16], strides = [1, 1, 1, 1]} : vector<2x7x11x16xf32> to vector<1x1x10x16xf32>
    %157 = vector.shape_cast %156 : vector<1x1x10x16xf32> to vector<10x16xf32>
    %158 = tpu.concatenate %151, %153, %155, %157 in 1 : vector<10x16xf32>, vector<10x16xf32>, vector<10x16xf32>, vector<10x16xf32> -> vector<10x64xf32>
    %cst_43 = arith.constant dense<0.000000e+00> : vector<10x32xf32>
    %159 = tpu.matmul %158, %83, %cst_43 {dimension_numbers = #tpu.dot_dimension_numbers<[1], [0], [0], [1], [0, 0, 1, 1], [], []>} : vector<10x64xf32>, vector<64x32xf32>, vector<10x32xf32> -> vector<10x32xf32>
    %160 = vector.shape_cast %159 : vector<10x32xf32> to vector<1x10x32xf32>
    %161 = vector.extract_strided_slice %82 {offsets = [1, 1, 0, 0], sizes = [1, 1, 10, 16], strides = [1, 1, 1, 1]} : vector<2x7x11x16xf32> to vector<1x1x10x16xf32>
    %162 = vector.shape_cast %161 : vector<1x1x10x16xf32> to vector<10x16xf32>
    %163 = vector.extract_strided_slice %82 {offsets = [1, 1, 1, 0], sizes = [1, 1, 10, 16], strides = [1, 1, 1, 1]} : vector<2x7x11x16xf32> to vector<1x1x10x16xf32>
    %164 = vector.shape_cast %163 : vector<1x1x10x16xf32> to vector<10x16xf32>
    %165 = vector.extract_strided_slice %82 {offsets = [1, 2, 0, 0], sizes = [1, 1, 10, 16], strides = [1, 1, 1, 1]} : vector<2x7x11x16xf32> to vector<1x1x10x16xf32>
    %166 = vector.shape_cast %165 : vector<1x1x10x16xf32> to vector<10x16xf32>
    %167 = vector.extract_strided_slice %82 {offsets = [1, 2, 1, 0], sizes = [1, 1, 10, 16], strides = [1, 1, 1, 1]} : vector<2x7x11x16xf32> to vector<1x1x10x16xf32>
    %168 = vector.shape_cast %167 : vector<1x1x10x16xf32> to vector<10x16xf32>
    %169 = tpu.concatenate %162, %164, %166, %168 in 1 : vector<10x16xf32>, vector<10x16xf32>, vector<10x16xf32>, vector<10x16xf32> -> vector<10x64xf32>
    %cst_44 = arith.constant dense<0.000000e+00> : vector<10x32xf32>
    %170 = tpu.matmul %169, %83, %cst_44 {dimension_numbers = #tpu.dot_dimension_numbers<[1], [0], [0], [1], [0, 0, 1, 1], [], []>} : vector<10x64xf32>, vector<64x32xf32>, vector<10x32xf32> -> vector<10x32xf32>
    %171 = vector.shape_cast %170 : vector<10x32xf32> to vector<1x10x32xf32>
    %172 = vector.extract_strided_slice %82 {offsets = [1, 2, 0, 0], sizes = [1, 1, 10, 16], strides = [1, 1, 1, 1]} : vector<2x7x11x16xf32> to vector<1x1x10x16xf32>
    %173 = vector.shape_cast %172 : vector<1x1x10x16xf32> to vector<10x16xf32>
    %174 = vector.extract_strided_slice %82 {offsets = [1, 2, 1, 0], sizes = [1, 1, 10, 16], strides = [1, 1, 1, 1]} : vector<2x7x11x16xf32> to vector<1x1x10x16xf32>
    %175 = vector.shape_cast %174 : vector<1x1x10x16xf32> to vector<10x16xf32>
    %176 = vector.extract_strided_slice %82 {offsets = [1, 3, 0, 0], sizes = [1, 1, 10, 16], strides = [1, 1, 1, 1]} : vector<2x7x11x16xf32> to vector<1x1x10x16xf32>
    %177 = vector.shape_cast %176 : vector<1x1x10x16xf32> to vector<10x16xf32>
    %178 = vector.extract_strided_slice %82 {offsets = [1, 3, 1, 0], sizes = [1, 1, 10, 16], strides = [1, 1, 1, 1]} : vector<2x7x11x16xf32> to vector<1x1x10x16xf32>
    %179 = vector.shape_cast %178 : vector<1x1x10x16xf32> to vector<10x16xf32>
    %180 = tpu.concatenate %173, %175, %177, %179 in 1 : vector<10x16xf32>, vector<10x16xf32>, vector<10x16xf32>, vector<10x16xf32> -> vector<10x64xf32>
    %cst_45 = arith.constant dense<0.000000e+00> : vector<10x32xf32>
    %181 = tpu.matmul %180, %83, %cst_45 {dimension_numbers = #tpu.dot_dimension_numbers<[1], [0], [0], [1], [0, 0, 1, 1], [], []>} : vector<10x64xf32>, vector<64x32xf32>, vector<10x32xf32> -> vector<10x32xf32>
    %182 = vector.shape_cast %181 : vector<10x32xf32> to vector<1x10x32xf32>
    %183 = vector.extract_strided_slice %82 {offsets = [1, 3, 0, 0], sizes = [1, 1, 10, 16], strides = [1, 1, 1, 1]} : vector<2x7x11x16xf32> to vector<1x1x10x16xf32>
    %184 = vector.shape_cast %183 : vector<1x1x10x16xf32> to vector<10x16xf32>
    %185 = vector.extract_strided_slice %82 {offsets = [1, 3, 1, 0], sizes = [1, 1, 10, 16], strides = [1, 1, 1, 1]} : vector<2x7x11x16xf32> to vector<1x1x10x16xf32>
    %186 = vector.shape_cast %185 : vector<1x1x10x16xf32> to vector<10x16xf32>
    %187 = vector.extract_strided_slice %82 {offsets = [1, 4, 0, 0], sizes = [1, 1, 10, 16], strides = [1, 1, 1, 1]} : vector<2x7x11x16xf32> to vector<1x1x10x16xf32>
    %188 = vector.shape_cast %187 : vector<1x1x10x16xf32> to vector<10x16xf32>
    %189 = vector.extract_strided_slice %82 {offsets = [1, 4, 1, 0], sizes = [1, 1, 10, 16], strides = [1, 1, 1, 1]} : vector<2x7x11x16xf32> to vector<1x1x10x16xf32>
    %190 = vector.shape_cast %189 : vector<1x1x10x16xf32> to vector<10x16xf32>
    %191 = tpu.concatenate %184, %186, %188, %190 in 1 : vector<10x16xf32>, vector<10x16xf32>, vector<10x16xf32>, vector<10x16xf32> -> vector<10x64xf32>
    %cst_46 = arith.constant dense<0.000000e+00> : vector<10x32xf32>
    %192 = tpu.matmul %191, %83, %cst_46 {dimension_numbers = #tpu.dot_dimension_numbers<[1], [0], [0], [1], [0, 0, 1, 1], [], []>} : vector<10x64xf32>, vector<64x32xf32>, vector<10x32xf32> -> vector<10x32xf32>
    %193 = vector.shape_cast %192 : vector<10x32xf32> to vector<1x10x32xf32>
    %194 = vector.extract_strided_slice %82 {offsets = [1, 4, 0, 0], sizes = [1, 1, 10, 16], strides = [1, 1, 1, 1]} : vector<2x7x11x16xf32> to vector<1x1x10x16xf32>
    %195 = vector.shape_cast %194 : vector<1x1x10x16xf32> to vector<10x16xf32>
    %196 = vector.extract_strided_slice %82 {offsets = [1, 4, 1, 0], sizes = [1, 1, 10, 16], strides = [1, 1, 1, 1]} : vector<2x7x11x16xf32> to vector<1x1x10x16xf32>
    %197 = vector.shape_cast %196 : vector<1x1x10x16xf32> to vector<10x16xf32>
    %198 = vector.extract_strided_slice %82 {offsets = [1, 5, 0, 0], sizes = [1, 1, 10, 16], strides = [1, 1, 1, 1]} : vector<2x7x11x16xf32> to vector<1x1x10x16xf32>
    %199 = vector.shape_cast %198 : vector<1x1x10x16xf32> to vector<10x16xf32>
    %200 = vector.extract_strided_slice %82 {offsets = [1, 5, 1, 0], sizes = [1, 1, 10, 16], strides = [1, 1, 1, 1]} : vector<2x7x11x16xf32> to vector<1x1x10x16xf32>
    %201 = vector.shape_cast %200 : vector<1x1x10x16xf32> to vector<10x16xf32>
    %202 = tpu.concatenate %195, %197, %199, %201 in 1 : vector<10x16xf32>, vector<10x16xf32>, vector<10x16xf32>, vector<10x16xf32> -> vector<10x64xf32>
    %cst_47 = arith.constant dense<0.000000e+00> : vector<10x32xf32>
    %203 = tpu.matmul %202, %83, %cst_47 {dimension_numbers = #tpu.dot_dimension_numbers<[1], [0], [0], [1], [0, 0, 1, 1], [], []>} : vector<10x64xf32>, vector<64x32xf32>, vector<10x32xf32> -> vector<10x32xf32>
    %204 = vector.shape_cast %203 : vector<10x32xf32> to vector<1x10x32xf32>
    %205 = vector.extract_strided_slice %82 {offsets = [1, 5, 0, 0], sizes = [1, 1, 10, 16], strides = [1, 1, 1, 1]} : vector<2x7x11x16xf32> to vector<1x1x10x16xf32>
    %206 = vector.shape_cast %205 : vector<1x1x10x16xf32> to vector<10x16xf32>
    %207 = vector.extract_strided_slice %82 {offsets = [1, 5, 1, 0], sizes = [1, 1, 10, 16], strides = [1, 1, 1, 1]} : vector<2x7x11x16xf32> to vector<1x1x10x16xf32>
    %208 = vector.shape_cast %207 : vector<1x1x10x16xf32> to vector<10x16xf32>
    %209 = vector.extract_strided_slice %82 {offsets = [1, 6, 0, 0], sizes = [1, 1, 10, 16], strides = [1, 1, 1, 1]} : vector<2x7x11x16xf32> to vector<1x1x10x16xf32>
    %210 = vector.shape_cast %209 : vector<1x1x10x16xf32> to vector<10x16xf32>
    %211 = vector.extract_strided_slice %82 {offsets = [1, 6, 1, 0], sizes = [1, 1, 10, 16], strides = [1, 1, 1, 1]} : vector<2x7x11x16xf32> to vector<1x1x10x16xf32>
    %212 = vector.shape_cast %211 : vector<1x1x10x16xf32> to vector<10x16xf32>
    %213 = tpu.concatenate %206, %208, %210, %212 in 1 : vector<10x16xf32>, vector<10x16xf32>, vector<10x16xf32>, vector<10x16xf32> -> vector<10x64xf32>
    %cst_48 = arith.constant dense<0.000000e+00> : vector<10x32xf32>
    %214 = tpu.matmul %213, %83, %cst_48 {dimension_numbers = #tpu.dot_dimension_numbers<[1], [0], [0], [1], [0, 0, 1, 1], [], []>} : vector<10x64xf32>, vector<64x32xf32>, vector<10x32xf32> -> vector<10x32xf32>
    %215 = vector.shape_cast %214 : vector<10x32xf32> to vector<1x10x32xf32>
    %216 = tpu.concatenate %94, %105, %116, %127, %138, %149, %160, %171, %182, %193, %204, %215 in 0 : vector<1x10x32xf32>, vector<1x10x32xf32>, vector<1x10x32xf32>, vector<1x10x32xf32>, vector<1x10x32xf32>, vector<1x10x32xf32>, vector<1x10x32xf32>, vector<1x10x32xf32>, vector<1x10x32xf32>, vector<1x10x32xf32>, vector<1x10x32xf32>, vector<1x10x32xf32> -> vector<12x10x32xf32>
    %217 = vector.shape_cast %216 : vector<12x10x32xf32> to vector<2x6x10x32xf32>
    %c0_49 = arith.constant 0 : index
    %c0_50 = arith.constant 0 : index
    %218 = vector.load %arg4[%c0_49, %c0_50] : memref<1x32xf32, #tpu.memory_space<vmem>>, vector<1x32xf32>
    %219 = vector.shape_cast %218 : vector<1x32xf32> to vector<1x1x1x32xf32>
    %220 = vector.broadcast %219 : vector<1x1x1x32xf32> to vector<2x6x10x32xf32>
    %221 = arith.addf %217, %220 : vector<2x6x10x32xf32>
    %cst_51 = arith.constant 0.00999999977 : f32
    %222 = vector.broadcast %cst_51 : f32 to vector<2x6x10x32xf32>
    %223 = arith.mulf %222, %221 : vector<2x6x10x32xf32>
    %224 = arith.maximumf %221, %223 : vector<2x6x10x32xf32>
    %cst_52 = arith.constant dense<0.000000e+00> : vector<6x10x32xf32>
    %225 = vector.multi_reduction <add>, %224, %cst_52 [0] : vector<2x6x10x32xf32> to vector<6x10x32xf32>
    %226 = vector.shape_cast %225 : vector<6x10x32xf32> to vector<1x6x10x32xf32>
    %cst_53 = arith.constant dense<0.000000e+00> : vector<1x10x32xf32>
    %227 = vector.multi_reduction <add>, %226, %cst_53 [1] : vector<1x6x10x32xf32> to vector<1x10x32xf32>
    %228 = vector.shape_cast %227 : vector<1x10x32xf32> to vector<1x1x10x32xf32>
    %cst_54 = arith.constant dense<0.000000e+00> : vector<1x1x32xf32>
    %229 = vector.multi_reduction <add>, %228, %cst_54 [2] : vector<1x1x10x32xf32> to vector<1x1x32xf32>
    %230 = vector.shape_cast %229 : vector<1x1x32xf32> to vector<1x1x1x32xf32>
    %231 = arith.mulf %224, %224 : vector<2x6x10x32xf32>
    %cst_55 = arith.constant dense<0.000000e+00> : vector<6x10x32xf32>
    %232 = vector.multi_reduction <add>, %231, %cst_55 [0] : vector<2x6x10x32xf32> to vector<6x10x32xf32>
    %233 = vector.shape_cast %232 : vector<6x10x32xf32> to vector<1x6x10x32xf32>
    %cst_56 = arith.constant dense<0.000000e+00> : vector<1x10x32xf32>
    %234 = vector.multi_reduction <add>, %233, %cst_56 [1] : vector<1x6x10x32xf32> to vector<1x10x32xf32>
    %235 = vector.shape_cast %234 : vector<1x10x32xf32> to vector<1x1x10x32xf32>
    %cst_57 = arith.constant dense<0.000000e+00> : vector<1x1x32xf32>
    %236 = vector.multi_reduction <add>, %235, %cst_57 [2] : vector<1x1x10x32xf32> to vector<1x1x32xf32>
    %237 = vector.shape_cast %236 : vector<1x1x32xf32> to vector<1x1x1x32xf32>
    %cst_58 = arith.constant 1.200000e+02 : f32
    %238 = vector.broadcast %cst_58 : f32 to vector<1x1x1x32xf32>
    %239 = arith.divf %230, %238 : vector<1x1x1x32xf32>
    %cst_59 = arith.constant 1.200000e+02 : f32
    %240 = vector.broadcast %cst_59 : f32 to vector<1x1x1x32xf32>
    %241 = arith.divf %237, %240 : vector<1x1x1x32xf32>
    %242 = arith.mulf %239, %239 : vector<1x1x1x32xf32>
    %243 = arith.subf %241, %242 : vector<1x1x1x32xf32>
    %244 = vector.broadcast %239 : vector<1x1x1x32xf32> to vector<2x6x10x32xf32>
    %245 = arith.subf %224, %244 : vector<2x6x10x32xf32>
    %cst_60 = arith.constant 9.99999974E-6 : f32
    %246 = vector.broadcast %cst_60 : f32 to vector<1x1x1x32xf32>
    %247 = arith.addf %243, %246 : vector<1x1x1x32xf32>
    %248 = math.rsqrt %247 : vector<1x1x1x32xf32>
    %249 = vector.broadcast %248 : vector<1x1x1x32xf32> to vector<2x6x10x32xf32>
    %250 = arith.mulf %245, %249 : vector<2x6x10x32xf32>
    %251 = vector.shape_cast %250 : vector<2x6x10x32xf32> to vector<2x3x2x10x32xf32>
    %252 = vector.extract_strided_slice %251 {offsets = [0, 0, 0, 0, 0], sizes = [2, 3, 1, 10, 32], strides = [1, 1, 1, 1, 1]} : vector<2x3x2x10x32xf32> to vector<2x3x1x10x32xf32>
    %253 = vector.shape_cast %252 : vector<2x3x1x10x32xf32> to vector<2x3x10x32xf32>
    %254 = vector.extract_strided_slice %251 {offsets = [0, 0, 1, 0, 0], sizes = [2, 3, 1, 10, 32], strides = [1, 1, 1, 1, 1]} : vector<2x3x2x10x32xf32> to vector<2x3x1x10x32xf32>
    %255 = vector.shape_cast %254 : vector<2x3x1x10x32xf32> to vector<2x3x10x32xf32>
    %256 = arith.maximumf %253, %255 : vector<2x3x10x32xf32>
    %c0_61 = arith.constant 0 : index
    %c0_62 = arith.constant 0 : index
    %257 = vector.load %arg5[%c0_61, %c0_62] : memref<64x64xf32, #tpu.memory_space<vmem>>, vector<64x64xf32>
    %258 = vector.extract_strided_slice %256 {offsets = [0, 0, 0, 0], sizes = [1, 1, 10, 32], strides = [1, 1, 1, 1]} : vector<2x3x10x32xf32> to vector<1x1x10x32xf32>
    %259 = vector.shape_cast %258 : vector<1x1x10x32xf32> to vector<10x32xf32>
    %260 = vector.extract_strided_slice %256 {offsets = [0, 1, 0, 0], sizes = [1, 1, 10, 32], strides = [1, 1, 1, 1]} : vector<2x3x10x32xf32> to vector<1x1x10x32xf32>
    %261 = vector.shape_cast %260 : vector<1x1x10x32xf32> to vector<10x32xf32>
    %262 = tpu.concatenate %259, %261 in 1 : vector<10x32xf32>, vector<10x32xf32> -> vector<10x64xf32>
    %cst_63 = arith.constant dense<0.000000e+00> : vector<10x64xf32>
    %263 = tpu.matmul %262, %257, %cst_63 {dimension_numbers = #tpu.dot_dimension_numbers<[1], [0], [0], [1], [0, 0, 1, 1], [], []>} : vector<10x64xf32>, vector<64x64xf32>, vector<10x64xf32> -> vector<10x64xf32>
    %264 = vector.shape_cast %263 : vector<10x64xf32> to vector<1x10x64xf32>
    %265 = vector.extract_strided_slice %256 {offsets = [0, 1, 0, 0], sizes = [1, 1, 10, 32], strides = [1, 1, 1, 1]} : vector<2x3x10x32xf32> to vector<1x1x10x32xf32>
    %266 = vector.shape_cast %265 : vector<1x1x10x32xf32> to vector<10x32xf32>
    %267 = vector.extract_strided_slice %256 {offsets = [0, 2, 0, 0], sizes = [1, 1, 10, 32], strides = [1, 1, 1, 1]} : vector<2x3x10x32xf32> to vector<1x1x10x32xf32>
    %268 = vector.shape_cast %267 : vector<1x1x10x32xf32> to vector<10x32xf32>
    %269 = tpu.concatenate %266, %268 in 1 : vector<10x32xf32>, vector<10x32xf32> -> vector<10x64xf32>
    %cst_64 = arith.constant dense<0.000000e+00> : vector<10x64xf32>
    %270 = tpu.matmul %269, %257, %cst_64 {dimension_numbers = #tpu.dot_dimension_numbers<[1], [0], [0], [1], [0, 0, 1, 1], [], []>} : vector<10x64xf32>, vector<64x64xf32>, vector<10x64xf32> -> vector<10x64xf32>
    %271 = vector.shape_cast %270 : vector<10x64xf32> to vector<1x10x64xf32>
    %272 = vector.extract_strided_slice %256 {offsets = [1, 0, 0, 0], sizes = [1, 1, 10, 32], strides = [1, 1, 1, 1]} : vector<2x3x10x32xf32> to vector<1x1x10x32xf32>
    %273 = vector.shape_cast %272 : vector<1x1x10x32xf32> to vector<10x32xf32>
    %274 = vector.extract_strided_slice %256 {offsets = [1, 1, 0, 0], sizes = [1, 1, 10, 32], strides = [1, 1, 1, 1]} : vector<2x3x10x32xf32> to vector<1x1x10x32xf32>
    %275 = vector.shape_cast %274 : vector<1x1x10x32xf32> to vector<10x32xf32>
    %276 = tpu.concatenate %273, %275 in 1 : vector<10x32xf32>, vector<10x32xf32> -> vector<10x64xf32>
    %cst_65 = arith.constant dense<0.000000e+00> : vector<10x64xf32>
    %277 = tpu.matmul %276, %257, %cst_65 {dimension_numbers = #tpu.dot_dimension_numbers<[1], [0], [0], [1], [0, 0, 1, 1], [], []>} : vector<10x64xf32>, vector<64x64xf32>, vector<10x64xf32> -> vector<10x64xf32>
    %278 = vector.shape_cast %277 : vector<10x64xf32> to vector<1x10x64xf32>
    %279 = vector.extract_strided_slice %256 {offsets = [1, 1, 0, 0], sizes = [1, 1, 10, 32], strides = [1, 1, 1, 1]} : vector<2x3x10x32xf32> to vector<1x1x10x32xf32>
    %280 = vector.shape_cast %279 : vector<1x1x10x32xf32> to vector<10x32xf32>
    %281 = vector.extract_strided_slice %256 {offsets = [1, 2, 0, 0], sizes = [1, 1, 10, 32], strides = [1, 1, 1, 1]} : vector<2x3x10x32xf32> to vector<1x1x10x32xf32>
    %282 = vector.shape_cast %281 : vector<1x1x10x32xf32> to vector<10x32xf32>
    %283 = tpu.concatenate %280, %282 in 1 : vector<10x32xf32>, vector<10x32xf32> -> vector<10x64xf32>
    %cst_66 = arith.constant dense<0.000000e+00> : vector<10x64xf32>
    %284 = tpu.matmul %283, %257, %cst_66 {dimension_numbers = #tpu.dot_dimension_numbers<[1], [0], [0], [1], [0, 0, 1, 1], [], []>} : vector<10x64xf32>, vector<64x64xf32>, vector<10x64xf32> -> vector<10x64xf32>
    %285 = vector.shape_cast %284 : vector<10x64xf32> to vector<1x10x64xf32>
    %286 = tpu.concatenate %264, %271, %278, %285 in 0 : vector<1x10x64xf32>, vector<1x10x64xf32>, vector<1x10x64xf32>, vector<1x10x64xf32> -> vector<4x10x64xf32>
    %287 = vector.shape_cast %286 : vector<4x10x64xf32> to vector<2x2x10x64xf32>
    %c0_67 = arith.constant 0 : index
    %c0_68 = arith.constant 0 : index
    %288 = vector.load %arg6[%c0_67, %c0_68] : memref<1x64xf32, #tpu.memory_space<vmem>>, vector<1x64xf32>
    %289 = vector.shape_cast %288 : vector<1x64xf32> to vector<1x1x1x64xf32>
    %290 = vector.broadcast %289 : vector<1x1x1x64xf32> to vector<2x2x10x64xf32>
    %291 = arith.addf %287, %290 : vector<2x2x10x64xf32>
    %cst_69 = arith.constant 0.00999999977 : f32
    %292 = vector.broadcast %cst_69 : f32 to vector<2x2x10x64xf32>
    %293 = arith.mulf %292, %291 : vector<2x2x10x64xf32>
    %294 = arith.maximumf %291, %293 : vector<2x2x10x64xf32>
    %cst_70 = arith.constant dense<0.000000e+00> : vector<2x10x64xf32>
    %295 = vector.multi_reduction <add>, %294, %cst_70 [0] : vector<2x2x10x64xf32> to vector<2x10x64xf32>
    %296 = vector.shape_cast %295 : vector<2x10x64xf32> to vector<1x2x10x64xf32>
    %cst_71 = arith.constant dense<0.000000e+00> : vector<1x10x64xf32>
    %297 = vector.multi_reduction <add>, %296, %cst_71 [1] : vector<1x2x10x64xf32> to vector<1x10x64xf32>
    %298 = vector.shape_cast %297 : vector<1x10x64xf32> to vector<1x1x10x64xf32>
    %cst_72 = arith.constant dense<0.000000e+00> : vector<1x1x64xf32>
    %299 = vector.multi_reduction <add>, %298, %cst_72 [2] : vector<1x1x10x64xf32> to vector<1x1x64xf32>
    %300 = vector.shape_cast %299 : vector<1x1x64xf32> to vector<1x1x1x64xf32>
    %301 = arith.mulf %294, %294 : vector<2x2x10x64xf32>
    %cst_73 = arith.constant dense<0.000000e+00> : vector<2x10x64xf32>
    %302 = vector.multi_reduction <add>, %301, %cst_73 [0] : vector<2x2x10x64xf32> to vector<2x10x64xf32>
    %303 = vector.shape_cast %302 : vector<2x10x64xf32> to vector<1x2x10x64xf32>
    %cst_74 = arith.constant dense<0.000000e+00> : vector<1x10x64xf32>
    %304 = vector.multi_reduction <add>, %303, %cst_74 [1] : vector<1x2x10x64xf32> to vector<1x10x64xf32>
    %305 = vector.shape_cast %304 : vector<1x10x64xf32> to vector<1x1x10x64xf32>
    %cst_75 = arith.constant dense<0.000000e+00> : vector<1x1x64xf32>
    %306 = vector.multi_reduction <add>, %305, %cst_75 [2] : vector<1x1x10x64xf32> to vector<1x1x64xf32>
    %307 = vector.shape_cast %306 : vector<1x1x64xf32> to vector<1x1x1x64xf32>
    %cst_76 = arith.constant 4.000000e+01 : f32
    %308 = vector.broadcast %cst_76 : f32 to vector<1x1x1x64xf32>
    %309 = arith.divf %300, %308 : vector<1x1x1x64xf32>
    %cst_77 = arith.constant 4.000000e+01 : f32
    %310 = vector.broadcast %cst_77 : f32 to vector<1x1x1x64xf32>
    %311 = arith.divf %307, %310 : vector<1x1x1x64xf32>
    %312 = arith.mulf %309, %309 : vector<1x1x1x64xf32>
    %313 = arith.subf %311, %312 : vector<1x1x1x64xf32>
    %314 = vector.broadcast %309 : vector<1x1x1x64xf32> to vector<2x2x10x64xf32>
    %315 = arith.subf %294, %314 : vector<2x2x10x64xf32>
    %cst_78 = arith.constant 9.99999974E-6 : f32
    %316 = vector.broadcast %cst_78 : f32 to vector<1x1x1x64xf32>
    %317 = arith.addf %313, %316 : vector<1x1x1x64xf32>
    %318 = math.rsqrt %317 : vector<1x1x1x64xf32>
    %319 = vector.broadcast %318 : vector<1x1x1x64xf32> to vector<2x2x10x64xf32>
    %320 = arith.mulf %315, %319 : vector<2x2x10x64xf32>
    %321 = vector.shape_cast %320 : vector<2x2x10x64xf32> to vector<2x1x2x10x64xf32>
    %322 = vector.extract_strided_slice %321 {offsets = [0, 0, 0, 0, 0], sizes = [2, 1, 1, 10, 64], strides = [1, 1, 1, 1, 1]} : vector<2x1x2x10x64xf32> to vector<2x1x1x10x64xf32>
    %323 = vector.shape_cast %322 : vector<2x1x1x10x64xf32> to vector<2x1x10x64xf32>
    %324 = vector.extract_strided_slice %321 {offsets = [0, 0, 1, 0, 0], sizes = [2, 1, 1, 10, 64], strides = [1, 1, 1, 1, 1]} : vector<2x1x2x10x64xf32> to vector<2x1x1x10x64xf32>
    %325 = vector.shape_cast %324 : vector<2x1x1x10x64xf32> to vector<2x1x10x64xf32>
    %326 = arith.maximumf %323, %325 : vector<2x1x10x64xf32>
    %c0_79 = arith.constant 0 : index
    %c0_80 = arith.constant 0 : index
    %c0_81 = arith.constant 0 : index
    %c0_82 = arith.constant 0 : index
    %327 = vector.load %arg7[%c0_79, %c0_80, %c0_81, %c0_82] : memref<1x1x10x64xf32, #tpu.memory_space<vmem>>, vector<1x1x10x64xf32>
    %328 = vector.broadcast %327 : vector<1x1x10x64xf32> to vector<2x1x10x64xf32>
    %329 = arith.mulf %326, %328 : vector<2x1x10x64xf32>
    %cst_83 = arith.constant dense<0.000000e+00> : vector<2x10x64xf32>
    %330 = vector.multi_reduction <add>, %329, %cst_83 [1] : vector<2x1x10x64xf32> to vector<2x10x64xf32>
    %331 = vector.shape_cast %330 : vector<2x10x64xf32> to vector<2x1x10x64xf32>
    %cst_84 = arith.constant dense<0.000000e+00> : vector<2x1x64xf32>
    %332 = vector.multi_reduction <add>, %331, %cst_84 [2] : vector<2x1x10x64xf32> to vector<2x1x64xf32>
    %333 = vector.shape_cast %332 : vector<2x1x64xf32> to vector<2x1x1x64xf32>
    %cst_85 = arith.constant dense<0.000000e+00> : vector<2x1x1xf32>
    %334 = vector.multi_reduction <add>, %333, %cst_85 [3] : vector<2x1x1x64xf32> to vector<2x1x1xf32>
    %335 = vector.shape_cast %334 : vector<2x1x1xf32> to vector<2x1x1x1xf32>
    %c0_86 = arith.constant 0 : index
    %c0_87 = arith.constant 0 : index
    %c0_88 = arith.constant 0 : index
    %c0_89 = arith.constant 0 : index
    %336 = vector.load %arg8[%c0_86, %c0_87, %c0_88, %c0_89] : memref<1x1x1x1xf32, #tpu.memory_space<vmem>>, vector<1x1x1x1xf32>
    %337 = vector.broadcast %336 : vector<1x1x1x1xf32> to vector<2x1x1x1xf32>
    %338 = arith.addf %335, %337 : vector<2x1x1x1xf32>
    %cst_90 = arith.constant 0.000000e+00 : f32
    %339 = vector.broadcast %cst_90 : f32 to vector<2x1x1x1xf32>
    %340 = arith.subf %339, %338 : vector<2x1x1x1xf32>
    %341 = math.exp %340 : vector<2x1x1x1xf32>
    %cst_91 = arith.constant 1.000000e+00 : f32
    %342 = vector.broadcast %cst_91 : f32 to vector<2x1x1x1xf32>
    %343 = arith.addf %342, %341 : vector<2x1x1x1xf32>
    %cst_92 = arith.constant 1.000000e+00 : f32
    %344 = vector.broadcast %cst_92 : f32 to vector<2x1x1x1xf32>
    %345 = arith.divf %344, %343 : vector<2x1x1x1xf32>
    %c0_93 = arith.constant 0 : index
    %c0_94 = arith.constant 0 : index
    %c0_95 = arith.constant 0 : index
    %c0_96 = arith.constant 0 : index
    %346 = vector.load %arg9[%c0_93, %c0_94, %c0_95, %c0_96] : memref<2x1x1x1xf32, #tpu.memory_space<vmem>>, vector<2x1x1x1xf32>
    tpu.vector_store %arg9[%c0_93, %c0_94, %c0_95, %c0_96], %345 {strides = array<i32>} : memref<2x1x1x1xf32, #tpu.memory_space<vmem>>, vector<2x1x1x1xf32>,
    return
  }
}

</mosaic_0001>

<bundles_post_ra>
// kernel: cnn3_forward.1
= control target key start
LH: loop header
LB: loop body
LE: loop exit
PB: predicated region body
PF: predicated region fallthrough
CT: control target
= control target key end

     0   :  { %v6619_v0 = vmov 0   ;;  %vm2924_vm0 = vcmask 130048   ;;  %vm2928_vm1 = vcmask 124928   ;;  %vm3433_vm2 = vcmask 1046528   ;;  %s6620_s11 = smov 16   ;;  %s6621_s12 = smov 32   ;;  %s11488_s0 = inlined_call_operand.vmem [shape: f32[2,16,12,1], index: 0, kind: input, shape index: {}]   ;;  %s11489_s1 = inlined_call_operand.vmem [shape: f32[6,16], index: 1, kind: input, shape index: {}]   ;;  %s11490_s2 = inlined_call_operand.vmem [shape: f32[1,16], index: 2, kind: input, shape index: {}]   ;;  %s11491_s3 = inlined_call_operand.vmem [shape: f32[64,32], index: 3, kind: input, shape index: {}]   ;;  %s11492_s5 = inlined_call_operand.vmem [shape: f32[64,64], index: 5, kind: input, shape index: {}]   ;;  %s11493_s4 = inlined_call_operand.vmem [shape: f32[1,32], index: 4, kind: input, shape index: {}]   ;;  %s11494_s8 = inlined_call_operand.<no memory space> [shape: f32[1,1,1,1], index: 8, kind: input, shape index: {}]   ;;  %s11495_s6 = inlined_call_operand.vmem [shape: f32[1,64], index: 6, kind: input, shape index: {}]   ;;  %s11496_s7 = inlined_call_operand.vmem [shape: f32[1,1,10,64], index: 7, kind: input, shape index: {}]   ;;  %s11497_s9 = inlined_call_operand.vmem [shape: f32[2,1,1,1], index: 9, kind: output, shape index: {}]  }
   0x1   :  { %6603 = vset.pattern.permute.xlu1 %v6619_v0  ;;  %6602 = vset.pattern.permute.xlu0 %v6619_v0  ;;  %v6676_v1 = vld [vmem:[%s11488_s0 + $0x10] sm:$0xff]  ;;  %v35_v2 = vld [vmem:[%s11488_s0] sm:$0xff]  ;;  %v38_v3 = vld [vmem:[%s11488_s0 + $0x18] sm:$0x7]  ;;  %s6622_s13 = smov 48   ;;  %vm3462_vm3 = vcmask 261120  }
   0x2   :  { %103 = vperm.xlu1 %6603, %v6676_v1   ;;  %93 = vperm.xlu0 %6602, %v35_v2   ;;  %v36_v4 = vld [vmem:[%s11488_s0 + $0x8] sm:$0x7]  ;;  %v6694_v6 = vld [vmem:[%s11488_s0 + $0x20] sm:$0xff]  ;;  %v42_v7 = vld [vmem:[%s11488_s0 + $0x38] sm:$0x7]  ;;  %vm3465_vm4 = vcmask 392192  }
   0x3   :  { %v40_v5 = vld [vmem:[%s11488_s0 + $0x28] sm:$0x7]  ;;  %v6703_v8 = vld [vmem:[%s11488_s0 + $0x30] sm:$0xff]  ;;  %v6712_v10 = vld [vmem:[%s11488_s0 + $0x40] sm:$0xff]  ;;  %vm3468_vm5 = vcmask 523264   ;;  %vm4847_vm6 = vcmask 254976  }
   0x4   :  { %v44_v9 = vld [vmem:[%s11488_s0 + $0x48] sm:$0x7]  ;;  %v46_v11 = vld [vmem:[%s11488_s0 + $0x58] sm:$0x7]  ;;  %v6721_v12 = vld [vmem:[%s11488_s0 + $0x50] sm:$0xff]  ;;  %vm5476_vm7 = vcmask 517120  }
   0x5   :  { %v48_v13 = vld [vmem:[%s11488_s0 + $0x68] sm:$0x7]  ;;  %v6730_v14 = vld [vmem:[%s11488_s0 + $0x60] sm:$0xff]  ;;  %v50_v15 = vld [vmem:[%s11488_s0 + $0x78] sm:$0x7]  ;;  %vm5612_vm8 = vcmask 0  }
   0x6   :  { %108 = vperm.xlu1 %6603, %v38_v3   ;;  %98 = vperm.xlu0 %6602, %v36_v4   ;;  %v6739_v16 = vld [vmem:[%s11488_s0 + $0x70] sm:$0xff]  ;;  %v52_v17 = vld [vmem:[%s11488_s0 + $0x88] sm:$0x7]  ;;  %v6748_v18 = vld [vmem:[%s11488_s0 + $0x80] sm:$0xff] }
   0x7   :  { %v54_v19 = vld [vmem:[%s11488_s0 + $0x98] sm:$0x7]  ;;  %v53_v20 = vld [vmem:[%s11488_s0 + $0x90] sm:$0xff]  ;;  %v56_v21 = vld [vmem:[%s11488_s0 + $0xa8] sm:$0x7] }
   0x8   :  { %v55_v22 = vld [vmem:[%s11488_s0 + $0xa0] sm:$0xff]  ;;  %v58_v23 = vld [vmem:[%s11488_s0 + $0xb8] sm:$0x7]  ;;  %v57_v24 = vld [vmem:[%s11488_s0 + $0xb0] sm:$0xff] }
   0x9   :  { %v60_v25 = vld [vmem:[%s11488_s0 + $0xc8] sm:$0x7]  ;;  %v59_v26 = vld [vmem:[%s11488_s0 + $0xc0] sm:$0xff]  ;;  %v62_v27 = vld [vmem:[%s11488_s0 + $0xd8] sm:$0x7] }
   0xa   :  { %118 = vperm.xlu1 %6603, %v40_v5   ;;  %113 = vperm.xlu0 %6602, %v6694_v6   ;;  %v61_v28 = vld [vmem:[%s11488_s0 + $0xd0] sm:$0xff]  ;;  %v64_v29 = vld [vmem:[%s11488_s0 + $0x108] sm:$0x7]  ;;  %v63_v30 = vld [vmem:[%s11488_s0 + $0x100] sm:$0xff] }
   0xb   :  { %v66_v31 = vld [vmem:[%s11488_s0 + $0x118] sm:$0x7]  ;;  %v6793_v32 = vld [vmem:[%s11488_s0 + $0x110] sm:$0xff]  ;;  %v68_v33 = vld [vmem:[%s11488_s0 + $0x128] sm:$0x7] }
   0xc   :  { %v6802_v34 = vld [vmem:[%s11488_s0 + $0x120] sm:$0xff]  ;;  %v70_v35 = vld [vmem:[%s11488_s0 + $0x138] sm:$0x7]  ;;  %v6811_v36 = vld [vmem:[%s11488_s0 + $0x130] sm:$0xff] }
   0xd   :  { %v72_v37 = vld [vmem:[%s11488_s0 + $0x148] sm:$0x7]  ;;  %v6820_v38 = vld [vmem:[%s11488_s0 + $0x140] sm:$0xff]  ;;  %v74_v39 = vld [vmem:[%s11488_s0 + $0x158] sm:$0x7] }
   0xe   :  { %128 = vperm.xlu1 %6603, %v42_v7   ;;  %123 = vperm.xlu0 %6602, %v6703_v8   ;;  %v6829_v40 = vld [vmem:[%s11488_s0 + $0x150] sm:$0xff]  ;;  %v76_v41 = vld [vmem:[%s11488_s0 + $0x168] sm:$0x7]  ;;  %v75_v42 = vld [vmem:[%s11488_s0 + $0x160] sm:$0xff] }
   0xf   :  { %v78_v43 = vld [vmem:[%s11488_s0 + $0x178] sm:$0x7]  ;;  %v77_v44 = vld [vmem:[%s11488_s0 + $0x170] sm:$0xff]  ;;  %v80_v45 = vld [vmem:[%s11488_s0 + $0x188] sm:$0x7] }
  0x10   :  { %v79_v46 = vld [vmem:[%s11488_s0 + $0x180] sm:$0xff]  ;;  %v82_v47 = vld [vmem:[%s11488_s0 + $0x198] sm:$0x7]  ;;  %v81_v48 = vld [vmem:[%s11488_s0 + $0x190] sm:$0xff] }
  0x11   :  { %v84_v49 = vld [vmem:[%s11488_s0 + $0x1a8] sm:$0x7]  ;;  %v83_v50 = vld [vmem:[%s11488_s0 + $0x1a0] sm:$0xff]  ;;  %v86_v51 = vld [vmem:[%s11488_s0 + $0x1b8] sm:$0x7] }
  0x12   :  { %138 = vperm.xlu1 %6603, %v44_v9   ;;  %133 = vperm.xlu0 %6602, %v6712_v10   ;;  %v85_v52 = vld [vmem:[%s11488_s0 + $0x1b0] sm:$0xff]  ;;  %v88_v53 = vld [vmem:[%s11488_s0 + $0x1c8] sm:$0x7]  ;;  %v87_v54 = vld [vmem:[%s11488_s0 + $0x1c0] sm:$0xff] }
  0x13   :  { %v90_v55 = vld [vmem:[%s11488_s0 + $0x1d8] sm:$0x7]  ;;  %v89_v56 = vld [vmem:[%s11488_s0 + $0x1d0] sm:$0xff]  ;;  %v488_v57 = vld [vmem:[%s11488_s0 + $0x9] sm:$0x7] }
  0x14   :  { %v487_v58 = vld [vmem:[%s11488_s0 + $0x1] sm:$0xff]  ;;  %v490_v59 = vld [vmem:[%s11488_s0 + $0x19] sm:$0x7]  ;;  %v6892_v60 = vld [vmem:[%s11488_s0 + $0x11] sm:$0xff] }
  0x15   :  { %v492_v61 = vld [vmem:[%s11488_s0 + $0x29] sm:$0x7]  ;;  %v6901_v62 = vld [vmem:[%s11488_s0 + $0x21] sm:$0xff]  ;;  %v494_v63 = vld [vmem:[%s11488_s0 + $0x39] sm:$0x7] }
  0x16   :  { %148 = vperm.xlu1 %6603, %v46_v11   ;;  %143 = vperm.xlu0 %6602, %v6721_v12   ;;  %v6910_v0 = vld [vmem:[%s11488_s0 + $0x31] sm:$0xff]  ;;  %v496_v2 = vld [vmem:[%s11488_s0 + $0x49] sm:$0x7]  ;;  %v6919_v3 = vld [vmem:[%s11488_s0 + $0x41] sm:$0xff] }
  0x17   :  { %v498_v7 = vld [vmem:[%s11488_s0 + $0x59] sm:$0x7]  ;;  %v6932_v9 = vld [vmem:[%s11488_s0 + $0x51] sm:$0xff] }
  0x1a   :  { %158 = vperm.xlu1 %6603, %v48_v13   ;;  %153 = vperm.xlu0 %6602, %v6730_v14  }
  0x1e   :  { %168 = vperm.xlu1 %6603, %v50_v15   ;;  %163 = vperm.xlu0 %6602, %v6739_v16   ;;  %v500_v15 = vld [vmem:[%s11488_s0 + $0x69] sm:$0x7] }
  0x22   :  { %178 = vperm.xlu1 %6603, %v52_v17   ;;  %173 = vperm.xlu0 %6602, %v6748_v18   ;;  %v499_v17 = vld [vmem:[%s11488_s0 + $0x61] sm:$0xff] }
  0x26   :  { %188 = vperm.xlu1 %6603, %v54_v19   ;;  %183 = vperm.xlu0 %6602, %v53_v20  }
  0x2a   :  { %198 = vperm.xlu1 %6603, %v56_v21   ;;  %193 = vperm.xlu0 %6602, %v55_v22   ;;  %v502_v21 = vld [vmem:[%s11488_s0 + $0x79] sm:$0x7]  ;;  %v501_v22 = vld [vmem:[%s11488_s0 + $0x71] sm:$0xff] }
  0x2e   :  { %208 = vperm.xlu1 %6603, %v58_v23   ;;  %203 = vperm.xlu0 %6602, %v57_v24  }
  0x32   :  { %218 = vperm.xlu1 %6603, %v60_v25   ;;  %213 = vperm.xlu0 %6602, %v59_v26   ;;  %v504_v25 = vld [vmem:[%s11488_s0 + $0x89] sm:$0x7]  ;;  %v503_v26 = vld [vmem:[%s11488_s0 + $0x81] sm:$0xff] }
  0x36   :  { %228 = vperm.xlu1 %6603, %v62_v27   ;;  %223 = vperm.xlu0 %6602, %v61_v28  }
  0x3a   :  { %238 = vperm.xlu1 %6603, %v64_v29   ;;  %233 = vperm.xlu0 %6602, %v63_v30   ;;  %v506_v29 = vld [vmem:[%s11488_s0 + $0x99] sm:$0x7]  ;;  %v505_v30 = vld [vmem:[%s11488_s0 + $0x91] sm:$0xff] }
  0x3e   :  { %248 = vperm.xlu1 %6603, %v66_v31   ;;  %243 = vperm.xlu0 %6602, %v6793_v32  }
  0x42   :  { %258 = vperm.xlu1 %6603, %v68_v33   ;;  %253 = vperm.xlu0 %6602, %v6802_v34  }
  0x46   :  { %268 = vperm.xlu1 %6603, %v70_v35   ;;  %263 = vperm.xlu0 %6602, %v6811_v36   ;;  %v508_v35 = vld [vmem:[%s11488_s0 + $0xa9] sm:$0x7] }
  0x4a   :  { %278 = vperm.xlu1 %6603, %v72_v37   ;;  %273 = vperm.xlu0 %6602, %v6820_v38   ;;  %v507_v37 = vld [vmem:[%s11488_s0 + $0xa1] sm:$0xff] }
  0x4e   :  { %288 = vperm.xlu1 %6603, %v74_v39   ;;  %283 = vperm.xlu0 %6602, %v6829_v40  }
  0x52   :  { %298 = vperm.xlu1 %6603, %v76_v41   ;;  %293 = vperm.xlu0 %6602, %v75_v42   ;;  %v510_v42 = vld [vmem:[%s11488_s0 + $0xb9] sm:$0x7] }
  0x56   :  { %308 = vperm.xlu1 %6603, %v78_v43   ;;  %303 = vperm.xlu0 %6602, %v77_v44   ;;  %v509_v43 = vld [vmem:[%s11488_s0 + $0xb1] sm:$0xff] }
  0x5a   :  { %318 = vperm.xlu1 %6603, %v80_v45   ;;  %313 = vperm.xlu0 %6602, %v79_v46   ;;  %v512_v46 = vld [vmem:[%s11488_s0 + $0xc9] sm:$0x7] }
  0x5e   :  { %328 = vperm.xlu1 %6603, %v82_v47   ;;  %323 = vperm.xlu0 %6602, %v81_v48   ;;  %v511_v47 = vld [vmem:[%s11488_s0 + $0xc1] sm:$0xff] }
  0x62   :  { %338 = vperm.xlu1 %6603, %v84_v49   ;;  %333 = vperm.xlu0 %6602, %v83_v50   ;;  %v514_v50 = vld [vmem:[%s11488_s0 + $0xd9] sm:$0x7] }
  0x66   :  { %348 = vperm.xlu1 %6603, %v86_v51   ;;  %343 = vperm.xlu0 %6602, %v85_v52   ;;  %v513_v51 = vld [vmem:[%s11488_s0 + $0xd1] sm:$0xff] }
  0x6a   :  { %358 = vperm.xlu1 %6603, %v88_v53   ;;  %353 = vperm.xlu0 %6602, %v87_v54   ;;  %v516_v54 = vld [vmem:[%s11488_s0 + $0x109] sm:$0x7] }
  0x6e   :  { %368 = vperm.xlu1 %6603, %v90_v55   ;;  %363 = vperm.xlu0 %6602, %v89_v56   ;;  %v515_v55 = vld [vmem:[%s11488_s0 + $0x101] sm:$0xff] }
  0x72   :  { %550 = vperm.xlu1 %6603, %v488_v57   ;;  %545 = vperm.xlu0 %6602, %v487_v58   ;;  %v518_v58 = vld [vmem:[%s11488_s0 + $0x119] sm:$0x7] }
  0x76   :  { %560 = vperm.xlu1 %6603, %v490_v59   ;;  %555 = vperm.xlu0 %6602, %v6892_v60   ;;  %v7035_v59 = vld [vmem:[%s11488_s0 + $0x111] sm:$0xff] }
  0x7a   :  { %570 = vperm.xlu1 %6603, %v492_v61   ;;  %565 = vperm.xlu0 %6602, %v6901_v62  }
  0x7e   :  { %580 = vperm.xlu1 %6603, %v494_v63   ;;  %575 = vperm.xlu0 %6602, %v6910_v0  }
  0x81   :  { %v6921_v4 = vpop.permute.xlu1 %103  ;;  %v6923_v5 = vpop.permute.xlu0 %93 }
  0x82   :  { %590 = vperm.xlu1 %6603, %v496_v2   ;;  %585 = vperm.xlu0 %6602, %v6919_v3   ;;  %v520_v2 = vld [vmem:[%s11488_s0 + $0x129] sm:$0x7] }
  0x85   :  { %v6934_v11 = vpop.permute.xlu1 %108  ;;  %v6936_v13 = vpop.permute.xlu0 %98 }
  0x86   :  { %600 = vperm.xlu1 %6603, %v498_v7   ;;  %595 = vperm.xlu0 %6602, %v6932_v9   ;;  %v7048_v7 = vld [vmem:[%s11488_s0 + $0x121] sm:$0xff] }
  0x89   :  { %v6945_v19 = vpop.permute.xlu1 %118  ;;  %v6947_v20 = vpop.permute.xlu0 %113 }
  0x8a   :  { %610 = vperm.xlu1 %6603, %v500_v15   ;;  %605 = vperm.xlu0 %6602, %v499_v17  }
  0x8d   :  { %v6955_v23 = vpop.permute.xlu1 %128  ;;  %v6957_v24 = vpop.permute.xlu0 %123 }
  0x8e   :  { %620 = vperm.xlu1 %6603, %v502_v21   ;;  %615 = vperm.xlu0 %6602, %v501_v22   ;;  %v522_v21 = vld [vmem:[%s11488_s0 + $0x139] sm:$0x7]  ;;  %v7061_v22 = vld [vmem:[%s11488_s0 + $0x131] sm:$0xff] }
  0x91   :  { %v6965_v27 = vpop.permute.xlu1 %138  ;;  %v6967_v28 = vpop.permute.xlu0 %133 }
  0x92   :  { %630 = vperm.xlu1 %6603, %v504_v25   ;;  %625 = vperm.xlu0 %6602, %v503_v26  }
  0x95   :  { %v6975_v31 = vpop.permute.xlu1 %148  ;;  %v6977_v33 = vpop.permute.xlu0 %143 }
  0x96   :  { %640 = vperm.xlu1 %6603, %v506_v29   ;;  %635 = vperm.xlu0 %6602, %v505_v30   ;;  %v524_v29 = vld [vmem:[%s11488_s0 + $0x149] sm:$0x7]  ;;  %v7074_v30 = vld [vmem:[%s11488_s0 + $0x141] sm:$0xff] }
  0x99   :  { %v6985_v39 = vpop.permute.xlu1 %158  ;;  %v6987_v41 = vpop.permute.xlu0 %153 }
  0x9a   :  { %650 = vperm.xlu1 %6603, %v508_v35   ;;  %645 = vperm.xlu0 %6602, %v507_v37  }
  0x9d   :  { %v6995_v44 = vpop.permute.xlu1 %168  ;;  %v6997_v45 = vpop.permute.xlu0 %163 }
  0x9e   :  { %660 = vperm.xlu1 %6603, %v510_v42   ;;  %655 = vperm.xlu0 %6602, %v509_v43   ;;  %v526_v42 = vld [vmem:[%s11488_s0 + $0x159] sm:$0x7]  ;;  %v7087_v43 = vld [vmem:[%s11488_s0 + $0x151] sm:$0xff] }
  0xa1   :  { %v7005_v48 = vpop.permute.xlu1 %178  ;;  %v7007_v49 = vpop.permute.xlu0 %173 }
  0xa2   :  { %670 = vperm.xlu1 %6603, %v512_v46   ;;  %665 = vperm.xlu0 %6602, %v511_v47  }
  0xa5   :  { %v7015_v52 = vpop.permute.xlu1 %188  ;;  %v7017_v53 = vpop.permute.xlu0 %183 }
  0xa6   :  { %680 = vperm.xlu1 %6603, %v514_v50   ;;  %675 = vperm.xlu0 %6602, %v513_v51   ;;  %v528_v50 = vld [vmem:[%s11488_s0 + $0x169] sm:$0x7]  ;;  %v7100_v51 = vld [vmem:[%s11488_s0 + $0x161] sm:$0xff] }
  0xa9   :  { %v7025_v56 = vpop.permute.xlu1 %198  ;;  %v7027_v57 = vpop.permute.xlu0 %193 }
  0xaa   :  { %690 = vperm.xlu1 %6603, %v516_v54   ;;  %685 = vperm.xlu0 %6602, %v515_v55  }
  0xad   :  { %v7037_v61 = vpop.permute.xlu1 %208  ;;  %v7039_v63 = vpop.permute.xlu0 %203 }
  0xae   :  { %700 = vperm.xlu1 %6603, %v518_v58   ;;  %695 = vperm.xlu0 %6602, %v7035_v59   ;;  %v530_v58 = vld [vmem:[%s11488_s0 + $0x179] sm:$0x7] }
  0xb1   :  { %v7050_v15 = vpop.permute.xlu1 %218  ;;  %v7052_v17 = vpop.permute.xlu0 %213 }
  0xb2   :  { %710 = vperm.xlu1 %6603, %v520_v2   ;;  %705 = vperm.xlu0 %6602, %v7048_v7   ;;  %v529_v2 = vld [vmem:[%s11488_s0 + $0x171] sm:$0xff] }
  0xb5   :  { %v7063_v25 = vpop.permute.xlu1 %228  ;;  %v7065_v26 = vpop.permute.xlu0 %223 }
  0xb6   :  { %720 = vperm.xlu1 %6603, %v522_v21   ;;  %715 = vperm.xlu0 %6602, %v7061_v22  }
  0xb9   :  { %v7076_v35 = vpop.permute.xlu1 %238  ;;  %v7078_v37 = vpop.permute.xlu0 %233 }
  0xba   :  { %730 = vperm.xlu1 %6603, %v524_v29   ;;  %725 = vperm.xlu0 %6602, %v7074_v30  }
  0xbd   :  { %v7089_v46 = vpop.permute.xlu1 %248  ;;  %v7091_v47 = vpop.permute.xlu0 %243 }
  0xbe   :  { %740 = vperm.xlu1 %6603, %v526_v42   ;;  %735 = vperm.xlu0 %6602, %v7087_v43   ;;  %v532_v42 = vld [vmem:[%s11488_s0 + $0x189] sm:$0x7] }
  0xc1   :  { %v7102_v54 = vpop.permute.xlu1 %258  ;;  %v7104_v55 = vpop.permute.xlu0 %253 }
  0xc2   :  { %11558 = vst [vmem:[#allocation3_spill] sm:$0xff] %v7102_v54  ;;  %11559 = vst [vmem:[#allocation4_spill] sm:$0xff] %v7104_v55  ;;  %750 = vperm.xlu1 %6603, %v528_v50   ;;  %745 = vperm.xlu0 %6602, %v7100_v51   ;;  %v531_v50 = vld [vmem:[%s11488_s0 + $0x181] sm:$0xff] }
  0xc5   :  { %v7113_v21 = vpop.permute.xlu1 %268  ;;  %v7115_v29 = vpop.permute.xlu0 %263 }
  0xc6   :  { %11560 = vst [vmem:[#allocation5_spill] sm:$0xff] %v7113_v21  ;;  %11561 = vst [vmem:[#allocation6_spill] sm:$0xff] %v7115_v29  ;;  %760 = vperm.xlu1 %6603, %v530_v58   ;;  %755 = vperm.xlu0 %6602, %v529_v2   ;;  %v534_v29 = vld [vmem:[%s11488_s0 + $0x199] sm:$0x7]  ;;  %v533_v58 = vld [vmem:[%s11488_s0 + $0x191] sm:$0xff] }
  0xc9   :  { %v7123_v55 = vpop.permute.xlu1 %278  ;;  %v7125_v54 = vpop.permute.xlu0 %273 }
  0xca   :  { %11562 = vst [vmem:[#allocation7_spill] sm:$0xff] %v7123_v55  ;;  %11563 = vst [vmem:[#allocation8_spill] sm:$0xff] %v7125_v54  ;;  %770 = vperm.xlu1 %6603, %v532_v42   ;;  %765 = vperm.xlu0 %6602, %v531_v50   ;;  %v536_v54 = vld [vmem:[%s11488_s0 + $0x1a9] sm:$0x7]  ;;  %v535_v42 = vld [vmem:[%s11488_s0 + $0x1a1] sm:$0xff] }
  0xcd   :  { %v7133_v2 = vpop.permute.xlu1 %288  ;;  %v7135_v21 = vpop.permute.xlu0 %283 }
  0xce   :  { %11564 = vst [vmem:[#allocation9_spill] sm:$0xff] %v7133_v2  ;;  %11565 = vst [vmem:[#allocation10_spill] sm:$0xff] %v7135_v21  ;;  %780 = vperm.xlu1 %6603, %v534_v29   ;;  %775 = vperm.xlu0 %6602, %v533_v58   ;;  %v538_v21 = vld [vmem:[%s11488_s0 + $0x1b9] sm:$0x7]  ;;  %v537_v29 = vld [vmem:[%s11488_s0 + $0x1b1] sm:$0xff] }
  0xd1   :  { %v7143_v50 = vpop.permute.xlu1 %298  ;;  %v7145_v55 = vpop.permute.xlu0 %293 }
  0xd2   :  { %11566 = vst [vmem:[#allocation11_spill] sm:$0xff] %v7143_v50  ;;  %11567 = vst [vmem:[#allocation12_spill] sm:$0xff] %v7145_v55  ;;  %790 = vperm.xlu1 %6603, %v536_v54   ;;  %785 = vperm.xlu0 %6602, %v535_v42   ;;  %v540_v55 = vld [vmem:[%s11488_s0 + $0x1c9] sm:$0x7]  ;;  %v539_v54 = vld [vmem:[%s11488_s0 + $0x1c1] sm:$0xff] }
  0xd5   :  { %v7153_v58 = vpop.permute.xlu1 %308  ;;  %v7155_v2 = vpop.permute.xlu0 %303 }
  0xd6   :  { %11568 = vst [vmem:[#allocation13_spill] sm:$0xff] %v7153_v58  ;;  %11569 = vst [vmem:[#allocation14_spill] sm:$0xff] %v7155_v2  ;;  %800 = vperm.xlu1 %6603, %v538_v21   ;;  %795 = vperm.xlu0 %6602, %v537_v29   ;;  %v542_v2 = vld [vmem:[%s11488_s0 + $0x1d9] sm:$0x7]  ;;  %v541_v21 = vld [vmem:[%s11488_s0 + $0x1d1] sm:$0xff] }
  0xd9   :  { %v7163_v42 = vpop.permute.xlu1 %318  ;;  %v7165_v50 = vpop.permute.xlu0 %313 }
  0xda   :  { %11570 = vst [vmem:[#allocation15_spill] sm:$0xff] %v7163_v42  ;;  %11571 = vst [vmem:[#allocation16_spill] sm:$0xff] %v7165_v50  ;;  %810 = vperm.xlu1 %6603, %v540_v55   ;;  %805 = vperm.xlu0 %6602, %v539_v54   ;;  %v5620_v50 = vld [vmem:[%s11488_s0 + $0x18] sm:$0x7]  ;;  %v5622_v42 = vld [vmem:[%s11488_s0 + $0x28] sm:$0x7] }
  0xdd   :  { %v7173_v29 = vpop.permute.xlu1 %328  ;;  %v7175_v58 = vpop.permute.xlu0 %323 }
  0xde   :  { %11572 = vst [vmem:[#allocation17_spill] sm:$0xff] %v7173_v29  ;;  %11573 = vst [vmem:[#allocation18_spill] sm:$0xff] %v7175_v58  ;;  %820 = vperm.xlu1 %6603, %v542_v2   ;;  %815 = vperm.xlu0 %6602, %v541_v21   ;;  %v5624_v2 = vld [vmem:[%s11488_s0 + $0x38] sm:$0x7] }
  0xe1   :  { %v7180_v55 = vpop.permute.xlu1 %338  ;;  %v7182_v54 = vpop.permute.xlu0 %333 }
  0xe2   :  { %11574 = vst [vmem:[#allocation19_spill] sm:$0xff] %v7182_v54  ;;  %1003 = vperm.xlu1 %6603, %v5620_v50   ;;  %998 = vperm.xlu0 %6602, %v6676_v1   ;;  %v5626_v1 = vld [vmem:[%s11488_s0 + $0x48] sm:$0x7] }
  0xe5   :  { %v7188_v29 = vpop.permute.xlu1 %348  ;;  %v7190_v58 = vpop.permute.xlu0 %343 }
  0xe6   :  { %11575 = vst [vmem:[#allocation20_spill] sm:$0xff] %v7188_v29  ;;  %11576 = vst [vmem:[#allocation21_spill] sm:$0xff] %v7190_v58  ;;  %1013 = vperm.xlu1 %6603, %v5622_v42   ;;  %1008 = vperm.xlu0 %6602, %v6694_v6  }
  0xe9   :  { %v7196_v21 = vpop.permute.xlu1 %358  ;;  %v7198_v50 = vpop.permute.xlu0 %353 }
  0xea   :  { %11577 = vst [vmem:[#allocation22_spill] sm:$0xff] %v7196_v21  ;;  %11578 = vst [vmem:[#allocation23_spill] sm:$0xff] %v7198_v50  ;;  %1023 = vperm.xlu1 %6603, %v5624_v2   ;;  %1018 = vperm.xlu0 %6602, %v6703_v8   ;;  %v5628_v21 = vld [vmem:[%s11488_s0 + $0x58] sm:$0x7] }
  0xed   :  { %v7204_v29 = vpop.permute.xlu1 %368  ;;  %v7206_v42 = vpop.permute.xlu0 %363 }
  0xee   :  { %11579 = vst [vmem:[#allocation24_spill] sm:$0xff] %v7204_v29  ;;  %11580 = vst [vmem:[#allocation25_spill] sm:$0xff] %v7206_v42  ;;  %1033 = vperm.xlu1 %6603, %v5626_v1   ;;  %1028 = vperm.xlu0 %6602, %v6712_v10   ;;  %v5630_v29 = vld [vmem:[%s11488_s0 + $0x68] sm:$0x7]  ;;  %v5632_v10 = vld [vmem:[%s11488_s0 + $0x78] sm:$0x7] }
  0xf1   :  { %v7212_v58 = vpop.permute.xlu1 %550  ;;  %v7214_v2 = vpop.permute.xlu0 %545 }
  0xf2   :  { %1043 = vperm.xlu1 %6603, %v5628_v21   ;;  %1038 = vperm.xlu0 %6602, %v6721_v12  }
  0xf5   :  { %v7220_v50 = vpop.permute.xlu1 %560  ;;  %v7222_v1 = vpop.permute.xlu0 %555 }
  0xf6   :  { %1053 = vperm.xlu1 %6603, %v5630_v29   ;;  %1048 = vperm.xlu0 %6602, %v6730_v14   ;;  %v5648_v14 = vld [vmem:[%s11488_s0 + $0x118] sm:$0x7] }
  0xf9   :  { %v7228_v42 = vpop.permute.xlu1 %570  ;;  %v7230_v21 = vpop.permute.xlu0 %565 }
  0xfa   :  { %11581 = vst [vmem:[#allocation26_spill] sm:$0xff] %v7228_v42  ;;  %1063 = vperm.xlu1 %6603, %v5632_v10   ;;  %1058 = vperm.xlu0 %6602, %v6739_v16   ;;  %v5650_v16 = vld [vmem:[%s11488_s0 + $0x128] sm:$0x7] }
  0xfd   :  { %v7233_v12 = vpop.permute.xlu1 %580  ;;  %v7235_v54 = vpop.permute.xlu0 %575 }
  0xfe   :  { %1138 = vperm.xlu1 %6603, %v6793_v32   ;;  %1068 = vperm.xlu0 %6602, %v6748_v18   ;;  %v5652_v18 = vld [vmem:[%s11488_s0 + $0x138] sm:$0x7] }
 0x101   :  { %v7242_v29 = vpop.permute.xlu1 %590  ;;  %v7244_v42 = vpop.permute.xlu0 %585 }
 0x102   :  { %11582 = vst [vmem:[#allocation27_spill] sm:$0xff] %v7242_v29  ;;  %11583 = vst [vmem:[#allocation28_spill] sm:$0xff] %v7244_v42  ;;  %1148 = vperm.xlu1 %6603, %v6802_v34   ;;  %1143 = vperm.xlu0 %6602, %v5648_v14   ;;  %v5676_v14 = vld [vmem:[%s11488_s0 + $0x19] sm:$0x7] }
 0x105   :  { %v7250_v10 = vpop.permute.xlu1 %600  ;;  %v7252_v32 = vpop.permute.xlu0 %595 }
 0x106   :  { %11584 = vst [vmem:[#allocation29_spill] sm:$0xff] %v7250_v10  ;;  %11585 = vst [vmem:[#allocation30_spill] sm:$0xff] %v7252_v32  ;;  %1158 = vperm.xlu1 %6603, %v6811_v36   ;;  %1153 = vperm.xlu0 %6602, %v5650_v16   ;;  %v5678_v16 = vld [vmem:[%s11488_s0 + $0x29] sm:$0x7] }
 0x109   :  { %v7258_v29 = vpop.permute.xlu1 %610  ;;  %v7260_v42 = vpop.permute.xlu0 %605 }
 0x10a   :  { %11586 = vst [vmem:[#allocation31_spill] sm:$0xff] %v7258_v29  ;;  %11587 = vst [vmem:[#allocation32_spill] sm:$0xff] %v7260_v42  ;;  %1450 = vperm.xlu1 %6603, %v6892_v60   ;;  %1163 = vperm.xlu0 %6602, %v5652_v18   ;;  %v5704_v60 = vld [vmem:[%s11488_s0 + $0x119] sm:$0x7] }
 0x10d   :  { %v7266_v10 = vpop.permute.xlu1 %620  ;;  %v7268_v32 = vpop.permute.xlu0 %615 }
 0x10e   :  { %11588 = vst [vmem:[#allocation33_spill] sm:$0xff] %v7268_v32  ;;  %1460 = vperm.xlu1 %6603, %v6901_v62   ;;  %1455 = vperm.xlu0 %6602, %v5676_v14   ;;  %v5706_v14 = vld [vmem:[%s11488_s0 + $0x129] sm:$0x7] }
 0x111   :  { %v7274_v29 = vpop.permute.xlu1 %630  ;;  %v7276_v42 = vpop.permute.xlu0 %625 }
 0x112   :  { %11589 = vst [vmem:[#allocation34_spill] sm:$0xff] %v7274_v29  ;;  %11590 = vst [vmem:[#allocation35_spill] sm:$0xff] %v7276_v42  ;;  %1590 = vperm.xlu1 %6603, %v7035_v59   ;;  %1465 = vperm.xlu0 %6602, %v5678_v16   ;;  %v5654_v59 = vld [vmem:[%s11488_s0 + $0x148] sm:$0x7] }
 0x115   :  { %v7282_v18 = vpop.permute.xlu1 %640  ;;  %v7284_v32 = vpop.permute.xlu0 %635 }
 0x116   :  { %11591 = vst [vmem:[#allocation36_spill] sm:$0xff] %v7284_v32  ;;  %1600 = vperm.xlu1 %6603, %v7048_v7   ;;  %1595 = vperm.xlu0 %6602, %v5704_v60   ;;  %v5680_v60 = vld [vmem:[%s11488_s0 + $0x39] sm:$0x7] }
 0x119   :  { %v7290_v29 = vpop.permute.xlu1 %650  ;;  %v7292_v42 = vpop.permute.xlu0 %645 }
 0x11a   :  { %11592 = vst [vmem:[#allocation37_spill] sm:$0xff] %v7290_v29  ;;  %11593 = vst [vmem:[#allocation38_spill] sm:$0xff] %v7292_v42  ;;  %1168 = vperm.xlu1 %6603, %v6820_v38   ;;  %1605 = vperm.xlu0 %6602, %v5706_v14   ;;  %v5708_v14 = vld [vmem:[%s11488_s0 + $0x139] sm:$0x7] }
 0x11d   :  { %v7298_v16 = vpop.permute.xlu1 %660  ;;  %v7300_v32 = vpop.permute.xlu0 %655 }
 0x11e   :  { %11594 = vst [vmem:[#allocation39_spill] sm:$0xff] %v7298_v16  ;;  %11595 = vst [vmem:[#allocation40_spill] sm:$0xff] %v7300_v32  ;;  %1470 = vperm.xlu1 %6603, %v6910_v0   ;;  %1173 = vperm.xlu0 %6602, %v5654_v59   ;;  %v5732_v59 = vld [vmem:[%s11488_s0 + $0x28] sm:$0x7] }
 0x121   :  { %v7306_v29 = vpop.permute.xlu1 %670  ;;  %v7308_v42 = vpop.permute.xlu0 %665 }
 0x122   :  { %11596 = vst [vmem:[#allocation41_spill] sm:$0xff] %v7306_v29  ;;  %11597 = vst [vmem:[#allocation42_spill] sm:$0xff] %v7308_v42  ;;  %1610 = vperm.xlu1 %6603, %v7061_v22   ;;  %1475 = vperm.xlu0 %6602, %v5680_v60   ;;  %v5734_v60 = vld [vmem:[%s11488_s0 + $0x38] sm:$0x7] }
 0x125   :  { %v7314_v16 = vpop.permute.xlu1 %680  ;;  %v7316_v32 = vpop.permute.xlu0 %675 }
 0x126   :  { %11598 = vst [vmem:[#allocation43_spill] sm:$0xff] %v7314_v16  ;;  %11599 = vst [vmem:[#allocation44_spill] sm:$0xff] %v7316_v32  ;;  %1903 = vperm.xlu1 %6603, %v6694_v6   ;;  %1615 = vperm.xlu0 %6602, %v5708_v14   ;;  %v5760_v6 = vld [vmem:[%s11488_s0 + $0x128] sm:$0x7] }
 0x129   :  { %v7322_v29 = vpop.permute.xlu1 %690  ;;  %v7324_v42 = vpop.permute.xlu0 %685 }
 0x12a   :  { %11600 = vst [vmem:[#allocation45_spill] sm:$0xff] %v7324_v42  ;;  %1913 = vperm.xlu1 %6603, %v6703_v8   ;;  %1908 = vperm.xlu0 %6602, %v5732_v59   ;;  %v5762_v8 = vld [vmem:[%s11488_s0 + $0x138] sm:$0x7] }
 0x12d   :  { %v7330_v16 = vpop.permute.xlu1 %700  ;;  %v7332_v32 = vpop.permute.xlu0 %695 }
 0x12e   :  { %11601 = vst [vmem:[#allocation46_spill] sm:$0xff] %v7332_v32  ;;  %2043 = vperm.xlu1 %6603, %v6802_v34   ;;  %1918 = vperm.xlu0 %6602, %v5734_v60   ;;  %v5656_v34 = vld [vmem:[%s11488_s0 + $0x158] sm:$0x7] }
 0x131   :  { %v7338_v14 = vpop.permute.xlu1 %710  ;;  %v7340_v42 = vpop.permute.xlu0 %705 }
 0x132   :  { %11602 = vst [vmem:[#allocation47_spill] sm:$0xff] %v7340_v42  ;;  %2053 = vperm.xlu1 %6603, %v6811_v36   ;;  %2048 = vperm.xlu0 %6602, %v5760_v6   ;;  %v5682_v36 = vld [vmem:[%s11488_s0 + $0x49] sm:$0x7] }
 0x135   :  { %v7346_v59 = vpop.permute.xlu1 %720  ;;  %v7348_v32 = vpop.permute.xlu0 %715 }
 0x136   :  { %11603 = vst [vmem:[#allocation48_spill] sm:$0xff] %v7348_v32  ;;  %1178 = vperm.xlu1 %6603, %v6829_v40   ;;  %2058 = vperm.xlu0 %6602, %v5762_v8   ;;  %v5735_v40 = vld [vmem:[%s11488_s0 + $0x40] sm:$0xff] }
 0x139   :  { %v7354_v60 = vpop.permute.xlu1 %730  ;;  %v7356_v42 = vpop.permute.xlu0 %725 }
 0x13a   :  { %11604 = vst [vmem:[#allocation49_spill] sm:$0xff] %v7354_v60  ;;  %11605 = vst [vmem:[#allocation50_spill] sm:$0xff] %v7356_v42  ;;  %1480 = vperm.xlu1 %6603, %v6919_v3   ;;  %1183 = vperm.xlu0 %6602, %v5656_v34   ;;  %v5710_v3 = vld [vmem:[%s11488_s0 + $0x149] sm:$0x7]  ;;  %v11732_v60 = vld [vmem:[#allocation5_spill] sm:$0xff] }
 0x13b   :  { %v5764_v42 = vld [vmem:[%s11488_s0 + $0x148] sm:$0x7] }
 0x13d   :  { %v7362_v6 = vpop.permute.xlu1 %740  ;;  %v7364_v32 = vpop.permute.xlu0 %735 }
 0x13e   :  { %11606 = vst [vmem:[#allocation51_spill] sm:$0xff] %v7362_v6  ;;  %11607 = vst [vmem:[#allocation52_spill] sm:$0xff] %v7364_v32  ;;  %1620 = vperm.xlu1 %6603, %v7074_v30   ;;  %1485 = vperm.xlu0 %6602, %v5682_v36   ;;  %v5736_v32 = vld [vmem:[%s11488_s0 + $0x48] sm:$0x7] }
 0x141   :  { %v7373_v8 = vpop.permute.xlu1 %750  ;;  %v7375_v34 = vpop.permute.xlu0 %745 }
 0x142   :  { %11608 = vst [vmem:[#allocation53_spill] sm:$0xff] %v7373_v8  ;;  %11609 = vst [vmem:[#allocation54_spill] sm:$0xff] %v7375_v34  ;;  %1923 = vperm.xlu1 %6603, %v5735_v40   ;;  %1625 = vperm.xlu0 %6602, %v5710_v3   ;;  %v5788_v40 = vld [vmem:[%s11488_s0 + $0x29] sm:$0x7] }
 0x145   :  { %v7380_v6 = vpop.permute.xlu1 %760  ;;  %v7382_v36 = vpop.permute.xlu0 %755 }
 0x146   :  { %11610 = vst [vmem:[#allocation55_spill] sm:$0xff] %v7380_v6  ;;  %11611 = vst [vmem:[#allocation56_spill] sm:$0xff] %v7382_v36  ;;  %2063 = vperm.xlu1 %6603, %v6820_v38   ;;  %1928 = vperm.xlu0 %6602, %v5736_v32   ;;  %v5790_v38 = vld [vmem:[%s11488_s0 + $0x39] sm:$0x7]  ;;  %v11730_v6 = vld [vmem:[#allocation4_spill] sm:$0xff] }
 0x149   :  { %v7388_v8 = vpop.permute.xlu1 %770  ;;  %v7390_v34 = vpop.permute.xlu0 %765 }
 0x14a   :  { %11612 = vst [vmem:[#allocation57_spill] sm:$0xff] %v7388_v8  ;;  %11613 = vst [vmem:[#allocation58_spill] sm:$0xff] %v7390_v34  ;;  %2355 = vperm.xlu1 %6603, %v6901_v62   ;;  %2068 = vperm.xlu0 %6602, %v5764_v42   ;;  %v5816_v62 = vld [vmem:[%s11488_s0 + $0x129] sm:$0x7] }
 0x14d   :  { %v7396_v3 = vpop.permute.xlu1 %780  ;;  %v7398_v36 = vpop.permute.xlu0 %775 }
 0x14e   :  { %11614 = vst [vmem:[#allocation59_spill] sm:$0xff] %v7396_v3  ;;  %11615 = vst [vmem:[#allocation60_spill] sm:$0xff] %v7398_v36  ;;  %2365 = vperm.xlu1 %6603, %v6910_v0   ;;  %2360 = vperm.xlu0 %6602, %v5788_v40   ;;  %v7420_v0 = vld [vmem:[%s11488_s0 + $0x160] sm:$0xff]  ;;  %v5798_v3 = vld [vmem:[%s11488_s0 + $0x79] sm:$0x7] }
 0x151   :  { %v7404_v32 = vpop.permute.xlu1 %790  ;;  %v7406_v34 = vpop.permute.xlu0 %785 }
 0x152   :  { %11616 = vst [vmem:[#allocation61_spill] sm:$0xff] %v7404_v32  ;;  %11617 = vst [vmem:[#allocation62_spill] sm:$0xff] %v7406_v34  ;;  %2495 = vperm.xlu1 %6603, %v7048_v7   ;;  %2370 = vperm.xlu0 %6602, %v5790_v38   ;;  %v5818_v7 = vld [vmem:[%s11488_s0 + $0x139] sm:$0x7]  ;;  %v5796_v34 = vld [vmem:[%s11488_s0 + $0x69] sm:$0x7] }
 0x155   :  { %v7412_v42 = vpop.permute.xlu1 %800  ;;  %v7414_v36 = vpop.permute.xlu0 %795 }
 0x156   :  { %11618 = vst [vmem:[#allocation63_spill] sm:$0xff] %v7412_v42  ;;  %11619 = vst [vmem:[#allocation64_spill] sm:$0xff] %v7414_v36  ;;  %2505 = vperm.xlu1 %6603, %v7061_v22   ;;  %2500 = vperm.xlu0 %6602, %v5816_v62   ;;  %v5658_v22 = vld [vmem:[%s11488_s0 + $0x168] sm:$0x7] }
 0x159   :  { %v7425_v40 = vpop.permute.xlu1 %810  ;;  %v7427_v38 = vpop.permute.xlu0 %805 }
 0x15a   :  { %11620 = vst [vmem:[#allocation65_spill] sm:$0xff] %v7425_v40  ;;  %11621 = vst [vmem:[#allocation66_spill] sm:$0xff] %v7427_v38  ;;  %1188 = vperm.xlu1 %6603, %v7420_v0   ;;  %2510 = vperm.xlu0 %6602, %v5818_v7   ;;  %v5684_v40 = vld [vmem:[%s11488_s0 + $0x59] sm:$0x7]  ;;  %v5737_v7 = vld [vmem:[%s11488_s0 + $0x50] sm:$0xff] }
 0x15d   :  { %v7433_v62 = vpop.permute.xlu1 %820  ;;  %v7435_v36 = vpop.permute.xlu0 %815 }
 0x15e   :  { %11622 = vst [vmem:[#allocation67_spill] sm:$0xff] %v7433_v62  ;;  %11623 = vst [vmem:[#allocation68_spill] sm:$0xff] %v7435_v36  ;;  %1490 = vperm.xlu1 %6603, %v6932_v9   ;;  %1193 = vperm.xlu0 %6602, %v5658_v22   ;;  %v5712_v9 = vld [vmem:[%s11488_s0 + $0x159] sm:$0x7] }
 0x161   :  { %v7441_v42 = vpop.permute.xlu1 %1003  ;;  %v7443_v38 = vpop.permute.xlu0 %998 }
 0x162   :  { %11624 = vst [vmem:[#allocation69_spill] sm:$0xff] %v7441_v42  ;;  %11625 = vst [vmem:[#allocation70_spill] sm:$0xff] %v7443_v38  ;;  %1630 = vperm.xlu1 %6603, %v7087_v43   ;;  %1495 = vperm.xlu0 %6602, %v5684_v40   ;;  %v5765_v38 = vld [vmem:[%s11488_s0 + $0x150] sm:$0xff]  ;;  %v5738_v40 = vld [vmem:[%s11488_s0 + $0x58] sm:$0x7] }
 0x165   :  { %v7452_v22 = vpop.permute.xlu1 %1013  ;;  %v7454_v36 = vpop.permute.xlu0 %1008 }
 0x166   :  { %11626 = vst [vmem:[#allocation71_spill] sm:$0xff] %v7452_v22  ;;  %11627 = vst [vmem:[#allocation72_spill] sm:$0xff] %v7454_v36  ;;  %1933 = vperm.xlu1 %6603, %v5737_v7   ;;  %1635 = vperm.xlu0 %6602, %v5712_v9   ;;  %v5791_v36 = vld [vmem:[%s11488_s0 + $0x41] sm:$0xff]  ;;  %v5766_v7 = vld [vmem:[%s11488_s0 + $0x158] sm:$0x7] }
 0x169   :  { %v7462_v42 = vpop.permute.xlu1 %1023  ;;  %v7464_v62 = vpop.permute.xlu0 %1018 }
 0x16a   :  { %11628 = vst [vmem:[#allocation73_spill] sm:$0xff] %v7462_v42  ;;  %11629 = vst [vmem:[#allocation74_spill] sm:$0xff] %v7464_v62  ;;  %2073 = vperm.xlu1 %6603, %v5765_v38   ;;  %1938 = vperm.xlu0 %6602, %v5738_v40   ;;  %v5792_v62 = vld [vmem:[%s11488_s0 + $0x49] sm:$0x7]  ;;  %v7487_v42 = vld [vmem:[%s11488_s0 + $0x170] sm:$0xff] }
 0x16d   :  { %v7472_v9 = vpop.permute.xlu1 %1033  ;;  %v7474_v22 = vpop.permute.xlu0 %1028 }
 0x16e   :  { %11630 = vst [vmem:[#allocation75_spill] sm:$0xff] %v7472_v9  ;;  %11631 = vst [vmem:[#allocation76_spill] sm:$0xff] %v7474_v22  ;;  %2375 = vperm.xlu1 %6603, %v5791_v36   ;;  %2078 = vperm.xlu0 %6602, %v5766_v7   ;;  %v5820_v36 = vld [vmem:[%s11488_s0 + $0x149] sm:$0x7] }
 0x171   :  { %v7479_v38 = vpop.permute.xlu1 %1043  ;;  %v7481_v40 = vpop.permute.xlu0 %1038 }
 0x172   :  { %11632 = vst [vmem:[#allocation77_spill] sm:$0xff] %v7479_v38  ;;  %11633 = vst [vmem:[#allocation78_spill] sm:$0xff] %v7481_v40  ;;  %2515 = vperm.xlu1 %6603, %v7074_v30   ;;  %2380 = vperm.xlu0 %6602, %v5792_v62   ;;  %v7500_v30 = vld [vmem:[%s11488_s0 + $0x61] sm:$0xff]  ;;  %v5660_v62 = vld [vmem:[%s11488_s0 + $0x178] sm:$0x7] }
 0x175   :  { %v7492_v7 = vpop.permute.xlu1 %1053  ;;  %v7494_v22 = vpop.permute.xlu0 %1048 }
 0x176   :  { %11634 = vst [vmem:[#allocation79_spill] sm:$0xff] %v7492_v7  ;;  %11635 = vst [vmem:[#allocation80_spill] sm:$0xff] %v7494_v22  ;;  %1198 = vperm.xlu1 %6603, %v7487_v42   ;;  %2520 = vperm.xlu0 %6602, %v5820_v36   ;;  %v5686_v36 = vld [vmem:[%s11488_s0 + $0x69] sm:$0x7] }
 0x179   :  { %v7505_v40 = vpop.permute.xlu1 %1063  ;;  %v7507_v38 = vpop.permute.xlu0 %1058 }
 0x17a   :  { %11636 = vst [vmem:[#allocation81_spill] sm:$0xff] %v7505_v40  ;;  %11637 = vst [vmem:[#allocation82_spill] sm:$0xff] %v7507_v38  ;;  %1500 = vperm.xlu1 %6603, %v7500_v30   ;;  %1203 = vperm.xlu0 %6602, %v5660_v62   ;;  %v5739_v40 = vld [vmem:[%s11488_s0 + $0x60] sm:$0xff]  ;;  %v5714_v38 = vld [vmem:[%s11488_s0 + $0x169] sm:$0x7] }
 0x17d   :  { %v7513_v22 = vpop.permute.xlu1 %1138  ;;  %v7515_v7 = vpop.permute.xlu0 %1068 }
 0x17e   :  { %11638 = vst [vmem:[#allocation83_spill] sm:$0xff] %v7513_v22  ;;  %11639 = vst [vmem:[#allocation84_spill] sm:$0xff] %v7515_v7  ;;  %1640 = vperm.xlu1 %6603, %v7100_v51   ;;  %1505 = vperm.xlu0 %6602, %v5686_v36   ;;  %v5740_v7 = vld [vmem:[%s11488_s0 + $0x68] sm:$0x7]  ;;  %v5793_v22 = vld [vmem:[%s11488_s0 + $0x51] sm:$0xff] }
 0x181   :  { %v7524_v62 = vpop.permute.xlu1 %1148  ;;  %v7526_v9 = vpop.permute.xlu0 %1143 }
 0x182   :  { %11640 = vst [vmem:[#allocation85_spill] sm:$0xff] %v7524_v62  ;;  %11641 = vst [vmem:[#allocation86_spill] sm:$0xff] %v7526_v9  ;;  %1943 = vperm.xlu1 %6603, %v5739_v40   ;;  %1645 = vperm.xlu0 %6602, %v5714_v38   ;;  %v5768_v40 = vld [vmem:[%s11488_s0 + $0x168] sm:$0x7] }
 0x185   :  { %v7531_v51 = vpop.permute.xlu1 %1158  ;;  %v7533_v36 = vpop.permute.xlu0 %1153 }
 0x186   :  { %11642 = vst [vmem:[#allocation87_spill] sm:$0xff] %v7531_v51  ;;  %11643 = vst [vmem:[#allocation88_spill] sm:$0xff] %v7533_v36  ;;  %2083 = vperm.xlu1 %6603, %v7420_v0   ;;  %1948 = vperm.xlu0 %6602, %v5740_v7   ;;  %v5794_v36 = vld [vmem:[%s11488_s0 + $0x59] sm:$0x7]  ;;  %v5634_v51 = vld [vmem:[%s11488_s0 + $0x88] sm:$0x7] }
 0x189   :  { %v7542_v38 = vpop.permute.xlu1 %1450  ;;  %v7544_v9 = vpop.permute.xlu0 %1163 }
 0x18a   :  { %11644 = vst [vmem:[#allocation89_spill] sm:$0xff] %v7542_v38  ;;  %11645 = vst [vmem:[#allocation90_spill] sm:$0xff] %v7544_v9  ;;  %2385 = vperm.xlu1 %6603, %v5793_v22   ;;  %2088 = vperm.xlu0 %6602, %v5768_v40   ;;  %v5822_v22 = vld [vmem:[%s11488_s0 + $0x159] sm:$0x7] }
 0x18d   :  { %v7549_v0 = vpop.permute.xlu1 %1460  ;;  %v7551_v7 = vpop.permute.xlu0 %1455 }
 0x18e   :  { %11646 = vst [vmem:[#allocation91_spill] sm:$0xff] %v7549_v0  ;;  %11647 = vst [vmem:[#allocation92_spill] sm:$0xff] %v7551_v7  ;;  %2525 = vperm.xlu1 %6603, %v7087_v43   ;;  %2390 = vperm.xlu0 %6602, %v5794_v36   ;;  %v5662_v7 = vld [vmem:[%s11488_s0 + $0x188] sm:$0x7]  ;;  %v7570_v43 = vld [vmem:[%s11488_s0 + $0x180] sm:$0xff] }
 0x191   :  { %v7560_v40 = vpop.permute.xlu1 %1590  ;;  %v7562_v9 = vpop.permute.xlu0 %1465 }
 0x192   :  { %11648 = vst [vmem:[#allocation93_spill] sm:$0xff] %v7560_v40  ;;  %11649 = vst [vmem:[#allocation94_spill] sm:$0xff] %v7562_v9  ;;  %1073 = vperm.xlu1 %6603, %v5634_v51   ;;  %2530 = vperm.xlu0 %6602, %v5822_v22   ;;  %v5688_v51 = vld [vmem:[%s11488_s0 + $0x79] sm:$0x7]  ;;  %v7583_v22 = vld [vmem:[%s11488_s0 + $0x71] sm:$0xff] }
 0x195   :  { %v7572_v36 = vpop.permute.xlu1 %1600  ;;  %v7574_v0 = vpop.permute.xlu0 %1595 }
 0x196   :  { %11650 = vst [vmem:[#allocation95_spill] sm:$0xff] %v7572_v36  ;;  %11651 = vst [vmem:[#allocation96_spill] sm:$0xff] %v7574_v0  ;;  %1213 = vperm.xlu1 %6603, %v5662_v7   ;;  %1208 = vperm.xlu0 %6602, %v7570_v43   ;;  %v5716_v7 = vld [vmem:[%s11488_s0 + $0x179] sm:$0x7]  ;;  %v7596_v0 = vld [vmem:[%s11488_s0 + $0x171] sm:$0xff] }
 0x199   :  { %v7585_v9 = vpop.permute.xlu1 %1168  ;;  %v7587_v40 = vpop.permute.xlu0 %1605 }
 0x19a   :  { %11652 = vst [vmem:[#allocation97_spill] sm:$0xff] %v7585_v9  ;;  %11653 = vst [vmem:[#allocation98_spill] sm:$0xff] %v7587_v40  ;;  %1515 = vperm.xlu1 %6603, %v5688_v51   ;;  %1510 = vperm.xlu0 %6602, %v7583_v22   ;;  %v5742_v51 = vld [vmem:[%s11488_s0 + $0x78] sm:$0x7]  ;;  %v5741_v40 = vld [vmem:[%s11488_s0 + $0x70] sm:$0xff] }
 0x19d   :  { %v7598_v36 = vpop.permute.xlu1 %1470  ;;  %v7600_v38 = vpop.permute.xlu0 %1173 }
 0x19e   :  { %11654 = vst [vmem:[#allocation99_spill] sm:$0xff] %v7598_v36  ;;  %11655 = vst [vmem:[#allocation100_spill] sm:$0xff] %v7600_v38  ;;  %1655 = vperm.xlu1 %6603, %v5716_v7   ;;  %1650 = vperm.xlu0 %6602, %v7596_v0   ;;  %v5770_v7 = vld [vmem:[%s11488_s0 + $0x178] sm:$0x7] }
 0x1a1   :  { %v7609_v9 = vpop.permute.xlu1 %1610  ;;  %v7611_v62 = vpop.permute.xlu0 %1475 }
 0x1a2   :  { %11656 = vst [vmem:[#allocation101_spill] sm:$0xff] %v7609_v9  ;;  %11657 = vst [vmem:[#allocation102_spill] sm:$0xff] %v7611_v62  ;;  %1958 = vperm.xlu1 %6603, %v5742_v51   ;;  %1953 = vperm.xlu0 %6602, %v5741_v40   ;;  %v5824_v40 = vld [vmem:[%s11488_s0 + $0x169] sm:$0x7]  ;;  %v5823_v51 = vld [vmem:[%s11488_s0 + $0x161] sm:$0xff] }
 0x1a5   :  { %v7616_v38 = vpop.permute.xlu1 %1903  ;;  %v7618_v36 = vpop.permute.xlu0 %1615 }
 0x1a6   :  { %11658 = vst [vmem:[#allocation103_spill] sm:$0xff] %v7616_v38  ;;  %11659 = vst [vmem:[#allocation104_spill] sm:$0xff] %v7618_v36  ;;  %2098 = vperm.xlu1 %6603, %v5770_v7   ;;  %2093 = vperm.xlu0 %6602, %v7487_v42  }
 0x1a9   :  { %v7624_v9 = vpop.permute.xlu1 %1913  ;;  %v7626_v62 = vpop.permute.xlu0 %1908 }
 0x1aa   :  { %11660 = vst [vmem:[#allocation105_spill] sm:$0xff] %v7624_v9  ;;  %11661 = vst [vmem:[#allocation106_spill] sm:$0xff] %v7626_v62  ;;  %2400 = vperm.xlu1 %6603, %v5796_v34   ;;  %2395 = vperm.xlu0 %6602, %v7500_v30   ;;  %v5636_v34 = vld [vmem:[%s11488_s0 + $0x98] sm:$0x7]  ;;  %v7645_v30 = vld [vmem:[%s11488_s0 + $0x90] sm:$0xff] }
 0x1ad   :  { %v7635_v42 = vpop.permute.xlu1 %2043  ;;  %v7637_v7 = vpop.permute.xlu0 %1918 }
 0x1ae   :  { %11662 = vst [vmem:[#allocation107_spill] sm:$0xff] %v7635_v42  ;;  %11663 = vst [vmem:[#allocation108_spill] sm:$0xff] %v7637_v7  ;;  %2540 = vperm.xlu1 %6603, %v5824_v40   ;;  %2535 = vperm.xlu0 %6602, %v5823_v51   ;;  %v5664_v40 = vld [vmem:[%s11488_s0 + $0x198] sm:$0x7]  ;;  %v7658_v51 = vld [vmem:[%s11488_s0 + $0x190] sm:$0xff] }
 0x1b1   :  { %v7647_v36 = vpop.permute.xlu1 %2053  ;;  %v7649_v62 = vpop.permute.xlu0 %2048 }
 0x1b2   :  { %11664 = vst [vmem:[#allocation109_spill] sm:$0xff] %v7647_v36  ;;  %11665 = vst [vmem:[#allocation110_spill] sm:$0xff] %v7649_v62  ;;  %1083 = vperm.xlu1 %6603, %v5636_v34   ;;  %1078 = vperm.xlu0 %6602, %v7645_v30   ;;  %v5690_v34 = vld [vmem:[%s11488_s0 + $0x89] sm:$0x7]  ;;  %v7671_v62 = vld [vmem:[%s11488_s0 + $0x81] sm:$0xff] }
 0x1b5   :  { %v7660_v7 = vpop.permute.xlu1 %1178  ;;  %v7662_v42 = vpop.permute.xlu0 %2058 }
 0x1b6   :  { %11666 = vst [vmem:[#allocation111_spill] sm:$0xff] %v7660_v7  ;;  %11667 = vst [vmem:[#allocation112_spill] sm:$0xff] %v7662_v42  ;;  %1223 = vperm.xlu1 %6603, %v5664_v40   ;;  %1218 = vperm.xlu0 %6602, %v7658_v51   ;;  %v5718_v40 = vld [vmem:[%s11488_s0 + $0x189] sm:$0x7]  ;;  %v7684_v42 = vld [vmem:[%s11488_s0 + $0x181] sm:$0xff] }
 0x1b9   :  { %v7673_v36 = vpop.permute.xlu1 %1480  ;;  %v7675_v9 = vpop.permute.xlu0 %1183 }
 0x1ba   :  { %11668 = vst [vmem:[#allocation113_spill] sm:$0xff] %v7673_v36  ;;  %11669 = vst [vmem:[#allocation114_spill] sm:$0xff] %v7675_v9  ;;  %1525 = vperm.xlu1 %6603, %v5690_v34   ;;  %1520 = vperm.xlu0 %6602, %v7671_v62   ;;  %v5744_v34 = vld [vmem:[%s11488_s0 + $0x88] sm:$0x7]  ;;  %v5743_v9 = vld [vmem:[%s11488_s0 + $0x80] sm:$0xff] }
 0x1bd   :  { %v7686_v7 = vpop.permute.xlu1 %1620  ;;  %v7688_v38 = vpop.permute.xlu0 %1485 }
 0x1be   :  { %11670 = vst [vmem:[#allocation115_spill] sm:$0xff] %v7686_v7  ;;  %11671 = vst [vmem:[#allocation116_spill] sm:$0xff] %v7688_v38  ;;  %1665 = vperm.xlu1 %6603, %v5718_v40   ;;  %1660 = vperm.xlu0 %6602, %v7684_v42   ;;  %v5772_v40 = vld [vmem:[%s11488_s0 + $0x188] sm:$0x7] }
 0x1c1   :  { %v7697_v36 = vpop.permute.xlu1 %1923  ;;  %v7699_v32 = vpop.permute.xlu0 %1625 }
 0x1c2   :  { %11672 = vst [vmem:[#allocation117_spill] sm:$0xff] %v7697_v36  ;;  %11673 = vst [vmem:[#allocation118_spill] sm:$0xff] %v7699_v32  ;;  %1968 = vperm.xlu1 %6603, %v5744_v34   ;;  %1963 = vperm.xlu0 %6602, %v5743_v9   ;;  %v5826_v9 = vld [vmem:[%s11488_s0 + $0x179] sm:$0x7] }
 0x1c5   :  { %v7704_v38 = vpop.permute.xlu1 %2063  ;;  %v7706_v7 = vpop.permute.xlu0 %1928 }
 0x1c6   :  { %11674 = vst [vmem:[#allocation119_spill] sm:$0xff] %v7704_v38  ;;  %11675 = vst [vmem:[#allocation120_spill] sm:$0xff] %v7706_v7  ;;  %2108 = vperm.xlu1 %6603, %v5772_v40   ;;  %2103 = vperm.xlu0 %6602, %v7570_v43   ;;  %v5638_v43 = vld [vmem:[%s11488_s0 + $0xa8] sm:$0x7] }
 0x1c9   :  { %v7712_v36 = vpop.permute.xlu1 %2355  ;;  %v7714_v32 = vpop.permute.xlu0 %2068 }
 0x1ca   :  { %11676 = vst [vmem:[#allocation121_spill] sm:$0xff] %v7712_v36  ;;  %11677 = vst [vmem:[#allocation122_spill] sm:$0xff] %v7714_v32  ;;  %2410 = vperm.xlu1 %6603, %v5798_v3   ;;  %2405 = vperm.xlu0 %6602, %v7583_v22   ;;  %v7731_v3 = vld [vmem:[%s11488_s0 + $0xa0] sm:$0xff] }
 0x1cd   :  { %v7720_v34 = vpop.permute.xlu1 %2365  ;;  %v7722_v40 = vpop.permute.xlu0 %2360 }
 0x1ce   :  { %11678 = vst [vmem:[#allocation123_spill] sm:$0xff] %v7720_v34  ;;  %11679 = vst [vmem:[#allocation124_spill] sm:$0xff] %v7722_v40  ;;  %2550 = vperm.xlu1 %6603, %v5826_v9   ;;  %2545 = vperm.xlu0 %6602, %v7596_v0   ;;  %v5666_v0 = vld [vmem:[%s11488_s0 + $0x1a8] sm:$0x7]  ;;  %v7744_v9 = vld [vmem:[%s11488_s0 + $0x1a0] sm:$0xff] }
 0x1d1   :  { %v7733_v22 = vpop.permute.xlu1 %2495  ;;  %v7735_v32 = vpop.permute.xlu0 %2370 }
 0x1d2   :  { %11680 = vst [vmem:[#allocation125_spill] sm:$0xff] %v7733_v22  ;;  %11681 = vst [vmem:[#allocation126_spill] sm:$0xff] %v7735_v32  ;;  %1093 = vperm.xlu1 %6603, %v5638_v43   ;;  %1088 = vperm.xlu0 %6602, %v7731_v3   ;;  %v5692_v43 = vld [vmem:[%s11488_s0 + $0x99] sm:$0x7]  ;;  %v7757_v32 = vld [vmem:[%s11488_s0 + $0x91] sm:$0xff] }
 0x1d5   :  { %v7746_v7 = vpop.permute.xlu1 %2505  ;;  %v7748_v38 = vpop.permute.xlu0 %2500 }
 0x1d6   :  { %11682 = vst [vmem:[#allocation127_spill] sm:$0xff] %v7746_v7  ;;  %11683 = vst [vmem:[#allocation128_spill] sm:$0xff] %v7748_v38  ;;  %1233 = vperm.xlu1 %6603, %v5666_v0   ;;  %1228 = vperm.xlu0 %6602, %v7744_v9   ;;  %v5720_v0 = vld [vmem:[%s11488_s0 + $0x199] sm:$0x7]  ;;  %v7770_v38 = vld [vmem:[%s11488_s0 + $0x191] sm:$0xff] }
 0x1d9   :  { %v7759_v22 = vpop.permute.xlu1 %1188  ;;  %v7761_v40 = vpop.permute.xlu0 %2510 }
 0x1da   :  { %11684 = vst [vmem:[#allocation129_spill] sm:$0xff] %v7759_v22  ;;  %11685 = vst [vmem:[#allocation130_spill] sm:$0xff] %v7761_v40  ;;  %1535 = vperm.xlu1 %6603, %v5692_v43   ;;  %1530 = vperm.xlu0 %6602, %v7757_v32   ;;  %v5746_v43 = vld [vmem:[%s11488_s0 + $0x98] sm:$0x7] }
 0x1dd   :  { %v7772_v7 = vpop.permute.xlu1 %1490  ;;  %v7774_v34 = vpop.permute.xlu0 %1193 }
 0x1de   :  { %11686 = vst [vmem:[#allocation131_spill] sm:$0xff] %v7772_v7  ;;  %11687 = vst [vmem:[#allocation132_spill] sm:$0xff] %v7774_v34  ;;  %1675 = vperm.xlu1 %6603, %v5720_v0   ;;  %1670 = vperm.xlu0 %6602, %v7770_v38   ;;  %v5774_v7 = vld [vmem:[%s11488_s0 + $0x198] sm:$0x7] }
 0x1e1   :  { %v7780_v22 = vpop.permute.xlu1 %1630  ;;  %v7782_v40 = vpop.permute.xlu0 %1495 }
 0x1e2   :  { %11688 = vst [vmem:[#allocation133_spill] sm:$0xff] %v7780_v22  ;;  %11689 = vst [vmem:[#allocation134_spill] sm:$0xff] %v7782_v40  ;;  %1978 = vperm.xlu1 %6603, %v5746_v43   ;;  %1973 = vperm.xlu0 %6602, %v7645_v30   ;;  %v5800_v22 = vld [vmem:[%s11488_s0 + $0x89] sm:$0x7]  ;;  %v7841_v40 = vld [vmem:[%s11488_s0 + $0xa1] sm:$0xff] }
 0x1e3   :  { %v5828_v30 = vld [vmem:[%s11488_s0 + $0x189] sm:$0x7] }
 0x1e5   :  { %v7788_v36 = vpop.permute.xlu1 %1933  ;;  %v7790_v0 = vpop.permute.xlu0 %1635 }
 0x1e6   :  { %11690 = vst [vmem:[#allocation135_spill] sm:$0xff] %v7788_v36  ;;  %11691 = vst [vmem:[#allocation136_spill] sm:$0xff] %v7790_v0  ;;  %2118 = vperm.xlu1 %6603, %v5774_v7   ;;  %2113 = vperm.xlu0 %6602, %v7658_v51   ;;  %v5640_v51 = vld [vmem:[%s11488_s0 + $0xb8] sm:$0x7] }
 0x1e9   :  { %v7796_v34 = vpop.permute.xlu1 %2073  ;;  %v7798_v43 = vpop.permute.xlu0 %1938 }
 0x1ea   :  { %11692 = vst [vmem:[#allocation137_spill] sm:$0xff] %v7796_v34  ;;  %11693 = vst [vmem:[#allocation138_spill] sm:$0xff] %v7798_v43  ;;  %2420 = vperm.xlu1 %6603, %v5800_v22   ;;  %2415 = vperm.xlu0 %6602, %v7671_v62   ;;  %v7815_v22 = vld [vmem:[%s11488_s0 + $0xb0] sm:$0xff] }
 0x1ed   :  { %v7804_v36 = vpop.permute.xlu1 %2375  ;;  %v7806_v7 = vpop.permute.xlu0 %2078 }
 0x1ee   :  { %11694 = vst [vmem:[#allocation139_spill] sm:$0xff] %v7804_v36  ;;  %11695 = vst [vmem:[#allocation140_spill] sm:$0xff] %v7806_v7  ;;  %2560 = vperm.xlu1 %6603, %v5828_v30   ;;  %2555 = vperm.xlu0 %6602, %v7684_v42   ;;  %v5668_v42 = vld [vmem:[%s11488_s0 + $0x1b8] sm:$0x7]  ;;  %v7828_v30 = vld [vmem:[%s11488_s0 + $0x1b0] sm:$0xff] }
 0x1f1   :  { %v7817_v62 = vpop.permute.xlu1 %2515  ;;  %v7819_v43 = vpop.permute.xlu0 %2380 }
 0x1f2   :  { %11696 = vst [vmem:[#allocation141_spill] sm:$0xff] %v7817_v62  ;;  %11697 = vst [vmem:[#allocation142_spill] sm:$0xff] %v7819_v43  ;;  %1103 = vperm.xlu1 %6603, %v5640_v51   ;;  %1098 = vperm.xlu0 %6602, %v7815_v22   ;;  %v5694_v51 = vld [vmem:[%s11488_s0 + $0xa9] sm:$0x7] }
 0x1f5   :  { %v7830_v7 = vpop.permute.xlu1 %1198  ;;  %v7832_v0 = vpop.permute.xlu0 %2520 }
 0x1f6   :  { %11698 = vst [vmem:[#allocation143_spill] sm:$0xff] %v7830_v7  ;;  %11699 = vst [vmem:[#allocation144_spill] sm:$0xff] %v7832_v0  ;;  %1243 = vperm.xlu1 %6603, %v5668_v42   ;;  %1238 = vperm.xlu0 %6602, %v7828_v30   ;;  %v5722_v42 = vld [vmem:[%s11488_s0 + $0x1a9] sm:$0x7]  ;;  %v7854_v7 = vld [vmem:[%s11488_s0 + $0x1a1] sm:$0xff] }
 0x1f9   :  { %v7843_v34 = vpop.permute.xlu1 %1500  ;;  %v7845_v43 = vpop.permute.xlu0 %1203 }
 0x1fa   :  { %11700 = vst [vmem:[#allocation145_spill] sm:$0xff] %v7843_v34  ;;  %11701 = vst [vmem:[#allocation146_spill] sm:$0xff] %v7845_v43  ;;  %1545 = vperm.xlu1 %6603, %v5694_v51   ;;  %1540 = vperm.xlu0 %6602, %v7841_v40   ;;  %v5748_v51 = vld [vmem:[%s11488_s0 + $0xa8] sm:$0x7] }
 0x1fd   :  { %v7856_v0 = vpop.permute.xlu1 %1640  ;;  %v7858_v36 = vpop.permute.xlu0 %1505 }
 0x1fe   :  { %11702 = vst [vmem:[#allocation147_spill] sm:$0xff] %v7856_v0  ;;  %11703 = vst [vmem:[#allocation148_spill] sm:$0xff] %v7858_v36  ;;  %1685 = vperm.xlu1 %6603, %v5722_v42   ;;  %1680 = vperm.xlu0 %6602, %v7854_v7   ;;  %v5776_v0 = vld [vmem:[%s11488_s0 + $0x1a8] sm:$0x7] }
 0x201   :  { %v7864_v43 = vpop.permute.xlu1 %1943  ;;  %v7866_v34 = vpop.permute.xlu0 %1645 }
 0x202   :  { %11704 = vst [vmem:[#allocation149_spill] sm:$0xff] %v7864_v43  ;;  %11705 = vst [vmem:[#allocation150_spill] sm:$0xff] %v7866_v34  ;;  %1988 = vperm.xlu1 %6603, %v5748_v51   ;;  %1983 = vperm.xlu0 %6602, %v7731_v3   ;;  %v5802_v43 = vld [vmem:[%s11488_s0 + $0x99] sm:$0x7]  ;;  %v371_v3 = vlaneseq }
 0x203   :  { %v5830_v34 = vld [vmem:[%s11488_s0 + $0x199] sm:$0x7] }
 0x205   :  { %v7872_v62 = vpop.permute.xlu1 %2083  ;;  %v7874_v42 = vpop.permute.xlu0 %1948 }
 0x206   :  { %11706 = vst [vmem:[#allocation151_spill] sm:$0xff] %v7872_v62  ;;  %11707 = vst [vmem:[#allocation152_spill] sm:$0xff] %v7874_v42  ;;  %2128 = vperm.xlu1 %6603, %v5776_v0   ;;  %2123 = vperm.xlu0 %6602, %v7744_v9   ;;  %v7892_v9 = vshrl.u32 %v371_v3, 7  ;;  %v7920_v3 = vld [vmem:[%s11488_s0 + $0x1c0] sm:$0xff] }
 0x207   :  { %11715 = vst [vmem:[#allocation160_spill] sm:$0xff] %v7920_v3 }
 0x209   :  { %v7880_v36 = vpop.permute.xlu1 %2385  ;;  %v7882_v51 = vpop.permute.xlu0 %2088 }
 0x20a   :  { %11708 = vst [vmem:[#allocation153_spill] sm:$0xff] %v7880_v36  ;;  %11709 = vst [vmem:[#allocation154_spill] sm:$0xff] %v7882_v51  ;;  %2430 = vperm.xlu1 %6603, %v5802_v43   ;;  %2425 = vperm.xlu0 %6602, %v7757_v32   ;;  %v5642_v51 = vld [vmem:[%s11488_s0 + $0xc8] sm:$0x7]  ;;  %v7901_v32 = vld [vmem:[%s11488_s0 + $0xc0] sm:$0xff]  ;;  %v825_v36 = vsub.s32 1, %v7892_v9 }
 0x20b   :  { %11712 = vst [vmem:[#allocation157_spill] sm:$0xff] %v7901_v32 }
 0x20d   :  { %v7888_v62 = vpop.permute.xlu1 %2525  ;;  %v7890_v0 = vpop.permute.xlu0 %2390 }
 0x20e   :  { %11710 = vst [vmem:[#allocation155_spill] sm:$0xff] %v7888_v62  ;;  %11711 = vst [vmem:[#allocation156_spill] sm:$0xff] %v7890_v0  ;;  %2570 = vperm.xlu1 %6603, %v5830_v34   ;;  %2565 = vperm.xlu0 %6602, %v7770_v38   ;;  %v373_v0 = vsub.s32 0, %v7892_v9  ;;  %v7911_v38 = vld [vmem:[%s11489_s1] sm:$0x3f] }
 0x20f   :  { %v5670_v34 = vld [vmem:[%s11488_s0 + $0x1c8] sm:$0x7]  ;;  %v5696_v62 = vld [vmem:[%s11488_s0 + $0xb9] sm:$0x7]  ;;  %v7956_v8 = vrot.slane %v7911_v38, %v825_v36 }
 0x210   :  { %v5724_v36 = vld [vmem:[%s11488_s0 + $0x1b9] sm:$0x7] }
 0x211   :  { %v7903_v43 = vpop.permute.xlu1 %1073  ;;  %v7905_v42 = vpop.permute.xlu0 %2530 }
 0x212   :  { %11713 = vst [vmem:[#allocation158_spill] sm:$0xff] %v7903_v43  ;;  %11714 = vst [vmem:[#allocation159_spill] sm:$0xff] %v7905_v42  ;;  %1113 = vperm.xlu1 %6603, %v5642_v51   ;;  %1108 = vperm.xlu0 %6602, %v7901_v32   ;;  %v7927_v51 = vrot.slane %v7911_v38, %v373_v0  ;;  %v7937_v32 = vld [vmem:[%s11488_s0 + $0xb1] sm:$0xff] }
 0x213   :  { %11718 = vst [vmem:[#allocation163_spill] sm:$0xff] %v7937_v32 }
 0x214   :  { %v7945_v0 = vmul.f32 %v7927_v51, %v6921_v4  ;;  %v7964_v4 = vmul.f32 %v7927_v51, %v6945_v19  ;;  %v7984_v19 = vmul.f32 %v7927_v51, %v6965_v27  ;;  %v8005_v27 = vmul.f32 %v7927_v51, %v6985_v39 }
 0x215   :  { %v7922_v43 = vpop.permute.xlu1 %1213  ;;  %v7924_v42 = vpop.permute.xlu0 %1208  ;;  %v8025_v39 = vmul.f32 %v7927_v51, %v7005_v48  ;;  %v8045_v48 = vmul.f32 %v7927_v51, %v7027_v57  ;;  %v8065_v57 = vmul.f32 %v7927_v51, %v7052_v17  ;;  %v8085_v17 = vmul.f32 %v7927_v51, %v7089_v46 }
 0x216   :  { %11716 = vst [vmem:[#allocation161_spill] sm:$0xff] %v7922_v43  ;;  %11717 = vst [vmem:[#allocation162_spill] sm:$0xff] %v7924_v42  ;;  %1253 = vperm.xlu1 %6603, %v5670_v34   ;;  %1248 = vperm.xlu0 %6602, %v7920_v3   ;;  %v7949_v34 = vmul.f32 %v7927_v51, %v6923_v5  ;;  %v7953_v3 = vmul.f32 %v7927_v51, %v6934_v11 }
 0x217   :  { %v7968_v5 = vmul.f32 %v7927_v51, %v6947_v20  ;;  %v7972_v11 = vmul.f32 %v7927_v51, %v6955_v23  ;;  %v7988_v20 = vmul.f32 %v7927_v51, %v6967_v28  ;;  %v7992_v23 = vmul.f32 %v7927_v51, %v6975_v31  ;;  %11724 = vst [vmem:[#allocation169_spill] sm:$0xff] %v8085_v17  ;;  %v11736_v17 = vld [vmem:[#allocation7_spill] sm:$0xff] }
 0x218   :  { %v8009_v28 = vmul.f32 %v7927_v51, %v6987_v41  ;;  %v8013_v31 = vmul.f32 %v7927_v51, %v6995_v44  ;;  %v8029_v41 = vmul.f32 %v7927_v51, %v7007_v49  ;;  %v8033_v44 = vmul.f32 %v7927_v51, %v7015_v52  ;;  %v5750_v52 = vld [vmem:[%s11488_s0 + $0xb8] sm:$0x7] }
 0x219   :  { %v7939_v43 = vpop.permute.xlu1 %1515  ;;  %v7941_v42 = vpop.permute.xlu0 %1510  ;;  %v8049_v49 = vmul.f32 %v7927_v51, %v7037_v61  ;;  %v8069_v61 = vmul.f32 %v7927_v51, %v7063_v25  ;;  %v8105_v46 = vmul.f32 %v7927_v51, %v11732_v60  ;;  %v5778_v60 = vld [vmem:[%s11488_s0 + $0x1b8] sm:$0x7] }
 0x21a   :  { %11719 = vst [vmem:[#allocation164_spill] sm:$0xff] %v7939_v43  ;;  %11720 = vst [vmem:[#allocation165_spill] sm:$0xff] %v7941_v42  ;;  %1555 = vperm.xlu1 %6603, %v5696_v62   ;;  %v7960_v43 = vmul.f32 %v7927_v51, %v6936_v13  ;;  %1550 = vperm.xlu0 %6602, %v7937_v32   ;;  %v7980_v13 = vmul.f32 %v7927_v51, %v6957_v24  ;;  %v7997_v62 = vld [vmem:[%s11488_s0 + $0x1b1] sm:$0xff] }
 0x21b   :  { %11721 = vst [vmem:[#allocation166_spill] sm:$0xff] %v7997_v62  ;;  %v8001_v24 = vmul.f32 %v7927_v51, %v6977_v33  ;;  %v8021_v33 = vmul.f32 %v7927_v51, %v6997_v45  ;;  %v8041_v45 = vmul.f32 %v7927_v51, %v7025_v56  ;;  %v8061_v56 = vmul.f32 %v7927_v51, %v7050_v15 }
 0x21c   :  { %v8081_v15 = vmul.f32 %v7927_v51, %v7078_v37  ;;  %v8101_v37 = vmul.f32 %v7927_v51, %v11730_v6  ;;  %11733 = vst [vmem:[#allocation5_spill] sm:$0xff] %v8105_v46  ;;  %v1278_v6 = vsub.s32 2, %v7892_v9 }
 0x21d   :  { %v8015_v42 = vpop.permute.xlu1 %1655  ;;  %v8017_v32 = vpop.permute.xlu0 %1650 }
 0x21e   :  { %11722 = vst [vmem:[#allocation167_spill] sm:$0xff] %v8015_v42  ;;  %11723 = vst [vmem:[#allocation168_spill] sm:$0xff] %v8017_v32  ;;  %1695 = vperm.xlu1 %6603, %v5724_v36   ;;  %v8037_v32 = vmul.f32 %v7927_v51, %v7017_v53  ;;  %1690 = vperm.xlu0 %6602, %v7997_v62   ;;  %v8057_v53 = vmul.f32 %v7927_v51, %v7039_v63  ;;  %v11728_v62 = vld [vmem:[#allocation3_spill] sm:$0xff] }
 0x21f   :  { %v8073_v36 = vmul.f32 %v7927_v51, %v7065_v26  ;;  %v8077_v63 = vmul.f32 %v7927_v51, %v7076_v35  ;;  %v8093_v26 = vmul.f32 %v7927_v51, %v7091_v47  ;;  %v8097_v35 = vmul.f32 %v7927_v51, %v11728_v62  ;;  %11731 = vst [vmem:[#allocation4_spill] sm:$0xff] %v8101_v37 }
 0x220   :  { %v8113_v47 = vmul.f32 %v7927_v51, %v11736_v17 }
 0x221   :  { %v8087_v42 = vpop.permute.xlu1 %1958  ;;  %v8089_v25 = vpop.permute.xlu0 %1953  ;;  %11727 = vst [vmem:[#allocation172_spill] sm:$0xff] %v8093_v26  ;;  %11729 = vst [vmem:[#allocation3_spill] sm:$0xff] %v8097_v35  ;;  %v11738_v26 = vld [vmem:[#allocation8_spill] sm:$0xff]  ;;  %v11750_v35 = vld [vmem:[#allocation14_spill] sm:$0xff] }
 0x222   :  { %11725 = vst [vmem:[#allocation170_spill] sm:$0xff] %v8087_v42  ;;  %11726 = vst [vmem:[#allocation171_spill] sm:$0xff] %v8089_v25  ;;  %1998 = vperm.xlu1 %6603, %v5750_v52   ;;  %v11734_v42 = vld [vmem:[#allocation6_spill] sm:$0xff]  ;;  %v8117_v62 = vmul.f32 %v7927_v51, %v11738_v26  ;;  %1993 = vperm.xlu0 %6602, %v7815_v22   ;;  %v11740_v52 = vld [vmem:[#allocation9_spill] sm:$0xff] }
 0x223   :  { %v8109_v25 = vmul.f32 %v7927_v51, %v11734_v42  ;;  %11737 = vst [vmem:[#allocation7_spill] sm:$0xff] %v8113_v47  ;;  %v8126_v42 = vmul.f32 %v7927_v51, %v11740_v52  ;;  %v11744_v47 = vld [vmem:[#allocation11_spill] sm:$0xff]  ;;  %v11748_v22 = vld [vmem:[#allocation13_spill] sm:$0xff]  ;;  %v8146_v52 = vmul.f32 %v7927_v51, %v11750_v35 }
 0x224   :  { %11739 = vst [vmem:[#allocation8_spill] sm:$0xff] %v8117_v62  ;;  %v8134_v26 = vmul.f32 %v7927_v51, %v11744_v47  ;;  %v11746_v62 = vld [vmem:[#allocation12_spill] sm:$0xff]  ;;  %v8142_v37 = vmul.f32 %v7927_v51, %v11748_v22 }
 0x225   :  { %11735 = vst [vmem:[#allocation6_spill] sm:$0xff] %v8109_v25  ;;  %11741 = vst [vmem:[#allocation9_spill] sm:$0xff] %v8126_v42  ;;  %v11742_v25 = vld [vmem:[#allocation10_spill] sm:$0xff]  ;;  %v8138_v46 = vmul.f32 %v7927_v51, %v11746_v62  ;;  %v11751_v42 = vld [vmem:[#allocation15_spill] sm:$0xff]  ;;  %v8158_v62 = vpop.permute.xlu0 %2093 }
 0x226   :  { %v8130_v17 = vmul.f32 %v7927_v51, %v11742_v25  ;;  %11745 = vst [vmem:[#allocation11_spill] sm:$0xff] %v8134_v26  ;;  %11749 = vst [vmem:[#allocation13_spill] sm:$0xff] %v8142_v37  ;;  %v8150_v25 = vmul.f32 %v7927_v51, %v11751_v42  ;;  %v8156_v26 = vpop.permute.xlu1 %2098  ;;  %v11757_v37 = vld [vmem:[#allocation18_spill] sm:$0xff]  ;;  %v828_v42 = vmul.f32 %v7956_v8, %v7212_v58  ;;  %2138 = vperm.xlu1 %6603, %v5778_v60   ;;  %v5804_v58 = vld [vmem:[%s11488_s0 + $0xa9] sm:$0x7] }
 0x227   :  { %11747 = vst [vmem:[#allocation12_spill] sm:$0xff] %v8138_v46  ;;  %11754 = vst [vmem:[#allocation15_spill] sm:$0xff] %v8156_v26  ;;  %v11756_v46 = vld [vmem:[#allocation17_spill] sm:$0xff]  ;;  %v8166_v35 = vmul.f32 %v7927_v51, %v11757_v37  ;;  %v8183_v37 = vrot.slane %v7911_v38, %v1278_v6  ;;  %2133 = vperm.xlu0 %6602, %v7828_v30   ;;  %v829_v6 = vmul.f32 %v7956_v8, %v7222_v1  ;;  %v11769_v30 = vld [vmem:[#allocation23_spill] sm:$0xff] }
 0x228   :  { %11743 = vst [vmem:[#allocation10_spill] sm:$0xff] %v8130_v17  ;;  %11752 = vst [vmem:[#allocation14_spill] sm:$0xff] %v8150_v25  ;;  %v11753_v17 = vld [vmem:[#allocation16_spill] sm:$0xff]  ;;  %v8162_v22 = vmul.f32 %v7927_v51, %v11756_v46  ;;  %v827_v25 = vmul.f32 %v7956_v8, %v7214_v2  ;;  %v830_v46 = vmul.f32 %v7956_v8, %v7220_v50  ;;  %v11765_v60 = vld [vmem:[#allocation21_spill] sm:$0xff] }
 0x229   :  { %v8154_v47 = vmul.f32 %v7927_v51, %v11753_v17  ;;  %11755 = vst [vmem:[#allocation16_spill] sm:$0xff] %v8158_v62  ;;  %11758 = vst [vmem:[#allocation17_spill] sm:$0xff] %v8166_v35  ;;  %v8174_v17 = vmul.f32 %v7927_v51, %v7180_v55  ;;  %v11760_v62 = vld [vmem:[#allocation19_spill] sm:$0xff]  ;;  %v11763_v2 = vld [vmem:[#allocation20_spill] sm:$0xff]  ;;  %v8222_v1 = vadd.f32 %v828_v42, %v7960_v43 }
 0x22a   :  { %v8178_v26 = vmul.f32 %v7927_v51, %v11760_v62  ;;  %11762 = vst [vmem:[#allocation173_spill] sm:$0xff] %v8183_v37  ;;  %v8191_v55 = vmul.f32 %v7927_v51, %v11763_v2  ;;  %v8195_v62 = vmul.f32 %v7927_v51, %v11765_v60  ;;  %v8205_v37 = vmul.f32 %v7927_v51, %v11769_v30  ;;  %v11771_v2 = vld [vmem:[#allocation25_spill] sm:$0xff]  ;;  %v11772_v60 = vld [vmem:[#allocation26_spill] sm:$0xff]  ;;  %v11777_v42 = vld [vmem:[#allocation28_spill] sm:$0xff] }
 0x22b   :  { %11759 = vst [vmem:[#allocation18_spill] sm:$0xff] %v8174_v17  ;;  %v11770_v17 = vld [vmem:[#allocation24_spill] sm:$0xff]  ;;  %v8225_v30 = vadd.f32 %v827_v25, %v7949_v34  ;;  %2440 = vperm.xlu1 %6603, %v5804_v58   ;;  %v835_v34 = vmul.f32 %v7956_v8, %v11777_v42  ;;  %2435 = vperm.xlu0 %6602, %v7841_v40   ;;  %v1730_v58 = vsub.s32 3, %v7892_v9  ;;  %v11782_v42 = vld [vmem:[#allocation31_spill] sm:$0xff] }
 0x22c   :  { %11761 = vst [vmem:[#allocation19_spill] sm:$0xff] %v8178_v26  ;;  %11764 = vst [vmem:[#allocation20_spill] sm:$0xff] %v8191_v55  ;;  %v11767_v26 = vld [vmem:[#allocation22_spill] sm:$0xff]  ;;  %v8209_v35 = vmul.f32 %v7927_v51, %v11770_v17  ;;  %v8213_v55 = vmul.f32 %v7927_v51, %v11771_v2  ;;  %v831_v17 = vmul.f32 %v7956_v8, %v7230_v21  ;;  %v5832_v21 = vld [vmem:[%s11488_s0 + $0x1a9] sm:$0x7] }
 0x22d   :  { %11766 = vst [vmem:[#allocation21_spill] sm:$0xff] %v8195_v62  ;;  %v8199_v50 = vmul.f32 %v7927_v51, %v11767_v26  ;;  %v832_v62 = vmul.f32 %v7956_v8, %v11772_v60  ;;  %v8217_v26 = vpop.permute.xlu1 %2400  ;;  %v834_v51 = vmul.f32 %v7956_v8, %v7233_v12  ;;  %v8232_v2 = vadd.f32 %v830_v46, %v7953_v3  ;;  %v11779_v3 = vld [vmem:[#allocation29_spill] sm:$0xff]  ;;  %v11780_v46 = vld [vmem:[#allocation30_spill] sm:$0xff] }
 0x22e   :  { %11773 = vst [vmem:[#allocation23_spill] sm:$0xff] %v8217_v26  ;;  %v833_v60 = vmul.f32 %v7956_v8, %v7235_v54  ;;  %v8245_v12 = vadd.f32 %v829_v6, %v7945_v0  ;;  %v838_v25 = vmul.f32 %v7956_v8, %v11779_v3  ;;  %v837_v54 = vmul.f32 %v7956_v8, %v11780_v46  ;;  %v11783_v26 = vld [vmem:[#allocation32_spill] sm:$0xff] }
 0x22f   :  { %11768 = vst [vmem:[#allocation22_spill] sm:$0xff] %v8199_v50  ;;  %v8219_v50 = vpop.permute.xlu0 %2395  ;;  %11775 = vst [vmem:[#allocation25_spill] sm:$0xff] %v8232_v2  ;;  %v840_v40 = vmul.f32 %v7956_v8, %v11782_v42  ;;  %v839_v2 = vmul.f32 %v7956_v8, %v11783_v26  ;;  %v842_v0 = vmul.f32 %v7956_v8, %v7266_v10  ;;  %v11786_v42 = vld [vmem:[#allocation34_spill] sm:$0xff]  ;;  %2580 = vperm.xlu1 %6603, %v5832_v21  }
 0x230   :  { %11774 = vst [vmem:[#allocation24_spill] sm:$0xff] %v8219_v50  ;;  %v11776_v50 = vld [vmem:[#allocation27_spill] sm:$0xff]  ;;  %11778 = vst [vmem:[#allocation26_spill] sm:$0xff] %v8245_v12  ;;  %v8266_v46 = vadd.f32 %v831_v17, %v7968_v5  ;;  %v8269_v12 = vadd.f32 %v834_v51, %v7972_v11  ;;  %v8276_v26 = vadd.f32 %v833_v60, %v7980_v13  ;;  %2575 = vperm.xlu0 %6602, %v7854_v7   ;;  %v5644_v17 = vld [vmem:[%s11488_s0 + $0xd8] sm:$0x7] }
 0x231   :  { %v836_v43 = vmul.f32 %v7956_v8, %v11776_v50  ;;  %v8253_v50 = vadd.f32 %v832_v62, %v7964_v4  ;;  %v8261_v6 = vpop.permute.xlu1 %2540  ;;  %v11785_v4 = vld [vmem:[#allocation33_spill] sm:$0xff]  ;;  %v11787_v5 = vld [vmem:[#allocation35_spill] sm:$0xff]  ;;  %v8291_v51 = vadd.f32 %v838_v25, %v7992_v23  ;;  %v8294_v13 = vadd.f32 %v837_v54, %v8001_v24 }
 0x232   :  { %v841_v62 = vmul.f32 %v7956_v8, %v11785_v4  ;;  %v843_v11 = vmul.f32 %v7956_v8, %v11787_v5  ;;  %v8304_v7 = vld [vmem:[%s11488_s0 + $0xd0] sm:$0xff]  ;;  %v8307_v60 = vadd.f32 %v840_v40, %v8005_v27  ;;  %v8310_v23 = vadd.f32 %v839_v2, %v8009_v28  ;;  %v11793_v2 = vld [vmem:[#allocation38_spill] sm:$0xff]  ;;  %v11795_v40 = vld [vmem:[#allocation39_spill] sm:$0xff] }
 0x233   :  { %11781 = vst [vmem:[#allocation27_spill] sm:$0xff] %v8253_v50  ;;  %v8263_v3 = vpop.permute.xlu0 %2535  ;;  %v844_v50 = vmul.f32 %v7956_v8, %v11786_v42  ;;  %v8279_v10 = vadd.f32 %v836_v43, %v7984_v19  ;;  %v846_v19 = vmul.f32 %v7956_v8, %v7282_v18  ;;  %v8313_v24 = vadd.f32 %v842_v0, %v8013_v31  ;;  %v11788_v43 = vld [vmem:[#allocation36_spill] sm:$0xff]  ;;  %v11792_v27 = vld [vmem:[#allocation37_spill] sm:$0xff] }
 0x234   :  { %11784 = vst [vmem:[#allocation28_spill] sm:$0xff] %v8263_v3  ;;  %v8282_v3 = vadd.f32 %v835_v34, %v7988_v20  ;;  %v8299_v20 = vrot.slane %v7911_v38, %v1730_v58  ;;  %v845_v18 = vmul.f32 %v7956_v8, %v11788_v43  ;;  %v8322_v25 = vadd.f32 %v841_v62, %v8021_v33  ;;  %v11796_v4 = vld [vmem:[#allocation40_spill] sm:$0xff]  ;;  %v11797_v62 = vld [vmem:[#allocation41_spill] sm:$0xff] }
 0x235   :  { %v8317_v34 = vpop.permute.xlu1 %1083  ;;  %v8325_v54 = vadd.f32 %v844_v50, %v8025_v39  ;;  %v848_v28 = vmul.f32 %v7956_v8, %v11792_v27  ;;  %v847_v31 = vmul.f32 %v7956_v8, %v11793_v2  ;;  %1123 = vperm.xlu1 %6603, %v5644_v17   ;;  %v8332_v58 = vadd.f32 %v843_v11, %v8029_v41  ;;  %v5672_v50 = vld [vmem:[%s11488_s0 + $0x1d8] sm:$0x7]  ;;  %v11800_v11 = vld [vmem:[#allocation43_spill] sm:$0xff]  ;;  %v8355_v27 = vld [vmem:[%s11488_s0 + $0x1d0] sm:$0xff] }
 0x236   :  { %11789 = vst [vmem:[#allocation29_spill] sm:$0xff] %v8317_v34  ;;  %v850_v0 = vmul.f32 %v7956_v8, %v11795_v40  ;;  %v849_v33 = vmul.f32 %v7956_v8, %v11796_v4  ;;  %v852_v39 = vmul.f32 %v7956_v8, %v11797_v62  ;;  %1118 = vperm.xlu0 %6602, %v8304_v7   ;;  %v11799_v41 = vld [vmem:[#allocation42_spill] sm:$0xff]  ;;  %v2183_v43 = vsub.s32 4, %v7892_v9  ;;  %v11802_v40 = vld [vmem:[#allocation44_spill] sm:$0xff]  ;;  %v11803_v4 = vld [vmem:[#allocation45_spill] sm:$0xff] }
 0x237   :  { %v8319_v21 = vpop.permute.xlu0 %1078  ;;  %11791 = vst [vmem:[#allocation31_spill] sm:$0xff] %v8325_v54  ;;  %11794 = vst [vmem:[#allocation32_spill] sm:$0xff] %v8332_v58  ;;  %v8345_v42 = vadd.f32 %v846_v19, %v8033_v44  ;;  %v851_v5 = vmul.f32 %v7956_v8, %v11799_v41  ;;  %v854_v17 = vmul.f32 %v7956_v8, %v11800_v11  ;;  %v11838_v54 = vld [vmem:[#allocation59_spill] sm:$0xff] }
 0x238   :  { %11790 = vst [vmem:[#allocation30_spill] sm:$0xff] %v8319_v21  ;;  %v8358_v2 = vadd.f32 %v845_v18, %v8037_v32  ;;  %v853_v44 = vmul.f32 %v7956_v8, %v11802_v40  ;;  %v856_v19 = vmul.f32 %v7956_v8, %v7322_v29  ;;  %v855_v62 = vmul.f32 %v7956_v8, %v11803_v4  ;;  %v11808_v18 = vld [vmem:[#allocation46_spill] sm:$0xff] }
 0x239   :  { %11798 = vst [vmem:[#allocation33_spill] sm:$0xff] %v8345_v42  ;;  %v8366_v41 = vpop.permute.xlu1 %1223  ;;  %v8371_v42 = vadd.f32 %v848_v28, %v8041_v45  ;;  %v8374_v58 = vadd.f32 %v847_v31, %v8045_v48  ;;  %v858_v32 = vmul.f32 %v7956_v8, %v7330_v16  ;;  %v857_v40 = vmul.f32 %v7956_v8, %v11808_v18  ;;  %v5698_v16 = vld [vmem:[%s11488_s0 + $0xc9] sm:$0x7] }
 0x23a   :  { %11801 = vst [vmem:[#allocation34_spill] sm:$0xff] %v8358_v2  ;;  %11804 = vst [vmem:[#allocation35_spill] sm:$0xff] %v8366_v41  ;;  %1263 = vperm.xlu1 %6603, %v5672_v50   ;;  %v8381_v29 = vadd.f32 %v850_v0, %v8049_v49  ;;  %v8384_v4 = vadd.f32 %v849_v33, %v8057_v53  ;;  %v8387_v2 = vadd.f32 %v852_v39, %v8061_v56  ;;  %v11814_v53 = vld [vmem:[#allocation47_spill] sm:$0xff]  ;;  %v11818_v50 = vld [vmem:[#allocation169_spill] sm:$0xff] }
 0x23b   :  { %v8368_v11 = vpop.permute.xlu0 %1218  ;;  %11806 = vst [vmem:[#allocation37_spill] sm:$0xff] %v8371_v42  ;;  %11807 = vst [vmem:[#allocation38_spill] sm:$0xff] %v8374_v58  ;;  %v860_v45 = vmul.f32 %v7956_v8, %v7338_v14  ;;  %1258 = vperm.xlu0 %6602, %v8355_v27   ;;  %v8396_v48 = vadd.f32 %v851_v5, %v8065_v57  ;;  %v8399_v49 = vadd.f32 %v854_v17, %v8069_v61  ;;  %v8409_v14 = vld [vmem:[%s11488_s0 + $0xc1] sm:$0xff]  ;;  %v11819_v17 = vld [vmem:[#allocation172_spill] sm:$0xff] }
 0x23c   :  { %11805 = vst [vmem:[#allocation36_spill] sm:$0xff] %v8368_v11  ;;  %11809 = vst [vmem:[#allocation39_spill] sm:$0xff] %v8381_v29  ;;  %v859_v28 = vmul.f32 %v7956_v8, %v11814_v53  ;;  %v8404_v56 = vrot.slane %v7911_v38, %v2183_v43  ;;  %v8412_v31 = vadd.f32 %v853_v44, %v8073_v36  ;;  %v11820_v36 = vld [vmem:[#allocation48_spill] sm:$0xff]  ;;  %v11821_v44 = vld [vmem:[#allocation49_spill] sm:$0xff] }
 0x23d   :  { %11810 = vst [vmem:[#allocation40_spill] sm:$0xff] %v8384_v4  ;;  %11811 = vst [vmem:[#allocation41_spill] sm:$0xff] %v8387_v2  ;;  %v8415_v57 = vadd.f32 %v856_v19, %v8077_v63  ;;  %v8418_v61 = vadd.f32 %v855_v62, %v8081_v15  ;;  %v862_v0 = vmul.f32 %v7956_v8, %v7346_v59  ;;  %v8422_v33 = vpop.permute.xlu1 %1525  ;;  %v11822_v19 = vld [vmem:[#allocation3_spill] sm:$0xff]  ;;  %v11823_v59 = vld [vmem:[#allocation50_spill] sm:$0xff]  ;;  %v2635_v4 = vsub.s32 5, %v7892_v9 }
 0x23e   :  { %11812 = vst [vmem:[#allocation42_spill] sm:$0xff] %v8396_v48  ;;  %11813 = vst [vmem:[#allocation43_spill] sm:$0xff] %v8399_v49  ;;  %v8427_v5 = vadd.f32 %v858_v32, %v11818_v50  ;;  %v8430_v43 = vadd.f32 %v857_v40, %v11819_v17  ;;  %v861_v63 = vmul.f32 %v7956_v8, %v11820_v36  ;;  %1565 = vperm.xlu1 %6603, %v5698_v16   ;;  %v11824_v53 = vld [vmem:[#allocation51_spill] sm:$0xff]  ;;  %v11825_v50 = vld [vmem:[#allocation52_spill] sm:$0xff] }
 0x23f   :  { %11815 = vst [vmem:[#allocation44_spill] sm:$0xff] %v8412_v31  ;;  %11816 = vst [vmem:[#allocation45_spill] sm:$0xff] %v8422_v33  ;;  %v8424_v39 = vpop.permute.xlu0 %1520  ;;  %v864_v15 = vmul.f32 %v7956_v8, %v11821_v44  ;;  %v8437_v62 = vadd.f32 %v860_v45, %v11822_v19  ;;  %v863_v18 = vmul.f32 %v7956_v8, %v11823_v59  ;;  %1560 = vperm.xlu0 %6602, %v8409_v14   ;;  %v5726_v17 = vld [vmem:[%s11488_s0 + $0x1c9] sm:$0x7]  ;;  %v11827_v45 = vld [vmem:[#allocation53_spill] sm:$0xff] }
 0x240   :  { %11817 = vst [vmem:[#allocation46_spill] sm:$0xff] %v8424_v39  ;;  %v866_v32 = vmul.f32 %v7956_v8, %v11824_v53  ;;  %v865_v40 = vmul.f32 %v7956_v8, %v11825_v50  ;;  %v11826_v36 = vld [vmem:[#allocation4_spill] sm:$0xff]  ;;  %v868_v44 = vmul.f32 %v7956_v8, %v11827_v45  ;;  %v11828_v19 = vld [vmem:[#allocation54_spill] sm:$0xff]  ;;  %v11829_v31 = vld [vmem:[#allocation55_spill] sm:$0xff] }
 0x241   :  { %v8450_v16 = vadd.f32 %v859_v28, %v11826_v36  ;;  %v867_v59 = vmul.f32 %v7956_v8, %v11828_v19  ;;  %v870_v53 = vmul.f32 %v7956_v8, %v11829_v31  ;;  %v8461_v50 = vld [vmem:[%s11488_s0 + $0x1c1] sm:$0xff]  ;;  %v11830_v49 = vld [vmem:[#allocation5_spill] sm:$0xff]  ;;  %v11831_v2 = vld [vmem:[#allocation56_spill] sm:$0xff]  ;;  %v8471_v19 = vpop.permute.xlu1 %1665 }
 0x242   :  { %v8464_v48 = vadd.f32 %v862_v0, %v11830_v49  ;;  %v869_v28 = vmul.f32 %v7956_v8, %v11831_v2  ;;  %v11832_v36 = vld [vmem:[#allocation57_spill] sm:$0xff]  ;;  %11833 = vst [vmem:[#allocation47_spill] sm:$0xff] %v8471_v19  ;;  %v11835_v31 = vld [vmem:[#allocation6_spill] sm:$0xff]  ;;  %v11836_v42 = vld [vmem:[#allocation7_spill] sm:$0xff]  ;;  %v874_v2 = vmul.f32 %v7956_v8, %v11838_v54  ;;  %1705 = vperm.xlu1 %6603, %v5726_v17  }
 0x243   :  { %v872_v45 = vmul.f32 %v7956_v8, %v11832_v36  ;;  %v8473_v29 = vpop.permute.xlu0 %1660  ;;  %v8476_v58 = vadd.f32 %v861_v63, %v11835_v31  ;;  %v8479_v39 = vadd.f32 %v864_v15, %v11836_v42  ;;  %v11837_v49 = vld [vmem:[#allocation58_spill] sm:$0xff]  ;;  %v11839_v36 = vld [vmem:[#allocation8_spill] sm:$0xff]  ;;  %v11840_v9 = vld [vmem:[#allocation9_spill] sm:$0xff]  ;;  %1700 = vperm.xlu0 %6602, %v8461_v50  }
 0x244   :  { %11834 = vst [vmem:[#allocation169_spill] sm:$0xff] %v8473_v29  ;;  %v871_v0 = vmul.f32 %v7956_v8, %v11837_v49  ;;  %v8486_v33 = vadd.f32 %v863_v18, %v11839_v36  ;;  %v8489_v19 = vadd.f32 %v866_v32, %v11840_v9  ;;  %v11841_v29 = vld [vmem:[#allocation10_spill] sm:$0xff]  ;;  %v11842_v63 = vld [vmem:[#allocation60_spill] sm:$0xff]  ;;  %v11843_v54 = vld [vmem:[#allocation11_spill] sm:$0xff]  ;;  %v8512_v36 = vadd.f32 %v869_v28, %v8146_v52 }
 0x245   :  { %v8492_v11 = vadd.f32 %v865_v40, %v11841_v29  ;;  %v873_v42 = vmul.f32 %v7956_v8, %v11842_v63  ;;  %v5752_v15 = vld [vmem:[%s11488_s0 + $0xc8] sm:$0x7]  ;;  %v8501_v17 = vadd.f32 %v868_v44, %v11843_v54  ;;  %v11845_v32 = vld [vmem:[#allocation13_spill] sm:$0xff]  ;;  %v11849_v9 = vld [vmem:[#allocation14_spill] sm:$0xff]  ;;  %v8520_v44 = vrot.slane %v7911_v38, %v2635_v4 }
 0x246   :  { %v11844_v18 = vld [vmem:[#allocation12_spill] sm:$0xff]  ;;  %v8507_v49 = vadd.f32 %v870_v53, %v11845_v32  ;;  %v11847_v29 = vld [vmem:[#allocation61_spill] sm:$0xff]  ;;  %11848 = vst [vmem:[#allocation48_spill] sm:$0xff] %v8512_v36  ;;  %v8515_v63 = vadd.f32 %v872_v45, %v11849_v9  ;;  %v11851_v41 = vld [vmem:[#allocation62_spill] sm:$0xff]  ;;  %v8527_v53 = vadd.f32 %v871_v0, %v8154_v47  ;;  %2008 = vperm.xlu1 %6603, %v5752_v15  }
 0x247   :  { %v8504_v31 = vadd.f32 %v867_v59, %v11844_v18  ;;  %v876_v40 = vmul.f32 %v7956_v8, %v11847_v29  ;;  %v875_v21 = vmul.f32 %v7956_v8, %v11851_v41  ;;  %v8522_v59 = vpop.permute.xlu1 %1968  ;;  %v8524_v54 = vpop.permute.xlu0 %1963  ;;  %v8530_v18 = vadd.f32 %v874_v2, %v8162_v22  ;;  %v11856_v52 = vld [vmem:[#allocation63_spill] sm:$0xff]  ;;  %v11857_v45 = vld [vmem:[#allocation64_spill] sm:$0xff]  ;;  %v11858_v41 = vld [vmem:[#allocation17_spill] sm:$0xff] }
 0x248   :  { %11846 = vst [vmem:[#allocation172_spill] sm:$0xff] %v8507_v49  ;;  %11850 = vst [vmem:[#allocation49_spill] sm:$0xff] %v8515_v63  ;;  %v878_v28 = vmul.f32 %v7956_v8, %v11856_v52  ;;  %v877_v32 = vmul.f32 %v7956_v8, %v11857_v45  ;;  %v8537_v38 = vadd.f32 %v873_v42, %v11858_v41  ;;  %v11860_v4 = vld [vmem:[#allocation65_spill] sm:$0xff]  ;;  %v11861_v9 = vld [vmem:[#allocation66_spill] sm:$0xff] }
 0x249   :  { %11852 = vst [vmem:[#allocation3_spill] sm:$0xff] %v8522_v59  ;;  %11853 = vst [vmem:[#allocation50_spill] sm:$0xff] %v8524_v54  ;;  %v880_v29 = vmul.f32 %v7956_v8, %v11860_v4  ;;  %v879_v47 = vmul.f32 %v7956_v8, %v11861_v9  ;;  %v11862_v0 = vld [vmem:[#allocation67_spill] sm:$0xff]  ;;  %v11863_v2 = vld [vmem:[#allocation157_spill] sm:$0xff] }
 0x24a   :  { %11854 = vst [vmem:[#allocation51_spill] sm:$0xff] %v8527_v53  ;;  %11855 = vst [vmem:[#allocation52_spill] sm:$0xff] %v8530_v18  ;;  %v882_v22 = vmul.f32 %v7956_v8, %v11862_v0  ;;  %2003 = vperm.xlu0 %6602, %v11863_v2   ;;  %v5780_v52 = vld [vmem:[%s11488_s0 + $0x1c8] sm:$0x7]  ;;  %v11864_v45 = vld [vmem:[#allocation18_spill] sm:$0xff] }
 0x24b   :  { %11859 = vst [vmem:[#allocation4_spill] sm:$0xff] %v8537_v38  ;;  %v8550_v15 = vadd.f32 %v876_v40, %v11864_v45  ;;  %v11866_v42 = vld [vmem:[#allocation68_spill] sm:$0xff]  ;;  %v11867_v38 = vld [vmem:[#allocation69_spill] sm:$0xff]  ;;  %v11869_v54 = vld [vmem:[#allocation70_spill] sm:$0xff]  ;;  %2148 = vperm.xlu1 %6603, %v5780_v52  }
 0x24c   :  { %v881_v41 = vmul.f32 %v7956_v8, %v11866_v42  ;;  %v11868_v4 = vld [vmem:[#allocation173_spill] sm:$0xff]  ;;  %v11870_v59 = vld [vmem:[#allocation19_spill] sm:$0xff]  ;;  %v11873_v63 = vld [vmem:[#allocation72_spill] sm:$0xff]  ;;  %v8569_v8 = vpop.permute.xlu0 %2103 }
 0x24d   :  { %11865 = vst [vmem:[#allocation53_spill] sm:$0xff] %v8550_v15  ;;  %v1281_v18 = vmul.f32 %v11868_v4, %v11867_v38  ;;  %v1280_v9 = vmul.f32 %v11868_v4, %v11869_v54  ;;  %v8559_v0 = vadd.f32 %v875_v21, %v11870_v59  ;;  %v11872_v2 = vld [vmem:[#allocation71_spill] sm:$0xff]  ;;  %v1282_v34 = vmul.f32 %v11868_v4, %v11873_v63  ;;  %v11874_v40 = vld [vmem:[#allocation73_spill] sm:$0xff]  ;;  %v8567_v15 = vpop.permute.xlu1 %2108  ;;  %v11877_v38 = vld [vmem:[#allocation20_spill] sm:$0xff] }
 0x24e   :  { %v1283_v53 = vmul.f32 %v11868_v4, %v11872_v2  ;;  %v1285_v45 = vmul.f32 %v11868_v4, %v11874_v40  ;;  %11875 = vst [vmem:[#allocation55_spill] sm:$0xff] %v8567_v15  ;;  %11876 = vst [vmem:[#allocation5_spill] sm:$0xff] %v8569_v8  ;;  %v8572_v42 = vadd.f32 %v878_v28, %v11877_v38  ;;  %v11879_v54 = vld [vmem:[#allocation21_spill] sm:$0xff]  ;;  %v11881_v21 = vld [vmem:[#allocation74_spill] sm:$0xff] }
 0x24f   :  { %11871 = vst [vmem:[#allocation54_spill] sm:$0xff] %v8559_v0  ;;  %v8575_v36 = vadd.f32 %v877_v32, %v11879_v54  ;;  %v1284_v59 = vmul.f32 %v11868_v4, %v11881_v21  ;;  %v11882_v2 = vld [vmem:[#allocation75_spill] sm:$0xff]  ;;  %v11883_v63 = vld [vmem:[#allocation22_spill] sm:$0xff]  ;;  %v8585_v40 = vadd.f32 %v879_v47, %v8205_v37  ;;  %v8588_v8 = vadd.f32 %v882_v22, %v8209_v35  ;;  %v11887_v28 = vld [vmem:[#allocation76_spill] sm:$0xff] }
 0x250   :  { %11878 = vst [vmem:[#allocation56_spill] sm:$0xff] %v8572_v42  ;;  %v1287_v0 = vmul.f32 %v11868_v4, %v11882_v2  ;;  %v8582_v49 = vadd.f32 %v880_v29, %v11883_v63  ;;  %v1286_v32 = vmul.f32 %v11868_v4, %v11887_v28  ;;  %v11888_v38 = vld [vmem:[#allocation160_spill] sm:$0xff]  ;;  %v5806_v54 = vld [vmem:[%s11488_s0 + $0xb9] sm:$0x7]  ;;  %v8597_v52 = vadd.f32 %v881_v41, %v8213_v55  ;;  %v11890_v47 = vld [vmem:[#allocation77_spill] sm:$0xff]  ;;  %v8614_v41 = vpop.permute.xlu0 %2405 }
 0x251   :  { %11880 = vst [vmem:[#allocation57_spill] sm:$0xff] %v8575_v36  ;;  %11885 = vst [vmem:[#allocation7_spill] sm:$0xff] %v8585_v40  ;;  %2143 = vperm.xlu0 %6602, %v11888_v38   ;;  %v1337_v29 = vadd.f32 %v1281_v18, %v8222_v1  ;;  %v1336_v37 = vadd.f32 %v1280_v9, %v8225_v30  ;;  %v1289_v35 = vmul.f32 %v11868_v4, %v11890_v47  ;;  %v11891_v22 = vld [vmem:[#allocation25_spill] sm:$0xff]  ;;  %v11892_v2 = vld [vmem:[#allocation26_spill] sm:$0xff]  ;;  %v8612_v55 = vpop.permute.xlu1 %2410 }
 0x252   :  { %11884 = vst [vmem:[#allocation6_spill] sm:$0xff] %v8582_v49  ;;  %11886 = vst [vmem:[#allocation58_spill] sm:$0xff] %v8588_v8  ;;  %v8604_v21 = vadd.f32 %v1283_v53, %v11891_v22  ;;  %v1338_v63 = vadd.f32 %v1282_v34, %v11892_v2  ;;  %v11893_v28 = vld [vmem:[#allocation27_spill] sm:$0xff]  ;;  %v11894_v8 = vld [vmem:[#allocation78_spill] sm:$0xff]  ;;  %v8617_v1 = vadd.f32 %v1284_v59, %v8266_v46  ;;  %2450 = vperm.xlu1 %6603, %v5806_v54  }
 0x253   :  { %11889 = vst [vmem:[#allocation59_spill] sm:$0xff] %v8597_v52  ;;  %v8608_v38 = vadd.f32 %v1285_v45, %v11893_v28  ;;  %v1288_v40 = vmul.f32 %v11868_v4, %v11894_v8  ;;  %11895 = vst [vmem:[#allocation8_spill] sm:$0xff] %v8612_v55  ;;  %v8620_v30 = vadd.f32 %v1287_v0, %v8269_v12  ;;  %v11897_v53 = vld [vmem:[#allocation79_spill] sm:$0xff]  ;;  %v11898_v34 = vld [vmem:[#allocation80_spill] sm:$0xff] }
 0x254   :  { %11896 = vst [vmem:[#allocation9_spill] sm:$0xff] %v8614_v41  ;;  %v1291_v18 = vmul.f32 %v11868_v4, %v11897_v53  ;;  %v1290_v9 = vmul.f32 %v11868_v4, %v11898_v34  ;;  %v8627_v45 = vadd.f32 %v1286_v32, %v8276_v26  ;;  %v11899_v8 = vld [vmem:[#allocation81_spill] sm:$0xff]  ;;  %v11900_v22 = vld [vmem:[#allocation82_spill] sm:$0xff]  ;;  %v11901_v59 = vld [vmem:[#allocation83_spill] sm:$0xff]  ;;  %v8640_v54 = vadd.f32 %v1289_v35, %v8279_v10 }
 0x255   :  { %v1293_v47 = vmul.f32 %v11868_v4, %v11899_v8  ;;  %v1292_v46 = vmul.f32 %v11868_v4, %v11900_v22  ;;  %v1308_v12 = vmul.f32 %v11868_v4, %v11901_v59  ;;  %v11902_v0 = vld [vmem:[#allocation163_spill] sm:$0xff]  ;;  %v5834_v2 = vld [vmem:[%s11488_s0 + $0x1b9] sm:$0x7]  ;;  %v11903_v26 = vld [vmem:[#allocation84_spill] sm:$0xff]  ;;  %v8649_v22 = vadd.f32 %v1288_v40, %v8282_v3  ;;  %v8657_v36 = vpop.permute.xlu1 %2550 }
 0x256   :  { %2445 = vperm.xlu0 %6602, %v11902_v0   ;;  %v1294_v32 = vmul.f32 %v11868_v4, %v11903_v26  ;;  %v11904_v28 = vld [vmem:[#allocation85_spill] sm:$0xff]  ;;  %v11905_v34 = vld [vmem:[#allocation86_spill] sm:$0xff]  ;;  %v11906_v59 = vld [vmem:[#allocation87_spill] sm:$0xff]  ;;  %11909 = vst [vmem:[#allocation10_spill] sm:$0xff] %v8657_v36  ;;  %v8659_v26 = vpop.permute.xlu0 %2545  ;;  %2590 = vperm.xlu1 %6603, %v5834_v2  }
 0x257   :  { %v1310_v53 = vmul.f32 %v11868_v4, %v11904_v28  ;;  %v1309_v8 = vmul.f32 %v11868_v4, %v11905_v34  ;;  %v1312_v0 = vmul.f32 %v11868_v4, %v11906_v59  ;;  %v11907_v52 = vld [vmem:[#allocation88_spill] sm:$0xff]  ;;  %v11908_v10 = vld [vmem:[#allocation89_spill] sm:$0xff]  ;;  %11910 = vst [vmem:[#allocation60_spill] sm:$0xff] %v8659_v26  ;;  %v8662_v28 = vadd.f32 %v1291_v18, %v8291_v51  ;;  %v11911_v3 = vld [vmem:[#allocation90_spill] sm:$0xff] }
 0x258   :  { %v1311_v49 = vmul.f32 %v11868_v4, %v11907_v52  ;;  %v1732_v35 = vmul.f32 %v8299_v20, %v11908_v10  ;;  %v8665_v34 = vadd.f32 %v1290_v9, %v8294_v13  ;;  %v1313_v40 = vmul.f32 %v11868_v4, %v11911_v3  ;;  %v11912_v59 = vld [vmem:[#allocation91_spill] sm:$0xff]  ;;  %v11914_v51 = vld [vmem:[#allocation92_spill] sm:$0xff]  ;;  %v11915_v13 = vld [vmem:[#allocation166_spill] sm:$0xff] }
 0x259   :  { %v1734_v42 = vmul.f32 %v8299_v20, %v11912_v59  ;;  %v8672_v52 = vadd.f32 %v1293_v47, %v8307_v60  ;;  %v8675_v10 = vadd.f32 %v1292_v46, %v8310_v23  ;;  %v1364_v15 = vadd.f32 %v1308_v12, %v8418_v61  ;;  %v5646_v9 = vld [vmem:[%s11488_s0 + $0xe8] sm:$0x7]  ;;  %v11917_v23 = vld [vmem:[#allocation93_spill] sm:$0xff]  ;;  %v8694_v61 = vld [vmem:[%s11488_s0 + $0xe0] sm:$0xff] }
 0x25a   :  { %v1733_v18 = vmul.f32 %v8299_v20, %v11914_v51  ;;  %2585 = vperm.xlu0 %6602, %v11915_v13   ;;  %v8685_v3 = vadd.f32 %v1294_v32, %v8322_v25  ;;  %v1366_v60 = vadd.f32 %v1310_v53, %v8430_v43  ;;  %v1365_v47 = vadd.f32 %v1309_v8, %v8415_v57  ;;  %v11918_v25 = vld [vmem:[#allocation94_spill] sm:$0xff]  ;;  %v8702_v43 = vpop.permute.xlu1 %1093  ;;  %v11920_v8 = vld [vmem:[#allocation95_spill] sm:$0xff]  ;;  %v11933_v41 = vld [vmem:[#allocation124_spill] sm:$0xff] }
 0x25b   :  { %11913 = vst [vmem:[#allocation11_spill] sm:$0xff] %v8675_v10  ;;  %v1760_v46 = vmul.f32 %v8299_v20, %v11917_v23  ;;  %v8697_v12 = vadd.f32 %v1312_v0, %v8450_v16  ;;  %v1367_v2 = vadd.f32 %v1311_v49, %v8427_v5  ;;  %v1788_v59 = vadd.f32 %v1732_v35, %v1336_v37  ;;  %v11921_v13 = vld [vmem:[#allocation103_spill] sm:$0xff]  ;;  %v8711_v16 = vpop.permute.xlu0 %1088  ;;  %v11923_v49 = vld [vmem:[#allocation96_spill] sm:$0xff]  ;;  %v11924_v0 = vld [vmem:[#allocation97_spill] sm:$0xff] }
 0x25c   :  { %11916 = vst [vmem:[#allocation12_spill] sm:$0xff] %v8685_v3  ;;  %v1735_v32 = vmul.f32 %v8299_v20, %v11918_v25  ;;  %11919 = vst [vmem:[#allocation13_spill] sm:$0xff] %v8702_v43  ;;  %v8705_v57 = vadd.f32 %v1313_v40, %v8437_v62  ;;  %v1790_v53 = vadd.f32 %v1734_v42, %v1338_v63  ;;  %1133 = vperm.xlu1 %6603, %v5646_v9   ;;  %v11925_v25 = vld [vmem:[#allocation105_spill] sm:$0xff]  ;;  %v5674_v42 = vld [vmem:[%s11488_s0 + $0x1e8] sm:$0x7] }
 0x25d   :  { %v1762_v51 = vmul.f32 %v8299_v20, %v11920_v8  ;;  %v2185_v23 = vmul.f32 %v8404_v56, %v11921_v13  ;;  %11922 = vst [vmem:[#allocation61_spill] sm:$0xff] %v8711_v16  ;;  %v1789_v5 = vadd.f32 %v1733_v18, %v1337_v29  ;;  %v1761_v37 = vmul.f32 %v8299_v20, %v11923_v49  ;;  %v11926_v40 = vld [vmem:[#allocation106_spill] sm:$0xff]  ;;  %v11927_v29 = vld [vmem:[#allocation107_spill] sm:$0xff]  ;;  %v11928_v8 = vld [vmem:[#allocation121_spill] sm:$0xff] }
 0x25e   :  { %v1314_v35 = vmul.f32 %v11868_v4, %v11924_v0  ;;  %v2187_v62 = vmul.f32 %v8404_v56, %v11925_v25  ;;  %1128 = vperm.xlu0 %6602, %v8694_v61   ;;  %v1816_v63 = vadd.f32 %v1760_v46, %v1364_v15  ;;  %v2186_v9 = vmul.f32 %v8404_v56, %v11926_v40  ;;  %v8732_v49 = vld [vmem:[%s11488_s0 + $0x1e0] sm:$0xff]  ;;  %v11934_v55 = vld [vmem:[#allocation125_spill] sm:$0xff] }
 0x25f   :  { %v2213_v18 = vmul.f32 %v8404_v56, %v11927_v29  ;;  %v2637_v13 = vmul.f32 %v8520_v44, %v11928_v8  ;;  %v1791_v0 = vadd.f32 %v1735_v32, %v8604_v21  ;;  %v11929_v25 = vld [vmem:[#allocation98_spill] sm:$0xff]  ;;  %v11930_v15 = vld [vmem:[#allocation99_spill] sm:$0xff]  ;;  %v8741_v29 = vpop.permute.xlu1 %1233  ;;  %v1818_v3 = vadd.f32 %v1762_v51, %v1366_v60  ;;  %v8747_v21 = vpop.permute.xlu0 %1228 }
 0x260   :  { %v1763_v16 = vmul.f32 %v8299_v20, %v11929_v25  ;;  %v1736_v46 = vmul.f32 %v8299_v20, %v11930_v15  ;;  %v11931_v40 = vld [vmem:[#allocation123_spill] sm:$0xff]  ;;  %11932 = vst [vmem:[#allocation14_spill] sm:$0xff] %v8741_v29  ;;  %v2241_v8 = vadd.f32 %v2185_v23, %v1788_v59  ;;  %v2638_v26 = vmul.f32 %v8520_v44, %v11933_v41  ;;  %v11936_v15 = vld [vmem:[#allocation100_spill] sm:$0xff]  ;;  %v5700_v41 = vld [vmem:[%s11488_s0 + $0xd9] sm:$0x7] }
 0x261   :  { %v2639_v43 = vmul.f32 %v8520_v44, %v11931_v40  ;;  %v2665_v36 = vmul.f32 %v8520_v44, %v11934_v55  ;;  %11935 = vst [vmem:[#allocation62_spill] sm:$0xff] %v8747_v21  ;;  %1273 = vperm.xlu1 %6603, %v5674_v42   ;;  %v1817_v32 = vadd.f32 %v1761_v37, %v1365_v47  ;;  %v11937_v55 = vld [vmem:[#allocation109_spill] sm:$0xff]  ;;  %v11953_v29 = vld [vmem:[#allocation130_spill] sm:$0xff] }
 0x262   :  { %v8750_v25 = vadd.f32 %v1314_v35, %v8476_v58  ;;  %v1315_v40 = vmul.f32 %v11868_v4, %v11936_v15  ;;  %v2243_v10 = vadd.f32 %v2187_v62, %v1790_v53  ;;  %1268 = vperm.xlu0 %6602, %v8732_v49   ;;  %v2242_v60 = vadd.f32 %v2186_v9, %v1789_v5  ;;  %v8763_v58 = vld [vmem:[%s11488_s0 + $0xd1] sm:$0xff]  ;;  %v8773_v5 = vld [vmem:[%s11490_s2] ss:$0 sm:$0xff] }
 0x263   :  { %v2269_v59 = vadd.f32 %v2213_v18, %v1816_v63  ;;  %v2215_v51 = vmul.f32 %v8404_v56, %v11937_v55  ;;  %v2693_v23 = vadd.f32 %v2637_v13, %v2241_v8  ;;  %v1819_v47 = vadd.f32 %v1763_v16, %v1367_v2  ;;  %v11938_v37 = vld [vmem:[#allocation101_spill] sm:$0xff]  ;;  %v8775_v42 = vpop.permute.xlu1 %1535  ;;  %v11940_v63 = vld [vmem:[#allocation108_spill] sm:$0xff]  ;;  %v11941_v2 = vld [vmem:[#allocation127_spill] sm:$0xff]  ;;  %v8781_v16 = vpop.permute.xlu0 %1530 }
 0x264   :  { %v8766_v53 = vadd.f32 %v1736_v46, %v8617_v1  ;;  %v1764_v35 = vmul.f32 %v8299_v20, %v11938_v37  ;;  %v2695_v62 = vadd.f32 %v2639_v43, %v2243_v10  ;;  %11939 = vst [vmem:[#allocation63_spill] sm:$0xff] %v8775_v42  ;;  %v2188_v9 = vmul.f32 %v8404_v56, %v11940_v63  ;;  %v11943_v8 = vld [vmem:[#allocation102_spill] sm:$0xff]  ;;  %v11944_v10 = vld [vmem:[#allocation104_spill] sm:$0xff]  ;;  %v8804_v63 = vld [vmem:[%s11488_s0 + $0x1d1] sm:$0xff] }
 0x265   :  { %v2694_v18 = vadd.f32 %v2638_v26, %v2242_v60  ;;  %v2721_v13 = vadd.f32 %v2665_v36, %v2269_v59  ;;  %v2667_v1 = vmul.f32 %v8520_v44, %v11941_v2  ;;  %11942 = vst [vmem:[#allocation64_spill] sm:$0xff] %v8781_v16  ;;  %1575 = vperm.xlu1 %6603, %v5700_v41   ;;  %v11945_v55 = vld [vmem:[#allocation110_spill] sm:$0xff]  ;;  %v11946_v41 = vld [vmem:[#allocation111_spill] sm:$0xff] }
 0x266   :  { %v8784_v46 = vadd.f32 %v1315_v40, %v8464_v48  ;;  %v1737_v15 = vmul.f32 %v8299_v20, %v11943_v8  ;;  %v1765_v43 = vmul.f32 %v8299_v20, %v11944_v10  ;;  %v2214_v37 = vmul.f32 %v8404_v56, %v11945_v55  ;;  %1570 = vperm.xlu0 %6602, %v8763_v58   ;;  %v5728_v36 = vld [vmem:[%s11488_s0 + $0x1d9] sm:$0x7]  ;;  %v11948_v8 = vld [vmem:[#allocation112_spill] sm:$0xff] }
 0x267   :  { %v2271_v26 = vadd.f32 %v2215_v51, %v1818_v3  ;;  %v1316_v48 = vmul.f32 %v11868_v4, %v11946_v41  ;;  %v2756_v40 = vadd.f32 %v8773_v5, %v2693_v23  ;;  %v11947_v60 = vld [vmem:[#allocation126_spill] sm:$0xff]  ;;  %v1820_v2 = vadd.f32 %v1764_v35, %v8697_v12  ;;  %v11949_v51 = vld [vmem:[#allocation128_spill] sm:$0xff]  ;;  %v8812_v41 = vpop.permute.xlu1 %1675  ;;  %v8816_v21 = vpop.permute.xlu0 %1670 }
 0x268   :  { %v2640_v59 = vmul.f32 %v8520_v44, %v11947_v60  ;;  %v2216_v10 = vmul.f32 %v8404_v56, %v11948_v8  ;;  %v2758_v3 = vadd.f32 %v8773_v5, %v2695_v62  ;;  %v2666_v55 = vmul.f32 %v8520_v44, %v11949_v51  ;;  %11950 = vst [vmem:[#allocation17_spill] sm:$0xff] %v8812_v41  ;;  %v11952_v8 = vld [vmem:[#allocation113_spill] sm:$0xff] }
 0x269   :  { %v2244_v23 = vadd.f32 %v2188_v9, %v1791_v0  ;;  %v2757_v60 = vadd.f32 %v8773_v5, %v2694_v18  ;;  %v2784_v16 = vadd.f32 %v8773_v5, %v2721_v13  ;;  %v2723_v42 = vadd.f32 %v2667_v1, %v2271_v26  ;;  %11951 = vst [vmem:[#allocation65_spill] sm:$0xff] %v8816_v21  ;;  %v5754_v0 = vld [vmem:[%s11488_s0 + $0xd8] sm:$0x7]  ;;  %v11956_v26 = vld [vmem:[#allocation115_spill] sm:$0xff] }
 0x26a   :  { %1715 = vperm.xlu1 %6603, %v5728_v36   ;;  %v1793_v12 = vadd.f32 %v1737_v15, %v8608_v38  ;;  %v2270_v35 = vadd.f32 %v2214_v37, %v1817_v32  ;;  %v1738_v62 = vmul.f32 %v8299_v20, %v11952_v8  ;;  %v2668_v51 = vmul.f32 %v8520_v44, %v11953_v29  ;;  %v11954_v1 = vld [vmem:[#allocation114_spill] sm:$0xff] }
 0x26b   :  { %1710 = vperm.xlu0 %6602, %v8804_v63   ;;  %v1821_v9 = vadd.f32 %v1765_v43, %v8705_v57  ;;  %v8829_v18 = vadd.f32 %v1316_v48, %v8486_v33  ;;  %v2812_v38 = vmul.f32 0.01, %v2756_v40  ;;  %v2696_v32 = vadd.f32 %v2640_v59, %v2244_v23  ;;  %v8833_v36 = vpop.permute.xlu1 %1978  ;;  %v8838_v43 = vpop.permute.xlu0 %1973  ;;  %v11958_v48 = vld [vmem:[#allocation116_spill] sm:$0xff] }
 0x26c   :  { %v2272_v13 = vadd.f32 %v2216_v10, %v1819_v47  ;;  %v1317_v15 = vmul.f32 %v11868_v4, %v11954_v1  ;;  %v2814_v37 = vmul.f32 0.01, %v2758_v3  ;;  %v2722_v29 = vadd.f32 %v2666_v55, %v2270_v35  ;;  %11955 = vst [vmem:[#allocation66_spill] sm:$0xff] %v8833_v36  ;;  %11957 = vst [vmem:[#allocation67_spill] sm:$0xff] %v8838_v43  ;;  %v11959_v10 = vld [vmem:[#allocation117_spill] sm:$0xff] }
 0x26d   :  { %v1766_v8 = vmul.f32 %v8299_v20, %v11956_v26  ;;  %v2813_v21 = vmul.f32 0.01, %v2757_v60  ;;  %v2840_v57 = vmul.f32 0.01, %v2784_v16  ;;  %v2786_v33 = vadd.f32 %v8773_v5, %v2723_v42  ;;  %v5782_v35 = vld [vmem:[%s11488_s0 + $0x1d8] sm:$0x7] }
 0x26e   :  { %2018 = vperm.xlu1 %6603, %v5754_v0   ;;  %v8841_v47 = vadd.f32 %v1738_v62, %v8627_v45  ;;  %v1739_v59 = vmul.f32 %v8299_v20, %v11958_v48  ;;  %v2189_v55 = vmul.f32 %v8404_v56, %v11959_v10  ;;  %v2724_v23 = vadd.f32 %v2668_v51, %v2272_v13  ;;  %v11960_v42 = vld [vmem:[#allocation118_spill] sm:$0xff]  ;;  %v11961_v0 = vld [vmem:[#allocation119_spill] sm:$0xff]  ;;  %v11963_v51 = vld [vmem:[#allocation120_spill] sm:$0xff] }
 0x26f   :  { %2013 = vperm.xlu0 %6602, %v8304_v7   ;;  %v1767_v1 = vmul.f32 %v8299_v20, %v11960_v42  ;;  %v2217_v45 = vmul.f32 %v8404_v56, %v11961_v0  ;;  %v8855_v62 = vmax.f32 %v2756_v40, %v2812_v38  ;;  %v2759_v26 = vadd.f32 %v8773_v5, %v2696_v32  ;;  %v8866_v43 = vpop.permute.xlu1 %2118  ;;  %v8875_v32 = vpop.permute.xlu0 %2113 }
 0x270   :  { %v8859_v48 = vadd.f32 %v1317_v15, %v8479_v39  ;;  %v2190_v7 = vmul.f32 %v8404_v56, %v11963_v51  ;;  %v8863_v13 = vmax.f32 %v2758_v3, %v2814_v37  ;;  %v2785_v10 = vadd.f32 %v8773_v5, %v2722_v29  ;;  %11965 = vst [vmem:[#allocation68_spill] sm:$0xff] %v8866_v43  ;;  %v11969_v15 = vld [vmem:[#allocation122_spill] sm:$0xff] }
 0x271   :  { %11962 = vst [vmem:[#allocation157_spill] sm:$0xff] %v8855_v62  ;;  %v8869_v42 = vadd.f32 %v1766_v8, %v8750_v25  ;;  %v8871_v0 = vmax.f32 %v2757_v60, %v2813_v21  ;;  %v8873_v40 = vmax.f32 %v2784_v16, %v2840_v57  ;;  %v2842_v38 = vmul.f32 0.01, %v2786_v33  ;;  %11968 = vst [vmem:[#allocation70_spill] sm:$0xff] %v8875_v32  ;;  %v5808_v21 = vld [vmem:[%s11488_s0 + $0xc9] sm:$0x7] }
 0x272   :  { %11964 = vst [vmem:[#allocation18_spill] sm:$0xff] %v8863_v13  ;;  %2158 = vperm.xlu1 %6603, %v5782_v35   ;;  %v8878_v39 = vadd.f32 %v1739_v59, %v8620_v30  ;;  %v2245_v3 = vadd.f32 %v2189_v55, %v8766_v53  ;;  %v2218_v37 = vmul.f32 %v8404_v56, %v11969_v15  ;;  %v2815_v60 = vmul.f32 0.01, %v2759_v26  ;;  %v11970_v59 = vld [vmem:[#allocation141_spill] sm:$0xff]  ;;  %v11973_v15 = vld [vmem:[#allocation139_spill] sm:$0xff] }
 0x273   :  { %11966 = vst [vmem:[#allocation69_spill] sm:$0xff] %v8871_v0  ;;  %11967 = vst [vmem:[#allocation173_spill] sm:$0xff] %v8873_v40  ;;  %v2787_v29 = vadd.f32 %v8773_v5, %v2724_v23  ;;  %2153 = vperm.xlu0 %6602, %v8355_v27   ;;  %v8889_v25 = vadd.f32 %v1767_v1, %v8784_v46  ;;  %v2273_v16 = vadd.f32 %v2217_v45, %v1820_v2  ;;  %v8899_v55 = vpop.permute.xlu1 %2420  ;;  %v11972_v35 = vld [vmem:[#allocation129_spill] sm:$0xff]  ;;  %v8909_v1 = vpop.permute.xlu0 %2415 }
 0x274   :  { %v3073_v30 = vmul.f32 %v8855_v62, %v8855_v62  ;;  %v8893_v53 = vadd.f32 %v2190_v7, %v1793_v12  ;;  %v3075_v8 = vmul.f32 %v8863_v13, %v8863_v13  ;;  %v2841_v57 = vmul.f32 0.01, %v2785_v10 }
 0x275   :  { %v2669_v27 = vmul.f32 %v8520_v44, %v11970_v59  ;;  %v3074_v46 = vmul.f32 %v8871_v0, %v8871_v0  ;;  %v3101_v2 = vmul.f32 %v8873_v40, %v8873_v40  ;;  %v8905_v23 = vmax.f32 %v2786_v33, %v2842_v38  ;;  %v5836_v33 = vld [vmem:[%s11488_s0 + $0x1c9] sm:$0x7] }
 0x276   :  { %v1318_v12 = vmul.f32 %v11868_v4, %v11972_v35  ;;  %2460 = vperm.xlu1 %6603, %v5808_v21   ;;  %v2925_v45 = vsel %vm2924_vm0, %v8855_v62, 0.0  ;;  %v2274_v51 = vadd.f32 %v2218_v37, %v1821_v9  ;;  %v2843_v7 = vmul.f32 0.01, %v2787_v29 }
 0x277   :  { %11971 = vst [vmem:[#allocation19_spill] sm:$0xff] %v8905_v23  ;;  %v2641_v59 = vmul.f32 %v8520_v44, %v11973_v15  ;;  %2455 = vperm.xlu0 %6602, %v8409_v14   ;;  %v3129_v38 = vsel %vm2924_vm0, %v3073_v30, 0.0  ;;  %v2932_v35 = vsel %vm2924_vm0, %v8863_v13, 0.0  ;;  %v2929_v21 = vsel %vm2928_vm1, %v8871_v0, 0.0  ;;  %v8931_v41 = vpop.permute.xlu1 %2560 }
 0x278   :  { %v8924_v62 = vmax.f32 %v2759_v26, %v2815_v60  ;;  %v3135_v9 = vsel %vm2924_vm0, %v3075_v8, 0.0  ;;  %v2926_v37 = vsel %vm2924_vm0, %v8873_v40, 0.0  ;;  %v8929_v14 = vmax.f32 %v2785_v10, %v2841_v57  ;;  %v8942_v60 = vpop.permute.xlu0 %2555  ;;  %v11977_v57 = vld [vmem:[#allocation144_spill] sm:$0xff] }
 0x279   :  { %v2725_v15 = vadd.f32 %v2669_v27, %v2273_v16  ;;  %v8934_v30 = vsel %vm2928_vm1, %v3074_v46, 0.0  ;;  %v3130_v13 = vsel %vm2924_vm0, %v3101_v2, 0.0  ;;  %v3103_v0 = vmul.f32 %v8905_v23, %v8905_v23  ;;  %v5702_v46 = vld [vmem:[%s11488_s0 + $0xe9] sm:$0x7] }
 0x27a   :  { %11974 = vst [vmem:[#allocation71_spill] sm:$0xff] %v8924_v62  ;;  %11975 = vst [vmem:[#allocation72_spill] sm:$0xff] %v8929_v14  ;;  %v8940_v26 = vadd.f32 %v1318_v12, %v8492_v11  ;;  %2600 = vperm.xlu1 %6603, %v5836_v33   ;;  %v2933_v10 = vsel %vm2924_vm0, %v8905_v23, 0.0  ;;  %v8946_v16 = vmax.f32 %v2787_v29, %v2843_v7  ;;  %v11978_v12 = vld [vmem:[#allocation131_spill] sm:$0xff]  ;;  %v11979_v23 = vld [vmem:[#allocation142_spill] sm:$0xff]  ;;  %v2930_v7 = vsel %vm2928_vm1, %v8929_v14, 0.0 }
 0x27b   :  { %v2697_v8 = vadd.f32 %v2641_v59, %v2245_v3  ;;  %v2670_v27 = vmul.f32 %v8520_v44, %v11977_v57  ;;  %2595 = vperm.xlu0 %6602, %v8461_v50   ;;  %v2927_v11 = vadd.f32 %v2926_v37, %v2925_v45  ;;  %v3076_v2 = vmul.f32 %v8924_v62, %v8924_v62  ;;  %v8963_v3 = vld [vmem:[%s11488_s0 + $0xe1] sm:$0xff]  ;;  %v11980_v59 = vld [vmem:[#allocation132_spill] sm:$0xff]  ;;  %v8970_v57 = vpop.permute.xlu1 %1103 }
 0x27c   :  { %11976 = vst [vmem:[#allocation73_spill] sm:$0xff] %v8946_v16  ;;  %v1740_v33 = vmul.f32 %v8299_v20, %v11978_v12  ;;  %v2642_v29 = vmul.f32 %v8520_v44, %v11979_v23  ;;  %v3131_v50 = vadd.f32 %v3130_v13, %v3129_v38  ;;  %v1319_v45 = vmul.f32 %v11868_v4, %v11980_v59  ;;  %v8977_v13 = vpop.permute.xlu0 %1098 }
 0x27d   :  { %v2788_v37 = vadd.f32 %v8773_v5, %v2725_v15  ;;  %11981 = vst [vmem:[#allocation20_spill] sm:$0xff] %v8970_v57  ;;  %v2935_v12 = vsel %vm2928_vm1, %v8924_v62, 0.0  ;;  %v2934_v23 = vadd.f32 %v2933_v10, %v2932_v35  ;;  %v3136_v40 = vsel %vm2924_vm0, %v3103_v0, 0.0  ;;  %11982 = vst [vmem:[#allocation21_spill] sm:$0xff] %v8977_v13  ;;  %v5730_v0 = vld [vmem:[%s11488_s0 + $0x1e9] sm:$0x7] }
 0x27e   :  { %v3102_v32 = vmul.f32 %v8929_v14, %v8929_v14  ;;  %1585 = vperm.xlu1 %6603, %v5702_v46   ;;  %v2936_v38 = vsel %vm2928_vm1, %v8946_v16, 0.0  ;;  %v3104_v15 = vmul.f32 %v8946_v16, %v8946_v16  ;;  %v2760_v59 = vadd.f32 %v8773_v5, %v2697_v8  ;;  %v8994_v16 = vld [vmem:[%s11488_s0 + $0x1e1] sm:$0xff]  ;;  %v11985_v13 = vld [vmem:[#allocation137_spill] sm:$0xff] }
 0x27f   :  { %v2726_v57 = vadd.f32 %v2670_v27, %v2274_v51  ;;  %1580 = vperm.xlu0 %6602, %v8963_v3   ;;  %v3010_v35 = vsel %vm2924_vm0, %v2927_v11, 0.0  ;;  %v3138_v10 = vsel %vm2928_vm1, %v3076_v2, 0.0  ;;  %v2931_v46 = vadd.f32 %v2930_v7, %v2929_v21  ;;  %v9003_v11 = vpop.permute.xlu1 %1243 }
 0x280   :  { %v2698_v14 = vadd.f32 %v2642_v29, %v8893_v53  ;;  %v3213_v51 = vsel %vm2924_vm0, %v3131_v50, 0.0  ;;  %v8998_v8 = vadd.f32 %v1740_v33, %v8649_v22  ;;  %v9001_v27 = vadd.f32 %v1319_v45, %v8489_v19  ;;  %11983 = vst [vmem:[#allocation74_spill] sm:$0xff] %v9003_v11  ;;  %v9007_v7 = vpop.permute.xlu0 %1238 }
 0x281   :  { %v2844_v62 = vmul.f32 0.01, %v2788_v37  ;;  %v3011_v21 = vsel %vm2924_vm0, %v2934_v23, 0.0  ;;  %v3137_v2 = vadd.f32 %v3136_v40, %v3135_v9  ;;  %v3133_v53 = vsel %vm2928_vm1, %v3102_v32, 0.0  ;;  %11984 = vst [vmem:[#allocation75_spill] sm:$0xff] %v9007_v7  ;;  %v11986_v9 = vld [vmem:[#allocation133_spill] sm:$0xff] }
 0x282   :  { %v2937_v29 = vadd.f32 %v2936_v38, %v2935_v12  ;;  %1725 = vperm.xlu1 %6603, %v5730_v0   ;;  %v3139_v50 = vsel %vm2928_vm1, %v3104_v15, 0.0  ;;  %v2219_v22 = vmul.f32 %v8404_v56, %v11985_v13  ;;  %v2816_v33 = vmul.f32 0.01, %v2760_v59  ;;  %v5756_v40 = vld [vmem:[%s11488_s0 + $0xe8] sm:$0x7]  ;;  %v11987_v12 = vld [vmem:[#allocation134_spill] sm:$0xff] }
 0x283   :  { %v2789_v19 = vadd.f32 %v8773_v5, %v2726_v57  ;;  %1720 = vperm.xlu0 %6602, %v8994_v16   ;;  %v3037_v32 = vsel %vm2928_vm1, %v2931_v46, 0.0  ;;  %v1768_v45 = vmul.f32 %v8299_v20, %v11986_v9  ;;  %v1741_v23 = vmul.f32 %v8299_v20, %v11987_v12  ;;  %v11988_v15 = vld [vmem:[#allocation135_spill] sm:$0xff]  ;;  %v9031_v36 = vpop.permute.xlu1 %1545 }
 0x284   :  { %v2761_v38 = vadd.f32 %v8773_v5, %v2698_v14  ;;  %v9023_v13 = vadd.f32 %v3011_v21, %v3010_v35  ;;  %v2191_v57 = vmul.f32 %v8404_v56, %v11988_v15  ;;  %v9027_v0 = vmax.f32 %v2788_v37, %v2844_v62  ;;  %v11990_v7 = vld [vmem:[#allocation155_spill] sm:$0xff]  ;;  %v9036_v14 = vpop.permute.xlu0 %1540  ;;  %v11992_v37 = vld [vmem:[#allocation153_spill] sm:$0xff] }
 0x285   :  { %v2671_v11 = vmul.f32 %v8520_v44, %v11990_v7  ;;  %v3214_v46 = vsel %vm2924_vm0, %v3137_v2, 0.0  ;;  %v3134_v9 = vadd.f32 %v3133_v53, %v8934_v30  ;;  %v3038_v12 = vsel %vm2928_vm1, %v2937_v29, 0.0  ;;  %v5784_v30 = vld [vmem:[%s11488_s0 + $0x1e8] sm:$0x7] }
 0x286   :  { %11989 = vst [vmem:[#allocation22_spill] sm:$0xff] %v9027_v0  ;;  %v3140_v43 = vadd.f32 %v3139_v50, %v3138_v10  ;;  %2028 = vperm.xlu1 %6603, %v5756_v40   ;;  %v2275_v35 = vadd.f32 %v2219_v22, %v8869_v42  ;;  %v9039_v21 = vmax.f32 %v2760_v59, %v2816_v33  ;;  %v2845_v62 = vmul.f32 0.01, %v2789_v19  ;;  %v11993_v53 = vld [vmem:[#allocation136_spill] sm:$0xff] }
 0x287   :  { %v2643_v7 = vmul.f32 %v8520_v44, %v11992_v37  ;;  %2023 = vperm.xlu0 %6602, %v8694_v61   ;;  %v9048_v2 = vadd.f32 %v1768_v45, %v8829_v18  ;;  %v9051_v10 = vadd.f32 %v1741_v23, %v8640_v54  ;;  %v1769_v42 = vmul.f32 %v8299_v20, %v11993_v53  ;;  %v9060_v33 = vpop.permute.xlu1 %1685  ;;  %v11995_v45 = vld [vmem:[#allocation138_spill] sm:$0xff] }
 0x288   :  { %11991 = vst [vmem:[#allocation76_spill] sm:$0xff] %v9039_v21  ;;  %v2817_v59 = vmul.f32 0.01, %v2761_v38  ;;  %v9055_v29 = vadd.f32 %v3214_v46, %v3213_v51  ;;  %v2247_v50 = vadd.f32 %v2191_v57, %v8841_v47  ;;  %v2939_v61 = vsel %vm2924_vm0, %v9027_v0, 0.0  ;;  %11994 = vst [vmem:[#allocation160_spill] sm:$0xff] %v9060_v33  ;;  %v9068_v15 = vpop.permute.xlu0 %1680  ;;  %v11997_v51 = vld [vmem:[#allocation140_spill] sm:$0xff] }
 0x289   :  { %v2727_v22 = vadd.f32 %v2671_v11, %v2275_v35  ;;  %v3240_v18 = vsel %vm2928_vm1, %v3134_v9, 0.0  ;;  %v9063_v40 = vadd.f32 %v3038_v12, %v3037_v32  ;;  %v3241_v54 = vsel %vm2928_vm1, %v3140_v43, 0.0  ;;  %11996 = vst [vmem:[#allocation77_spill] sm:$0xff] %v9068_v15  ;;  %v5810_v43 = vld [vmem:[%s11488_s0 + $0xd9] sm:$0x7]  ;;  %v12018_v33 = vld [vmem:[#allocation24_spill] sm:$0xff] }
 0x28a   :  { %v2192_v23 = vmul.f32 %v8404_v56, %v11995_v45  ;;  %2168 = vperm.xlu1 %6603, %v5784_v30   ;;  %v2938_v47 = vsel %vm2924_vm0, %v9039_v21, 0.0  ;;  %v2220_v11 = vmul.f32 %v8404_v56, %v11997_v51  ;;  %v9074_v57 = vmax.f32 %v2789_v19, %v2845_v62  ;;  %v12000_v62 = vld [vmem:[#allocation156_spill] sm:$0xff]  ;;  %v12005_v45 = vld [vmem:[#allocation146_spill] sm:$0xff] }
 0x28b   :  { %v2699_v46 = vadd.f32 %v2643_v7, %v2247_v50  ;;  %2163 = vperm.xlu0 %6602, %v8732_v49   ;;  %v9081_v32 = vadd.f32 %v1769_v42, %v8859_v48  ;;  %v2940_v9 = vadd.f32 %v2939_v61, %v2938_v47  ;;  %v3105_v12 = vmul.f32 %v9027_v0, %v9027_v0  ;;  %v12001_v7 = vld [vmem:[#allocation159_spill] sm:$0xff]  ;;  %v9094_v53 = vpop.permute.xlu1 %1988  ;;  %v5838_v47 = vld [vmem:[%s11488_s0 + $0x1d9] sm:$0x7] }
 0x28c   :  { %11998 = vst [vmem:[#allocation25_spill] sm:$0xff] %v9074_v57  ;;  %v9085_v35 = vmax.f32 %v2761_v38, %v2817_v59  ;;  %v9087_v37 = vadd.f32 %v3241_v54, %v3240_v18  ;;  %v2790_v19 = vadd.f32 %v8773_v5, %v2727_v22  ;;  %v2644_v49 = vmul.f32 %v8520_v44, %v12000_v62  ;;  %v12002_v50 = vld [vmem:[#allocation143_spill] sm:$0xff]  ;;  %v12003_v59 = vld [vmem:[#allocation145_spill] sm:$0xff]  ;;  %v9103_v22 = vpop.permute.xlu0 %1983 }
 0x28d   :  { %v2672_v30 = vmul.f32 %v8520_v44, %v12001_v7  ;;  %v2248_v48 = vadd.f32 %v2192_v23, %v8878_v39  ;;  %v3077_v42 = vmul.f32 %v9039_v21, %v9039_v21  ;;  %v1320_v38 = vmul.f32 %v11868_v4, %v12002_v50  ;;  %12004 = vst [vmem:[#allocation27_spill] sm:$0xff] %v9103_v22 }
 0x28e   :  { %11999 = vst [vmem:[#allocation26_spill] sm:$0xff] %v9085_v35  ;;  %v1742_v61 = vmul.f32 %v8299_v20, %v12003_v59  ;;  %2470 = vperm.xlu1 %6603, %v5810_v43   ;;  %v2276_v18 = vadd.f32 %v2220_v11, %v8889_v25  ;;  %v3106_v54 = vmul.f32 %v9074_v57, %v9074_v57  ;;  %v3013_v51 = vsel %vm2924_vm0, %v2940_v9, 0.0  ;;  %v12006_v11 = vld [vmem:[#allocation147_spill] sm:$0xff] }
 0x28f   :  { %v1321_v39 = vmul.f32 %v11868_v4, %v12005_v45  ;;  %v2762_v23 = vadd.f32 %v8773_v5, %v2699_v46  ;;  %2465 = vperm.xlu0 %6602, %v8763_v58   ;;  %v3142_v43 = vsel %vm2924_vm0, %v3105_v12, 0.0  ;;  %v3078_v25 = vmul.f32 %v9085_v35, %v9085_v35  ;;  %v9123_v59 = vpop.permute.xlu1 %2128 }
 0x290   :  { %v1770_v62 = vmul.f32 %v8299_v20, %v12006_v11  ;;  %v2942_v7 = vsel %vm2928_vm1, %v9074_v57, 0.0  ;;  %v2846_v46 = vmul.f32 0.01, %v2790_v19  ;;  %v2700_v50 = vadd.f32 %v2644_v49, %v2248_v48  ;;  %v9134_v11 = vpop.permute.xlu0 %2123 }
 0x291   :  { %v2728_v58 = vadd.f32 %v2672_v30, %v2276_v18  ;;  %v3141_v45 = vsel %vm2924_vm0, %v3077_v42, 0.0  ;;  %v2941_v9 = vsel %vm2928_vm1, %v9085_v35, 0.0  ;;  %v9129_v12 = vadd.f32 %v1320_v38, %v8504_v31  ;;  %12007 = vst [vmem:[#allocation78_spill] sm:$0xff] %v9134_v11  ;;  %v12008_v30 = vld [vmem:[#allocation148_spill] sm:$0xff]  ;;  %v5758_v31 = vld [vmem:[%s11488_s0 + $0xf8] sm:$0x7] }
 0x292   :  { %v9132_v0 = vadd.f32 %v1742_v61, %v8665_v34  ;;  %2610 = vperm.xlu1 %6603, %v5838_v47   ;;  %v3143_v57 = vadd.f32 %v3142_v43, %v3141_v45  ;;  %v3145_v49 = vsel %vm2928_vm1, %v3106_v54, 0.0  ;;  %v1743_v48 = vmul.f32 %v8299_v20, %v12008_v30  ;;  %v5757_v54 = vld [vmem:[%s11488_s0 + $0xf0] sm:$0xff] }
 0x293   :  { %v2818_v18 = vmul.f32 0.01, %v2762_v23  ;;  %2605 = vperm.xlu0 %6602, %v8804_v63   ;;  %v9144_v42 = vadd.f32 %v3013_v51, %v9023_v13  ;;  %v3144_v34 = vsel %vm2928_vm1, %v3078_v25, 0.0  ;;  %v2943_v38 = vadd.f32 %v2942_v7, %v2941_v9  ;;  %v9160_v51 = vpop.permute.xlu1 %2430  ;;  %v12010_v7 = vld [vmem:[#allocation149_spill] sm:$0xff]  ;;  %v12012_v9 = vld [vmem:[#allocation154_spill] sm:$0xff] }
 0x294   :  { %v9148_v61 = vadd.f32 %v1321_v39, %v8501_v17  ;;  %v9154_v47 = vadd.f32 %v1770_v62, %v8940_v26  ;;  %v9156_v63 = vmax.f32 %v2790_v19, %v2846_v46  ;;  %v2763_v43 = vadd.f32 %v8773_v5, %v2700_v50  ;;  %v12011_v39 = vld [vmem:[#allocation152_spill] sm:$0xff]  ;;  %v9168_v26 = vpop.permute.xlu0 %2425  ;;  %v12013_v46 = vld [vmem:[#allocation151_spill] sm:$0xff] }
 0x295   :  { %v2791_v13 = vadd.f32 %v8773_v5, %v2728_v58  ;;  %v3146_v25 = vadd.f32 %v3145_v49, %v3144_v34  ;;  %v2193_v17 = vmul.f32 %v8404_v56, %v12010_v7  ;;  %v2194_v45 = vmul.f32 %v8404_v56, %v12011_v39  ;;  %v5786_v49 = vld [vmem:[%s11488_s0 + $0x1f8] sm:$0x7]  ;;  %v12016_v39 = vld [vmem:[#allocation23_spill] sm:$0xff] }
 0x296   :  { %12009 = vst [vmem:[#allocation79_spill] sm:$0xff] %v9156_v63  ;;  %v2222_v30 = vmul.f32 %v8404_v56, %v12012_v9  ;;  %2038 = vperm.xlu1 %6603, %v5758_v31   ;;  %v3216_v19 = vsel %vm2924_vm0, %v3143_v57, 0.0  ;;  %v9172_v62 = vadd.f32 %v1743_v48, %v8662_v28  ;;  %v2221_v50 = vmul.f32 %v8404_v56, %v12013_v46  ;;  %v12015_v7 = vld [vmem:[#allocation150_spill] sm:$0xff]  ;;  %v12017_v9 = vld [vmem:[#allocation28_spill] sm:$0xff] }
 0x297   :  { %v9176_v58 = vmax.f32 %v2762_v23, %v2818_v18  ;;  %2033 = vperm.xlu0 %6602, %v5757_v54   ;;  %v3040_v34 = vsel %vm2928_vm1, %v2943_v38, 0.0  ;;  %v1771_v31 = vmul.f32 %v8299_v20, %v12015_v7  ;;  %v2646_v57 = vmul.f32 %v8520_v44, %v12016_v39  ;;  %v5785_v23 = vld [vmem:[%s11488_s0 + $0x1f0] sm:$0xff]  ;;  %v9195_v46 = vpop.permute.xlu1 %2570 }
 0x298   :  { %v2674_v28 = vmul.f32 %v8520_v44, %v8261_v6  ;;  %v3107_v48 = vmul.f32 %v9156_v63, %v9156_v63  ;;  %v2819_v18 = vmul.f32 0.01, %v2763_v43  ;;  %v2847_v54 = vmul.f32 0.01, %v2791_v13  ;;  %v9201_v35 = vpop.permute.xlu0 %2565 }
 0x299   :  { %12014 = vst [vmem:[#allocation80_spill] sm:$0xff] %v9176_v58  ;;  %v2673_v38 = vmul.f32 %v8520_v44, %v12017_v9  ;;  %v3243_v7 = vsel %vm2928_vm1, %v3146_v25, 0.0  ;;  %v2249_v39 = vadd.f32 %v2193_v17, %v8998_v8  ;;  %v2250_v6 = vadd.f32 %v2194_v45, %v9051_v10  ;;  %v5812_v8 = vld [vmem:[%s11488_s0 + $0xe9] sm:$0x7] }
 0x29a   :  { %v2278_v21 = vadd.f32 %v2222_v30, %v9081_v32  ;;  %2178 = vperm.xlu1 %6603, %v5786_v49   ;;  %v2277_v22 = vadd.f32 %v2221_v50, %v9048_v2  ;;  %v3079_v15 = vmul.f32 %v9176_v58, %v9176_v58  ;;  %v2945_v9 = vsel %vm2924_vm0, %v9156_v63, 0.0  ;;  %v12019_v32 = vld [vmem:[#allocation158_spill] sm:$0xff] }
 0x29b   :  { %v2645_v25 = vmul.f32 %v8520_v44, %v12018_v33  ;;  %2173 = vperm.xlu0 %6602, %v5785_v23   ;;  %v2944_v10 = vsel %vm2924_vm0, %v9176_v58, 0.0  ;;  %v1295_v2 = vmul.f32 %v11868_v4, %v12019_v32  ;;  %v2702_v17 = vadd.f32 %v2646_v57, %v2250_v6  ;;  %v9222_v23 = vpop.permute.xlu1 %1113  ;;  %v12025_v6 = vld [vmem:[#allocation165_spill] sm:$0xff] }
 0x29c   :  { %v2730_v45 = vadd.f32 %v2674_v28, %v2278_v21  ;;  %v3148_v30 = vsel %vm2924_vm0, %v3107_v48, 0.0  ;;  %v9218_v50 = vmax.f32 %v2763_v43, %v2819_v18  ;;  %v9220_v49 = vmax.f32 %v2791_v13, %v2847_v54  ;;  %v9231_v57 = vpop.permute.xlu0 %1108  ;;  %v12022_v43 = vld [vmem:[#allocation161_spill] sm:$0xff] }
 0x29d   :  { %v2729_v33 = vadd.f32 %v2673_v38, %v2277_v22  ;;  %v3217_v63 = vadd.f32 %v3216_v19, %v9055_v29  ;;  %v9226_v11 = vadd.f32 %v3040_v34, %v9063_v40  ;;  %v9229_v58 = vadd.f32 %v1771_v31, %v9001_v27  ;;  %v12023_v22 = vld [vmem:[#allocation162_spill] sm:$0xff]  ;;  %v5840_v27 = vld [vmem:[%s11488_s0 + $0x1e9] sm:$0x7] }
 0x29e   :  { %12020 = vst [vmem:[#allocation81_spill] sm:$0xff] %v9218_v50  ;;  %12021 = vst [vmem:[#allocation82_spill] sm:$0xff] %v9220_v49  ;;  %v2946_v32 = vadd.f32 %v2945_v9, %v2944_v10  ;;  %2480 = vperm.xlu1 %6603, %v5812_v8   ;;  %v3147_v21 = vsel %vm2924_vm0, %v3079_v15, 0.0  ;;  %v1323_v13 = vmul.f32 %v11868_v4, %v12022_v43  ;;  %v12026_v8 = vld [vmem:[#allocation172_spill] sm:$0xff] }
 0x29f   :  { %v1322_v28 = vmul.f32 %v11868_v4, %v12023_v22  ;;  %v2701_v48 = vadd.f32 %v2645_v25, %v2249_v39  ;;  %2475 = vperm.xlu0 %6602, %v8963_v3   ;;  %v9243_v29 = vadd.f32 %v3243_v7, %v9087_v37  ;;  %v3149_v40 = vadd.f32 %v3148_v30, %v3147_v21  ;;  %v9255_v54 = vpop.permute.xlu1 %1253  ;;  %v12024_v7 = vld [vmem:[#allocation164_spill] sm:$0xff]  ;;  %v5814_v30 = vld [vmem:[%s11488_s0 + $0xf9] sm:$0x7] }
 0x2a0   :  { %v2765_v19 = vadd.f32 %v8773_v5, %v2702_v17  ;;  %v2793_v15 = vadd.f32 %v8773_v5, %v2730_v45  ;;  %v3080_v34 = vmul.f32 %v9218_v50, %v9218_v50  ;;  %v9250_v31 = vadd.f32 %v1295_v2, %v8313_v24  ;;  %v9264_v24 = vpop.permute.xlu0 %1248  ;;  %v12027_v2 = vld [vmem:[#allocation48_spill] sm:$0xff] }
 0x2a1   :  { %v2948_v3 = vsel %vm2928_vm1, %v9220_v49, 0.0  ;;  %v2792_v18 = vadd.f32 %v8773_v5, %v2729_v33  ;;  %v3015_v37 = vsel %vm2924_vm0, %v2946_v32, 0.0  ;;  %v3108_v38 = vmul.f32 %v9220_v49, %v9220_v49  ;;  %v12033_v49 = vld [vmem:[#allocation15_spill] sm:$0xff] }
 0x2a2   :  { %v1745_v39 = vmul.f32 %v8299_v20, %v12024_v7  ;;  %v1744_v9 = vmul.f32 %v8299_v20, %v12025_v6  ;;  %2620 = vperm.xlu1 %6603, %v5840_v27   ;;  %v2947_v25 = vsel %vm2928_vm1, %v9218_v50, 0.0  ;;  %v9269_v10 = vadd.f32 %v1323_v13, %v12026_v8  ;;  %v5813_v13 = vld [vmem:[%s11488_s0 + $0xf1] sm:$0xff]  ;;  %v12029_v6 = vld [vmem:[#allocation11_spill] sm:$0xff]  ;;  %v12030_v8 = vld [vmem:[#allocation168_spill] sm:$0xff] }
 0x2a3   :  { %v9272_v17 = vadd.f32 %v1322_v28, %v12027_v2  ;;  %v2764_v45 = vadd.f32 %v8773_v5, %v2701_v48  ;;  %2615 = vperm.xlu0 %6602, %v8994_v16   ;;  %v3218_v33 = vsel %vm2924_vm0, %v3149_v40, 0.0  ;;  %v2949_v32 = vadd.f32 %v2948_v3, %v2947_v25  ;;  %v12028_v48 = vld [vmem:[#allocation167_spill] sm:$0xff]  ;;  %v9289_v7 = vpop.permute.xlu1 %1555  ;;  %v12032_v2 = vld [vmem:[#allocation170_spill] sm:$0xff] }
 0x2a4   :  { %v2821_v21 = vmul.f32 0.01, %v2765_v19  ;;  %v2849_v43 = vmul.f32 0.01, %v2793_v15  ;;  %v9284_v22 = vadd.f32 %v3015_v37, %v9144_v42  ;;  %v3150_v28 = vsel %vm2928_vm1, %v3080_v34, 0.0  ;;  %v9300_v37 = vpop.permute.xlu0 %1550 }
 0x2a5   :  { %v1773_v16 = vmul.f32 %v8299_v20, %v12028_v48  ;;  %v2848_v27 = vmul.f32 0.01, %v2792_v18  ;;  %v3151_v40 = vsel %vm2928_vm1, %v3108_v38, 0.0  ;;  %v9293_v3 = vadd.f32 %v1745_v39, %v8672_v52  ;;  %12031 = vst [vmem:[#allocation83_spill] sm:$0xff] %v9300_v37  ;;  %v5842_v52 = vld [vmem:[%s11488_s0 + $0x1f9] sm:$0x7] }
 0x2a6   :  { %v9296_v25 = vadd.f32 %v1744_v9, %v12029_v6  ;;  %v1772_v42 = vmul.f32 %v8299_v20, %v12030_v8  ;;  %2490 = vperm.xlu1 %6603, %v5814_v30   ;;  %v9302_v34 = vadd.f32 %v3218_v33, %v3217_v63  ;;  %v2196_v48 = vmul.f32 %v8404_v56, %v12032_v2  ;;  %v12034_v9 = vld [vmem:[#allocation16_spill] sm:$0xff]  ;;  %v5841_v33 = vld [vmem:[%s11488_s0 + $0x1f1] sm:$0xff]  ;;  %v12038_v2 = vld [vmem:[#allocation10_spill] sm:$0xff] }
 0x2a7   :  { %v2224_v38 = vmul.f32 %v8404_v56, %v12033_v49  ;;  %v2820_v50 = vmul.f32 0.01, %v2764_v45  ;;  %2485 = vperm.xlu0 %6602, %v5813_v13   ;;  %v3042_v39 = vsel %vm2928_vm1, %v2949_v32, 0.0  ;;  %v2223_v6 = vmul.f32 %v8404_v56, %v12034_v9  ;;  %v9328_v37 = vpop.permute.xlu1 %1695 }
 0x2a8   :  { %v9314_v30 = vmax.f32 %v2765_v19, %v2821_v21  ;;  %v9316_v63 = vmax.f32 %v2793_v15, %v2849_v43  ;;  %v3152_v49 = vadd.f32 %v3151_v40, %v3150_v28  ;;  %v9322_v13 = vadd.f32 %v1773_v16, %v9148_v61  ;;  %12039 = vst [vmem:[#allocation86_spill] sm:$0xff] %v9328_v37  ;;  %v12040_v15 = vld [vmem:[#allocation171_spill] sm:$0xff]  ;;  %v12041_v43 = vld [vmem:[#allocation8_spill] sm:$0xff]  ;;  %v9339_v16 = vpop.permute.xlu0 %1690 }
 0x2a9   :  { %v9324_v8 = vmax.f32 %v2792_v18, %v2848_v27  ;;  %v2676_v32 = vmul.f32 %v8520_v44, %v12038_v2  ;;  %v9331_v19 = vadd.f32 %v1772_v42, %v9129_v12  ;;  %v2195_v21 = vmul.f32 %v8404_v56, %v12040_v15  ;;  %v12042_v28 = vld [vmem:[#allocation60_spill] sm:$0xff]  ;;  %12043 = vst [vmem:[#allocation87_spill] sm:$0xff] %v9339_v16 }
 0x2aa   :  { %12035 = vst [vmem:[#allocation163_spill] sm:$0xff] %v9314_v30  ;;  %12036 = vst [vmem:[#allocation84_spill] sm:$0xff] %v9316_v63  ;;  %v2648_v9 = vmul.f32 %v8520_v44, %v12041_v43  ;;  %v2675_v61 = vmul.f32 %v8520_v44, %v12042_v28  ;;  %2630 = vperm.xlu1 %6603, %v5842_v52   ;;  %v3043_v18 = vadd.f32 %v3042_v39, %v9226_v11  ;;  %v12045_v43 = vld [vmem:[#allocation9_spill] sm:$0xff] }
 0x2ab   :  { %12037 = vst [vmem:[#allocation85_spill] sm:$0xff] %v9324_v8  ;;  %v2252_v27 = vadd.f32 %v2196_v48, %v9172_v62  ;;  %v2280_v40 = vadd.f32 %v2224_v38, %v9229_v58  ;;  %v9344_v12 = vmax.f32 %v2764_v45, %v2820_v50  ;;  %2625 = vperm.xlu0 %6602, %v5841_v33   ;;  %v2954_v11 = vsel %vm2928_vm1, %v9316_v63, 0.0 }
 0x2ac   :  { %v2279_v42 = vadd.f32 %v2223_v6, %v9154_v47  ;;  %v3082_v2 = vmul.f32 %v9314_v30, %v9314_v30  ;;  %v3110_v15 = vmul.f32 %v9316_v63, %v9316_v63  ;;  %v2647_v52 = vmul.f32 %v8520_v44, %v12045_v43  ;;  %v9359_v47 = vpop.permute.xlu1 %1998  ;;  %v9363_v6 = vpop.permute.xlu0 %1993 }
 0x2ad   :  { %12044 = vst [vmem:[#allocation88_spill] sm:$0xff] %v9344_v12  ;;  %v2951_v62 = vsel %vm2924_vm0, %v9324_v8, 0.0  ;;  %v3109_v58 = vmul.f32 %v9324_v8, %v9324_v8  ;;  %v2732_v50 = vadd.f32 %v2676_v32, %v2280_v40  ;;  %12046 = vst [vmem:[#allocation89_spill] sm:$0xff] %v9359_v47  ;;  %v3245_v45 = vsel %vm2928_vm1, %v3152_v49, 0.0  ;;  %v12048_v32 = vld [vmem:[#allocation29_spill] sm:$0xff] }
 0x2ae   :  { %v2251_v48 = vadd.f32 %v2195_v21, %v9132_v0  ;;  %v2704_v38 = vadd.f32 %v2648_v9, %v2252_v27  ;;  %v2731_v39 = vadd.f32 %v2675_v61, %v2279_v42  ;;  %12047 = vst [vmem:[#allocation90_spill] sm:$0xff] %v9363_v6  ;;  %v2953_v33 = vsel %vm2928_vm1, %v9314_v30, 0.0  ;;  %v12049_v27 = vld [vmem:[#allocation30_spill] sm:$0xff] }
 0x2af   :  { %v2950_v28 = vsel %vm2924_vm0, %v9344_v12, 0.0  ;;  %v3081_v43 = vmul.f32 %v9344_v12, %v9344_v12  ;;  %v1297_v40 = vmul.f32 %v11868_v4, %v12048_v32  ;;  %v2955_v8 = vadd.f32 %v2954_v11, %v2953_v33  ;;  %v12051_v12 = vld [vmem:[#allocation35_spill] sm:$0xff]  ;;  %v12052_v32 = vld [vmem:[#allocation36_spill] sm:$0xff] }
 0x2b0   :  { %v3157_v49 = vsel %vm2928_vm1, %v3110_v15, 0.0  ;;  %v2952_v0 = vadd.f32 %v2951_v62, %v2950_v28  ;;  %v2703_v21 = vadd.f32 %v2647_v52, %v2251_v48  ;;  %v3156_v9 = vsel %vm2928_vm1, %v3082_v2, 0.0  ;;  %v9379_v30 = vpop.permute.xlu1 %2138  ;;  %v9387_v2 = vpop.permute.xlu0 %2133 }
 0x2b1   :  { %v3154_v61 = vsel %vm2924_vm0, %v3109_v58, 0.0  ;;  %v1296_v42 = vmul.f32 %v11868_v4, %v12049_v27  ;;  %v2795_v63 = vadd.f32 %v8773_v5, %v2732_v50  ;;  %12050 = vst [vmem:[#allocation91_spill] sm:$0xff] %v9379_v30  ;;  %v1325_v16 = vmul.f32 %v11868_v4, %v12051_v12  ;;  %12053 = vst [vmem:[#allocation92_spill] sm:$0xff] %v9387_v2  ;;  %v12054_v50 = vld [vmem:[#allocation45_spill] sm:$0xff]  ;;  %v12062_v30 = vld [vmem:[#allocation12_spill] sm:$0xff] }
 0x2b2   :  { %v1324_v11 = vmul.f32 %v11868_v4, %v12052_v32  ;;  %v2767_v15 = vadd.f32 %v8773_v5, %v2704_v38  ;;  %v2794_v52 = vadd.f32 %v8773_v5, %v2731_v39  ;;  %v3246_v62 = vadd.f32 %v3245_v45, %v9243_v29  ;;  %v12055_v38 = vld [vmem:[#allocation31_spill] sm:$0xff]  ;;  %v12056_v39 = vld [vmem:[#allocation32_spill] sm:$0xff]  ;;  %v12057_v29 = vld [vmem:[#allocation46_spill] sm:$0xff] }
 0x2b3   :  { %v3153_v58 = vsel %vm2924_vm0, %v3081_v43, 0.0  ;;  %v3158_v48 = vadd.f32 %v3157_v49, %v3156_v9  ;;  %v1747_v33 = vmul.f32 %v8299_v20, %v12054_v50  ;;  %v3044_v28 = vsel %vm2928_vm1, %v2955_v8, 0.0  ;;  %v12058_v9 = vld [vmem:[#allocation49_spill] sm:$0xff]  ;;  %v12059_v8 = vld [vmem:[#allocation51_spill] sm:$0xff] }
 0x2b4   :  { %v3017_v12 = vsel %vm2924_vm0, %v2952_v0, 0.0  ;;  %v3155_v27 = vadd.f32 %v3154_v61, %v3153_v58  ;;  %v2766_v32 = vadd.f32 %v8773_v5, %v2703_v21  ;;  %v9397_v6 = vadd.f32 %v1297_v40, %v12055_v38  ;;  %v9404_v49 = vpop.permute.xlu1 %2440  ;;  %v9412_v58 = vpop.permute.xlu0 %2435 }
 0x2b5   :  { %v9400_v47 = vadd.f32 %v1296_v42, %v12056_v39  ;;  %v1746_v45 = vmul.f32 %v8299_v20, %v12057_v29  ;;  %v2851_v43 = vmul.f32 0.01, %v2795_v63  ;;  %v9407_v50 = vadd.f32 %v1325_v16, %v12058_v9  ;;  %v12060_v29 = vld [vmem:[#allocation47_spill] sm:$0xff] }
 0x2b6   :  { %v9410_v0 = vadd.f32 %v1324_v11, %v12059_v8  ;;  %v2823_v61 = vmul.f32 0.01, %v2767_v15  ;;  %v2850_v21 = vmul.f32 0.01, %v2794_v52  ;;  %v9414_v40 = vadd.f32 %v3044_v28, %v3043_v18  ;;  %v12061_v9 = vld [vmem:[#allocation55_spill] sm:$0xff]  ;;  %v12063_v28 = vld [vmem:[#allocation169_spill] sm:$0xff] }
 0x2b7   :  { %v3247_v42 = vsel %vm2928_vm1, %v3158_v48, 0.0  ;;  %v9418_v38 = vadd.f32 %v3017_v12, %v9284_v22  ;;  %v9421_v39 = vadd.f32 %v1747_v33, %v9250_v31  ;;  %v3220_v16 = vsel %vm2924_vm0, %v3155_v27, 0.0  ;;  %v12064_v22 = vld [vmem:[#allocation5_spill] sm:$0xff]  ;;  %v12066_v27 = vld [vmem:[#allocation3_spill] sm:$0xff] }
 0x2b8   :  { %v1775_v11 = vmul.f32 %v8299_v20, %v12060_v29  ;;  %v2226_v8 = vmul.f32 %v8404_v56, %v12061_v9  ;;  %v2822_v2 = vmul.f32 0.01, %v2766_v32  ;;  %v9429_v18 = vadd.f32 %v1746_v45, %v12062_v30  ;;  %v9437_v33 = vpop.permute.xlu1 %2580  ;;  %v9447_v45 = vpop.permute.xlu0 %2575 }
 0x2b9   :  { %v1774_v48 = vmul.f32 %v8299_v20, %v12063_v28  ;;  %v2225_v12 = vmul.f32 %v8404_v56, %v12064_v22  ;;  %v9435_v31 = vmax.f32 %v2795_v63, %v2851_v43  ;;  %v2198_v29 = vmul.f32 %v8404_v56, %v12066_v27  ;;  %v12069_v63 = vld [vmem:[#allocation50_spill] sm:$0xff] }
 0x2ba   :  { %v9441_v37 = vmax.f32 %v2767_v15, %v2823_v61  ;;  %v9443_v9 = vmax.f32 %v2794_v52, %v2850_v21  ;;  %v2678_v30 = vmul.f32 %v8520_v44, %v8931_v41  ;;  %v9449_v28 = vadd.f32 %v3247_v42, %v3246_v62 }
 0x2bb   :  { %12065 = vst [vmem:[#allocation166_spill] sm:$0xff] %v9435_v31  ;;  %v9452_v22 = vadd.f32 %v3220_v16, %v9302_v34  ;;  %v2197_v43 = vmul.f32 %v8404_v56, %v12069_v63  ;;  %v2677_v27 = vmul.f32 %v8520_v44, %v8942_v60  ;;  %v9459_v15 = vadd.f32 %v1775_v11, %v9269_v10 }
 0x2bc   :  { %12067 = vst [vmem:[#allocation93_spill] sm:$0xff] %v9441_v37  ;;  %12068 = vst [vmem:[#allocation94_spill] sm:$0xff] %v9443_v9  ;;  %v2282_v52 = vadd.f32 %v2226_v8, %v9322_v13  ;;  %v9462_v61 = vmax.f32 %v2766_v32, %v2822_v2  ;;  %v2650_v41 = vmul.f32 %v8520_v44, %v8899_v55  ;;  %v2960_v34 = vsel %vm2928_vm1, %v9435_v31, 0.0  ;;  %v9473_v10 = vpop.permute.xlu1 %1123  ;;  %v9480_v32 = vpop.permute.xlu0 %1118 }
 0x2bd   :  { %v2281_v62 = vadd.f32 %v2225_v12, %v9331_v19  ;;  %v3112_v21 = vmul.f32 %v9435_v31, %v9435_v31  ;;  %v2649_v60 = vmul.f32 %v8520_v44, %v8909_v1  ;;  %v2254_v13 = vadd.f32 %v2198_v29, %v9293_v3  ;;  %v12071_v12 = vld [vmem:[#allocation13_spill] sm:$0xff] }
 0x2be   :  { %12070 = vst [vmem:[#allocation95_spill] sm:$0xff] %v9462_v61  ;;  %v3084_v2 = vmul.f32 %v9441_v37, %v9441_v37  ;;  %v2957_v55 = vsel %vm2924_vm0, %v9443_v9, 0.0  ;;  %v2734_v19 = vadd.f32 %v2678_v30, %v2282_v52  ;;  %v2253_v42 = vadd.f32 %v2197_v43, %v9296_v25 }
 0x2bf   :  { %v2959_v16 = vsel %vm2928_vm1, %v9441_v37, 0.0  ;;  %v3111_v1 = vmul.f32 %v9443_v9, %v9443_v9  ;;  %v2733_v11 = vadd.f32 %v2677_v27, %v2281_v62  ;;  %v2956_v3 = vsel %vm2924_vm0, %v9462_v61, 0.0  ;;  %v12072_v62 = vld [vmem:[#allocation61_spill] sm:$0xff] }
 0x2c0   :  { %v2961_v8 = vadd.f32 %v2960_v34, %v2959_v16  ;;  %v1299_v29 = vmul.f32 %v11868_v4, %v12071_v12  ;;  %v2706_v63 = vadd.f32 %v2650_v41, %v2254_v13  ;;  %v3083_v30 = vmul.f32 %v9462_v61, %v9462_v61  ;;  %v9494_v31 = vpop.permute.xlu1 %1263  ;;  %v9501_v12 = vpop.permute.xlu0 %1258  ;;  %v12074_v13 = vld [vmem:[#allocation14_spill] sm:$0xff]  ;;  %v12077_v61 = vld [vmem:[#allocation63_spill] sm:$0xff] }
 0x2c1   :  { %v3163_v25 = vsel %vm2928_vm1, %v3112_v21, 0.0  ;;  %v2958_v43 = vadd.f32 %v2957_v55, %v2956_v3  ;;  %v2705_v52 = vadd.f32 %v2649_v60, %v2253_v42  ;;  %v1830_v9 = vadd.f32 %v1774_v48, %v9272_v17  ;;  %12073 = vst [vmem:[#allocation103_spill] sm:$0xff] %v9501_v12  ;;  %v12075_v55 = vld [vmem:[#allocation62_spill] sm:$0xff] }
 0x2c2   :  { %v3162_v27 = vsel %vm2928_vm1, %v3084_v2, 0.0  ;;  %v1298_v34 = vmul.f32 %v11868_v4, %v12072_v62  ;;  %v2797_v16 = vadd.f32 %v8773_v5, %v2734_v19  ;;  %v3160_v41 = vsel %vm2924_vm0, %v3111_v1, 0.0  ;;  %v12076_v2 = vld [vmem:[#allocation33_spill] sm:$0xff]  ;;  %v12079_v12 = vld [vmem:[#allocation34_spill] sm:$0xff] }
 0x2c3   :  { %v1327_v21 = vmul.f32 %v11868_v4, %v12074_v13  ;;  %v1326_v60 = vmul.f32 %v11868_v4, %v12075_v55  ;;  %v2796_v42 = vadd.f32 %v8773_v5, %v2733_v11  ;;  %v3046_v17 = vsel %vm2928_vm1, %v2961_v8, 0.0 }
 0x2c4   :  { %v3164_v48 = vadd.f32 %v3163_v25, %v3162_v27  ;;  %v9511_v3 = vadd.f32 %v1299_v29, %v12076_v2  ;;  %v2769_v19 = vadd.f32 %v8773_v5, %v2706_v63  ;;  %v3159_v62 = vsel %vm2924_vm0, %v3083_v30, 0.0  ;;  %v9519_v55 = vpop.permute.xlu1 %1565  ;;  %v12080_v25 = vld [vmem:[#allocation64_spill] sm:$0xff]  ;;  %v9526_v63 = vpop.permute.xlu0 %1560 }
 0x2c5   :  { %v3019_v1 = vsel %vm2924_vm0, %v2958_v43, 0.0  ;;  %v1749_v13 = vmul.f32 %v8299_v20, %v12077_v61  ;;  %v2768_v37 = vadd.f32 %v8773_v5, %v2705_v52  ;;  %12078 = vst [vmem:[#allocation96_spill] sm:$0xff] %v9519_v55  ;;  %v3161_v11 = vadd.f32 %v3160_v41, %v3159_v62  ;;  %12081 = vst [vmem:[#allocation97_spill] sm:$0xff] %v9526_v63  ;;  %v12082_v43 = vld [vmem:[#allocation52_spill] sm:$0xff] }
 0x2c6   :  { %v9522_v8 = vadd.f32 %v1298_v34, %v12079_v12  ;;  %v1748_v29 = vmul.f32 %v8299_v20, %v12080_v25  ;;  %v2853_v27 = vmul.f32 0.01, %v2797_v16  ;;  %v9529_v30 = vadd.f32 %v3046_v17, %v9414_v40  ;;  %v12083_v61 = vld [vmem:[#allocation4_spill] sm:$0xff]  ;;  %v12085_v40 = vld [vmem:[#allocation66_spill] sm:$0xff] }
 0x2c7   :  { %v9532_v2 = vadd.f32 %v1327_v21, %v12082_v43  ;;  %v9535_v5 = vadd.f32 %v1326_v60, %v12083_v61  ;;  %v2852_v52 = vmul.f32 0.01, %v2796_v42  ;;  %v3249_v41 = vsel %vm2928_vm1, %v3164_v48, 0.0  ;;  %v12084_v12 = vld [vmem:[#allocation68_spill] sm:$0xff]  ;;  %v12086_v17 = vld [vmem:[#allocation70_spill] sm:$0xff] }
 0x2c8   :  { %v9539_v34 = vadd.f32 %v3019_v1, %v9418_v38  ;;  %v2228_v62 = vmul.f32 %v8404_v56, %v12084_v12  ;;  %v2825_v25 = vmul.f32 0.01, %v2769_v19  ;;  %v9544_v63 = vadd.f32 %v1749_v13, %v9397_v6  ;;  %v9550_v61 = vpop.permute.xlu1 %1705  ;;  %v9560_v13 = vpop.permute.xlu0 %1700 }
 0x2c9   :  { %v2200_v21 = vmul.f32 %v8404_v56, %v12085_v40  ;;  %v2227_v60 = vmul.f32 %v8404_v56, %v12086_v17  ;;  %v2824_v43 = vmul.f32 0.01, %v2768_v37  ;;  %12087 = vst [vmem:[#allocation105_spill] sm:$0xff] %v9550_v61  ;;  %v3222_v48 = vsel %vm2924_vm0, %v3161_v11, 0.0  ;;  %12089 = vst [vmem:[#allocation107_spill] sm:$0xff] %v9560_v13  ;;  %v12090_v40 = vld [vmem:[#allocation17_spill] sm:$0xff] }
 0x2ca   :  { %v9554_v38 = vadd.f32 %v1748_v29, %v9400_v47  ;;  %v9556_v1 = vmax.f32 %v2797_v16, %v2853_v27  ;;  %v2680_v6 = vmul.f32 %v8520_v44, %v9195_v46  ;;  %v9563_v12 = vadd.f32 %v3249_v41, %v9449_v28  ;;  %v12092_v47 = vld [vmem:[#allocation67_spill] sm:$0xff]  ;;  %v12104_v61 = vld [vmem:[#allocation53_spill] sm:$0xff] }
 0x2cb   :  { %v1777_v17 = vmul.f32 %v8299_v20, %v12090_v40  ;;  %v9567_v55 = vmax.f32 %v2796_v42, %v2852_v52  ;;  %v2652_v11 = vmul.f32 %v8520_v44, %v9160_v51  ;;  %v2199_v16 = vmul.f32 %v8404_v56, %v12092_v47 }
 0x2cc   :  { %12088 = vst [vmem:[#allocation106_spill] sm:$0xff] %v9556_v1  ;;  %v2284_v29 = vadd.f32 %v2228_v62, %v9459_v15  ;;  %v9574_v27 = vmax.f32 %v2769_v19, %v2825_v25  ;;  %v2679_v46 = vmul.f32 %v8520_v44, %v9201_v35  ;;  %v9579_v28 = vadd.f32 %v3222_v48, %v9452_v22  ;;  %v9584_v40 = vpop.permute.xlu1 %2008  ;;  %v9592_v62 = vpop.permute.xlu0 %2003  ;;  %v12096_v22 = vld [vmem:[#allocation65_spill] sm:$0xff] }
 0x2cd   :  { %12091 = vst [vmem:[#allocation121_spill] sm:$0xff] %v9567_v55  ;;  %v2256_v41 = vadd.f32 %v2200_v21, %v9421_v39  ;;  %v2283_v42 = vadd.f32 %v2227_v60, %v1830_v9  ;;  %v9582_v52 = vmax.f32 %v2768_v37, %v2824_v43  ;;  %v2966_v51 = vsel %vm2928_vm1, %v9556_v1, 0.0  ;;  %12095 = vst [vmem:[#allocation123_spill] sm:$0xff] %v9592_v62 }
 0x2ce   :  { %12093 = vst [vmem:[#allocation98_spill] sm:$0xff] %v9574_v27  ;;  %v3114_v15 = vmul.f32 %v9556_v1, %v9556_v1  ;;  %v2651_v19 = vmul.f32 %v8520_v44, %v9168_v26  ;;  %v2736_v35 = vadd.f32 %v2680_v6, %v2284_v29  ;;  %v1776_v39 = vmul.f32 %v8299_v20, %v12096_v22 }
 0x2cf   :  { %12094 = vst [vmem:[#allocation99_spill] sm:$0xff] %v9582_v52  ;;  %v2963_v37 = vsel %vm2924_vm0, %v9567_v55, 0.0  ;;  %v3113_v9 = vmul.f32 %v9567_v55, %v9567_v55  ;;  %v2708_v25 = vadd.f32 %v2652_v11, %v2256_v41  ;;  %v2255_v21 = vadd.f32 %v2199_v16, %v9429_v18  ;;  %v9616_v41 = vld [vmem:[%s11490_s2] ss:$0 sm:$0xff] }
 0x2d0   :  { %v2965_v60 = vsel %vm2928_vm1, %v9574_v27, 0.0  ;;  %v3086_v26 = vmul.f32 %v9574_v27, %v9574_v27  ;;  %v2735_v43 = vadd.f32 %v2679_v46, %v2283_v42  ;;  %v1833_v48 = vadd.f32 %v1777_v17, %v9407_v50  ;;  %v9610_v22 = vpop.permute.xlu1 %2148  ;;  %v9619_v17 = vpop.permute.xlu0 %2143  ;;  %v12098_v42 = vld [vmem:[#allocation20_spill] sm:$0xff] }
 0x2d1   :  { %v2962_v6 = vsel %vm2924_vm0, %v9582_v52, 0.0  ;;  %v3085_v47 = vmul.f32 %v9582_v52, %v9582_v52  ;;  %v2967_v29 = vadd.f32 %v2966_v51, %v2965_v60  ;;  %v3169_v18 = vsel %vm2928_vm1, %v3114_v15, 0.0  ;;  %12097 = vst [vmem:[#allocation124_spill] sm:$0xff] %v9619_v17  ;;  %v12099_v60 = vld [vmem:[#allocation21_spill] sm:$0xff] }
 0x2d2   :  { %v2964_v11 = vadd.f32 %v2963_v37, %v2962_v6  ;;  %v2707_v16 = vadd.f32 %v2651_v19, %v2255_v21  ;;  %v2799_v50 = vadd.f32 %v9616_v41, %v2736_v35  ;;  %v3166_v46 = vsel %vm2924_vm0, %v3113_v9, 0.0  ;;  %v12100_v37 = vld [vmem:[#allocation74_spill] sm:$0xff]  ;;  %v12101_v6 = vld [vmem:[#allocation75_spill] sm:$0xff] }
 0x2d3   :  { %v1301_v51 = vmul.f32 %v11868_v4, %v12098_v42  ;;  %v1300_v55 = vmul.f32 %v11868_v4, %v12099_v60  ;;  %v2771_v15 = vadd.f32 %v9616_v41, %v2708_v25  ;;  %v3168_v19 = vsel %vm2928_vm1, %v3086_v26, 0.0 }
 0x2d4   :  { %v1329_v21 = vmul.f32 %v11868_v4, %v12100_v37  ;;  %v1328_v35 = vmul.f32 %v11868_v4, %v12101_v6  ;;  %v2798_v1 = vadd.f32 %v9616_v41, %v2735_v43  ;;  %v3165_v9 = vsel %vm2924_vm0, %v3085_v47, 0.0  ;;  %v9637_v27 = vpop.permute.xlu1 %2450  ;;  %v12102_v6 = vld [vmem:[#allocation37_spill] sm:$0xff] }
 0x2d5   :  { %v3048_v52 = vsel %vm2928_vm1, %v2967_v29, 0.0  ;;  %v3170_v42 = vadd.f32 %v3169_v18, %v3168_v19  ;;  %v1751_v60 = vmul.f32 %v8299_v20, %v9031_v36  ;;  %v3021_v25 = vsel %vm2924_vm0, %v2964_v11, 0.0  ;;  %v9641_v62 = vpop.permute.xlu0 %2445  ;;  %v12103_v36 = vld [vmem:[#allocation38_spill] sm:$0xff] }
 0x2d6   :  { %v3167_v26 = vadd.f32 %v3166_v46, %v3165_v9  ;;  %v2770_v37 = vadd.f32 %v9616_v41, %v2707_v16  ;;  %v2855_v13 = vmul.f32 0.01, %v2799_v50  ;;  %v1832_v43 = vadd.f32 %v1776_v39, %v9410_v0  ;;  %v12105_v46 = vld [vmem:[#allocation54_spill] sm:$0xff] }
 0x2d7   :  { %v9645_v47 = vadd.f32 %v1301_v51, %v12102_v6  ;;  %v1750_v29 = vmul.f32 %v8299_v20, %v9036_v14  ;;  %v2827_v18 = vmul.f32 0.01, %v2771_v15  ;;  %v9650_v19 = vadd.f32 %v1300_v55, %v12103_v36 }
 0x2d8   :  { %v9653_v11 = vadd.f32 %v1329_v21, %v12104_v61  ;;  %v9656_v16 = vadd.f32 %v1328_v35, %v12105_v46  ;;  %v2854_v9 = vmul.f32 0.01, %v2798_v1  ;;  %v9659_v17 = vadd.f32 %v3048_v52, %v9529_v30  ;;  %v9668_v55 = vpop.permute.xlu1 %2590 }
 0x2d9   :  { %v3251_v0 = vsel %vm2928_vm1, %v3170_v42, 0.0  ;;  %v9663_v39 = vadd.f32 %v3021_v25, %v9539_v34  ;;  %v9666_v14 = vadd.f32 %v1751_v60, %v9511_v3  ;;  %v3224_v61 = vsel %vm2924_vm0, %v3167_v26, 0.0  ;;  %v9675_v30 = vpop.permute.xlu0 %2585  ;;  %v12107_v3 = vld [vmem:[#allocation78_spill] sm:$0xff] }
 0x2da   :  { %v2230_v51 = vmul.f32 %v8404_v56, %v9123_v59  ;;  %v2826_v21 = vmul.f32 0.01, %v2770_v37  ;;  %v9673_v35 = vmax.f32 %v2799_v50, %v2855_v13  ;;  %v9678_v52 = vadd.f32 %v1750_v29, %v9522_v8  ;;  %v12108_v59 = vld [vmem:[#allocation160_spill] sm:$0xff]  ;;  %v12111_v29 = vld [vmem:[#allocation27_spill] sm:$0xff] }
 0x2db   :  { %v2202_v34 = vmul.f32 %v8404_v56, %v9094_v53  ;;  %v2229_v42 = vmul.f32 %v8404_v56, %v12107_v3  ;;  %v9684_v60 = vmax.f32 %v2771_v15, %v2827_v18  ;;  %v9687_v25 = vadd.f32 %v3251_v0, %v9563_v12  ;;  %v12110_v53 = vld [vmem:[#allocation77_spill] sm:$0xff] }
 0x2dc   :  { %12106 = vst [vmem:[#allocation125_spill] sm:$0xff] %v9673_v35  ;;  %v1779_v13 = vmul.f32 %v8299_v20, %v12108_v59  ;;  %v9691_v50 = vmax.f32 %v2798_v1, %v2854_v9  ;;  %v2682_v8 = vmul.f32 %v8520_v44, %v9437_v33  ;;  %v9696_v26 = vadd.f32 %v3224_v61, %v9579_v28  ;;  %v9704_v18 = vpop.permute.xlu1 %1133 }
 0x2dd   :  { %v1778_v6 = vmul.f32 %v8299_v20, %v12110_v53  ;;  %v2201_v15 = vmul.f32 %v8404_v56, %v12111_v29  ;;  %v2654_v12 = vmul.f32 %v8520_v44, %v9404_v49  ;;  %v2286_v36 = vadd.f32 %v2230_v51, %v1833_v48  ;;  %v9712_v46 = vpop.permute.xlu0 %1128 }
 0x2de   :  { %12109 = vst [vmem:[#allocation100_spill] sm:$0xff] %v9691_v50  ;;  %v9706_v1 = vmax.f32 %v2770_v37, %v2826_v21  ;;  %v3116_v33 = vmul.f32 %v9673_v35, %v9673_v35  ;;  %v2681_v28 = vmul.f32 %v8520_v44, %v9447_v45  ;;  %v2258_v9 = vadd.f32 %v2202_v34, %v9544_v63 }
 0x2df   :  { %v2285_v0 = vadd.f32 %v2229_v42, %v1832_v43  ;;  %v3088_v61 = vmul.f32 %v9684_v60, %v9684_v60  ;;  %v2972_v49 = vsel %vm2928_vm1, %v9673_v35, 0.0  ;;  %v2969_v48 = vsel %vm2924_vm0, %v9691_v50, 0.0 }
 0x2e0   :  { %v3115_v37 = vmul.f32 %v9691_v50, %v9691_v50  ;;  %v2653_v45 = vmul.f32 %v8520_v44, %v9412_v58  ;;  %v2738_v51 = vadd.f32 %v2682_v8, %v2286_v36  ;;  %v9726_v21 = vadd.f32 %v1779_v13, %v9532_v2  ;;  %v9731_v3 = vpop.permute.xlu1 %1273 }
 0x2e1   :  { %v2257_v63 = vadd.f32 %v2201_v15, %v9554_v38  ;;  %v2971_v43 = vsel %vm2928_vm1, %v9684_v60, 0.0  ;;  %v2710_v34 = vadd.f32 %v2654_v12, %v2258_v9  ;;  %v2968_v42 = vsel %vm2924_vm0, %v9706_v1, 0.0  ;;  %v9738_v53 = vpop.permute.xlu0 %1268 }
 0x2e2   :  { %v3087_v59 = vmul.f32 %v9706_v1, %v9706_v1  ;;  %v3175_v58 = vsel %vm2928_vm1, %v3116_v33, 0.0  ;;  %v2737_v8 = vadd.f32 %v2681_v28, %v2285_v0  ;;  %v2973_v2 = vadd.f32 %v2972_v49, %v2971_v43  ;;  %v12113_v43 = vld [vmem:[#allocation40_spill] sm:$0xff] }
 0x2e3   :  { %v2970_v13 = vadd.f32 %v2969_v48, %v2968_v42  ;;  %v1303_v38 = vmul.f32 %v11868_v4, %v9222_v23  ;;  %v1302_v29 = vmul.f32 %v11868_v4, %v9231_v57  ;;  %v3174_v15 = vsel %vm2928_vm1, %v3088_v61, 0.0 }
 0x2e4   :  { %v3172_v12 = vsel %vm2924_vm0, %v3115_v37, 0.0  ;;  %v2709_v36 = vadd.f32 %v2653_v45, %v2257_v63  ;;  %v2801_v9 = vadd.f32 %v9616_v41, %v2738_v51  ;;  %v3176_v50 = vadd.f32 %v3175_v58, %v3174_v15  ;;  %v9752_v23 = vpop.permute.xlu1 %1575  ;;  %v12112_v51 = vld [vmem:[#allocation39_spill] sm:$0xff]  ;;  %v12115_v58 = vld [vmem:[#allocation56_spill] sm:$0xff] }
 0x2e5   :  { %v1331_v33 = vmul.f32 %v11868_v4, %v9255_v54  ;;  %v1330_v28 = vmul.f32 %v11868_v4, %v9264_v24  ;;  %v2773_v0 = vadd.f32 %v9616_v41, %v2710_v34  ;;  %v1834_v57 = vadd.f32 %v1778_v6, %v9535_v5  ;;  %v9759_v37 = vpop.permute.xlu0 %1570  ;;  %v12114_v5 = vld [vmem:[#allocation83_spill] sm:$0xff] }
 0x2e6   :  { %v3171_v61 = vsel %vm2924_vm0, %v3087_v59, 0.0  ;;  %v1753_v49 = vmul.f32 %v8299_v20, %v9289_v7  ;;  %v2800_v48 = vadd.f32 %v9616_v41, %v2737_v8  ;;  %v3050_v54 = vsel %vm2928_vm1, %v2973_v2, 0.0  ;;  %v12116_v2 = vld [vmem:[#allocation57_spill] sm:$0xff] }
 0x2e7   :  { %v3023_v45 = vsel %vm2924_vm0, %v2970_v13, 0.0  ;;  %v3173_v24 = vadd.f32 %v3172_v12, %v3171_v61  ;;  %v9764_v63 = vadd.f32 %v1303_v38, %v12112_v51  ;;  %v9767_v34 = vadd.f32 %v1302_v29, %v12113_v43  ;;  %v12117_v51 = vld [vmem:[#allocation86_spill] sm:$0xff]  ;;  %v12118_v43 = vld [vmem:[#allocation91_spill] sm:$0xff] }
 0x2e8   :  { %v1752_v6 = vmul.f32 %v8299_v20, %v12114_v5  ;;  %v2772_v7 = vadd.f32 %v9616_v41, %v2709_v36  ;;  %v2857_v42 = vmul.f32 0.01, %v2801_v9  ;;  %v3253_v59 = vsel %vm2928_vm1, %v3176_v50, 0.0 }
 0x2e9   :  { %v9774_v8 = vadd.f32 %v1331_v33, %v12115_v58  ;;  %v9777_v13 = vadd.f32 %v1330_v28, %v12116_v2  ;;  %v2829_v15 = vmul.f32 0.01, %v2773_v0  ;;  %v9779_v38 = vpop.permute.xlu1 %1715  ;;  %v9782_v29 = vadd.f32 %v3050_v54, %v9659_v17  ;;  %v12119_v58 = vld [vmem:[#allocation92_spill] sm:$0xff]  ;;  %v12122_v2 = vld [vmem:[#allocation90_spill] sm:$0xff] }
 0x2ea   :  { %v9785_v12 = vadd.f32 %v3023_v45, %v9663_v39  ;;  %v9788_v36 = vadd.f32 %v1753_v49, %v9645_v47  ;;  %v2856_v61 = vmul.f32 0.01, %v2800_v48  ;;  %v9790_v50 = vpop.permute.xlu0 %1710  ;;  %v3226_v33 = vsel %vm2924_vm0, %v3173_v24, 0.0  ;;  %v12121_v45 = vld [vmem:[#allocation89_spill] sm:$0xff] }
 0x2eb   :  { %v1781_v28 = vmul.f32 %v8299_v20, %v12117_v51  ;;  %v2232_v5 = vmul.f32 %v8404_v56, %v12118_v43  ;;  %v2231_v17 = vmul.f32 %v8404_v56, %v12119_v58  ;;  %v9800_v39 = vadd.f32 %v3253_v59, %v9687_v25 }
 0x2ec   :  { %v9803_v47 = vadd.f32 %v1752_v6, %v9650_v19  ;;  %v2828_v49 = vmul.f32 0.01, %v2772_v7  ;;  %v9805_v54 = vmax.f32 %v2801_v9, %v2857_v42  ;;  %v2204_v24 = vmul.f32 %v8404_v56, %v12121_v45  ;;  %v12124_v19 = vld [vmem:[#allocation87_spill] sm:$0xff] }
 0x2ed   :  { %v2203_v51 = vmul.f32 %v8404_v56, %v12122_v2  ;;  %v9811_v35 = vmax.f32 %v2773_v0, %v2829_v15  ;;  %v2684_v43 = vmul.f32 %v8520_v44, %v9668_v55  ;;  %v9815_v58 = vpop.permute.xlu1 %2018  ;;  %v9818_v25 = vadd.f32 %v3226_v33, %v9696_v26 }
 0x2ee   :  { %12120 = vst [vmem:[#allocation109_spill] sm:$0xff] %v9805_v54  ;;  %v1780_v9 = vmul.f32 %v8299_v20, %v12124_v19  ;;  %v9822_v6 = vmax.f32 %v2800_v48, %v2856_v61  ;;  %v2683_v42 = vmul.f32 %v8520_v44, %v9675_v30  ;;  %v9826_v59 = vpop.permute.xlu0 %2013  ;;  %v9829_v0 = vadd.f32 %v1781_v28, %v9653_v11 }
 0x2ef   :  { %12123 = vst [vmem:[#allocation101_spill] sm:$0xff] %v9811_v35  ;;  %v2288_v55 = vadd.f32 %v2232_v5, %v9726_v21  ;;  %v2287_v15 = vadd.f32 %v2231_v17, %v1834_v57  ;;  %v2656_v26 = vmul.f32 %v8520_v44, %v9637_v27  ;;  %v9834_v33 = vmax.f32 %v2772_v7, %v2828_v49 }
 0x2f0   :  { %12125 = vst [vmem:[#allocation108_spill] sm:$0xff] %v9822_v6  ;;  %v2978_v48 = vsel %vm2928_vm1, %v9805_v54, 0.0  ;;  %v3118_v61 = vmul.f32 %v9805_v54, %v9805_v54  ;;  %v2655_v30 = vmul.f32 %v8520_v44, %v9641_v62  ;;  %v2260_v11 = vadd.f32 %v2204_v24, %v9666_v14 }
 0x2f1   :  { %12126 = vst [vmem:[#allocation127_spill] sm:$0xff] %v9834_v33  ;;  %v2259_v28 = vadd.f32 %v2203_v51, %v9678_v52  ;;  %v3090_v21 = vmul.f32 %v9811_v35, %v9811_v35  ;;  %v2740_v57 = vadd.f32 %v2684_v43, %v2288_v55  ;;  %v9846_v27 = vpop.permute.xlu1 %2158  ;;  %v2977_v7 = vsel %vm2928_vm1, %v9811_v35, 0.0 }
 0x2f2   :  { %v2975_v5 = vsel %vm2924_vm0, %v9822_v6, 0.0  ;;  %v3117_v17 = vmul.f32 %v9822_v6, %v9822_v6  ;;  %v2739_v62 = vadd.f32 %v2683_v42, %v2287_v15  ;;  %v9854_v49 = vpop.permute.xlu0 %2153  ;;  %v1836_v14 = vadd.f32 %v1780_v9, %v9656_v16 }
 0x2f3   :  { %v2979_v52 = vadd.f32 %v2978_v48, %v2977_v7  ;;  %v1305_v45 = vmul.f32 %v11868_v4, %v9473_v10  ;;  %v2712_v24 = vadd.f32 %v2656_v26, %v2260_v11  ;;  %v2974_v2 = vsel %vm2924_vm0, %v9834_v33, 0.0  ;;  %v12127_v48 = vld [vmem:[#allocation103_spill] sm:$0xff]  ;;  %v12128_v7 = vld [vmem:[#allocation96_spill] sm:$0xff] }
 0x2f4   :  { %v3089_v51 = vmul.f32 %v9834_v33, %v9834_v33  ;;  %v3181_v43 = vsel %vm2928_vm1, %v3118_v61, 0.0  ;;  %v2711_v19 = vadd.f32 %v2655_v30, %v2259_v28  ;;  %v3180_v42 = vsel %vm2928_vm1, %v3090_v21, 0.0 }
 0x2f5   :  { %v2976_v55 = vadd.f32 %v2975_v5, %v2974_v2  ;;  %v1304_v16 = vmul.f32 %v11868_v4, %v9480_v32  ;;  %v2803_v9 = vadd.f32 %v9616_v41, %v2740_v57  ;;  %v2461_v15 = vpop.permute.xlu1 %2460  ;;  %v3178_v10 = vsel %vm2924_vm0, %v3117_v17, 0.0  ;;  %v12129_v17 = vld [vmem:[#allocation41_spill] sm:$0xff] }
 0x2f6   :  { %v1333_v26 = vmul.f32 %v11868_v4, %v9494_v31  ;;  %v1332_v11 = vmul.f32 %v11868_v4, %v12127_v48  ;;  %v2802_v61 = vadd.f32 %v9616_v41, %v2739_v62  ;;  %v2456_v30 = vpop.permute.xlu0 %2455  ;;  %v3052_v28 = vsel %vm2928_vm1, %v2979_v52, 0.0  ;;  %v12130_v31 = vld [vmem:[#allocation97_spill] sm:$0xff]  ;;  %v12131_v52 = vld [vmem:[#allocation42_spill] sm:$0xff] }
 0x2f7   :  { %v3182_v21 = vadd.f32 %v3181_v43, %v3180_v42  ;;  %v1755_v32 = vmul.f32 %v8299_v20, %v12128_v7  ;;  %v2775_v57 = vadd.f32 %v9616_v41, %v2712_v24  ;;  %v3177_v5 = vsel %vm2924_vm0, %v3089_v51, 0.0  ;;  %v12132_v51 = vld [vmem:[#allocation6_spill] sm:$0xff] }
 0x2f8   :  { %v9880_v2 = vadd.f32 %v1305_v45, %v12129_v17  ;;  %v1754_v33 = vmul.f32 %v8299_v20, %v12130_v31  ;;  %v2774_v48 = vadd.f32 %v9616_v41, %v2711_v19  ;;  %v3025_v62 = vsel %vm2924_vm0, %v2976_v55, 0.0  ;;  %v12133_v45 = vld [vmem:[#allocation7_spill] sm:$0xff] }
 0x2f9   :  { %v3179_v35 = vadd.f32 %v3178_v10, %v3177_v5  ;;  %v9887_v43 = vadd.f32 %v1304_v16, %v12131_v52  ;;  %v2859_v42 = vmul.f32 0.01, %v2803_v9  ;;  %v2601_v7 = vpop.permute.xlu1 %2600  ;;  %v9890_v24 = vadd.f32 %v3052_v28, %v9782_v29 }
 0x2fa   :  { %v9893_v6 = vadd.f32 %v1333_v26, %v12132_v51  ;;  %v9896_v17 = vadd.f32 %v1332_v11, %v12133_v45  ;;  %v2858_v31 = vmul.f32 0.01, %v2802_v61  ;;  %v2596_v54 = vpop.permute.xlu0 %2595  ;;  %v3255_v19 = vsel %vm2928_vm1, %v3182_v21, 0.0  ;;  %v12134_v21 = vld [vmem:[#allocation124_spill] sm:$0xff] }
 0x2fb   :  { %v9900_v55 = vadd.f32 %v1755_v32, %v9764_v63  ;;  %v2234_v16 = vmul.f32 %v8404_v56, %v9610_v22  ;;  %v2831_v10 = vmul.f32 0.01, %v2775_v57  ;;  %v9905_v29 = vadd.f32 %v3025_v62, %v9785_v12  ;;  %v12136_v62 = vld [vmem:[#allocation123_spill] sm:$0xff] }
 0x2fc   :  { %v9908_v26 = vadd.f32 %v1754_v33, %v9767_v34  ;;  %v2206_v11 = vmul.f32 %v8404_v56, %v9584_v40  ;;  %v2830_v28 = vmul.f32 0.01, %v2774_v48  ;;  %v3228_v5 = vsel %vm2924_vm0, %v3179_v35, 0.0  ;;  %v12135_v34 = vld [vmem:[#allocation105_spill] sm:$0xff] }
 0x2fd   :  { %v2233_v63 = vmul.f32 %v8404_v56, %v12134_v21  ;;  %v9915_v32 = vmax.f32 %v2803_v9, %v2859_v42  ;;  %v2686_v22 = vmul.f32 %v8520_v44, %v2601_v7  ;;  %v9918_v52 = vpop.permute.xlu1 %1585  ;;  %v9921_v12 = vadd.f32 %v3255_v19, %v9800_v39  ;;  %v12137_v19 = vld [vmem:[#allocation107_spill] sm:$0xff] }
 0x2fe   :  { %v1783_v33 = vmul.f32 %v8299_v20, %v12135_v34  ;;  %v2205_v40 = vmul.f32 %v8404_v56, %v12136_v62  ;;  %v9927_v51 = vmax.f32 %v2802_v61, %v2858_v31  ;;  %v9929_v35 = vpop.permute.xlu0 %1580  ;;  %v2290_v9 = vadd.f32 %v2234_v16, %v9829_v0 }
 0x2ff   :  { %v9932_v42 = vmax.f32 %v2775_v57, %v2831_v10  ;;  %v2658_v7 = vmul.f32 %v8520_v44, %v2461_v15  ;;  %v2685_v45 = vmul.f32 %v8520_v44, %v2596_v54  ;;  %v9937_v39 = vadd.f32 %v3228_v5, %v9818_v25 }
 0x300   :  { %v1782_v21 = vmul.f32 %v8299_v20, %v12137_v19  ;;  %v2262_v34 = vadd.f32 %v2206_v11, %v9788_v36  ;;  %v9942_v61 = vmax.f32 %v2774_v48, %v2830_v28  ;;  %v2289_v31 = vadd.f32 %v2233_v63, %v1836_v14 }
 0x301   :  { %v3120_v0 = vmul.f32 %v9915_v32, %v9915_v32  ;;  %v2657_v57 = vmul.f32 %v8520_v44, %v2456_v30  ;;  %v2742_v16 = vadd.f32 %v2686_v22, %v2290_v9  ;;  %v9947_v15 = vpop.permute.xlu1 %1725  ;;  %v9950_v54 = vadd.f32 %v1783_v33, %v9774_v8 }
 0x302   :  { %v2261_v25 = vadd.f32 %v2205_v40, %v9803_v47  ;;  %v2984_v10 = vsel %vm2928_vm1, %v9915_v32, 0.0  ;;  %v3119_v36 = vmul.f32 %v9927_v51, %v9927_v51  ;;  %v9957_v14 = vpop.permute.xlu0 %1720  ;;  %v3092_v48 = vmul.f32 %v9932_v42, %v9932_v42 }
 0x303   :  { %v1307_v30 = vmul.f32 %v11868_v4, %v9704_v18  ;;  %v2714_v11 = vadd.f32 %v2658_v7, %v2262_v34  ;;  %v2741_v28 = vadd.f32 %v2685_v45, %v2289_v31  ;;  %v2983_v8 = vsel %vm2928_vm1, %v9932_v42, 0.0 }
 0x304   :  { %v3091_v47 = vmul.f32 %v9942_v61, %v9942_v61  ;;  %v2981_v5 = vsel %vm2924_vm0, %v9927_v51, 0.0  ;;  %v1306_v63 = vmul.f32 %v11868_v4, %v9712_v46  ;;  %v2985_v22 = vadd.f32 %v2984_v10, %v2983_v8 }
 0x305   :  { %v3187_v33 = vsel %vm2928_vm1, %v3120_v0, 0.0  ;;  %v2713_v62 = vadd.f32 %v2657_v57, %v2261_v25  ;;  %v2805_v18 = vadd.f32 %v9616_v41, %v2742_v16  ;;  %v9973_v40 = vpop.permute.xlu1 %2028  ;;  %v2980_v9 = vsel %vm2924_vm0, %v9942_v61, 0.0 }
 0x306   :  { %v3184_v7 = vsel %vm2924_vm0, %v3119_v36, 0.0  ;;  %v1335_v45 = vmul.f32 %v11868_v4, %v9731_v3  ;;  %v1334_v19 = vmul.f32 %v11868_v4, %v9738_v53  ;;  %v9982_v46 = vpop.permute.xlu0 %2023  ;;  %v3186_v34 = vsel %vm2928_vm1, %v3092_v48, 0.0 }
 0x307   :  { %v2982_v31 = vadd.f32 %v2981_v5, %v2980_v9  ;;  %v2777_v0 = vadd.f32 %v9616_v41, %v2714_v11  ;;  %v2804_v57 = vadd.f32 %v9616_v41, %v2741_v28  ;;  %v1838_v16 = vadd.f32 %v1782_v21, %v9777_v13  ;;  %v12138_v5 = vld [vmem:[#allocation43_spill] sm:$0xff]  ;;  %v12139_v28 = vld [vmem:[#allocation44_spill] sm:$0xff]  ;;  %v12140_v13 = vld [vmem:[#allocation58_spill] sm:$0xff] }
 0x308   :  { %v3183_v25 = vsel %vm2924_vm0, %v3091_v47, 0.0  ;;  %v3188_v10 = vadd.f32 %v3187_v33, %v3186_v34  ;;  %v1757_v3 = vmul.f32 %v8299_v20, %v9752_v23  ;;  %v3054_v36 = vsel %vm2928_vm1, %v2985_v22, 0.0  ;;  %v12141_v47 = vld [vmem:[#allocation59_spill] sm:$0xff] }
 0x309   :  { %v3185_v4 = vadd.f32 %v3184_v7, %v3183_v25  ;;  %v2776_v53 = vadd.f32 %v9616_v41, %v2713_v62  ;;  %v2861_v8 = vmul.f32 0.01, %v2805_v18  ;;  %v9993_v48 = vpop.permute.xlu1 %2168  ;;  %v9996_v11 = vadd.f32 %v1307_v30, %v12138_v5 }
 0x30a   :  { %v9999_v9 = vadd.f32 %v1306_v63, %v12139_v28  ;;  %v10002_v21 = vadd.f32 %v1335_v45, %v12140_v13  ;;  %v10005_v33 = vadd.f32 %v1334_v19, %v12141_v47  ;;  %v10007_v23 = vpop.permute.xlu0 %2163  ;;  %v3027_v22 = vsel %vm2924_vm0, %v2982_v31, 0.0 }
 0x30b   :  { %v1756_v62 = vmul.f32 %v8299_v20, %v9759_v37  ;;  %v2833_v7 = vmul.f32 0.01, %v2777_v0  ;;  %v2860_v34 = vmul.f32 0.01, %v2804_v57  ;;  %v10013_v30 = vadd.f32 %v3054_v36, %v9890_v24 }
 0x30c   :  { %v3257_v63 = vsel %vm2928_vm1, %v3188_v10, 0.0  ;;  %v10017_v45 = vadd.f32 %v1757_v3, %v9880_v2  ;;  %v2208_v19 = vmul.f32 %v8404_v56, %v9815_v58  ;;  %v3230_v25 = vsel %vm2924_vm0, %v3185_v4, 0.0 }
 0x30d   :  { %v1785_v31 = vmul.f32 %v8299_v20, %v9779_v38  ;;  %v2832_v5 = vmul.f32 0.01, %v2776_v53  ;;  %v10024_v37 = vmax.f32 %v2805_v18, %v2861_v8  ;;  %v2471_v28 = vpop.permute.xlu1 %2470  ;;  %v10027_v24 = vadd.f32 %v3027_v22, %v9905_v29 }
 0x30e   :  { %v2207_v10 = vmul.f32 %v8404_v56, %v9826_v59  ;;  %v2236_v2 = vmul.f32 %v8404_v56, %v9846_v27  ;;  %v2660_v58 = vmul.f32 %v8520_v44, %v2471_v28  ;;  %v2466_v3 = vpop.permute.xlu0 %2465  ;;  %v10035_v36 = vadd.f32 %v1756_v62, %v9887_v43 }
 0x30f   :  { %v2235_v38 = vmul.f32 %v8404_v56, %v9854_v49  ;;  %v10039_v18 = vmax.f32 %v2777_v0, %v2833_v7  ;;  %v10041_v4 = vmax.f32 %v2804_v57, %v2860_v34  ;;  %v10044_v29 = vadd.f32 %v3257_v63, %v9921_v12 }
 0x310   :  { %v10047_v59 = vadd.f32 %v3230_v25, %v9937_v39  ;;  %v2264_v27 = vadd.f32 %v2208_v19, %v9900_v55  ;;  %v2659_v8 = vmul.f32 %v8520_v44, %v2466_v3  ;;  %v10052_v43 = vadd.f32 %v1785_v31, %v9893_v6 }
 0x311   :  { %v1784_v49 = vmul.f32 %v8299_v20, %v9790_v50  ;;  %v10056_v0 = vmax.f32 %v2776_v53, %v2832_v5  ;;  %v3122_v57 = vmul.f32 %v10024_v37, %v10024_v37  ;;  %v2611_v12 = vpop.permute.xlu1 %2610  ;;  %v2263_v13 = vadd.f32 %v2207_v10, %v9908_v26 }
 0x312   :  { %v2292_v39 = vadd.f32 %v2236_v2, %v9950_v54  ;;  %v2716_v47 = vadd.f32 %v2660_v58, %v2264_v27  ;;  %v2688_v55 = vmul.f32 %v8520_v44, %v2611_v12  ;;  %v2606_v22 = vpop.permute.xlu0 %2605  ;;  %v2291_v62 = vadd.f32 %v2235_v38, %v1838_v16 }
 0x313   :  { %v3094_v6 = vmul.f32 %v10039_v18, %v10039_v18  ;;  %v2990_v50 = vsel %vm2928_vm1, %v10024_v37, 0.0  ;;  %v3121_v53 = vmul.f32 %v10041_v4, %v10041_v4  ;;  %v2989_v7 = vsel %vm2928_vm1, %v10039_v18, 0.0 }
 0x314   :  { %v1759_v26 = vmul.f32 %v8299_v20, %v9918_v52  ;;  %v2715_v54 = vadd.f32 %v2659_v8, %v2263_v13  ;;  %v2744_v34 = vadd.f32 %v2688_v55, %v2292_v39  ;;  %v3093_v16 = vmul.f32 %v10056_v0, %v10056_v0 }
 0x315   :  { %v3193_v63 = vsel %vm2928_vm1, %v3122_v57, 0.0  ;;  %v2987_v19 = vsel %vm2924_vm0, %v10041_v4, 0.0  ;;  %v2687_v25 = vmul.f32 %v8520_v44, %v2606_v22  ;;  %v2039_v31 = vpop.permute.xlu1 %2038  ;;  %v2986_v5 = vsel %vm2924_vm0, %v10056_v0, 0.0 }
 0x316   :  { %v2991_v28 = vadd.f32 %v2990_v50, %v2989_v7  ;;  %v1758_v52 = vmul.f32 %v8299_v20, %v9929_v35  ;;  %v2779_v10 = vadd.f32 %v9616_v41, %v2716_v47  ;;  %v2034_v2 = vpop.permute.xlu0 %2033  ;;  %v3192_v58 = vsel %vm2928_vm1, %v3094_v6, 0.0 }
 0x317   :  { %v3190_v3 = vsel %vm2924_vm0, %v3121_v53, 0.0  ;;  %v1787_v38 = vmul.f32 %v8299_v20, %v9947_v15  ;;  %v1786_v27 = vmul.f32 %v8299_v20, %v9957_v14  ;;  %v3194_v8 = vadd.f32 %v3193_v63, %v3192_v58 }
 0x318   :  { %v2988_v57 = vadd.f32 %v2987_v19, %v2986_v5  ;;  %v2778_v12 = vadd.f32 %v9616_v41, %v2715_v54  ;;  %v2807_v13 = vadd.f32 %v9616_v41, %v2744_v34  ;;  %v1840_v35 = vadd.f32 %v1784_v49, %v9896_v17 }
 0x319   :  { %v3189_v39 = vsel %vm2924_vm0, %v3093_v16, 0.0  ;;  %v2210_v47 = vmul.f32 %v8404_v56, %v9973_v40  ;;  %v2743_v55 = vadd.f32 %v2687_v25, %v2291_v62  ;;  %v2179_v22 = vpop.permute.xlu1 %2178  ;;  %v3056_v15 = vsel %vm2928_vm1, %v2991_v28, 0.0 }
 0x31a   :  { %v3191_v6 = vadd.f32 %v3190_v3, %v3189_v39  ;;  %v1815_v20 = vadd.f32 %v1759_v26, %v9996_v11  ;;  %v2835_v14 = vmul.f32 0.01, %v2779_v10  ;;  %v10098_v50 = vpop.permute.xlu0 %2173  ;;  %v1814_v53 = vadd.f32 %v1758_v52, %v9999_v9 }
 0x31b   :  { %v1843_v7 = vadd.f32 %v1787_v38, %v10002_v21  ;;  %v10103_v17 = vadd.f32 %v1786_v27, %v10005_v33  ;;  %v2209_v40 = vmul.f32 %v8404_v56, %v9982_v46  ;;  %v3259_v49 = vsel %vm2928_vm1, %v3194_v8, 0.0 }
 0x31c   :  { %v3029_v62 = vsel %vm2924_vm0, %v2988_v57, 0.0  ;;  %v2834_v54 = vmul.f32 0.01, %v2778_v12  ;;  %v2863_v34 = vmul.f32 0.01, %v2807_v13  ;;  %v10110_v11 = vadd.f32 %v3056_v15, %v10013_v30 }
 0x31d   :  { %v2266_v26 = vadd.f32 %v2210_v47, %v10017_v45  ;;  %v2238_v9 = vmul.f32 %v8404_v56, %v9993_v48  ;;  %v2806_v21 = vadd.f32 %v9616_v41, %v2743_v55  ;;  %v2481_v33 = vpop.permute.xlu1 %2480  ;;  %v3232_v16 = vsel %vm2924_vm0, %v3191_v6, 0.0 }
 0x31e   :  { %v2237_v46 = vmul.f32 %v8404_v56, %v10007_v23  ;;  %v10119_v63 = vmax.f32 %v2779_v10, %v2835_v14  ;;  %v2662_v19 = vmul.f32 %v8520_v44, %v2481_v33  ;;  %v2476_v25 = vpop.permute.xlu0 %2475  ;;  %v10123_v30 = vadd.f32 %v3259_v49, %v10044_v29 }
 0x31f   :  { %v10126_v45 = vadd.f32 %v3029_v62, %v10027_v24  ;;  %v2265_v48 = vadd.f32 %v2209_v40, %v10035_v36  ;;  %v2661_v5 = vmul.f32 %v8520_v44, %v2476_v25  ;;  %v10130_v28 = vmax.f32 %v2778_v12, %v2834_v54 }
 0x320   :  { %v10132_v52 = vmax.f32 %v2807_v13, %v2863_v34  ;;  %v2212_v23 = vmul.f32 %v8404_v56, %v2039_v31  ;;  %v2718_v10 = vadd.f32 %v2662_v19, %v2266_v26  ;;  %v10136_v58 = vadd.f32 %v3232_v16, %v10047_v59 }
 0x321   :  { %v2294_v29 = vadd.f32 %v2238_v9, %v10052_v43  ;;  %v2862_v3 = vmul.f32 0.01, %v2806_v21  ;;  %v2211_v24 = vmul.f32 %v8404_v56, %v2034_v2  ;;  %v2621_v38 = vpop.permute.xlu1 %2620  ;;  %v2293_v27 = vadd.f32 %v2237_v46, %v1840_v35 }
 0x322   :  { %v3096_v36 = vmul.f32 %v10119_v63, %v10119_v63  ;;  %v2781_v8 = vadd.f32 %v9616_v41, %v2718_v10  ;;  %v2690_v57 = vmul.f32 %v8520_v44, %v2621_v38  ;;  %v2616_v12 = vpop.permute.xlu0 %2615  ;;  %v2995_v31 = vsel %vm2928_vm1, %v10119_v63, 0.0 }
 0x323   :  { %v2240_v59 = vmul.f32 %v8404_v56, %v2179_v22  ;;  %v2717_v13 = vadd.f32 %v2661_v5, %v2265_v48  ;;  %v2689_v43 = vmul.f32 %v8520_v44, %v2616_v12  ;;  %v3095_v2 = vmul.f32 %v10130_v28, %v10130_v28 }
 0x324   :  { %v3124_v35 = vmul.f32 %v10132_v52, %v10132_v52  ;;  %v2268_v39 = vadd.f32 %v2212_v23, %v1815_v20  ;;  %v2746_v47 = vadd.f32 %v2690_v57, %v2294_v29  ;;  %v2996_v55 = vsel %vm2928_vm1, %v10132_v52, 0.0 }
 0x325   :  { %v10154_v15 = vmax.f32 %v2806_v21, %v2862_v3  ;;  %v2267_v6 = vadd.f32 %v2211_v24, %v1814_v53  ;;  %v2745_v14 = vadd.f32 %v2689_v43, %v2293_v27  ;;  %v2491_v40 = vpop.permute.xlu1 %2490  ;;  %v3198_v22 = vsel %vm2928_vm1, %v3096_v36, 0.0 }
 0x326   :  { %v2837_v49 = vmul.f32 0.01, %v2781_v8  ;;  %v2809_v62 = vadd.f32 %v9616_v41, %v2746_v47  ;;  %v2664_v54 = vmul.f32 %v8520_v44, %v2491_v40  ;;  %v2486_v34 = vpop.permute.xlu0 %2485  ;;  %v2296_v26 = vadd.f32 %v2240_v59, %v1843_v7 }
 0x327   :  { %v2780_v20 = vadd.f32 %v9616_v41, %v2717_v13  ;;  %v2808_v9 = vadd.f32 %v9616_v41, %v2745_v14  ;;  %v2663_v33 = vmul.f32 %v8520_v44, %v2486_v34  ;;  %v2997_v21 = vadd.f32 %v2996_v55, %v2995_v31 }
 0x328   :  { %v3199_v53 = vsel %vm2928_vm1, %v3124_v35, 0.0  ;;  %v2865_v16 = vmul.f32 0.01, %v2809_v62  ;;  %v2720_v46 = vadd.f32 %v2664_v54, %v2268_v39  ;;  %v2993_v19 = vsel %vm2924_vm0, %v10154_v15, 0.0 }
 0x329   :  { %v3123_v25 = vmul.f32 %v10154_v15, %v10154_v15  ;;  %v2864_v48 = vmul.f32 0.01, %v2808_v9  ;;  %v2719_v5 = vadd.f32 %v2663_v33, %v2267_v6  ;;  %v2631_v7 = vpop.permute.xlu1 %2630  ;;  %v10167_v23 = vmax.f32 %v2781_v8, %v2837_v49 }
 0x32a   :  { %v10169_v10 = vmax.f32 %v2809_v62, %v2865_v16  ;;  %v2783_v29 = vadd.f32 %v9616_v41, %v2720_v46  ;;  %v2692_v3 = vmul.f32 %v8520_v44, %v2631_v7  ;;  %v2992_v24 = vsel %vm2924_vm0, %v10130_v28, 0.0  ;;  %v2626_v59 = vpop.permute.xlu0 %2625 }
 0x32b   :  { %v3200_v38 = vadd.f32 %v3199_v53, %v3198_v22  ;;  %v2239_v27 = vmul.f32 %v8404_v56, %v10098_v50  ;;  %v2836_v36 = vmul.f32 0.01, %v2780_v20  ;;  %v3195_v57 = vsel %vm2924_vm0, %v3095_v2, 0.0 }
 0x32c   :  { %v3126_v8 = vmul.f32 %v10169_v10, %v10169_v10  ;;  %v2839_v12 = vmul.f32 0.01, %v2783_v29  ;;  %v2748_v31 = vadd.f32 %v2692_v3, %v2296_v26  ;;  %v2994_v13 = vadd.f32 %v2993_v19, %v2992_v24 }
 0x32d   :  { %v3196_v43 = vsel %vm2924_vm0, %v3123_v25, 0.0  ;;  %v10181_v35 = vmax.f32 %v2808_v9, %v2864_v48  ;;  %v2782_v39 = vadd.f32 %v9616_v41, %v2719_v5  ;;  %v3058_v47 = vsel %vm2928_vm1, %v2997_v21, 0.0 }
 0x32e   :  { %v3098_v56 = vmul.f32 %v10167_v23, %v10167_v23  ;;  %v3002_v50 = vsel %vm2928_vm1, %v10169_v10, 0.0  ;;  %v2811_v2 = vadd.f32 %v9616_v41, %v2748_v31  ;;  %v3261_v55 = vsel %vm2928_vm1, %v3200_v38, 0.0 }
 0x32f   :  { %v2295_v6 = vadd.f32 %v2239_v27, %v10103_v17  ;;  %v10192_v14 = vmax.f32 %v2780_v20, %v2836_v36  ;;  %v2691_v40 = vmul.f32 %v8520_v44, %v2626_v59  ;;  %v3197_v22 = vadd.f32 %v3196_v43, %v3195_v57 }
 0x330   :  { %v3001_v49 = vsel %vm2928_vm1, %v10167_v23, 0.0  ;;  %v3205_v62 = vsel %vm2928_vm1, %v3126_v8, 0.0  ;;  %v10198_v54 = vmax.f32 %v2783_v29, %v2839_v12  ;;  %v3059_v34 = vadd.f32 %v3058_v47, %v10110_v11 }
 0x331   :  { %v3003_v26 = vadd.f32 %v3002_v50, %v3001_v49  ;;  %v3125_v9 = vmul.f32 %v10181_v35, %v10181_v35  ;;  %v2838_v33 = vmul.f32 0.01, %v2782_v39  ;;  %v3262_v17 = vadd.f32 %v3261_v55, %v10123_v30 }
 0x332   :  { %v3031_v20 = vsel %vm2924_vm0, %v2994_v13, 0.0  ;;  %v3204_v44 = vsel %vm2928_vm1, %v3098_v56, 0.0  ;;  %v2867_v21 = vmul.f32 0.01, %v2811_v2  ;;  %v3097_v53 = vmul.f32 %v10192_v14, %v10192_v14 }
 0x333   :  { %v3206_v16 = vadd.f32 %v3205_v62, %v3204_v44  ;;  %v2999_v46 = vsel %vm2924_vm0, %v10181_v35, 0.0  ;;  %v2747_v11 = vadd.f32 %v2691_v40, %v2295_v6  ;;  %v3234_v19 = vsel %vm2924_vm0, %v3197_v22, 0.0 }
 0x334   :  { %v2998_v25 = vsel %vm2924_vm0, %v10192_v14, 0.0  ;;  %v3100_v30 = vmul.f32 %v10198_v54, %v10198_v54  ;;  %v10215_v48 = vmax.f32 %v2811_v2, %v2867_v21  ;;  %v3060_v5 = vsel %vm2928_vm1, %v3003_v26, 0.0 }
 0x335   :  { %v3202_v7 = vsel %vm2924_vm0, %v3125_v9, 0.0  ;;  %v10219_v29 = vmax.f32 %v2782_v39, %v2838_v33  ;;  %v2810_v3 = vadd.f32 %v9616_v41, %v2747_v11  ;;  %v3000_v24 = vadd.f32 %v2999_v46, %v2998_v25 }
 0x336   :  { %v3007_v38 = vsel %vm2928_vm1, %v10198_v54, 0.0  ;;  %v3008_v27 = vsel %vm2928_vm1, %v10215_v48, 0.0  ;;  %v3128_v36 = vmul.f32 %v10215_v48, %v10215_v48  ;;  %v3201_v57 = vsel %vm2924_vm0, %v3097_v53, 0.0 }
 0x337   :  { %v3263_v8 = vsel %vm2928_vm1, %v3206_v16, 0.0  ;;  %v3009_v12 = vadd.f32 %v3008_v27, %v3007_v38  ;;  %v2866_v31 = vmul.f32 0.01, %v2810_v3  ;;  %v3061_v59 = vadd.f32 %v3060_v5, %v3059_v34 }
 0x338   :  { %v3203_v13 = vadd.f32 %v3202_v7, %v3201_v57  ;;  %v3210_v41 = vsel %vm2928_vm1, %v3100_v30, 0.0  ;;  %v3211_v43 = vsel %vm2928_vm1, %v3128_v36, 0.0  ;;  %v3099_v39 = vmul.f32 %v10219_v29, %v10219_v29 }
 0x339   :  { %v3062_v47 = vsel %vm2928_vm1, %v3009_v12, 0.0  ;;  %v3212_v56 = vadd.f32 %v3211_v43, %v3210_v41  ;;  %v10235_v50 = vmax.f32 %v2810_v3, %v2866_v31  ;;  %v3032_v2 = vadd.f32 %v3031_v20, %v10126_v45 }
 0x33a   :  { %v3264_v55 = vadd.f32 %v3263_v8, %v3262_v17  ;;  %v3033_v6 = vsel %vm2924_vm0, %v3000_v24, 0.0  ;;  %v3004_v40 = vsel %vm2924_vm0, %v10219_v29, 0.0  ;;  %v3063_v22 = vadd.f32 %v3062_v47, %v3061_v59 }
 0x33b   :  { %v3265_v49 = vsel %vm2928_vm1, %v3212_v56, 0.0  ;;  %v3005_v62 = vsel %vm2924_vm0, %v10235_v50, 0.0  ;;  %v3127_v34 = vmul.f32 %v10235_v50, %v10235_v50  ;;  %v3235_v26 = vadd.f32 %v3234_v19, %v10136_v58 }
 0x33c   :  { %v3236_v9 = vsel %vm2924_vm0, %v3203_v13, 0.0  ;;  %v3006_v45 = vadd.f32 %v3005_v62, %v3004_v40  ;;  %v3034_v33 = vadd.f32 %v3033_v6, %v3032_v2  ;;  %v3207_v17 = vsel %vm2924_vm0, %v3099_v39, 0.0  ;;  %v12156_v2 = vld [vmem:[#allocation88_spill] sm:$0xff] }
 0x33d   :  { %v3266_v20 = vadd.f32 %v3265_v49, %v3264_v55  ;;  %v3208_v44 = vsel %vm2924_vm0, %v3127_v34, 0.0  ;;  %v3237_v16 = vadd.f32 %v3236_v9, %v3235_v26  ;;  %v3065_v46 = vsel %vm2928_vm1, %v3063_v22, 0.0 }
 0x33e   :  { %v3035_v21 = vsel %vm2924_vm0, %v3006_v45, 0.0  ;;  %v3209_v53 = vadd.f32 %v3208_v44, %v3207_v17  ;;  %v12142_v44 = vld [vmem:[#allocation157_spill] sm:$0xff] }
 0x33f   :  { %v3036_v11 = vadd.f32 %v3035_v21, %v3034_v33  ;;  %v3268_v58 = vsel %vm2928_vm1, %v3266_v20, 0.0  ;;  %v12158_v20 = vld [vmem:[#allocation98_spill] sm:$0xff] }
 0x340   :  { %v3238_v25 = vsel %vm2924_vm0, %v3209_v53, 0.0  ;;  %v3423_v53 = vld [vmem:[%s11491_s3] sm:$0xff] }
 0x341   :  { %v3064_v19 = vsel %vm2924_vm0, %v3036_v11, 0.0  ;;  %v3239_v30 = vadd.f32 %v3238_v25, %v3237_v16  ;;  %v3424_v16 = vld [vmem:[%s11491_s3 + $0x8] sm:$0xff]  ;;  %v12144_v25 = vld [vmem:[#allocation18_spill] sm:$0xff] }
 0x342   :  { %v3066_v5 = vadd.f32 %v3065_v46, %v3064_v19  ;;  %v12143_v46 = vld [vmem:[#allocation69_spill] sm:$0xff]  ;;  %v12145_v19 = vld [vmem:[#allocation71_spill] sm:$0xff] }
 0x343   :  { %v3267_v7 = vsel %vm2924_vm0, %v3239_v30, 0.0 }
 0x344   :  { %v3067_v3 = vrot.slane %v3066_v5, 4  ;;  %v3269_v24 = vadd.f32 %v3268_v58, %v3267_v7 }
 0x346   :  { %v3068_v38 = vadd.f32 %v3067_v3, %v3066_v5  ;;  %v3270_v27 = vrot.slane %v3269_v24, 4  ;;  %v12146_v5 = vld [vmem:[#allocation173_spill] sm:$0xff] }
 0x347   :  { %v3425_v3 = vld [vmem:[%s11491_s3 + $0x10] sm:$0xff] }
 0x348   :  { %v3069_v36 = vrot.slane %v3068_v38, 2  ;;  %v3271_v57 = vadd.f32 %v3270_v27, %v3269_v24  ;;  %v3426_v24 = vld [vmem:[%s11491_s3 + $0x18] sm:$0xff] }
 0x349   :  { %v10328_v33 = vpack.c.bf16 %v3426_v24, %v3425_v3 }
 0x34a   :  { %v3070_v8 = vadd.f32 %v3069_v36, %v3068_v38  ;;  %v3272_v12 = vrot.slane %v3271_v57, 2  ;;  %v12147_v38 = vld [vmem:[#allocation72_spill] sm:$0xff]  ;;  %v12148_v36 = vld [vmem:[#allocation19_spill] sm:$0xff] }
 0x34c   :  { %v3071_v31 = vrot.slane %v3070_v8, 1  ;;  %v3273_v59 = vadd.f32 %v3272_v12, %v3271_v57 }
 0x34e   :  { %v3072_v13 = vadd.f32 %v3071_v31, %v3070_v8  ;;  %v3274_v41 = vrot.slane %v3273_v59, 1  ;;  %v12149_v8 = vld [vmem:[#allocation73_spill] sm:$0xff]  ;;  %v12150_v31 = vld [vmem:[#allocation26_spill] sm:$0xff] }
 0x350   :  { %v3275_v43 = vadd.f32 %v3274_v41, %v3273_v59  ;;  %v10256_v39 = vmul.f32 0.0032467532, %v3072_v13  ;;  %v12151_v13 = vld [vmem:[#allocation81_spill] sm:$0xff] }
 0x352   :  { %v3278_v47 = vmul.f32 0.0032467532, %v3275_v43  ;;  %v3279_v56 = vmul.f32 %v10256_v39, %v10256_v39  ;;  %v3303_v55 = vsub.f32 %v10130_v28, %v10256_v39  ;;  %v3304_v40 = vsub.f32 %v10119_v63, %v10256_v39  ;;  %v12152_v43 = vld [vmem:[#allocation76_spill] sm:$0xff] }
 0x353   :  { %v3281_v21 = vsub.f32 %v12142_v44, %v10256_v39  ;;  %v3282_v11 = vsub.f32 %v12143_v46, %v10256_v39  ;;  %v3283_v58 = vsub.f32 %v12144_v25, %v10256_v39  ;;  %v3284_v30 = vsub.f32 %v12145_v19, %v10256_v39  ;;  %v12154_v44 = vld [vmem:[#allocation163_spill] sm:$0xff]  ;;  %v12155_v25 = vld [vmem:[#allocation93_spill] sm:$0xff] }
 0x354   :  { %v3280_v6 = vsub.f32 %v3278_v47, %v3279_v56  ;;  %v3286_v59 = vsub.f32 %v12150_v31, %v10256_v39  ;;  %v3288_v41 = vsub.f32 %v12151_v13, %v10256_v39  ;;  %v3285_v47 = vsub.f32 %v12152_v43, %v10256_v39  ;;  %v12153_v56 = vld [vmem:[#allocation80_spill] sm:$0xff]  ;;  %v3427_v13 = vld [vmem:[%s11491_s3 + $0x20] sm:$0xff]  ;;  %v12170_v31 = vld [vmem:[#allocation125_spill] sm:$0xff] }
 0x355   :  { %v12157_v43 = vld [vmem:[#allocation95_spill] sm:$0xff]  ;;  %v12173_v46 = vld [vmem:[#allocation109_spill] sm:$0xff]  ;;  %v12176_v49 = vsub.f32 %v10198_v54, %v10256_v39  ;;  %v12178_v28 = vsub.f32 %v12155_v25, %v10256_v39  ;;  %v12180_v54 = vsub.f32 %v10192_v14, %v10256_v39  ;;  %v12181_v25 = vsub.f32 %v10219_v29, %v10256_v39 }
 0x356   :  { %v3337_v26 = vadd.f32 1e-05, %v3280_v6  ;;  %v3287_v6 = vsub.f32 %v12153_v56, %v10256_v39  ;;  %v12165_v56 = vld [vmem:[#allocation84_spill] sm:$0xff]  ;;  %v12185_v29 = vsub.f32 %v12146_v5, %v10256_v39 }
 0x358   :  { %6604 = vrsqrt.f32 %v3337_v26  ;;  %v10320_v26 = vpack.c.bf16 %v3424_v16, %v3423_v53  ;;  %v3428_v53 = vld [vmem:[%s11491_s3 + $0x28] sm:$0xff] }
 0x359   :  { %v10343_v3 = vpack.c.bf16 %v3428_v53, %v3427_v13 }
 0x35a   :  { %6343 = vmatprep.subr.bf16.mxu0 %v10320_v26  ;;  %6359 = vmatprep.subr.bf16.mxu1 %v10320_v26 }
 0x35b   :  { %12159 = vst [vmem:[#allocation102_spill] sm:$0xff] %v10343_v3  ;;  %6345 = vmatpush3.bf16.msra.mxu0 %v10320_v26  ;;  %6361 = vmatpush3.bf16.msra.mxu1 %v10320_v26 }
 0x35c   :  { %6347 = vmatprep.subr.bf16.mxu0 %v10328_v33  ;;  %6363 = vmatprep.subr.bf16.mxu1 %v10328_v33 }
 0x35f   :  { %6349 = vmatpush3.bf16.msra.mxu0 %v10328_v33  ;;  %6365 = vmatpush3.bf16.msra.mxu1 %v10328_v33 }
 0x360   :  { %6351 = vmatprep.subr.bf16.mxu0 %v10343_v3  ;;  %6367 = vmatprep.subr.bf16.mxu1 %v10343_v3 }
 0x362   :  { %v10336_v16 = vpop.eup %6604 }
 0x363   :  { %v3340_v24 = vmul.f32 %v10336_v16, %v3282_v11  ;;  %v3342_v9 = vmul.f32 %v10336_v16, %v3284_v30  ;;  %v3339_v45 = vmul.f32 %v10336_v16, %v3281_v21  ;;  %v3341_v57 = vmul.f32 %v10336_v16, %v3283_v58  ;;  %v12160_v58 = vld [vmem:[#allocation99_spill] sm:$0xff]  ;;  %6353 = vmatpush3.bf16.msra.mxu0 %v10343_v3 }
 0x364   :  { %v3344_v7 = vmul.f32 %v10336_v16, %v3286_v59  ;;  %v3346_v17 = vmul.f32 %v10336_v16, %v3288_v41  ;;  %v3343_v12 = vmul.f32 %v10336_v16, %v3285_v47  ;;  %v3345_v13 = vmul.f32 %v10336_v16, %v3287_v6  ;;  %v12163_v59 = vld [vmem:[#allocation22_spill] sm:$0xff]  ;;  %6369 = vmatpush3.bf16.msra.mxu1 %v10343_v3 }
 0x365   :  { %v10356_v53 = vmax.f32 %v3340_v24, %v3342_v9  ;;  %v10358_v11 = vmax.f32 %v3339_v45, %v3341_v57  ;;  %v3302_v41 = vsub.f32 %v10039_v18, %v10256_v39  ;;  %v3301_v9 = vsub.f32 %v10056_v0, %v10256_v39  ;;  %v12161_v45 = vld [vmem:[#allocation25_spill] sm:$0xff]  ;;  %v12162_v24 = vld [vmem:[#allocation82_spill] sm:$0xff]  ;;  %v12164_v57 = vld [vmem:[#allocation79_spill] sm:$0xff] }
 0x366   :  { %v3316_v30 = vsub.f32 %v12162_v24, %v10256_v39  ;;  %v3313_v21 = vsub.f32 %v12163_v59, %v10256_v39  ;;  %v10381_v18 = vmax.f32 %v3344_v7, %v3346_v17  ;;  %v10383_v0 = vmax.f32 %v3343_v12, %v3345_v13  ;;  %v12166_v59 = vld [vmem:[#allocation166_spill] sm:$0xff]  ;;  %v12167_v17 = vld [vmem:[#allocation85_spill] sm:$0xff]  ;;  %v12174_v13 = vld [vmem:[#allocation108_spill] sm:$0xff] }
 0x367   :  { %v3435_v47 = vrot.slane %v10356_v53, 1  ;;  %v3434_v6 = vrot.slane %v10358_v11, 1  ;;  %v3315_v27 = vsub.f32 %v12164_v57, %v10256_v39  ;;  %v3320_v22 = vsub.f32 %v12166_v59, %v10256_v39  ;;  %v12168_v12 = vld [vmem:[#allocation94_spill] sm:$0xff]  ;;  %v12172_v59 = vld [vmem:[#allocation100_spill] sm:$0xff] }
 0x368   :  { %v3317_v7 = vsub.f32 %v12167_v17, %v10256_v39  ;;  %v12169_v57 = vld [vmem:[#allocation106_spill] sm:$0xff]  ;;  %v3451_v62 = vrot.slane %v10383_v0, 1  ;;  %v3452_v19 = vrot.slane %v10381_v18, 1  ;;  %v3360_v34 = vmul.f32 %v10336_v16, %v3302_v41 }
 0x369   :  { %3439 = vrot.lane.b32.xlu1 %v3435_v47, %s6620_s11  ;;  %v3436_v24 = vsel %vm3433_vm2, %v3434_v6, %v3435_v47  ;;  %v12171_v47 = vld [vmem:[#allocation121_spill] sm:$0xff]  ;;  %v3362_v6 = vmul.f32 %v10336_v16, %v3304_v40  ;;  %v3361_v40 = vmul.f32 %v10336_v16, %v3303_v55  ;;  %v12175_v41 = vsub.f32 %v10167_v23, %v10256_v39 }
 0x36a   :  { %3437 = vrot.lane.b32.xlu0 %v3436_v24, %s6620_s11  ;;  %v3359_v24 = vmul.f32 %v10336_v16, %v3301_v9  ;;  %v3366_v17 = vmul.f32 %v10336_v16, %v12176_v49  ;;  %v12177_v3 = vsub.f32 %v12154_v44, %v10256_v39  ;;  %v3350_v55 = vmul.f32 %v10336_v16, %v12178_v28 }
 0x36b   :  { %v10431_v63 = vmax.f32 %v3360_v34, %v3362_v6  ;;  %v3364_v9 = vmul.f32 %v10336_v16, %v12175_v41  ;;  %v12179_v23 = vsub.f32 %v12156_v2, %v10256_v39  ;;  %v3363_v49 = vmul.f32 %v10336_v16, %v12180_v54 }
 0x36c   :  { %v3348_v34 = vmul.f32 %v10336_v16, %v12177_v3  ;;  %v3453_v41 = vsel %vm3433_vm2, %v3451_v62, %v3452_v19  ;;  %v10462_v44 = vmax.f32 %v3359_v24, %v3361_v40  ;;  %v3365_v28 = vmul.f32 %v10336_v16, %v12181_v25 }
 0x36d   :  { %3447 = vrot.lane.b32.xlu1 %v10381_v18, %s6621_s12  ;;  %v3347_v6 = vmul.f32 %v10336_v16, %v12179_v23  ;;  %v10464_v3 = vmax.f32 %v3364_v9, %v3366_v17  ;;  %v12182_v2 = vsub.f32 %v12157_v43, %v10256_v39  ;;  %v12183_v23 = vsub.f32 %v12147_v38, %v10256_v39 }
 0x36e   :  { %3445 = vrot.lane.b32.xlu0 %v10383_v0, %s6621_s12  ;;  %v12184_v17 = vsub.f32 %v12149_v8, %v10256_v39  ;;  %v3367_v40 = vmul.f32 %v10336_v16, %v12185_v29  ;;  %v10488_v43 = vmax.f32 %v3363_v49, %v3365_v28  ;;  %v12186_v38 = vsub.f32 %v12148_v36, %v10256_v39 }
 0x36f   :  { %v3349_v14 = vmul.f32 %v10336_v16, %v12182_v2  ;;  %v3368_v62 = vmul.f32 %v10336_v16, %v12183_v23  ;;  %v4005_v9 = vrot.slane %v10464_v3, 1  ;;  %v3330_v8 = vsub.f32 %v10024_v37, %v10256_v39 }
 0x370   :  { %v3370_v24 = vmul.f32 %v10336_v16, %v12184_v17  ;;  %v3369_v54 = vmul.f32 %v10336_v16, %v12186_v38  ;;  %v12187_v5 = vsub.f32 %v12161_v45, %v10256_v39  ;;  %v3374_v49 = vmul.f32 %v10336_v16, %v3316_v30 }
 0x371   :  { %3550 = vrot.lane.b32.xlu1 %v3453_v41, %s6620_s11  ;;  %v10505_v28 = vmax.f32 %v3348_v34, %v3350_v55  ;;  %v4004_v36 = vrot.slane %v10488_v43, 1  ;;  %v3373_v17 = vmul.f32 %v10336_v16, %v3315_v27  ;;  %v10512_v37 = vmax.f32 %v3347_v6, %v3349_v14 }
 0x372   :  { %3454 = vrot.lane.b32.xlu0 %v3453_v41, %s6622_s13  ;;  %v10497_v25 = vmax.f32 %v3368_v62, %v3370_v24  ;;  %v3372_v2 = vmul.f32 %v10336_v16, %v12187_v5  ;;  %v3371_v41 = vmul.f32 %v10336_v16, %v3313_v21  ;;  %v10508_v23 = vmax.f32 %v3367_v40, %v3369_v54 }
 0x373   :  { %v12188_v45 = vsub.f32 %v12165_v56, %v10256_v39  ;;  %v3378_v21 = vmul.f32 %v10336_v16, %v3320_v22  ;;  %v10525_v34 = vsel %vm3433_vm2, %v4004_v36, %v4005_v9  ;;  %v3375_v55 = vmul.f32 %v10336_v16, %v3317_v7  ;;  %v3430_v36 = vld [vmem:[%s11491_s3 + $0x38] sm:$0xff] }
 0x374   :  { %v10514_v62 = vmax.f32 %v3372_v2, %v3374_v49  ;;  %v10527_v27 = vmax.f32 %v3371_v41, %v3373_v17  ;;  %v3329_v6 = vsub.f32 %v10041_v4, %v10256_v39  ;;  %v12189_v56 = vsub.f32 %v12158_v20, %v10256_v39 }
 0x375   :  { %3552 = vrot.lane.b32.xlu1 %v3452_v19, %s6620_s11  ;;  %v3376_v30 = vmul.f32 %v10336_v16, %v12188_v45  ;;  %v12191_v29 = vsub.f32 %v12169_v57, %v10256_v39  ;;  %v3565_v40 = vrot.slane %v10505_v28, 1  ;;  %v12192_v4 = vsub.f32 %v9684_v60, %v10256_v39 }
 0x376   :  { %3456 = vrot.lane.b32.xlu0 %v3452_v19, %s6622_s13  ;;  %v3352_v14 = vmul.f32 %v10336_v16, %v12189_v56  ;;  %v12190_v19 = vsub.f32 %v12168_v12, %v10256_v39  ;;  %v12193_v38 = vsub.f32 %v12170_v31, %v10256_v39  ;;  %v12194_v12 = vsub.f32 %v12171_v47, %v10256_v39  ;;  %v3429_v47 = vld [vmem:[%s11491_s3 + $0x30] sm:$0xff] }
 0x377   :  { %v10536_v22 = vmax.f32 %v3376_v30, %v3378_v21  ;;  %v3380_v7 = vmul.f32 %v10336_v16, %v12191_v29  ;;  %v3354_v20 = vmul.f32 %v10336_v16, %v12192_v4  ;;  %v3564_v57 = vrot.slane %v10512_v37, 1 }
 0x378   :  { %v3377_v24 = vmul.f32 %v10336_v16, %v12190_v19  ;;  %v3382_v54 = vmul.f32 %v10336_v16, %v12193_v38  ;;  %v3379_v5 = vmul.f32 %v10336_v16, %v12194_v12  ;;  %v12195_v60 = vsub.f32 %v12172_v59, %v10256_v39 }
 0x379   :  { %3560 = vrot.lane.b32.xlu1 %v10505_v28, %s6621_s12  ;;  %v12196_v31 = vsub.f32 %v12173_v46, %v10256_v39  ;;  %v12197_v59 = vsub.f32 %v12160_v58, %v10256_v39  ;;  %v12198_v46 = vsub.f32 %v9915_v32, %v10256_v39  ;;  %v12199_v21 = vsub.f32 %v12174_v13, %v10256_v39 }
 0x37a   :  { %v10562_v2 = vmax.f32 %v3375_v55, %v3377_v24  ;;  %v3381_v49 = vmul.f32 %v10336_v16, %v12195_v60  ;;  %3558 = vrot.lane.b32.xlu0 %v10512_v37, %s6621_s12  ;;  %v10584_v45 = vmax.f32 %v3380_v7, %v3382_v54  ;;  %v12200_v56 = vsub.f32 %v9706_v1, %v10256_v39 }
 0x37b   :  { %v3384_v41 = vmul.f32 %v10336_v16, %v12196_v31  ;;  %v3351_v17 = vmul.f32 %v10336_v16, %v12197_v59  ;;  %v3386_v30 = vmul.f32 %v10336_v16, %v12198_v46  ;;  %v3383_v55 = vmul.f32 %v10336_v16, %v12199_v21 }
 0x37c   :  { %v3353_v19 = vmul.f32 %v10336_v16, %v12200_v56  ;;  %v10598_v58 = vmax.f32 %v3379_v5, %v3381_v49  ;;  %v12201_v24 = vsub.f32 %v9927_v51, %v10256_v39  ;;  %v3388_v32 = vmul.f32 %v10336_v16, %v3330_v8 }
 0x37d   :  { %v10605_v7 = vmax.f32 %v3384_v41, %v3386_v30  ;;  %v12202_v13 = vsub.f32 %v10132_v52, %v10256_v39  ;;  %v10611_v38 = vpack.c.bf16 %v3430_v36, %v3429_v47  ;;  %3569 = vrot.lane.b32.xlu1 %v3565_v40, %s6622_s13  ;;  %v3566_v1 = vsel %vm3433_vm2, %v3564_v57, %v3565_v40  ;;  %v12209_v30 = vld [vmem:[#allocation127_spill] sm:$0xff] }
 0x37e   :  { %v3385_v29 = vmul.f32 %v10336_v16, %v12201_v24  ;;  %v3387_v51 = vmul.f32 %v10336_v16, %v3329_v6  ;;  %3567 = vrot.lane.b32.xlu0 %v3566_v1, %s6622_s13  ;;  %v12203_v52 = vsub.f32 %v10154_v15, %v10256_v39  ;;  %v10626_v5 = vmax.f32 %v3352_v14, %v3354_v20 }
 0x37f   :  { %v3390_v4 = vmul.f32 %v10336_v16, %v12202_v13  ;;  %6355 = vmatprep.subr.bf16.mxu0 %v10611_v38  ;;  %v10628_v60 = vmax.f32 %v3351_v17, %v3353_v19  ;;  %6371 = vmatprep.subr.bf16.mxu1 %v10611_v38  ;;  %v12204_v6 = vsub.f32 %v10169_v10, %v10256_v39 }
 0x380   :  { %v10615_v54 = vmax.f32 %v3383_v55, %v3385_v29  ;;  %v3389_v12 = vmul.f32 %v10336_v16, %v12203_v52  ;;  %6357 = vmatpush3.bf16.msra.mxu0 %v10611_v38  ;;  %6373 = vmatpush3.bf16.msra.mxu1 %v10611_v38  ;;  %v12205_v15 = vsub.f32 %v10215_v48, %v10256_v39 }
 0x381   :  { %v10619_v8 = vmax.f32 %v3388_v32, %v3390_v4  ;;  %v3392_v57 = vmul.f32 %v10336_v16, %v12204_v6  ;;  %6375 = vmatprep.subr.bf16.mxu0 %v10320_v26  ;;  %v12206_v20 = vsub.f32 %v10181_v35, %v10256_v39  ;;  %3662 = vrot.lane.b32.xlu1 %v3565_v40, %s6620_s11  ;;  %v3674_v36 = vrot.slane %v10628_v60, 1  ;;  %v12208_v40 = vld [vmem:[#allocation101_spill] sm:$0xff] }
 0x382   :  { %v10636_v49 = vmax.f32 %v3387_v51, %v3389_v12  ;;  %v3394_v14 = vmul.f32 %v10336_v16, %v12205_v15  ;;  %v12207_v10 = vsub.f32 %v10235_v50, %v10256_v39  ;;  %6391 = vmatprep.subr.bf16.mxu1 %v10320_v26  ;;  %3660 = vrot.lane.b32.xlu0 %v3566_v1, %s6620_s11  ;;  %v3675_v35 = vrot.slane %v10626_v5, 1 }
 0x383   :  { %v3391_v31 = vmul.f32 %v10336_v16, %v12206_v20  ;;  %v3298_v17 = vsub.f32 %v12208_v40, %v10256_v39  ;;  %v3300_v46 = vsub.f32 %v9932_v42, %v10256_v39  ;;  %v3297_v21 = vsub.f32 %v12209_v30, %v10256_v39 }
 0x384   :  { %v3393_v41 = vmul.f32 %v10336_v16, %v12207_v10  ;;  %v10655_v48 = vmax.f32 %v3392_v57, %v3394_v14  ;;  %v3299_v55 = vsub.f32 %v9942_v61, %v10256_v39  ;;  %v3676_v19 = vsel %vm3433_vm2, %v3674_v36, %v3675_v35 }
 0x385   :  { %3670 = vrot.lane.b32.xlu1 %v10626_v5, %s6621_s12  ;;  %v3356_v24 = vmul.f32 %v10336_v16, %v3298_v17  ;;  %v3358_v29 = vmul.f32 %v10336_v16, %v3300_v46  ;;  %v3355_v42 = vmul.f32 %v10336_v16, %v3297_v21  ;;  %v3894_v1 = vrot.slane %v10462_v44, 1 }
 0x386   :  { %v10657_v47 = vmax.f32 %v3391_v31, %v3393_v41  ;;  %v4670_v59 = vrot.slane %v10655_v48, 1  ;;  %3668 = vrot.lane.b32.xlu0 %v10628_v60, %s6621_s12  ;;  %v3357_v32 = vmul.f32 %v10336_v16, %v3299_v55  ;;  %v3895_v51 = vrot.slane %v10431_v63, 1 }
 0x387   :  { %v10688_v61 = vmax.f32 %v3356_v24, %v3358_v29  ;;  %v4103_v12 = vrot.slane %v10497_v25, 1  ;;  %v4102_v6 = vrot.slane %v10508_v23, 1  ;;  %v4119_v15 = vrot.slane %v10527_v27, 1 }
 0x388   :  { %v4669_v50 = vrot.slane %v10657_v47, 1  ;;  %v10690_v39 = vmax.f32 %v3355_v42, %v3357_v32  ;;  %v3896_v52 = vsel %vm3433_vm2, %v3894_v1, %v3895_v51  ;;  %v4339_v20 = vrot.slane %v10598_v58, 1 }
 0x389   :  { %3770 = vrot.lane.b32.xlu1 %v3676_v19, %s6620_s11  ;;  %v3785_v13 = vrot.slane %v10688_v61, 1  ;;  %v4104_v57 = vsel %vm3433_vm2, %v4102_v6, %v4103_v12  ;;  %v4340_v31 = vrot.slane %v10584_v45, 1  ;;  %v4450_v41 = vrot.slane %v10605_v7, 1 }
 0x38a   :  { %v10678_v56 = vsel %vm3433_vm2, %v4669_v50, %v4670_v59  ;;  %3677 = vrot.lane.b32.xlu0 %v3676_v19, %s6622_s13  ;;  %v3784_v4 = vrot.slane %v10690_v39, 1  ;;  %v4449_v36 = vrot.slane %v10615_v54, 1  ;;  %v4559_v24 = vrot.slane %v10636_v49, 1 }
 0x38b   :  { %v4341_v10 = vsel %vm3433_vm2, %v4339_v20, %v4340_v31  ;;  %v4560_v29 = vrot.slane %v10619_v8, 1 }
 0x38c   :  { %v3786_v16 = vsel %vm3433_vm2, %v3784_v4, %v3785_v13  ;;  %v4451_v40 = vsel %vm3433_vm2, %v4449_v36, %v4450_v41 }
 0x38d   :  { %3772 = vrot.lane.b32.xlu1 %v3675_v35, %s6620_s11 }
 0x38e   :  { %3679 = vrot.lane.b32.xlu0 %v3675_v35, %s6622_s13 }
 0x391   :  { %3780 = vrot.lane.b32.xlu1 %v10688_v61, %s6621_s12 }
 0x392   :  { %3778 = vrot.lane.b32.xlu0 %v10690_v39, %s6621_s12 }
 0x395   :  { %3789 = vrot.lane.b32.xlu1 %v3785_v13, %s6622_s13 }
 0x396   :  { %3787 = vrot.lane.b32.xlu0 %v3786_v16, %s6622_s13 }
 0x399   :  { %3882 = vrot.lane.b32.xlu1 %v3785_v13, %s6620_s11 }
 0x39a   :  { %3880 = vrot.lane.b32.xlu0 %v3786_v16, %s6620_s11  ;;  %v4561_v16 = vsel %vm3433_vm2, %v4559_v24, %v4560_v29 }
 0x39d   :  { %3890 = vrot.lane.b32.xlu1 %v10431_v63, %s6621_s12 }
 0x39e   :  { %3888 = vrot.lane.b32.xlu0 %v10462_v44, %s6621_s12 }
 0x3a1   :  { %3990 = vrot.lane.b32.xlu1 %v3896_v52, %s6620_s11 }
 0x3a2   :  { %3897 = vrot.lane.b32.xlu0 %v3896_v52, %s6622_s13 }
 0x3a5   :  { %3992 = vrot.lane.b32.xlu1 %v3895_v51, %s6620_s11 }
 0x3a6   :  { %3899 = vrot.lane.b32.xlu0 %v3895_v51, %s6622_s13 }
 0x3a9   :  { %4000 = vrot.lane.b32.xlu1 %v10464_v3, %s6621_s12 }
 0x3aa   :  { %3998 = vrot.lane.b32.xlu0 %v10488_v43, %s6621_s12  ;;  %v4120_v43 = vrot.slane %v10514_v62, 1 }
 0x3ac   :  { %v4121_v3 = vsel %vm3433_vm2, %v4119_v15, %v4120_v43 }
 0x3ad   :  { %4009 = vrot.lane.b32.xlu1 %v4005_v9, %s6622_s13  ;;  %v4230_v9 = vrot.slane %v10536_v22, 1 }
 0x3ae   :  { %4007 = vrot.lane.b32.xlu0 %v10525_v34, %s6622_s13  ;;  %v4229_v34 = vrot.slane %v10562_v2, 1 }
 0x3b0   :  { %v4231_v14 = vsel %vm3433_vm2, %v4229_v34, %v4230_v9 }
 0x3b1   :  { %4107 = vrot.lane.b32.xlu1 %v4103_v12, %s6620_s11 }
 0x3b2   :  { %4105 = vrot.lane.b32.xlu0 %v4104_v57, %s6620_s11 }
 0x3b5   :  { %4115 = vrot.lane.b32.xlu1 %v10514_v62, %s6621_s12 }
 0x3b6   :  { %4113 = vrot.lane.b32.xlu0 %v10527_v27, %s6621_s12 }
 0x3b9   :  { %4215 = vrot.lane.b32.xlu1 %v4121_v3, %s6620_s11 }
 0x3ba   :  { %4122 = vrot.lane.b32.xlu0 %v4121_v3, %s6622_s13 }
 0x3bd   :  { %4217 = vrot.lane.b32.xlu1 %v4120_v43, %s6620_s11 }
 0x3be   :  { %4124 = vrot.lane.b32.xlu0 %v4120_v43, %s6622_s13  ;;  %v12210_v43 = vld [vmem:[#allocation102_spill] sm:$0xff] }
 0x3c1   :  { %4225 = vrot.lane.b32.xlu1 %v10536_v22, %s6621_s12 }
 0x3c2   :  { %4223 = vrot.lane.b32.xlu0 %v10562_v2, %s6621_s12 }
 0x3c5   :  { %4234 = vrot.lane.b32.xlu1 %v4230_v9, %s6622_s13 }
 0x3c6   :  { %4232 = vrot.lane.b32.xlu0 %v4231_v14, %s6622_s13 }
 0x3c9   :  { %4327 = vrot.lane.b32.xlu1 %v4230_v9, %s6620_s11 }
 0x3ca   :  { %4325 = vrot.lane.b32.xlu0 %v4231_v14, %s6620_s11 }
 0x3cd   :  { %4335 = vrot.lane.b32.xlu1 %v10584_v45, %s6621_s12 }
 0x3ce   :  { %4333 = vrot.lane.b32.xlu0 %v10598_v58, %s6621_s12 }
 0x3d1   :  { %4435 = vrot.lane.b32.xlu1 %v4341_v10, %s6620_s11 }
 0x3d2   :  { %4342 = vrot.lane.b32.xlu0 %v4341_v10, %s6622_s13 }
 0x3d5   :  { %4437 = vrot.lane.b32.xlu1 %v4340_v31, %s6620_s11 }
 0x3d6   :  { %4344 = vrot.lane.b32.xlu0 %v4340_v31, %s6622_s13 }
 0x3d9   :  { %4445 = vrot.lane.b32.xlu1 %v10605_v7, %s6621_s12 }
 0x3da   :  { %4443 = vrot.lane.b32.xlu0 %v10615_v54, %s6621_s12 }
 0x3db   :  { %v3440_v35 = vpop.permute.xlu1 %3439 }
 0x3dc   :  { %v3438_v50 = vpop.permute.xlu0 %3437 }
 0x3dd   :  { %4454 = vrot.lane.b32.xlu1 %v4450_v41, %s6622_s13  ;;  %v3460_v30 = vsel %vm2924_vm0, %v10358_v11, %v3438_v50  ;;  %v3461_v11 = vsel %vm2924_vm0, %v10356_v53, %v3440_v35 }
 0x3de   :  { %4452 = vrot.lane.b32.xlu0 %v4451_v40, %s6622_s13 }
 0x3df   :  { %v3448_v17 = vpop.permute.xlu1 %3447 }
 0x3e0   :  { %v3446_v46 = vpop.permute.xlu0 %3445  ;;  %v3464_v13 = vsel %vm3462_vm3, %v3461_v11, %v3448_v17 }
 0x3e1   :  { %4547 = vrot.lane.b32.xlu1 %v4450_v41, %s6620_s11  ;;  %v3463_v55 = vsel %vm3462_vm3, %v3460_v30, %v3446_v46 }
 0x3e2   :  { %4545 = vrot.lane.b32.xlu0 %v4451_v40, %s6620_s11 }
 0x3e3   :  { %v3551_v21 = vpop.permute.xlu1 %3550 }
 0x3e4   :  { %v3455_v19 = vpop.permute.xlu0 %3454  ;;  %v3573_v53 = vsel %vm2924_vm0, %v10383_v0, %v3551_v21 }
 0x3e5   :  { %4555 = vrot.lane.b32.xlu1 %v10619_v8, %s6621_s12  ;;  %v3466_v42 = vsel %vm3465_vm4, %v3463_v55, %v3455_v19 }
 0x3e6   :  { %4553 = vrot.lane.b32.xlu0 %v10636_v49, %s6621_s12  ;;  %6054 = vmatprep.mubr.msk.f32.mxu0 %vm3468_vm5, %v3466_v42 }
 0x3e7   :  { %v3553_v32 = vpop.permute.xlu1 %3552 }
 0x3e8   :  { %v3457_v4 = vpop.permute.xlu0 %3456  ;;  %v3574_v6 = vsel %vm2924_vm0, %v10381_v18, %v3553_v32 }
 0x3e9   :  { %v3467_v1 = vsel %vm3465_vm4, %v3464_v13, %v3457_v4  ;;  %4655 = vrot.lane.b32.xlu1 %v4561_v16, %s6620_s11 }
 0x3ea   :  { %4562 = vrot.lane.b32.xlu0 %v4561_v16, %s6622_s13  ;;  %6055 = vmatmul.mubr.msk.f32.vlgmr.msra.gmra.mrb[0].mxu0 %vm3468_vm5, %v3467_v1 }
 0x3eb   :  { %v3561_v51 = vpop.permute.xlu1 %3560  ;;  %6377 = vmatpush3.bf16.msra.mxu0 %v10320_v26 }
 0x3ec   :  { %v3559_v52 = vpop.permute.xlu0 %3558  ;;  %6379 = vmatprep.subr.bf16.mxu0 %v10328_v33  ;;  %v3576_v3 = vsel %vm3462_vm3, %v3574_v6, %v3561_v51 }
 0x3ed   :  { %4657 = vrot.lane.b32.xlu1 %v4560_v29, %s6620_s11  ;;  %v3575_v57 = vsel %vm3462_vm3, %v3573_v53, %v3559_v52 }
 0x3ee   :  { %4564 = vrot.lane.b32.xlu0 %v4560_v29, %s6622_s13 }
 0x3ef   :  { %v3570_v12 = vpop.permute.xlu1 %3569  ;;  %6381 = vmatpush3.bf16.msra.mxu0 %v10328_v33 }
 0x3f0   :  { %v3568_v15 = vpop.permute.xlu0 %3567  ;;  %6383 = vmatprep.subr.bf16.mxu0 %v12210_v43  ;;  %v3578_v0 = vsel %vm3465_vm4, %v3576_v3, %v3570_v12 }
 0x3f1   :  { %4665 = vrot.lane.b32.xlu1 %v10655_v48, %s6621_s12  ;;  %v3577_v9 = vsel %vm3465_vm4, %v3575_v57, %v3568_v15 }
 0x3f2   :  { %4663 = vrot.lane.b32.xlu0 %v10657_v47, %s6621_s12  ;;  %6073 = vmatprep.mubr.msk.f32.mxu1 %vm3468_vm5, %v3577_v9 }
 0x3f3   :  { %v3663_v18 = vpop.permute.xlu1 %3662  ;;  %6074 = vmatmul.mubr.msk.f32.vlgmr.msra.gmra.mrb[0].mxu1 %vm3468_vm5, %v3578_v0  ;;  %6385 = vmatpush3.bf16.msra.mxu0 %v12210_v43 }
 0x3f4   :  { %v3661_v34 = vpop.permute.xlu0 %3660  ;;  %6393 = vmatpush3.bf16.msra.mxu1 %v10320_v26  ;;  %6387 = vmatprep.subr.bf16.mxu0 %v10611_v38  ;;  %v3684_v10 = vsel %vm2924_vm0, %v10505_v28, %v3663_v18 }
 0x3f5   :  { %4674 = vrot.lane.b32.xlu1 %v4670_v59, %s6622_s13  ;;  %6395 = vmatprep.subr.bf16.mxu1 %v10328_v33  ;;  %v3683_v20 = vsel %vm2924_vm0, %v10512_v37, %v3661_v34 }
 0x3f6   :  { %4672 = vrot.lane.b32.xlu0 %v10678_v56, %s6622_s13 }
 0x3f7   :  { %v3671_v47 = vpop.permute.xlu1 %3670  ;;  %6389 = vmatpush3.bf16.msra.mxu0 %v10611_v38 }
 0x3f8   :  { %v3669_v14 = vpop.permute.xlu0 %3668  ;;  %6397 = vmatpush3.bf16.msra.mxu1 %v10328_v33  ;;  %6407 = vmatprep.subr.bf16.mxu0 %v10320_v26  ;;  %v3686_v36 = vsel %vm3462_vm3, %v3684_v10, %v3671_v47 }
 0x3f9   :  { %6399 = vmatprep.subr.bf16.mxu1 %v12210_v43  ;;  %v3685_v59 = vsel %vm3462_vm3, %v3683_v20, %v3669_v14 }
 0x3fb   :  { %v3771_v48 = vpop.permute.xlu1 %3770 }
 0x3fc   :  { %v3678_v31 = vpop.permute.xlu0 %3677  ;;  %6401 = vmatpush3.bf16.msra.mxu1 %v12210_v43  ;;  %v3793_v28 = vsel %vm2924_vm0, %v10628_v60, %v3771_v48 }
 0x3fd   :  { %v3687_v56 = vsel %vm3465_vm4, %v3685_v59, %v3678_v31  ;;  %6403 = vmatprep.subr.bf16.mxu1 %v10611_v38 }
 0x3fe   :  { %6092 = vmatprep.mubr.msk.f32.mxu0 %vm3468_vm5, %v3687_v56 }
 0x3ff   :  { %v3773_v41 = vpop.permute.xlu1 %3772 }
 0x400   :  { %v3680_v35 = vpop.permute.xlu0 %3679  ;;  %6405 = vmatpush3.bf16.msra.mxu1 %v10611_v38  ;;  %v3794_v46 = vsel %vm2924_vm0, %v10626_v5, %v3773_v41 }
 0x401   :  { %v3688_v37 = vsel %vm3465_vm4, %v3686_v36, %v3680_v35  ;;  %6423 = vmatprep.subr.bf16.mxu1 %v10320_v26 }
 0x402   :  { %6093 = vmatmul.mubr.msk.f32.vlgmr.msra.gmra.mrb[2].mxu0 %vm3468_vm5, %v3688_v37 }
 0x403   :  { %v3781_v50 = vpop.permute.xlu1 %3780  ;;  %6409 = vmatpush3.bf16.msra.mxu0 %v10320_v26 }
 0x404   :  { %v3779_v40 = vpop.permute.xlu0 %3778  ;;  %6411 = vmatprep.subr.bf16.mxu0 %v10328_v33  ;;  %v3796_v55 = vsel %vm3462_vm3, %v3794_v46, %v3781_v50 }
 0x405   :  { %v3795_v30 = vsel %vm3462_vm3, %v3793_v28, %v3779_v40 }
 0x407   :  { %v3790_v17 = vpop.permute.xlu1 %3789  ;;  %6413 = vmatpush3.bf16.msra.mxu0 %v10328_v33 }
 0x408   :  { %v3788_v21 = vpop.permute.xlu0 %3787  ;;  %6415 = vmatprep.subr.bf16.mxu0 %v12210_v43  ;;  %v3798_v24 = vsel %vm3465_vm4, %v3796_v55, %v3790_v17 }
 0x409   :  { %v3797_v19 = vsel %vm3465_vm4, %v3795_v30, %v3788_v21 }
 0x40a   :  { %6111 = vmatprep.mubr.msk.f32.mxu1 %vm3468_vm5, %v3797_v19 }
 0x40b   :  { %v3883_v60 = vpop.permute.xlu1 %3882  ;;  %6112 = vmatmul.mubr.msk.f32.vlgmr.msra.gmra.mrb[2].mxu1 %vm3468_vm5, %v3798_v24  ;;  %6417 = vmatpush3.bf16.msra.mxu0 %v12210_v43 }
 0x40c   :  { %v3881_v29 = vpop.permute.xlu0 %3880  ;;  %6425 = vmatpush3.bf16.msra.mxu1 %v10320_v26  ;;  %6419 = vmatprep.subr.bf16.mxu0 %v10611_v38  ;;  %v3904_v1 = vsel %vm2924_vm0, %v10688_v61, %v3883_v60 }
 0x40d   :  { %6427 = vmatprep.subr.bf16.mxu1 %v10328_v33  ;;  %v3903_v11 = vsel %vm2924_vm0, %v10690_v39, %v3881_v29 }
 0x40f   :  { %v3891_v5 = vpop.permute.xlu1 %3890  ;;  %6421 = vmatpush3.bf16.msra.mxu0 %v10611_v38 }
 0x410   :  { %v3889_v42 = vpop.permute.xlu0 %3888  ;;  %6429 = vmatpush3.bf16.msra.mxu1 %v10328_v33  ;;  %6439 = vmatprep.subr.bf16.mxu0 %v10320_v26  ;;  %v3906_v52 = vsel %vm3462_vm3, %v3904_v1, %v3891_v5 }
 0x411   :  { %6431 = vmatprep.subr.bf16.mxu1 %v12210_v43  ;;  %v3905_v13 = vsel %vm3462_vm3, %v3903_v11, %v3889_v42 }
 0x413   :  { %v3991_v32 = vpop.permute.xlu1 %3990 }
 0x414   :  { %v3898_v4 = vpop.permute.xlu0 %3897  ;;  %6433 = vmatpush3.bf16.msra.mxu1 %v12210_v43  ;;  %v4013_v61 = vsel %vm2924_vm0, %v10462_v44, %v3991_v32 }
 0x415   :  { %v3907_v16 = vsel %vm3465_vm4, %v3905_v13, %v3898_v4  ;;  %6435 = vmatprep.subr.bf16.mxu1 %v10611_v38 }
 0x416   :  { %6130 = vmatprep.mubr.msk.f32.mxu0 %vm3468_vm5, %v3907_v16 }
 0x417   :  { %v3993_v51 = vpop.permute.xlu1 %3992 }
 0x418   :  { %v3900_v53 = vpop.permute.xlu0 %3899  ;;  %6437 = vmatpush3.bf16.msra.mxu1 %v10611_v38  ;;  %v4014_v15 = vsel %vm2924_vm0, %v10431_v63, %v3993_v51 }
 0x419   :  { %v3908_v39 = vsel %vm3465_vm4, %v3906_v52, %v3900_v53  ;;  %6455 = vmatprep.subr.bf16.mxu1 %v10320_v26 }
 0x41a   :  { %6131 = vmatmul.mubr.msk.f32.vlgmr.msra.gmra.mrb[4].mxu0 %vm3468_vm5, %v3908_v39 }
 0x41b   :  { %v4001_v12 = vpop.permute.xlu1 %4000  ;;  %6441 = vmatpush3.bf16.msra.mxu0 %v10320_v26 }
 0x41c   :  { %v3999_v6 = vpop.permute.xlu0 %3998  ;;  %6443 = vmatprep.subr.bf16.mxu0 %v10328_v33  ;;  %v4016_v0 = vsel %vm3462_vm3, %v4014_v15, %v4001_v12 }
 0x41d   :  { %v4015_v3 = vsel %vm3462_vm3, %v4013_v61, %v3999_v6 }
 0x41f   :  { %v4010_v57 = vpop.permute.xlu1 %4009  ;;  %6445 = vmatpush3.bf16.msra.mxu0 %v10328_v33 }
 0x420   :  { %v4008_v9 = vpop.permute.xlu0 %4007  ;;  %6447 = vmatprep.subr.bf16.mxu0 %v12210_v43  ;;  %v4018_v34 = vsel %vm3465_vm4, %v4016_v0, %v4010_v57 }
 0x421   :  { %v4017_v18 = vsel %vm3465_vm4, %v4015_v3, %v4008_v9 }
 0x422   :  { %6149 = vmatprep.mubr.msk.f32.mxu1 %vm3468_vm5, %v4017_v18 }
 0x423   :  { %v4108_v44 = vpop.permute.xlu1 %4107  ;;  %6150 = vmatmul.mubr.msk.f32.vlgmr.msra.gmra.mrb[4].mxu1 %vm3468_vm5, %v4018_v34  ;;  %6449 = vmatpush3.bf16.msra.mxu0 %v12210_v43 }
 0x424   :  { %v4106_v47 = vpop.permute.xlu0 %4105  ;;  %6457 = vmatpush3.bf16.msra.mxu1 %v10320_v26  ;;  %6451 = vmatprep.subr.bf16.mxu0 %v10611_v38  ;;  %v4129_v10 = vsel %vm2924_vm0, %v10497_v25, %v4108_v44 }
 0x425   :  { %6459 = vmatprep.subr.bf16.mxu1 %v10328_v33  ;;  %v4128_v20 = vsel %vm2924_vm0, %v10508_v23, %v4106_v47 }
 0x427   :  { %v4116_v63 = vpop.permute.xlu1 %4115  ;;  %6453 = vmatpush3.bf16.msra.mxu0 %v10611_v38 }
 0x428   :  { %v4114_v14 = vpop.permute.xlu0 %4113  ;;  %6461 = vmatpush3.bf16.msra.mxu1 %v10328_v33  ;;  %6471 = vmatprep.subr.bf16.mxu0 %v10320_v26  ;;  %v4131_v36 = vsel %vm3462_vm3, %v4129_v10, %v4116_v63 }
 0x429   :  { %6463 = vmatprep.subr.bf16.mxu1 %v12210_v43  ;;  %v4130_v59 = vsel %vm3462_vm3, %v4128_v20, %v4114_v14 }
 0x42b   :  { %v4216_v48 = vpop.permute.xlu1 %4215 }
 0x42c   :  { %v4123_v31 = vpop.permute.xlu0 %4122  ;;  %6465 = vmatpush3.bf16.msra.mxu1 %v12210_v43  ;;  %v4238_v25 = vsel %vm2924_vm0, %v10527_v27, %v4216_v48 }
 0x42d   :  { %v4132_v56 = vsel %vm3465_vm4, %v4130_v59, %v4123_v31  ;;  %6467 = vmatprep.subr.bf16.mxu1 %v10611_v38 }
 0x42e   :  { %6168 = vmatprep.mubr.msk.f32.mxu0 %vm3468_vm5, %v4132_v56 }
 0x42f   :  { %v4218_v41 = vpop.permute.xlu1 %4217 }
 0x430   :  { %v4125_v35 = vpop.permute.xlu0 %4124  ;;  %6469 = vmatpush3.bf16.msra.mxu1 %v10611_v38  ;;  %v4239_v28 = vsel %vm2924_vm0, %v10514_v62, %v4218_v41 }
 0x431   :  { %v4133_v23 = vsel %vm3465_vm4, %v4131_v36, %v4125_v35  ;;  %6487 = vmatprep.subr.bf16.mxu1 %v10320_v26 }
 0x432   :  { %6169 = vmatmul.mubr.msk.f32.vlgmr.msra.gmra.mrb[6].mxu0 %vm3468_vm5, %v4133_v23 }
 0x433   :  { %v4226_v37 = vpop.permute.xlu1 %4225  ;;  %6473 = vmatpush3.bf16.msra.mxu0 %v10320_v26 }
 0x434   :  { %v4224_v50 = vpop.permute.xlu0 %4223  ;;  %6475 = vmatprep.subr.bf16.mxu0 %v10328_v33  ;;  %v4241_v30 = vsel %vm3462_vm3, %v4239_v28, %v4226_v37 }
 0x435   :  { %v4240_v17 = vsel %vm3462_vm3, %v4238_v25, %v4224_v50 }
 0x437   :  { %v4235_v40 = vpop.permute.xlu1 %4234  ;;  %6477 = vmatpush3.bf16.msra.mxu0 %v10328_v33 }
 0x438   :  { %v4233_v46 = vpop.permute.xlu0 %4232  ;;  %6479 = vmatprep.subr.bf16.mxu0 %v12210_v43  ;;  %v4243_v55 = vsel %vm3465_vm4, %v4241_v30, %v4235_v40  ;;  %v5071_v30 = vld [vmem:[%s11492_s5 + $0x8] sm:$0xff] }
 0x439   :  { %v4242_v21 = vsel %vm3465_vm4, %v4240_v17, %v4233_v46  ;;  %v5070_v46 = vld [vmem:[%s11492_s5] sm:$0xff] }
 0x43a   :  { %6187 = vmatprep.mubr.msk.f32.mxu1 %vm3468_vm5, %v4242_v21  ;;  %v5072_v21 = vld [vmem:[%s11492_s5 + $0x10] sm:$0xff] }
 0x43b   :  { %v4328_v27 = vpop.permute.xlu1 %4327  ;;  %6188 = vmatmul.mubr.msk.f32.vlgmr.msra.gmra.mrb[6].mxu1 %vm3468_vm5, %v4243_v55  ;;  %6481 = vmatpush3.bf16.msra.mxu0 %v12210_v43  ;;  %v11008_v55 = vpack.c.bf16 %v5071_v30, %v5070_v46 }
 0x43c   :  { %v4326_v19 = vpop.permute.xlu0 %4325  ;;  %6489 = vmatpush3.bf16.msra.mxu1 %v10320_v26  ;;  %6483 = vmatprep.subr.bf16.mxu0 %v10611_v38  ;;  %v4349_v32 = vsel %vm2924_vm0, %v10536_v22, %v4328_v27  ;;  %v5073_v27 = vld [vmem:[%s11492_s5 + $0x18] sm:$0xff] }
 0x43d   :  { %6491 = vmatprep.subr.bf16.mxu1 %v10328_v33  ;;  %v4348_v60 = vsel %vm2924_vm0, %v10562_v2, %v4326_v19  ;;  %v11013_v19 = vpack.c.bf16 %v5073_v27, %v5072_v21 }
 0x43f   :  { %v4336_v62 = vpop.permute.xlu1 %4335  ;;  %6485 = vmatpush3.bf16.msra.mxu0 %v10611_v38 }
 0x440   :  { %v4334_v24 = vpop.permute.xlu0 %4333  ;;  %6493 = vmatpush3.bf16.msra.mxu1 %v10328_v33  ;;  %6503 = vmatprep.subr.bf16.mxu0 %v10320_v26  ;;  %v4351_v4 = vsel %vm3462_vm3, %v4349_v32, %v4336_v62  ;;  %v5074_v62 = vld [vmem:[%s11492_s5 + $0x20] sm:$0xff] }
 0x441   :  { %6495 = vmatprep.subr.bf16.mxu1 %v12210_v43  ;;  %v4350_v5 = vsel %vm3462_vm3, %v4348_v60, %v4334_v24  ;;  %v5075_v24 = vld [vmem:[%s11492_s5 + $0x28] sm:$0xff] }
 0x443   :  { %v4436_v29 = vpop.permute.xlu1 %4435 }
 0x444   :  { %v4343_v42 = vpop.permute.xlu0 %4342  ;;  %6497 = vmatpush3.bf16.msra.mxu1 %v12210_v43  ;;  %v4458_v22 = vsel %vm2924_vm0, %v10598_v58, %v4436_v29  ;;  %v11027_v29 = vpack.c.bf16 %v5075_v24, %v5074_v62 }
 0x445   :  { %v4352_v11 = vsel %vm3465_vm4, %v4350_v5, %v4343_v42  ;;  %6499 = vmatprep.subr.bf16.mxu1 %v10611_v38  ;;  %v11032_v5 = vld [vmem:[%s11493_s4] ss:$0 sm:$0xff] }
 0x446   :  { %6206 = vmatprep.mubr.msk.f32.mxu0 %vm3468_vm5, %v4352_v11 }
 0x447   :  { %v4438_v13 = vpop.permute.xlu1 %4437 }
 0x448   :  { %v4345_v16 = vpop.permute.xlu0 %4344  ;;  %6501 = vmatpush3.bf16.msra.mxu1 %v10611_v38  ;;  %v4459_v53 = vsel %vm2924_vm0, %v10584_v45, %v4438_v13 }
 0x449   :  { %v4353_v2 = vsel %vm3465_vm4, %v4351_v4, %v4345_v16  ;;  %6519 = vmatprep.subr.bf16.mxu1 %v10320_v26 }
 0x44a   :  { %6207 = vmatmul.mubr.msk.f32.vlgmr.msra.gmra.mrb[8].mxu0 %vm3468_vm5, %v4353_v2 }
 0x44b   :  { %v4446_v1 = vpop.permute.xlu1 %4445  ;;  %6505 = vmatpush3.bf16.msra.mxu0 %v10320_v26 }
 0x44c   :  { %v4444_v51 = vpop.permute.xlu0 %4443  ;;  %6507 = vmatprep.subr.bf16.mxu0 %v10328_v33  ;;  %v4461_v6 = vsel %vm3462_vm3, %v4459_v53, %v4446_v1 }
 0x44d   :  { %v4460_v39 = vsel %vm3462_vm3, %v4458_v22, %v4444_v51 }
 0x44f   :  { %v4455_v52 = vpop.permute.xlu1 %4454  ;;  %6509 = vmatpush3.bf16.msra.mxu0 %v10328_v33 }
 0x450   :  { %v4453_v12 = vpop.permute.xlu0 %4452  ;;  %6511 = vmatprep.subr.bf16.mxu0 %v12210_v43  ;;  %v4463_v57 = vsel %vm3465_vm4, %v4461_v6, %v4455_v52 }
 0x451   :  { %v4462_v61 = vsel %vm3465_vm4, %v4460_v39, %v4453_v12 }
 0x452   :  { %6225 = vmatprep.mubr.msk.f32.mxu1 %vm3468_vm5, %v4462_v61 }
 0x453   :  { %v4548_v58 = vpop.permute.xlu1 %4547  ;;  %6226 = vmatmul.mubr.msk.f32.vlgmr.msra.gmra.mrb[8].mxu1 %vm3468_vm5, %v4463_v57  ;;  %6513 = vmatpush3.bf16.msra.mxu0 %v12210_v43 }
 0x454   :  { %v4546_v15 = vpop.permute.xlu0 %4545  ;;  %6521 = vmatpush3.bf16.msra.mxu1 %v10320_v26  ;;  %6515 = vmatprep.subr.bf16.mxu0 %v10611_v38 }
 0x455   :  { %6523 = vmatprep.subr.bf16.mxu1 %v10328_v33  ;;  %v4568_v9 = vsel %vm2924_vm0, %v10615_v54, %v4546_v15 }
 0x457   :  { %v4556_v45 = vpop.permute.xlu1 %4555  ;;  %6517 = vmatpush3.bf16.msra.mxu0 %v10611_v38 }
 0x458   :  { %v4554_v3 = vpop.permute.xlu0 %4553  ;;  %6525 = vmatpush3.bf16.msra.mxu1 %v10328_v33  ;;  %v4569_v33 = vsel %vm2924_vm0, %v10605_v7, %v4548_v58  ;;  %6535 = vmatprep.subr.bf16.mxu0 %v11008_v55 }
 0x459   :  { %6527 = vmatprep.subr.bf16.mxu1 %v12210_v43  ;;  %v4570_v18 = vsel %vm3462_vm3, %v4568_v9, %v4554_v3  ;;  %v4571_v47 = vsel %vm3462_vm3, %v4569_v33, %v4556_v45 }
 0x45b   :  { %v4656_v0 = vpop.permute.xlu1 %4655 }
 0x45c   :  { %v4563_v34 = vpop.permute.xlu0 %4562  ;;  %6529 = vmatpush3.bf16.msra.mxu1 %v12210_v43  ;;  %v4678_v20 = vsel %vm2924_vm0, %v10636_v49, %v4656_v0 }
 0x45d   :  { %v4572_v26 = vsel %vm3465_vm4, %v4570_v18, %v4563_v34  ;;  %6531 = vmatprep.subr.bf16.mxu1 %v10611_v38 }
 0x45e   :  { %6244 = vmatprep.mubr.msk.f32.mxu0 %vm3468_vm5, %v4572_v26 }
 0x45f   :  { %v4658_v44 = vpop.permute.xlu1 %4657 }
 0x460   :  { %v4565_v63 = vpop.permute.xlu0 %4564  ;;  %6533 = vmatpush3.bf16.msra.mxu1 %v10611_v38  ;;  %v4679_v59 = vsel %vm2924_vm0, %v10619_v8, %v4658_v44 }
 0x461   :  { %v4573_v54 = vsel %vm3465_vm4, %v4571_v47, %v4565_v63  ;;  %6551 = vmatprep.subr.bf16.mxu1 %v11008_v55 }
 0x462   :  { %6245 = vmatmul.mubr.msk.f32.vlgmr.msra.gmra.mrb[10].mxu0 %vm3468_vm5, %v4573_v54 }
 0x463   :  { %v4666_v43 = vpop.permute.xlu1 %4665  ;;  %6537 = vmatpush3.bf16.msra.mxu0 %v11008_v55 }
 0x464   :  { %v4664_v14 = vpop.permute.xlu0 %4663  ;;  %v4681_v56 = vsel %vm3462_vm3, %v4679_v59, %v4666_v43  ;;  %6539 = vmatprep.subr.bf16.mxu0 %v11013_v19 }
 0x465   :  { %v4680_v7 = vsel %vm3462_vm3, %v4678_v20, %v4664_v14 }
 0x467   :  { %v4675_v48 = vpop.permute.xlu1 %4674  ;;  %6541 = vmatpush3.bf16.msra.mxu0 %v11013_v19 }
 0x468   :  { %v4673_v31 = vpop.permute.xlu0 %4672  ;;  %v4683_v10 = vsel %vm3465_vm4, %v4681_v56, %v4675_v48  ;;  %6543 = vmatprep.subr.bf16.mxu0 %v11027_v29 }
 0x469   :  { %v4682_v38 = vsel %vm3465_vm4, %v4680_v7, %v4673_v31 }
 0x46a   :  { %6263 = vmatprep.mubr.msk.f32.mxu1 %vm3468_vm5, %v4682_v38 }
 0x46b   :  { %6264 = vmatmul.mubr.msk.f32.vlgmr.msra.gmra.mrb[10].mxu1 %vm3468_vm5, %v4683_v10  ;;  %6545 = vmatpush3.bf16.msra.mxu0 %v11027_v29 }
 0x46c   :  { %6553 = vmatpush3.bf16.msra.mxu1 %v11008_v55 }
 0x46d   :  { %6555 = vmatprep.subr.bf16.mxu1 %v11013_v19 }
 0x470   :  { %6557 = vmatpush3.bf16.msra.mxu1 %v11013_v19 }
 0x471   :  { %6559 = vmatprep.subr.bf16.mxu1 %v11027_v29 }
 0x474   :  { %6561 = vmatpush3.bf16.msra.mxu1 %v11027_v29 }
 0x4bd   :  { %v6056_v41 = vpop.f32.mrb[0].mxu0 }
 0x4be   :  { %v3541_v36 = vpop.f32.mrb[1].mxu0  ;;  %v4773_v11 = vadd.f32 %v6056_v41, %v11032_v5 }
 0x4bf   :  { %v4772_v32 = vadd.f32 %v11032_v5, %v3541_v36 }
 0x4c0   :  { %v4797_v16 = vmul.f32 0.01, %v4773_v11 }
 0x4c1   :  { %v4796_v2 = vmul.f32 0.01, %v4772_v32 }
 0x4c2   :  { %v11048_v61 = vmax.f32 %v4773_v11, %v4797_v16 }
 0x4c3   :  { %v11050_v57 = vmax.f32 %v4772_v32, %v4796_v2 }
 0x4c4   :  { %v4913_v44 = vmul.f32 %v11048_v61, %v11048_v61  ;;  %v4848_v31 = vsel %vm4847_vm6, %v11048_v61, 0.0 }
 0x4c5   :  { %v4912_v47 = vmul.f32 %v11050_v57, %v11050_v57  ;;  %v4844_v56 = vsel %vm3462_vm3, %v11050_v57, 0.0 }
 0x4c6   :  { %v6075_v49 = vpop.f32.mrb[0].mxu1  ;;  %v4939_v41 = vsel %vm4847_vm6, %v4913_v44, 0.0 }
 0x4c7   :  { %v3651_v35 = vpop.f32.mrb[1].mxu1  ;;  %v4775_v13 = vadd.f32 %v6075_v49, %v11032_v5  ;;  %v4936_v36 = vsel %vm3462_vm3, %v4912_v47, 0.0 }
 0x4c8   :  { %v4774_v4 = vadd.f32 %v11032_v5, %v3651_v35 }
 0x4c9   :  { %v4799_v53 = vmul.f32 0.01, %v4775_v13 }
 0x4ca   :  { %v4798_v12 = vmul.f32 0.01, %v4774_v4 }
 0x4cb   :  { %v11054_v0 = vmax.f32 %v4775_v13, %v4799_v53 }
 0x4cc   :  { %v11058_v26 = vmax.f32 %v4774_v4, %v4798_v12 }
 0x4cd   :  { %v4915_v48 = vmul.f32 %v11054_v0, %v11054_v0 }
 0x4ce   :  { %v4914_v38 = vmul.f32 %v11058_v26, %v11058_v26  ;;  %v4851_v30 = vsel %vm3462_vm3, %v11058_v26, 0.0 }
 0x4cf   :  { %v4945_v46 = vsel %vm4847_vm6, %v4915_v48, 0.0 }
 0x4d0   :  { %v4942_v62 = vsel %vm3462_vm3, %v4914_v38, 0.0 }
 0x4d5   :  { %v6094_v23 = vpop.f32.mrb[2].mxu0 }
 0x4d6   :  { %v3761_v37 = vpop.f32.mrb[3].mxu0  ;;  %v4777_v1 = vadd.f32 %v6094_v23, %v11032_v5  ;;  %v4854_v23 = vsel %vm4847_vm6, %v11054_v0, 0.0 }
 0x4d7   :  { %v4776_v51 = vadd.f32 %v11032_v5, %v3761_v37 }
 0x4d8   :  { %v4801_v58 = vmul.f32 0.01, %v4777_v1 }
 0x4d9   :  { %v4800_v15 = vmul.f32 0.01, %v4776_v51 }
 0x4da   :  { %v11064_v63 = vmax.f32 %v4777_v1, %v4801_v58 }
 0x4db   :  { %v11066_v54 = vmax.f32 %v4776_v51, %v4800_v15 }
 0x4dc   :  { %v4917_v49 = vmul.f32 %v11064_v63, %v11064_v63  ;;  %v4860_v24 = vsel %vm4847_vm6, %v11064_v63, 0.0 }
 0x4dd   :  { %v4916_v35 = vmul.f32 %v11066_v54, %v11066_v54 }
 0x4de   :  { %v6113_v8 = vpop.f32.mrb[2].mxu1  ;;  %v4951_v11 = vsel %vm4847_vm6, %v4917_v49, 0.0 }
 0x4df   :  { %v3871_v50 = vpop.f32.mrb[3].mxu1  ;;  %v4779_v22 = vadd.f32 %v6113_v8, %v11032_v5  ;;  %v4948_v32 = vsel %vm3462_vm3, %v4916_v35, 0.0 }
 0x4e0   :  { %v4778_v6 = vadd.f32 %v11032_v5, %v3871_v50 }
 0x4e1   :  { %v4803_v45 = vmul.f32 0.01, %v4779_v22 }
 0x4e2   :  { %v4802_v33 = vmul.f32 0.01, %v4778_v6 }
 0x4e3   :  { %v11068_v43 = vmax.f32 %v4779_v22, %v4803_v45 }
 0x4e4   :  { %v11078_v10 = vmax.f32 %v4778_v6, %v4802_v33 }
 0x4e5   :  { %v4919_v37 = vmul.f32 %v11068_v43, %v11068_v43  ;;  %v11112_v13 = vsel %vm4847_vm6, %v11068_v43, 0.0 }
 0x4e6   :  { %v11116_v4 = vsel %vm3462_vm3, %v11078_v10, 0.0 }
 0x4e7   :  { %v11119_v2 = vsel %vm4847_vm6, %v4919_v37, 0.0 }
 0x4ed   :  { %v10991_v25 = vpop.f32.mrb[4].mxu0 }
 0x4ee   :  { %v10993_v40 = vpop.f32.mrb[5].mxu0  ;;  %v11138_v15 = vadd.f32 %v10991_v25, %v11032_v5 }
 0x4f6   :  { %v10995_v28 = vpop.f32.mrb[4].mxu1 }
 0x4f7   :  { %v10997_v17 = vpop.f32.mrb[5].mxu1 }
 0x505   :  { %v6170_v60 = vpop.f32.mrb[6].mxu0 }
 0x506   :  { %v4206_v42 = vpop.f32.mrb[7].mxu0  ;;  %v4785_v3 = vadd.f32 %v6170_v60, %v11032_v5  ;;  %v4857_v60 = vsel %vm3462_vm3, %v11066_v54, 0.0 }
 0x507   :  { %v4784_v18 = vadd.f32 %v11032_v5, %v4206_v42  ;;  %v4918_v42 = vmul.f32 %v11078_v10, %v11078_v10 }
 0x508   :  { %v4809_v14 = vmul.f32 0.01, %v4785_v3 }
 0x509   :  { %v4808_v59 = vmul.f32 0.01, %v4784_v18  ;;  %v11134_v58 = vsel %vm3462_vm3, %v4918_v42, 0.0 }
 0x50a   :  { %v11090_v8 = vmax.f32 %v4785_v3, %v4809_v14 }
 0x50b   :  { %v11097_v21 = vmax.f32 %v4784_v18, %v4808_v59 }
 0x50c   :  { %v4925_v1 = vmul.f32 %v11090_v8, %v11090_v8  ;;  %v4849_v53 = vsel %vm4847_vm6, %v11090_v8, 0.0 }
 0x50d   :  { %v4845_v45 = vsel %vm3462_vm3, %v11097_v21, 0.0  ;;  %v4850_v44 = vadd.f32 %v4849_v53, %v4848_v31 }
 0x50e   :  { %v6189_v52 = vpop.f32.mrb[6].mxu1  ;;  %v4940_v47 = vsel %vm4847_vm6, %v4925_v1, 0.0 }
 0x50f   :  { %v4316_v39 = vpop.f32.mrb[7].mxu1  ;;  %v4787_v9 = vadd.f32 %v6189_v52, %v11032_v5 }
 0x510   :  { %v4786_v34 = vadd.f32 %v11032_v5, %v4316_v39  ;;  %v4924_v39 = vmul.f32 %v11097_v21, %v11097_v21 }
 0x511   :  { %v4811_v20 = vmul.f32 0.01, %v4787_v9 }
 0x512   :  { %v4810_v7 = vmul.f32 0.01, %v4786_v34  ;;  %v4937_v48 = vsel %vm3462_vm3, %v4924_v39, 0.0 }
 0x513   :  { %v11092_v50 = vmax.f32 %v4787_v9, %v4811_v20  ;;  %v11144_v9 = vadd.f32 %v11032_v5, %v10993_v40  ;;  %v4846_v20 = vadd.f32 %v4845_v45, %v4844_v56 }
 0x514   :  { %v11099_v27 = vmax.f32 %v4786_v34, %v4810_v7 }
 0x515   :  { %v4927_v51 = vmul.f32 %v11092_v50, %v11092_v50  ;;  %v4855_v18 = vsel %vm4847_vm6, %v11092_v50, 0.0 }
 0x516   :  { %v4926_v12 = vmul.f32 %v11099_v27, %v11099_v27  ;;  %v4852_v34 = vsel %vm3462_vm3, %v11099_v27, 0.0  ;;  %v4856_v7 = vadd.f32 %v4855_v18, %v4854_v23 }
 0x517   :  { %v4946_v25 = vsel %vm4847_vm6, %v4927_v51, 0.0  ;;  %v4853_v38 = vadd.f32 %v4852_v34, %v4851_v30 }
 0x518   :  { %v4943_v40 = vsel %vm3462_vm3, %v4926_v12, 0.0  ;;  %v4947_v35 = vadd.f32 %v4946_v25, %v4945_v46  ;;  %v4893_v12 = vsel %vm4847_vm6, %v4856_v7, 0.0 }
 0x519   :  { %v4944_v1 = vadd.f32 %v4943_v40, %v4942_v62 }
 0x51a   :  { %v4984_v62 = vsel %vm4847_vm6, %v4947_v35, 0.0 }
 0x51b   :  { %v4973_v18 = vsel %vm3462_vm3, %v4944_v1, 0.0 }
 0x51d   :  { %v6208_v16 = vpop.f32.mrb[8].mxu0 }
 0x51e   :  { %v4789_v22 = vadd.f32 %v6208_v16, %v11032_v5  ;;  %v4426_v52 = vpop.f32.mrb[9].mxu0  ;;  %v4941_v16 = vadd.f32 %v4940_v47, %v4939_v41  ;;  %v4804_v41 = vmul.f32 0.01, %v11144_v9 }
 0x51f   :  { %v4788_v6 = vadd.f32 %v11032_v5, %v4426_v52 }
 0x520   :  { %v4813_v3 = vmul.f32 0.01, %v4789_v22 }
 0x521   :  { %v4812_v33 = vmul.f32 0.01, %v4788_v6 }
 0x522   :  { %v11152_v14 = vmax.f32 %v4789_v22, %v4813_v3  ;;  %v4938_v22 = vadd.f32 %v4937_v48, %v4936_v36  ;;  %v4881_v3 = vsel %vm3462_vm3, %v4846_v20, 0.0 }
 0x523   :  { %v11156_v59 = vmax.f32 %v4788_v6, %v4812_v33  ;;  %v4983_v33 = vsel %vm4847_vm6, %v4941_v16, 0.0 }
 0x524   :  { %v4861_v49 = vsel %vm4847_vm6, %v11152_v14, 0.0  ;;  %v4929_v31 = vmul.f32 %v11152_v14, %v11152_v14  ;;  %v4985_v48 = vadd.f32 %v4984_v62, %v4983_v33 }
 0x525   :  { %v4862_v37 = vadd.f32 %v4861_v49, %v4860_v24  ;;  %v4858_v42 = vsel %vm3462_vm3, %v11156_v59, 0.0  ;;  %v4928_v56 = vmul.f32 %v11156_v59, %v11156_v59  ;;  %v4805_v24 = vmul.f32 0.01, %v11138_v15 }
 0x526   :  { %v4952_v51 = vsel %vm4847_vm6, %v4929_v31, 0.0  ;;  %v4859_v23 = vadd.f32 %v4858_v42, %v4857_v60  ;;  %v6227_v30 = vpop.f32.mrb[8].mxu1  ;;  %v4882_v60 = vsel %vm3462_vm3, %v4853_v38, 0.0 }
 0x527   :  { %v4953_v52 = vadd.f32 %v4952_v51, %v4951_v11  ;;  %v4949_v53 = vsel %vm3462_vm3, %v4928_v56, 0.0  ;;  %v4791_v39 = vadd.f32 %v6227_v30, %v11032_v5  ;;  %v4536_v46 = vpop.f32.mrb[9].mxu1  ;;  %v4892_v11 = vsel %vm4847_vm6, %v4850_v44, 0.0 }
 0x528   :  { %v4950_v6 = vadd.f32 %v4949_v53, %v4948_v32  ;;  %v4790_v45 = vadd.f32 %v11032_v5, %v4536_v46  ;;  %v4972_v32 = vsel %vm3462_vm3, %v4938_v22, 0.0  ;;  %v4894_v47 = vadd.f32 %v4893_v12, %v4892_v11 }
 0x529   :  { %v4815_v36 = vmul.f32 0.01, %v4791_v39  ;;  %v4883_v40 = vadd.f32 %v4882_v60, %v4881_v3  ;;  %v4895_v7 = vsel %vm4847_vm6, %v4862_v37, 0.0  ;;  %v4974_v49 = vadd.f32 %v4973_v18, %v4972_v32 }
 0x52a   :  { %v4814_v34 = vmul.f32 0.01, %v4790_v45  ;;  %v4884_v44 = vsel %vm3462_vm3, %v4859_v23, 0.0  ;;  %v4986_v35 = vsel %vm4847_vm6, %v4953_v52, 0.0  ;;  %v4896_v16 = vadd.f32 %v4895_v7, %v4894_v47 }
 0x52b   :  { %v11180_v25 = vmax.f32 %v4791_v39, %v4815_v36  ;;  %v4975_v1 = vsel %vm3462_vm3, %v4950_v6, 0.0  ;;  %v4885_v30 = vadd.f32 %v4884_v44, %v4883_v40  ;;  %v4987_v53 = vadd.f32 %v4986_v35, %v4985_v48 }
 0x52c   :  { %v11183_v38 = vmax.f32 %v4790_v45, %v4814_v34  ;;  %v4976_v45 = vadd.f32 %v4975_v1, %v4974_v49  ;;  %v11207_v36 = vmax.f32 %v11138_v15, %v4805_v24  ;;  %v4783_v18 = vadd.f32 %v10995_v28, %v11032_v5 }
 0x52d   :  { %v4867_v20 = vsel %vm4847_vm6, %v11180_v25, 0.0  ;;  %v4931_v31 = vmul.f32 %v11180_v25, %v11180_v25 }
 0x52e   :  { %v4868_v42 = vadd.f32 %v4867_v20, %v11112_v13  ;;  %v4864_v56 = vsel %vm3462_vm3, %v11183_v38, 0.0  ;;  %v4930_v37 = vmul.f32 %v11183_v38, %v11183_v38  ;;  %v4921_v15 = vmul.f32 %v11207_v36, %v11207_v36 }
 0x52f   :  { %v4958_v51 = vsel %vm4847_vm6, %v4931_v31, 0.0  ;;  %v4865_v23 = vadd.f32 %v4864_v56, %v11116_v4  ;;  %v4807_v47 = vmul.f32 0.01, %v4783_v18  ;;  %v4872_v28 = vsel %vm4847_vm6, %v11207_v36, 0.0 }
 0x530   :  { %v4897_v22 = vsel %vm4847_vm6, %v4868_v42, 0.0  ;;  %v4959_v52 = vadd.f32 %v4958_v51, %v11119_v2  ;;  %v4955_v13 = vsel %vm3462_vm3, %v4930_v37, 0.0  ;;  %v11210_v2 = vmax.f32 %v11144_v9, %v4804_v41 }
 0x531   :  { %v4898_v39 = vadd.f32 %v4897_v22, %v4896_v16  ;;  %v4886_v46 = vsel %vm3462_vm3, %v4865_v23, 0.0  ;;  %v4956_v12 = vadd.f32 %v4955_v13, %v11134_v58  ;;  %v4782_v58 = vadd.f32 %v11032_v5, %v10997_v17 }
 0x532   :  { %v4988_v6 = vsel %vm4847_vm6, %v4959_v52, 0.0  ;;  %v4887_v62 = vadd.f32 %v4886_v46, %v4885_v30  ;;  %v4920_v9 = vmul.f32 %v11210_v2, %v11210_v2  ;;  %v4963_v7 = vsel %vm4847_vm6, %v4921_v15, 0.0 }
 0x533   :  { %v4989_v60 = vadd.f32 %v4988_v6, %v4987_v53  ;;  %v4977_v4 = vsel %vm3462_vm3, %v4956_v12, 0.0  ;;  %v4806_v48 = vmul.f32 0.01, %v4782_v58  ;;  %v4869_v49 = vsel %vm3462_vm3, %v11210_v2, 0.0 }
 0x534   :  { %v4978_v11 = vadd.f32 %v4977_v4, %v4976_v45  ;;  %v4960_v31 = vsel %vm3462_vm3, %v4920_v9, 0.0  ;;  %v11240_v37 = vmax.f32 %v4783_v18, %v4807_v47 }
 0x535   :  { %v6246_v3 = vpop.f32.mrb[10].mxu0  ;;  %v11242_v16 = vmax.f32 %v4782_v58, %v4806_v48 }
 0x536   :  { %v4793_v34 = vadd.f32 %v6246_v3, %v11032_v5  ;;  %v4646_v33 = vpop.f32.mrb[11].mxu0 }
 0x537   :  { %v4792_v32 = vadd.f32 %v11032_v5, %v4646_v33 }
 0x538   :  { %v4817_v24 = vmul.f32 0.01, %v4793_v34 }
 0x539   :  { %v4816_v41 = vmul.f32 0.01, %v4792_v32 }
 0x53a   :  { %v11222_v40 = vmax.f32 %v4793_v34, %v4817_v24 }
 0x53b   :  { %v11226_v17 = vmax.f32 %v4792_v32, %v4816_v41  ;;  %v4923_v32 = vmul.f32 %v11240_v37, %v11240_v37  ;;  %v4875_v41 = vsel %vm3462_vm3, %v11242_v16, 0.0 }
 0x53c   :  { %v4873_v44 = vsel %vm4847_vm6, %v11222_v40, 0.0  ;;  %v4933_v20 = vmul.f32 %v11222_v40, %v11222_v40 }
 0x53d   :  { %v4874_v35 = vadd.f32 %v4873_v44, %v4872_v28  ;;  %v4870_v42 = vsel %vm3462_vm3, %v11226_v17, 0.0  ;;  %v4932_v56 = vmul.f32 %v11226_v17, %v11226_v17  ;;  %v4969_v28 = vsel %vm4847_vm6, %v4923_v32, 0.0 }
 0x53e   :  { %v4964_v1 = vsel %vm4847_vm6, %v4933_v20, 0.0  ;;  %v4871_v51 = vadd.f32 %v4870_v42, %v4869_v49  ;;  %v6265_v23 = vpop.f32.mrb[10].mxu1 }
 0x53f   :  { %v4899_v30 = vsel %vm4847_vm6, %v4874_v35, 0.0  ;;  %v4965_v22 = vadd.f32 %v4964_v1, %v4963_v7  ;;  %v4961_v52 = vsel %vm3462_vm3, %v4932_v56, 0.0  ;;  %v4795_v13 = vadd.f32 %v6265_v23, %v11032_v5  ;;  %v4756_v53 = vpop.f32.mrb[11].mxu1 }
 0x540   :  { %v4900_v46 = vadd.f32 %v4899_v30, %v4898_v39  ;;  %v4888_v12 = vsel %vm3462_vm3, %v4871_v51, 0.0  ;;  %v4962_v45 = vadd.f32 %v4961_v52, %v4960_v31  ;;  %v4794_v6 = vadd.f32 %v11032_v5, %v4756_v53 }
 0x541   :  { %v4990_v4 = vsel %vm4847_vm6, %v4965_v22, 0.0  ;;  %v4889_v3 = vadd.f32 %v4888_v12, %v4887_v62  ;;  %v4819_v18 = vmul.f32 0.01, %v4795_v13  ;;  %v4922_v39 = vmul.f32 %v11242_v16, %v11242_v16 }
 0x542   :  { %v4991_v58 = vadd.f32 %v4990_v4, %v4989_v60  ;;  %v4979_v34 = vsel %vm3462_vm3, %v4962_v45, 0.0  ;;  %v4818_v33 = vmul.f32 0.01, %v4794_v6  ;;  %v4878_v5 = vsel %vm4847_vm6, %v11240_v37, 0.0 }
 0x543   :  { %v4980_v15 = vadd.f32 %v4979_v34, %v4978_v11  ;;  %v11254_v24 = vmax.f32 %v4795_v13, %v4819_v18  ;;  %v4966_v44 = vsel %vm3462_vm3, %v4922_v39, 0.0 }
 0x544   :  { %v11258_v9 = vmax.f32 %v4794_v6, %v4818_v33 }
 0x545   :  { %v4879_v62 = vsel %vm4847_vm6, %v11254_v24, 0.0  ;;  %v4935_v60 = vmul.f32 %v11254_v24, %v11254_v24 }
 0x546   :  { %v4880_v11 = vadd.f32 %v4879_v62, %v4878_v5  ;;  %v4876_v47 = vsel %vm3462_vm3, %v11258_v9, 0.0  ;;  %v4934_v48 = vmul.f32 %v11258_v9, %v11258_v9 }
 0x547   :  { %v4970_v7 = vsel %vm4847_vm6, %v4935_v60, 0.0  ;;  %v4877_v49 = vadd.f32 %v4876_v47, %v4875_v41 }
 0x548   :  { %v4901_v20 = vsel %vm4847_vm6, %v4880_v11, 0.0  ;;  %v4971_v31 = vadd.f32 %v4970_v7, %v4969_v28  ;;  %v4967_v35 = vsel %vm3462_vm3, %v4934_v48, 0.0 }
 0x549   :  { %v4902_v42 = vadd.f32 %v4901_v20, %v4900_v46  ;;  %v4890_v56 = vsel %vm3462_vm3, %v4877_v49, 0.0  ;;  %v4968_v1 = vadd.f32 %v4967_v35, %v4966_v44 }
 0x54a   :  { %v4992_v51 = vsel %vm4847_vm6, %v4971_v31, 0.0  ;;  %v4891_v23 = vadd.f32 %v4890_v56, %v4889_v3 }
 0x54b   :  { %v4904_v30 = vsel %vm4847_vm6, %v4902_v42, 0.0  ;;  %v4993_v22 = vadd.f32 %v4992_v51, %v4991_v58  ;;  %v4981_v52 = vsel %vm3462_vm3, %v4968_v1, 0.0 }
 0x54c   :  { %v4903_v13 = vsel %vm3462_vm3, %v4891_v23, 0.0  ;;  %v4982_v53 = vadd.f32 %v4981_v52, %v4980_v15 }
 0x54d   :  { %v4995_v12 = vsel %vm4847_vm6, %v4993_v22, 0.0  ;;  %v4905_v45 = vadd.f32 %v4904_v30, %v4903_v13 }
 0x54e   :  { %v4994_v6 = vsel %vm3462_vm3, %v4982_v53, 0.0 }
 0x54f   :  { %v4906_v46 = vrot.slane %v4905_v45, 4  ;;  %v4996_v4 = vadd.f32 %v4995_v12, %v4994_v6 }
 0x551   :  { %v4907_v18 = vadd.f32 %v4906_v46, %v4905_v45  ;;  %v4997_v34 = vrot.slane %v4996_v4, 4 }
 0x553   :  { %v4908_v33 = vrot.slane %v4907_v18, 2  ;;  %v4998_v32 = vadd.f32 %v4997_v34, %v4996_v4 }
 0x555   :  { %v4909_v3 = vadd.f32 %v4908_v33, %v4907_v18  ;;  %v4999_v39 = vrot.slane %v4998_v32, 2 }
 0x557   :  { %v4910_v5 = vrot.slane %v4909_v3, 1  ;;  %v5000_v58 = vadd.f32 %v4999_v39, %v4998_v32 }
 0x559   :  { %v4911_v62 = vadd.f32 %v4910_v5, %v4909_v3  ;;  %v5001_v60 = vrot.slane %v5000_v58, 1 }
 0x55b   :  { %v5002_v41 = vadd.f32 %v5001_v60, %v5000_v58  ;;  %v11284_v11 = vmul.f32 0.008333334, %v4911_v62 }
 0x55d   :  { %v5005_v15 = vmul.f32 0.008333334, %v5002_v41  ;;  %v5006_v47 = vmul.f32 %v11284_v11, %v11284_v11  ;;  %v5030_v48 = vsub.f32 %v11258_v9, %v11284_v11  ;;  %v5016_v28 = vsub.f32 %v11210_v2, %v11284_v11 }
 0x55e   :  { %v5018_v7 = vsub.f32 %v11242_v16, %v11284_v11  ;;  %v5012_v49 = vsub.f32 %v11066_v54, %v11284_v11  ;;  %v5014_v44 = vsub.f32 %v11078_v10, %v11284_v11  ;;  %v5017_v20 = vsub.f32 %v11207_v36, %v11284_v11 }
 0x55f   :  { %v5007_v31 = vsub.f32 %v5005_v15, %v5006_v47  ;;  %v5019_v35 = vsub.f32 %v11240_v37, %v11284_v11  ;;  %v5013_v9 = vsub.f32 %v11064_v63, %v11284_v11  ;;  %v5015_v2 = vsub.f32 %v11068_v43, %v11284_v11 }
 0x560   :  { %v5028_v16 = vsub.f32 %v11226_v17, %v11284_v11  ;;  %v5024_v54 = vsub.f32 %v11156_v59, %v11284_v11  ;;  %v5026_v10 = vsub.f32 %v11183_v38, %v11284_v11  ;;  %v5029_v36 = vsub.f32 %v11222_v40, %v11284_v11  ;;  %v5076_v59 = vld [vmem:[%s11492_s5 + $0x30] sm:$0xff]  ;;  %v5077_v38 = vld [vmem:[%s11492_s5 + $0x38] sm:$0xff] }
 0x561   :  { %v5032_v42 = vadd.f32 1e-05, %v5007_v31  ;;  %v5031_v37 = vsub.f32 %v11254_v24, %v11284_v11  ;;  %v5025_v63 = vsub.f32 %v11152_v14, %v11284_v11  ;;  %v5027_v43 = vsub.f32 %v11180_v25, %v11284_v11 }
 0x562   :  { %v11326_v40 = vpack.c.bf16 %v5077_v38, %v5076_v59  ;;  %v5008_v14 = vsub.f32 %v11050_v57, %v11284_v11  ;;  %v5010_v25 = vsub.f32 %v11058_v26, %v11284_v11  ;;  %v5009_v17 = vsub.f32 %v11048_v61, %v11284_v11 }
 0x563   :  { %6606 = vrsqrt.f32 %v5032_v42  ;;  %v5011_v24 = vsub.f32 %v11054_v0, %v11284_v11  ;;  %v5020_v1 = vsub.f32 %v11097_v21, %v11284_v11  ;;  %v5022_v51 = vsub.f32 %v11099_v27, %v11284_v11 }
 0x564   :  { %6547 = vmatprep.subr.bf16.mxu0 %v11326_v40  ;;  %6563 = vmatprep.subr.bf16.mxu1 %v11326_v40  ;;  %v5021_v23 = vsub.f32 %v11090_v8, %v11284_v11  ;;  %v5023_v57 = vsub.f32 %v11092_v50, %v11284_v11 }
 0x565   :  { %6549 = vmatpush3.bf16.msra.mxu0 %v11326_v40  ;;  %6565 = vmatpush3.bf16.msra.mxu1 %v11326_v40 }
 0x566   :  { %6567 = vmatprep.subr.bf16.mxu0 %v11008_v55  ;;  %6583 = vmatprep.subr.bf16.mxu1 %v11008_v55 }
 0x56d   :  { %v6607_v56 = vpop.eup %6606 }
 0x56e   :  { %v5056_v26 = vmul.f32 %v6607_v56, %v5030_v48  ;;  %v5042_v30 = vmul.f32 %v6607_v56, %v5016_v28  ;;  %v5044_v22 = vmul.f32 %v6607_v56, %v5018_v7  ;;  %v5038_v61 = vmul.f32 %v6607_v56, %v5012_v49 }
 0x56f   :  { %v5040_v52 = vmul.f32 %v6607_v56, %v5014_v44  ;;  %v5043_v13 = vmul.f32 %v6607_v56, %v5017_v20  ;;  %v5045_v0 = vmul.f32 %v6607_v56, %v5019_v35  ;;  %v5039_v53 = vmul.f32 %v6607_v56, %v5013_v9 }
 0x570   :  { %v5062_v12 = vmax.f32 %v5042_v30, %v5044_v22  ;;  %v5041_v45 = vmul.f32 %v6607_v56, %v5015_v2  ;;  %v5054_v21 = vmul.f32 %v6607_v56, %v5028_v16  ;;  %v5050_v6 = vmul.f32 %v6607_v56, %v5024_v54 }
 0x571   :  { %v5060_v46 = vmax.f32 %v5038_v61, %v5040_v52  ;;  %v5063_v27 = vmax.f32 %v5043_v13, %v5045_v0  ;;  %v5052_v4 = vmul.f32 %v6607_v56, %v5026_v10  ;;  %v5055_v18 = vmul.f32 %v6607_v56, %v5029_v36 }
 0x572   :  { %5171 = vrot.lane.b32.xlu1 %v5062_v12, %s6621_s12  ;;  %v5061_v8 = vmax.f32 %v5039_v53, %v5041_v45  ;;  %v5068_v50 = vmax.f32 %v5054_v21, %v5056_v26  ;;  %v5057_v34 = vmul.f32 %v6607_v56, %v5031_v37  ;;  %v5051_v33 = vmul.f32 %v6607_v56, %v5025_v63 }
 0x573   :  { %5080 = vrot.lane.b32.xlu0 %v5060_v46, %s6621_s12  ;;  %v5066_v32 = vmax.f32 %v5050_v6, %v5052_v4  ;;  %v5053_v3 = vmul.f32 %v6607_v56, %v5027_v43  ;;  %v5034_v39 = vmul.f32 %v6607_v56, %v5008_v14  ;;  %v5036_v5 = vmul.f32 %v6607_v56, %v5010_v25 }
 0x574   :  { %v5069_v58 = vmax.f32 %v5055_v18, %v5057_v34  ;;  %v5035_v62 = vmul.f32 %v6607_v56, %v5009_v17  ;;  %v5037_v60 = vmul.f32 %v6607_v56, %v5011_v24  ;;  %v5046_v41 = vmul.f32 %v6607_v56, %v5020_v1 }
 0x575   :  { %v5067_v11 = vmax.f32 %v5051_v33, %v5053_v3  ;;  %v5058_v15 = vmax.f32 %v5034_v39, %v5036_v5  ;;  %v5048_v47 = vmul.f32 %v6607_v56, %v5022_v51  ;;  %v5047_v48 = vmul.f32 %v6607_v56, %v5021_v23 }
 0x576   :  { %5173 = vrot.lane.b32.xlu1 %v5063_v27, %s6621_s12  ;;  %v5059_v28 = vmax.f32 %v5035_v62, %v5037_v60  ;;  %v5049_v7 = vmul.f32 %v6607_v56, %v5023_v57 }
 0x577   :  { %5082 = vrot.lane.b32.xlu0 %v5061_v8, %s6621_s12  ;;  %v5064_v49 = vmax.f32 %v5046_v41, %v5048_v47 }
 0x578   :  { %v5065_v44 = vmax.f32 %v5047_v48, %v5049_v7 }
 0x57a   :  { %5353 = vrot.lane.b32.xlu1 %v5068_v50, %s6621_s12 }
 0x57b   :  { %5262 = vrot.lane.b32.xlu0 %v5066_v32, %s6621_s12 }
 0x57e   :  { %5355 = vrot.lane.b32.xlu1 %v5069_v58, %s6621_s12 }
 0x57f   :  { %5264 = vrot.lane.b32.xlu0 %v5067_v11, %s6621_s12 }
 0x5e4   :  { %v5172_v20 = vpop.permute.xlu1 %5171 }
 0x5e5   :  { %v5177_v31 = vsel %vm3462_vm3, %v5060_v46, %v5172_v20  ;;  %v5081_v35 = vpop.permute.xlu0 %5080 }
 0x5e6   :  { %v5086_v9 = vsel %vm3462_vm3, %v5058_v15, %v5081_v35  ;;  %6301 = vmatprep.mubr.msk.f32.mxu1 %vm3468_vm5, %v5177_v31 }
 0x5e7   :  { %6282 = vmatprep.mubr.msk.f32.mxu0 %vm3468_vm5, %v5086_v9 }
 0x5e8   :  { %v5174_v2 = vpop.permute.xlu1 %5173 }
 0x5e9   :  { %v5178_v16 = vsel %vm3462_vm3, %v5061_v8, %v5174_v2  ;;  %v5083_v54 = vpop.permute.xlu0 %5082 }
 0x5ea   :  { %v5087_v10 = vsel %vm3462_vm3, %v5059_v28, %v5083_v54  ;;  %6302 = vmatmul.mubr.msk.f32.vlgmr.msra.gmra.mrb[12].mxu1 %vm3468_vm5, %v5178_v16 }
 0x5eb   :  { %6283 = vmatmul.mubr.msk.f32.vlgmr.msra.gmra.mrb[12].mxu0 %vm3468_vm5, %v5087_v10  ;;  %6585 = vmatpush3.bf16.msra.mxu1 %v11008_v55 }
 0x5ec   :  { %6569 = vmatpush3.bf16.msra.mxu0 %v11008_v55  ;;  %v5354_v36 = vpop.permute.xlu1 %5353  ;;  %6587 = vmatprep.subr.bf16.mxu1 %v11013_v19 }
 0x5ed   :  { %v5359_v42 = vsel %vm3462_vm3, %v5066_v32, %v5354_v36  ;;  %v5263_v37 = vpop.permute.xlu0 %5262  ;;  %6571 = vmatprep.subr.bf16.mxu0 %v11013_v19 }
 0x5ee   :  { %v5268_v63 = vsel %vm3462_vm3, %v5064_v49, %v5263_v37  ;;  %6339 = vmatprep.mubr.msk.f32.mxu1 %vm3468_vm5, %v5359_v42 }
 0x5ef   :  { %6320 = vmatprep.mubr.msk.f32.mxu0 %vm3468_vm5, %v5268_v63  ;;  %6589 = vmatpush3.bf16.msra.mxu1 %v11013_v19 }
 0x5f0   :  { %6573 = vmatpush3.bf16.msra.mxu0 %v11013_v19  ;;  %6591 = vmatprep.subr.bf16.mxu1 %v11027_v29  ;;  %v5356_v55 = vpop.permute.xlu1 %5355 }
 0x5f1   :  { %6575 = vmatprep.subr.bf16.mxu0 %v11027_v29  ;;  %v5265_v43 = vpop.permute.xlu0 %5264  ;;  %v5360_v19 = vsel %vm3462_vm3, %v5067_v11, %v5356_v55 }
 0x5f2   :  { %v5269_v59 = vsel %vm3462_vm3, %v5065_v44, %v5265_v43 }
 0x5f3   :  { %6593 = vmatpush3.bf16.msra.mxu1 %v11027_v29 }
 0x5f4   :  { %6577 = vmatpush3.bf16.msra.mxu0 %v11027_v29  ;;  %6595 = vmatprep.subr.bf16.mxu1 %v11326_v40  ;;  %v14_v29 = vstv %s11494_s8 }
 0x5f5   :  { %6579 = vmatprep.subr.bf16.mxu0 %v11326_v40  ;;  %15 = vst [vmem:[#allocation2] sm:$0x1] %v14_v29 }
 0x5f7   :  { %6597 = vmatpush3.bf16.msra.mxu1 %v11326_v40 }
 0x5f8   :  { %6581 = vmatpush3.bf16.msra.mxu0 %v11326_v40  ;;  %v5877_v40 = vld [vmem:[%s11495_s6] ss:$0 sm:$0xff] }
 0x5fa   :  { %6340 = vmatmul.mubr.msk.f32.vlgmr.msra.gmra.mrb[14].mxu1 %vm3468_vm5, %v5360_v19 }
 0x5fb   :  { %6321 = vmatmul.mubr.msk.f32.vlgmr.msra.gmra.mrb[14].mxu0 %vm3468_vm5, %v5269_v59 }
 0x6bd   :  { %v6303_v38 = vpop.f32.mrb[12].mxu1 }
 0x6be   :  { %v6284_v14 = vpop.f32.mrb[12].mxu0  ;;  %v5251_v25 = vpop.f32.mrb[13].mxu1  ;;  %v5452_v24 = vadd.f32 %v6303_v38, %v5877_v40 }
 0x6bf   :  { %v5160_v17 = vpop.f32.mrb[13].mxu0  ;;  %v5450_v56 = vadd.f32 %v6284_v14, %v5877_v40  ;;  %v5451_v51 = vadd.f32 %v5877_v40, %v5251_v25 }
 0x6c0   :  { %v5449_v1 = vadd.f32 %v5877_v40, %v5160_v17  ;;  %v5460_v23 = vmul.f32 0.01, %v5452_v24 }
 0x6c1   :  { %v5458_v57 = vmul.f32 0.01, %v5450_v56  ;;  %v5459_v30 = vmul.f32 0.01, %v5451_v51 }
 0x6c2   :  { %v5457_v26 = vmul.f32 0.01, %v5449_v1  ;;  %v11394_v22 = vmax.f32 %v5452_v24, %v5460_v23 }
 0x6c3   :  { %v11396_v61 = vmax.f32 %v5450_v56, %v5458_v57  ;;  %v11400_v13 = vmax.f32 %v5451_v51, %v5459_v30 }
 0x6c4   :  { %v11398_v52 = vmax.f32 %v5449_v1, %v5457_v26  ;;  %v5504_v53 = vmul.f32 %v11394_v22, %v11394_v22  ;;  %v5483_v18 = vsel %vm5476_vm7, %v11394_v22, 0.0 }
 0x6c5   :  { %v5502_v6 = vmul.f32 %v11396_v61, %v11396_v61  ;;  %v5477_v33 = vsel %vm5476_vm7, %v11396_v61, 0.0  ;;  %v5480_v32 = vsel %vm3468_vm5, %v11400_v13, 0.0  ;;  %v5503_v58 = vmul.f32 %v11400_v13, %v11400_v13 }
 0x6c6   :  { %v5501_v8 = vmul.f32 %v11398_v52, %v11398_v52  ;;  %v5518_v5 = vsel %vm5476_vm7, %v5504_v53, 0.0  ;;  %v5473_v11 = vsel %vm3468_vm5, %v11398_v52, 0.0 }
 0x6c7   :  { %v5512_v41 = vsel %vm5476_vm7, %v5502_v6, 0.0  ;;  %v5515_v51 = vsel %vm3468_vm5, %v5503_v58, 0.0 }
 0x6c8   :  { %v5509_v48 = vsel %vm3468_vm5, %v5501_v8, 0.0 }
 0x6cd   :  { %v6341_v0 = vpop.f32.mrb[14].mxu1 }
 0x6ce   :  { %v6322_v12 = vpop.f32.mrb[14].mxu0  ;;  %v5456_v45 = vadd.f32 %v6341_v0, %v5877_v40  ;;  %v5433_v21 = vpop.f32.mrb[15].mxu1 }
 0x6cf   :  { %v5454_v46 = vadd.f32 %v6322_v12, %v5877_v40  ;;  %v5342_v27 = vpop.f32.mrb[15].mxu0  ;;  %v5455_v4 = vadd.f32 %v5877_v40, %v5433_v21 }
 0x6d0   :  { %v5464_v50 = vmul.f32 0.01, %v5456_v45  ;;  %v5453_v34 = vadd.f32 %v5877_v40, %v5342_v27 }
 0x6d1   :  { %v5462_v3 = vmul.f32 0.01, %v5454_v46  ;;  %v5463_v39 = vmul.f32 0.01, %v5455_v4 }
 0x6d2   :  { %v11417_v62 = vmax.f32 %v5456_v45, %v5464_v50  ;;  %v5461_v60 = vmul.f32 0.01, %v5453_v34 }
 0x6d3   :  { %v11422_v15 = vmax.f32 %v5454_v46, %v5462_v3  ;;  %v11424_v47 = vmax.f32 %v5455_v4, %v5463_v39 }
 0x6d4   :  { %v5484_v28 = vsel %vm5476_vm7, %v11417_v62, 0.0  ;;  %v5508_v7 = vmul.f32 %v11417_v62, %v11417_v62  ;;  %v11431_v49 = vmax.f32 %v5453_v34, %v5461_v60 }
 0x6d5   :  { %v5478_v44 = vsel %vm5476_vm7, %v11422_v15, 0.0  ;;  %v5506_v20 = vmul.f32 %v11422_v15, %v11422_v15  ;;  %v5485_v31 = vadd.f32 %v5484_v28, %v5483_v18  ;;  %v5481_v35 = vsel %vm3468_vm5, %v11424_v47, 0.0 }
 0x6d6   :  { %v5479_v9 = vadd.f32 %v5478_v44, %v5477_v33  ;;  %v5519_v2 = vsel %vm5476_vm7, %v5508_v7, 0.0  ;;  %v5474_v16 = vsel %vm3468_vm5, %v11431_v49, 0.0  ;;  %v5505_v54 = vmul.f32 %v11431_v49, %v11431_v49 }
 0x6d7   :  { %v5513_v10 = vsel %vm5476_vm7, %v5506_v20, 0.0  ;;  %v5490_v36 = vsel %vm5476_vm7, %v5485_v31, 0.0  ;;  %v5520_v42 = vadd.f32 %v5519_v2, %v5518_v5  ;;  %v5475_v37 = vadd.f32 %v5474_v16, %v5473_v11 }
 0x6d8   :  { %v5489_v63 = vsel %vm5476_vm7, %v5479_v9, 0.0  ;;  %v5514_v55 = vadd.f32 %v5513_v10, %v5512_v41  ;;  %v5510_v43 = vsel %vm3468_vm5, %v5505_v54, 0.0  ;;  %v5482_v19 = vadd.f32 %v5481_v35, %v5480_v32 }
 0x6d9   :  { %v5491_v59 = vadd.f32 %v5490_v36, %v5489_v63  ;;  %v5525_v29 = vsel %vm5476_vm7, %v5520_v42, 0.0  ;;  %v5486_v38 = vsel %vm3468_vm5, %v5475_v37, 0.0  ;;  %v5511_v14 = vadd.f32 %v5510_v43, %v5509_v48 }
 0x6da   :  { %v5524_v25 = vsel %vm5476_vm7, %v5514_v55, 0.0  ;;  %v5487_v40 = vsel %vm3468_vm5, %v5482_v19, 0.0  ;;  %v5507_v17 = vmul.f32 %v11424_v47, %v11424_v47 }
 0x6db   :  { %v5493_v24 = vsel %vm5476_vm7, %v5491_v59, 0.0  ;;  %v5526_v56 = vadd.f32 %v5525_v29, %v5524_v25  ;;  %v5488_v1 = vadd.f32 %v5487_v40, %v5486_v38  ;;  %v5521_v57 = vsel %vm3468_vm5, %v5511_v14, 0.0 }
 0x6dc   :  { %v5516_v23 = vsel %vm3468_vm5, %v5507_v17, 0.0 }
 0x6dd   :  { %v5492_v26 = vsel %vm3468_vm5, %v5488_v1, 0.0  ;;  %v5517_v30 = vadd.f32 %v5516_v23, %v5515_v51  ;;  %v5528_v12 = vsel %vm5476_vm7, %v5526_v56, 0.0 }
 0x6de   :  { %v5494_v0 = vadd.f32 %v5493_v24, %v5492_v26 }
 0x6df   :  { %v5522_v53 = vsel %vm3468_vm5, %v5517_v30, 0.0 }
 0x6e0   :  { %v5495_v45 = vrot.slane %v5494_v0, 4  ;;  %v5523_v21 = vadd.f32 %v5522_v53, %v5521_v57 }
 0x6e2   :  { %v5496_v6 = vadd.f32 %v5495_v45, %v5494_v0  ;;  %v5527_v46 = vsel %vm3468_vm5, %v5523_v21, 0.0 }
 0x6e3   :  { %v5529_v27 = vadd.f32 %v5528_v12, %v5527_v46  ;;  %v5597_v46 = vld [vmem:[#allocation2] sm:$0x1] }
 0x6e4   :  { %v5497_v4 = vrot.slane %v5496_v6, 2 }
 0x6e5   :  { %v5530_v18 = vrot.slane %v5529_v27, 4 }
 0x6e6   :  { %v5498_v8 = vadd.f32 %v5497_v4, %v5496_v6 }
 0x6e7   :  { %v5531_v50 = vadd.f32 %v5530_v18, %v5529_v27 }
 0x6e8   :  { %v5499_v34 = vrot.slane %v5498_v8, 1 }
 0x6e9   :  { %v5532_v33 = vrot.slane %v5531_v50, 2 }
 0x6ea   :  { %v5500_v32 = vadd.f32 %v5499_v34, %v5498_v8 }
 0x6eb   :  { %v5533_v3 = vadd.f32 %v5532_v33, %v5531_v50 }
 0x6ec   :  { %v5537_v39 = vmul.f32 0.025, %v5500_v32 }
 0x6ed   :  { %v5534_v5 = vrot.slane %v5533_v3, 1 }
 0x6ee   :  { %v5539_v58 = vmul.f32 %v5537_v39, %v5537_v39  ;;  %v5545_v60 = vsub.f32 %v11431_v49, %v5537_v39  ;;  %v5547_v41 = vsub.f32 %v11424_v47, %v5537_v39  ;;  %v5546_v11 = vsub.f32 %v11422_v15, %v5537_v39 }
 0x6ef   :  { %v5535_v48 = vadd.f32 %v5534_v5, %v5533_v3  ;;  %v5548_v28 = vsub.f32 %v11417_v62, %v5537_v39  ;;  %v5541_v7 = vsub.f32 %v11398_v52, %v5537_v39  ;;  %v5542_v44 = vsub.f32 %v11396_v61, %v5537_v39  ;;  %v5563_v62 = vld [vmem:[%s11496_s7] sm:$0xff]  ;;  %v5564_v61 = vld [vmem:[%s11496_s7 + $0x8] sm:$0x3] }
 0x6f0   :  { %v5543_v20 = vsub.f32 %v11400_v13, %v5537_v39  ;;  %v5544_v31 = vsub.f32 %v11394_v22, %v5537_v39 }
 0x6f1   :  { %v5538_v35 = vmul.f32 0.025, %v5535_v48 }
 0x6f3   :  { %v5540_v9 = vsub.f32 %v5538_v35, %v5539_v58 }
 0x6f5   :  { %v5549_v2 = vadd.f32 1e-05, %v5540_v9 }
 0x6f7   :  { %6608 = vrsqrt.f32 %v5549_v2 }
 0x701   :  { %v6609_v49 = vpop.eup %6608 }
 0x702   :  { %v5555_v16 = vmul.f32 %v6609_v49, %v5545_v60  ;;  %v5557_v47 = vmul.f32 %v6609_v49, %v5547_v41  ;;  %v5556_v54 = vmul.f32 %v6609_v49, %v5546_v11  ;;  %v5558_v15 = vmul.f32 %v6609_v49, %v5548_v28 }
 0x703   :  { %v5551_v52 = vmul.f32 %v6609_v49, %v5541_v7  ;;  %v5552_v13 = vmul.f32 %v6609_v49, %v5542_v44  ;;  %v5553_v22 = vmul.f32 %v6609_v49, %v5543_v20  ;;  %v5554_v10 = vmul.f32 %v6609_v49, %v5544_v31 }
 0x704   :  { %v5561_v36 = vmax.f32 %v5555_v16, %v5557_v47  ;;  %v5562_v42 = vmax.f32 %v5556_v54, %v5558_v15 }
 0x705   :  { %v5559_v37 = vmax.f32 %v5551_v52, %v5553_v22  ;;  %v5560_v63 = vmax.f32 %v5552_v13, %v5554_v10 }
 0x706   :  { %v5567_v55 = vmul.f32 %v5563_v62, %v5561_v36  ;;  %v5568_v43 = vmul.f32 %v5564_v61, %v5562_v42 }
 0x707   :  { %v5565_v19 = vmul.f32 %v5563_v62, %v5559_v37  ;;  %v5566_v59 = vmul.f32 %v5564_v61, %v5560_v63 }
 0x708   :  { %v5582_v29 = vsel %vm3468_vm5, %v5567_v55, 0.0  ;;  %v5583_v38 = vsel %vm5476_vm7, %v5568_v43, 0.0 }
 0x709   :  { %v5584_v14 = vadd.f32 %v5583_v38, %v5582_v29  ;;  %v5573_v25 = vsel %vm3468_vm5, %v5565_v19, 0.0  ;;  %v5574_v40 = vsel %vm5476_vm7, %v5566_v59, 0.0 }
 0x70a   :  { %v5575_v17 = vadd.f32 %v5574_v40, %v5573_v25 }
 0x70b   :  { %v5585_v24 = vrot.slane %v5584_v14, 4 }
 0x70c   :  { %v5576_v56 = vrot.slane %v5575_v17, 4 }
 0x70d   :  { %v5586_v1 = vadd.f32 %v5585_v24, %v5584_v14 }
 0x70e   :  { %v5577_v51 = vadd.f32 %v5576_v56, %v5575_v17 }
 0x70f   :  { %v5587_v23 = vrot.slane %v5586_v1, 2 }
 0x710   :  { %v5578_v57 = vrot.slane %v5577_v51, 2 }
 0x711   :  { %v5588_v26 = vadd.f32 %v5587_v23, %v5586_v1 }
 0x712   :  { %v5579_v30 = vadd.f32 %v5578_v57, %v5577_v51 }
 0x713   :  { %v5589_v0 = vrot.slane %v5588_v26, 1 }
 0x714   :  { %v5580_v53 = vrot.slane %v5579_v30, 1 }
 0x715   :  { %v5590_v12 = vadd.f32 %v5589_v0, %v5588_v26 }
 0x716   :  { %v5581_v45 = vadd.f32 %v5580_v53, %v5579_v30 }
 0x717   :  { %v5594_v21 = vsel %vm3468_vm5, %v5590_v12, 0.0 }
 0x718   :  { %5595 = vadd.xlane.f32.xlu1 %v5594_v21  ;;  %v5591_v6 = vsel %vm3468_vm5, %v5581_v45, 0.0 }
 0x719   :  { %5592 = vadd.xlane.f32.xlu0 %v5591_v6 }
 0x7a5   :  { %v5596_v27 = vpop.xlane.xlu1 %5595 }
 0x7a6   :  { %v5599_v4 = vadd.f32 %v5597_v46, %v5596_v27  ;;  %v5593_v18 = vpop.xlane.xlu0 %5592 }
 0x7a7   :  { %v5598_v8 = vadd.f32 %v5597_v46, %v5593_v18 }
 0x7a8   :  { %v5601_v50 = vsub.f32 0.0, %v5599_v4 }
 0x7a9   :  { %v5600_v34 = vsub.f32 0.0, %v5598_v8 }
 0x7aa   :  { %v5604_v33 = vmul.f32 1.442695, %v5601_v50 }
 0x7ab   :  { %v5602_v32 = vmul.f32 1.442695, %v5600_v34 }
 0x7ac   :  { %6610 = vpow2.f32 %v5604_v33 }
 0x7ad   :  { %6612 = vpow2.f32 %v5602_v32 }
 0x7b6   :  { %v6611_v3 = vpop.eup %6610 }
 0x7b7   :  { %v6613_v39 = vpop.eup %6612  ;;  %v5607_v5 = vadd.f32 1.0, %v6611_v3 }
 0x7b8   :  { %v5606_v58 = vadd.f32 1.0, %v6613_v39 }
 0x7b9   :  { %6614 = vrcp.f32 %v5607_v5 }
 0x7ba   :  { %6616 = vrcp.f32 %v5606_v58 }
 0x7c3   :  { %v6615_v60 = vpop.eup %6614 }
 0x7c4   :  { %v6617_v41 = vpop.eup %6616  ;;  %5614 = vst.msk [vmem:[%s11497_s9 + $0x1] sm:$0x1] %vm5612_vm8, %v6615_v60 }
 0x7c5   :  { %5613 = vst.msk [vmem:[%s11497_s9] sm:$0x1] %vm5612_vm8, %v6617_v41 }

</bundles_post_ra>
